<compile_context>
chip_gen: v5e
topology: v5e:2x2
jax: 0.10.0
libtpu: 0.0.40
codegen_flags: <defaults>
</compile_context>

<pallas_src>
import jax
import jax.numpy as jnp
from jax.experimental import pallas as pl
from jax.experimental.pallas import tpu as pltpu

LN_EPS = 1e-5  # PyTorch LayerNorm default


def _round_up(n, m):
    return ((n + m - 1) // m) * m


# ----------------------------------------------------------------------------
# Kernel: LN (via group-mean matmul) + 4-layer MLP, one (TB, Fp) batch tile.
# ----------------------------------------------------------------------------
def policynet_kernel(x_ref, m_ref,
                     w1_ref, b1_ref, w2_ref, b2_ref,
                     w3_ref, b3_ref, w4_ref, b4_ref,
                     o_ref):
    # x_ref: (TB, Fp) lane-dense (Fp = round_up(S*J, 128)), bf16 or f32.
    x = x_ref[...].astype(jnp.float32)

    # LayerNorm over each group of J real joints, kept lane-dense:
    #   m[f, f'] = 1/J if f, f' are real features in the same sequence position
    # so x @ m broadcasts each group's mean over that group (padded lanes -> 0
    # contribution, padded columns -> 0).  Two-pass variance (no cancellation).
    m = m_ref[...]
    mean_b = jnp.dot(x, m, preferred_element_type=jnp.float32)       # (TB, Fp)
    d = x - mean_b
    var_b = jnp.dot(d * d, m, preferred_element_type=jnp.float32)    # (TB, Fp)
    xn = d * jax.lax.rsqrt(var_b + LN_EPS)
    # gamma/beta were folded into w1/b1 by prepare_params; padded feature lanes
    # hit zero rows of w1, so their (nonzero) normalized values vanish.

    h = xn.astype(w1_ref.dtype)

    # hidden1 + ReLU   (Dropout p=0.3: identity in eval mode)
    h = jnp.dot(h, w1_ref[...], preferred_element_type=jnp.float32) + b1_ref[...]
    h = jnp.maximum(h, 0.0).astype(w2_ref.dtype)

    # hidden2 + ReLU
    h = jnp.dot(h, w2_ref[...], preferred_element_type=jnp.float32) + b2_ref[...]
    h = jnp.maximum(h, 0.0).astype(w3_ref.dtype)

    # hidden3 + ReLU
    h = jnp.dot(h, w3_ref[...], preferred_element_type=jnp.float32) + b3_ref[...]
    h = jnp.maximum(h, 0.0).astype(w4_ref.dtype)

    # output layer (padded columns have zero weights/bias -> zero, sliced later)
    out = jnp.dot(h, w4_ref[...], preferred_element_type=jnp.float32) + b4_ref[...]
    o_ref[...] = out.astype(o_ref.dtype)


# ----------------------------------------------------------------------------
# One-time parameter transform: fold LN affine, build group-mean matrix, pad,
# (optionally) cast weights to bf16.  Called once; reused across forwards.
# ----------------------------------------------------------------------------
def prepare_params(params, seq, joint, *, lane=128, weight_dtype=jnp.bfloat16):
    gamma, beta = params["gamma"], params["beta"]
    w1, b1 = params["w1"], params["b1"]            # (S*J, H1), (1, H1)
    feat = seq * joint
    h1 = w1.shape[1]

    # (xn*gamma + beta) @ w1 + b1 == xn @ (w1 * tile(gamma,S)[:,None])
    #                                + (tile(beta,S) @ w1 + b1)        (exact, f32)
    g_t = jnp.tile(gamma, seq)                     # (S*J,)
    be_t = jnp.tile(beta, seq)                     # (S*J,)
    w1f = w1 * g_t[:, None]
    b1f = b1 + be_t[None, :] @ w1

    h2 = params["w2"].shape[1]
    h3 = params["w3"].shape[1]
    out = params["w4"].shape[1]
    featp = _round_up(feat, lane)
    h1p = _round_up(h1, lane)
    h2p = _round_up(h2, lane)
    h3p = _round_up(h3, lane)
    outp = _round_up(out, lane)

    def pad2(w, rows, cols):
        return jnp.pad(w, ((0, rows - w.shape[0]), (0, cols - w.shape[1])))

    # Group-mean matrix for the in-kernel LayerNorm (f32; LN math stays f32).
    f_idx = jnp.arange(featp)
    real = f_idx < feat
    same_group = (f_idx[:, None] // joint) == (f_idx[None, :] // joint)
    mmat = jnp.where(real[:, None] & real[None, :] & same_group,
                     1.0 / joint, 0.0).astype(jnp.float32)            # (Fp, Fp)

    return {
        "m": mmat,
        "w1": pad2(w1f, featp, h1p).astype(weight_dtype),
        "b1": pad2(b1f, 1, h1p).astype(jnp.float32),
        "w2": pad2(params["w2"], h1p, h2p).astype(weight_dtype),
        "b2": pad2(params["b2"], 1, h2p).astype(jnp.float32),
        "w3": pad2(params["w3"], h2p, h3p).astype(weight_dtype),
        "b3": pad2(params["b3"], 1, h3p).astype(jnp.float32),
        "w4": pad2(params["w4"], h3p, outp).astype(weight_dtype),
        "b4": pad2(params["b4"], 1, outp).astype(jnp.float32),
        "out_dim": out,
        "feat": feat,
        "featp": featp,
        "seq": seq,
        "joint": joint,
    }


# ----------------------------------------------------------------------------
# Wrapper
# ----------------------------------------------------------------------------
_PARAM_NAMES = ("m", "w1", "b1", "w2", "b2", "w3", "b3", "w4", "b4")


def policynet_forward(x, prepped, *, tb=1024, act_dtype=None, return_padded=False):
    """x: [B, S, J] float32.  prepped: output of prepare_params."""
    B, S, J = x.shape
    assert S == prepped["seq"] and J == prepped["joint"]
    feat, featp = prepped["feat"], prepped["featp"]
    out_dim = prepped["out_dim"]
    outp = prepped["w4"].shape[1]
    if act_dtype is None:
        act_dtype = prepped["w1"].dtype            # bf16 x halves input DMA

    # Lane-dense input: flatten [B,S,J] -> [B, S*J], zero-pad trailing lanes to
    # a multiple of 128, cast to act_dtype.  This is one tiny fused XLA kernel;
    # padded lanes meet zero rows of m / w1, so the result is exact.
    x2d = x.reshape(B, feat)
    x2d = jnp.pad(x2d, ((0, 0), (0, featp - feat))).astype(act_dtype)

    # Batch tile: big enough to amortize the ~0.35 us/step pipeline overhead,
    # capped at 2048 (v5e 16 MiB scoped-VMEM default; v7x 64 MiB physical /
    # 32 MiB scoped), and clamped so the grid has >= 2 steps whenever B allows
    # (v7x has 2 TensorCores sharding the "parallel" axis).
    tb = max(16, min(int(tb), 2048, _round_up(B, 16)))
    if B >= 32:
        tb = min(tb, _round_up(pl.cdiv(B, 2), 16))
    tb = _round_up(tb, 16)
    bp = _round_up(B, tb)
    if bp != B:
        x2d = jnp.pad(x2d, ((0, bp - B), (0, 0)))  # zero rows -> finite LN, dropped

    grid = (bp // tb,)
    resident = lambda i: (0, 0)  # weights / LN matrix: same block every step
    param_specs = [pl.BlockSpec(prepped[n].shape, resident) for n in _PARAM_NAMES]

    h1p = prepped["w1"].shape[1]
    h2p = prepped["w2"].shape[1]
    h3p = prepped["w3"].shape[1]

    flops = 2 * bp * (2 * featp * featp + featp * h1p + h1p * h2p
                      + h2p * h3p + h3p * outp)
    param_bytes = sum(int(prepped[n].size) * prepped[n].dtype.itemsize
                      for n in _PARAM_NAMES)
    bytes_accessed = (int(x2d.size) * x2d.dtype.itemsize
                      + bp * outp * jnp.dtype(act_dtype).itemsize + param_bytes)

    out_padded = pl.pallas_call(
        policynet_kernel,
        out_shape=jax.ShapeDtypeStruct((bp, outp), act_dtype),
        grid=grid,
        in_specs=[pl.BlockSpec((tb, featp), lambda i: (i, 0))] + param_specs,
        out_specs=pl.BlockSpec((tb, outp), lambda i: (i, 0)),
        compiler_params=pltpu.CompilerParams(
            dimension_semantics=("parallel",),      # both v7x TCs; no-op on 1-TC chips
            vmem_limit_bytes=32 * 1024 * 1024),     # headroom for tb=2048 on v5e
        cost_estimate=pl.CostEstimate(
            flops=int(flops), transcendentals=int(bp * featp),
            bytes_accessed=int(bytes_accessed)),
    )(x2d, *(prepped[n] for n in _PARAM_NAMES))

    if return_padded:
        # Consumers can slice [:B, :out_dim] themselves (avoids an extra pass
        # over the padded buffer just to extract the real columns here).
        return out_padded
    return out_padded[:B, :out_dim]


# ----------------------------------------------------------------------------
# Synthetic init + pure-JAX reference (eval-mode PyTorch semantics)
# ----------------------------------------------------------------------------
def init_params(key, seq, joint, hidden1, hidden2, hidden3, out_dim):
    """Deterministic synthetic init (uniform fan-in bound like torch defaults);
    gamma/beta randomized so the LN-affine fold is actually exercised."""
    ks = jax.random.split(key, 10)
    in_feat = seq * joint

    def lin(kw, kb, fan_in, fan_out):
        bound = 1.0 / jnp.sqrt(fan_in)
        w = jax.random.uniform(kw, (fan_in, fan_out), jnp.float32, -bound, bound)
        b = jax.random.uniform(kb, (1, fan_out), jnp.float32, -bound, bound)
        return w, b

    w1, b1 = lin(ks[0], ks[1], in_feat, hidden1)
    w2, b2 = lin(ks[2], ks[3], hidden1, hidden2)
    w3, b3 = lin(ks[4], ks[5], hidden2, hidden3)
    w4, b4 = lin(ks[6], ks[7], hidden3, out_dim)
    gamma = 1.0 + 0.2 * jax.random.normal(ks[8], (joint,), jnp.float32)
    beta = 0.1 * jax.random.normal(ks[9], (joint,), jnp.float32)
    return {"gamma": gamma, "beta": beta,
            "w1": w1, "b1": b1, "w2": w2, "b2": b2,
            "w3": w3, "b3": b3, "w4": w4, "b4": b4}


def policynet_reference(x, p):
    mean = jnp.mean(x, axis=-1, keepdims=True)
    var = jnp.mean((x - mean) ** 2, axis=-1, keepdims=True)
    xn = (x - mean) / jnp.sqrt(var + LN_EPS) * p["gamma"] + p["beta"]
    h = xn.reshape(x.shape[0], -1)
    h = jnp.maximum(h @ p["w1"] + p["b1"], 0.0)
    h = jnp.maximum(h @ p["w2"] + p["b2"], 0.0)
    h = jnp.maximum(h @ p["w3"] + p["b3"], 0.0)
    return h @ p["w4"] + p["b4"]


if __name__ == "__main__":
    # Shapes consistent with PolicyNet(input=SEQ, joint=5, ...): x = [b, input,
    # joint]; linear stack (SEQ*JOINT) -> H1 -> H2 -> H3 -> 5.  B chosen so the
    # default tb=1024 gives a 2-step "parallel" grid (both v7x TCs busy).
    B, SEQ, JOINT = 2048, 16, 5
    H1, H2, H3, OUT = 256, 128, 64, 5

    key = jax.random.PRNGKey(0)
    kx, kp = jax.random.split(key)
    x = jax.random.normal(kx, (B, SEQ, JOINT), jnp.float32)
    params = init_params(kp, SEQ, JOINT, H1, H2, H3, OUT)
    ref = policynet_reference(x, params)

    # f32 weights/activations: tight check of the LN-as-matmul / fold / padding
    # / batch tiling machinery.
    prepped_f32 = prepare_params(params, SEQ, JOINT, weight_dtype=jnp.float32)
    out_f32 = jax.block_until_ready(policynet_forward(x, prepped_f32, tb=1024))
    assert out_f32.shape == (B, OUT)
    assert jnp.allclose(out_f32, ref, atol=5e-3, rtol=5e-3), "f32 mismatch vs reference"

    # bf16 end-to-end (x, weights, activations, padded output) with f32 MXU
    # accumulation and f32 LN math: fast path on all TPU generations.
    prepped_bf16 = prepare_params(params, SEQ, JOINT, weight_dtype=jnp.bfloat16)
    out_bf16 = jax.block_until_ready(policynet_forward(x, prepped_bf16, tb=1024))
    assert out_bf16.shape == (B, OUT)
    assert jnp.allclose(out_bf16.astype(jnp.float32), ref, atol=1e-1, rtol=1e-1), \
        "bf16 mismatch vs reference"

    print("KERNEL_OK")
</pallas_src>

<mosaic_0001>
module attributes {stable_mosaic.version = 11 : i64} {
  func.func @policynet_kernel(%arg0: i32, %arg1: memref<1024x128xf32, #tpu.memory_space<vmem>>, %arg2: memref<128x128xf32, #tpu.memory_space<vmem>>, %arg3: memref<128x256xf32, #tpu.memory_space<vmem>>, %arg4: memref<1x256xf32, #tpu.memory_space<vmem>>, %arg5: memref<256x128xf32, #tpu.memory_space<vmem>>, %arg6: memref<1x128xf32, #tpu.memory_space<vmem>>, %arg7: memref<128x128xf32, #tpu.memory_space<vmem>>, %arg8: memref<1x128xf32, #tpu.memory_space<vmem>>, %arg9: memref<128x128xf32, #tpu.memory_space<vmem>>, %arg10: memref<1x128xf32, #tpu.memory_space<vmem>>, %arg11: memref<1024x128xf32, #tpu.memory_space<vmem>>) attributes {dimension_semantics = [#tpu.dimension_semantics<parallel>], iteration_bounds = array<i64: 2>, scalar_prefetch = 0 : i64, scratch_operands = 0 : i64, tpu.core_type = #tpu.core_type<tc>, window_params = [{transform_indices = @transform_0, window_bounds = array<i64: 1024, 128>}, {pipeline_mode = #tpu.pipeline_mode<synchronous>, transform_indices = @transform_1, window_bounds = array<i64: 128, 128>}, {pipeline_mode = #tpu.pipeline_mode<synchronous>, transform_indices = @transform_2, window_bounds = array<i64: 128, 256>}, {pipeline_mode = #tpu.pipeline_mode<synchronous>, transform_indices = @transform_3, window_bounds = array<i64: 1, 256>}, {pipeline_mode = #tpu.pipeline_mode<synchronous>, transform_indices = @transform_4, window_bounds = array<i64: 256, 128>}, {pipeline_mode = #tpu.pipeline_mode<synchronous>, transform_indices = @transform_5, window_bounds = array<i64: 1, 128>}, {pipeline_mode = #tpu.pipeline_mode<synchronous>, transform_indices = @transform_6, window_bounds = array<i64: 128, 128>}, {pipeline_mode = #tpu.pipeline_mode<synchronous>, transform_indices = @transform_7, window_bounds = array<i64: 1, 128>}, {pipeline_mode = #tpu.pipeline_mode<synchronous>, transform_indices = @transform_8, window_bounds = array<i64: 128, 128>}, {pipeline_mode = #tpu.pipeline_mode<synchronous>, transform_indices = @transform_9, window_bounds = array<i64: 1, 128>}, {transform_indices = @transform_10, window_bounds = array<i64: 1024, 128>}]} {
    %c0 = arith.constant 0 : index
    %c0_0 = arith.constant 0 : index
    %0 = vector.load %arg1[%c0, %c0_0] : memref<1024x128xf32, #tpu.memory_space<vmem>>, vector<1024x128xf32>
    %c0_1 = arith.constant 0 : index
    %c0_2 = arith.constant 0 : index
    %1 = vector.load %arg2[%c0_1, %c0_2] : memref<128x128xf32, #tpu.memory_space<vmem>>, vector<128x128xf32>
    %cst = arith.constant dense<0.000000e+00> : vector<1024x128xf32>
    %2 = tpu.matmul %0, %1, %cst {dimension_numbers = #tpu.dot_dimension_numbers<[1], [0], [0], [1], [0, 0, 1, 1], [], []>} : vector<1024x128xf32>, vector<128x128xf32>, vector<1024x128xf32> -> vector<1024x128xf32>
    %3 = arith.subf %0, %2 : vector<1024x128xf32>
    %4 = arith.mulf %3, %3 : vector<1024x128xf32>
    %cst_3 = arith.constant dense<0.000000e+00> : vector<1024x128xf32>
    %5 = tpu.matmul %4, %1, %cst_3 {dimension_numbers = #tpu.dot_dimension_numbers<[1], [0], [0], [1], [0, 0, 1, 1], [], []>} : vector<1024x128xf32>, vector<128x128xf32>, vector<1024x128xf32> -> vector<1024x128xf32>
    %cst_4 = arith.constant 9.99999974E-6 : f32
    %6 = vector.broadcast %cst_4 : f32 to vector<1024x128xf32>
    %7 = arith.addf %5, %6 : vector<1024x128xf32>
    %8 = math.rsqrt %7 : vector<1024x128xf32>
    %9 = arith.mulf %3, %8 : vector<1024x128xf32>
    %c0_5 = arith.constant 0 : index
    %c0_6 = arith.constant 0 : index
    %10 = vector.load %arg3[%c0_5, %c0_6] : memref<128x256xf32, #tpu.memory_space<vmem>>, vector<128x256xf32>
    %cst_7 = arith.constant dense<0.000000e+00> : vector<1024x256xf32>
    %11 = tpu.matmul %9, %10, %cst_7 {dimension_numbers = #tpu.dot_dimension_numbers<[1], [0], [0], [1], [0, 0, 1, 1], [], []>} : vector<1024x128xf32>, vector<128x256xf32>, vector<1024x256xf32> -> vector<1024x256xf32>
    %c0_8 = arith.constant 0 : index
    %c0_9 = arith.constant 0 : index
    %12 = vector.load %arg4[%c0_8, %c0_9] : memref<1x256xf32, #tpu.memory_space<vmem>>, vector<1x256xf32>
    %13 = vector.broadcast %12 : vector<1x256xf32> to vector<1024x256xf32>
    %14 = arith.addf %11, %13 : vector<1024x256xf32>
    %cst_10 = arith.constant 0.000000e+00 : f32
    %15 = vector.broadcast %cst_10 : f32 to vector<1024x256xf32>
    %16 = arith.maximumf %14, %15 : vector<1024x256xf32>
    %c0_11 = arith.constant 0 : index
    %c0_12 = arith.constant 0 : index
    %17 = vector.load %arg5[%c0_11, %c0_12] : memref<256x128xf32, #tpu.memory_space<vmem>>, vector<256x128xf32>
    %cst_13 = arith.constant dense<0.000000e+00> : vector<1024x128xf32>
    %18 = tpu.matmul %16, %17, %cst_13 {dimension_numbers = #tpu.dot_dimension_numbers<[1], [0], [0], [1], [0, 0, 1, 1], [], []>} : vector<1024x256xf32>, vector<256x128xf32>, vector<1024x128xf32> -> vector<1024x128xf32>
    %c0_14 = arith.constant 0 : index
    %c0_15 = arith.constant 0 : index
    %19 = vector.load %arg6[%c0_14, %c0_15] : memref<1x128xf32, #tpu.memory_space<vmem>>, vector<1x128xf32>
    %20 = vector.broadcast %19 : vector<1x128xf32> to vector<1024x128xf32>
    %21 = arith.addf %18, %20 : vector<1024x128xf32>
    %cst_16 = arith.constant 0.000000e+00 : f32
    %22 = vector.broadcast %cst_16 : f32 to vector<1024x128xf32>
    %23 = arith.maximumf %21, %22 : vector<1024x128xf32>
    %c0_17 = arith.constant 0 : index
    %c0_18 = arith.constant 0 : index
    %24 = vector.load %arg7[%c0_17, %c0_18] : memref<128x128xf32, #tpu.memory_space<vmem>>, vector<128x128xf32>
    %cst_19 = arith.constant dense<0.000000e+00> : vector<1024x128xf32>
    %25 = tpu.matmul %23, %24, %cst_19 {dimension_numbers = #tpu.dot_dimension_numbers<[1], [0], [0], [1], [0, 0, 1, 1], [], []>} : vector<1024x128xf32>, vector<128x128xf32>, vector<1024x128xf32> -> vector<1024x128xf32>
    %c0_20 = arith.constant 0 : index
    %c0_21 = arith.constant 0 : index
    %26 = vector.load %arg8[%c0_20, %c0_21] : memref<1x128xf32, #tpu.memory_space<vmem>>, vector<1x128xf32>
    %27 = vector.broadcast %26 : vector<1x128xf32> to vector<1024x128xf32>
    %28 = arith.addf %25, %27 : vector<1024x128xf32>
    %cst_22 = arith.constant 0.000000e+00 : f32
    %29 = vector.broadcast %cst_22 : f32 to vector<1024x128xf32>
    %30 = arith.maximumf %28, %29 : vector<1024x128xf32>
    %c0_23 = arith.constant 0 : index
    %c0_24 = arith.constant 0 : index
    %31 = vector.load %arg9[%c0_23, %c0_24] : memref<128x128xf32, #tpu.memory_space<vmem>>, vector<128x128xf32>
    %cst_25 = arith.constant dense<0.000000e+00> : vector<1024x128xf32>
    %32 = tpu.matmul %30, %31, %cst_25 {dimension_numbers = #tpu.dot_dimension_numbers<[1], [0], [0], [1], [0, 0, 1, 1], [], []>} : vector<1024x128xf32>, vector<128x128xf32>, vector<1024x128xf32> -> vector<1024x128xf32>
    %c0_26 = arith.constant 0 : index
    %c0_27 = arith.constant 0 : index
    %33 = vector.load %arg10[%c0_26, %c0_27] : memref<1x128xf32, #tpu.memory_space<vmem>>, vector<1x128xf32>
    %34 = vector.broadcast %33 : vector<1x128xf32> to vector<1024x128xf32>
    %35 = arith.addf %32, %34 : vector<1024x128xf32>
    %c0_28 = arith.constant 0 : index
    %c0_29 = arith.constant 0 : index
    %36 = vector.load %arg11[%c0_28, %c0_29] : memref<1024x128xf32, #tpu.memory_space<vmem>>, vector<1024x128xf32>
    tpu.vector_store %arg11[%c0_28, %c0_29], %35 {strides = array<i32>} : memref<1024x128xf32, #tpu.memory_space<vmem>>, vector<1024x128xf32>,
    return
  }
  func.func @transform_0(%arg0: i32) -> (i32, i32) {
    %c0_i32 = arith.constant 0 : i32
    %c0_i32_0 = arith.constant 0 : i32
    return %arg0, %c0_i32 : i32, i32
  }
  func.func @transform_1(%arg0: i32) -> (i32, i32) {
    %c0_i32 = arith.constant 0 : i32
    %c0_i32_0 = arith.constant 0 : i32
    %c0_i32_1 = arith.constant 0 : i32
    return %c0_i32, %c0_i32_0 : i32, i32
  }
  func.func @transform_2(%arg0: i32) -> (i32, i32) {
    %c0_i32 = arith.constant 0 : i32
    %c0_i32_0 = arith.constant 0 : i32
    %c0_i32_1 = arith.constant 0 : i32
    return %c0_i32, %c0_i32_0 : i32, i32
  }
  func.func @transform_3(%arg0: i32) -> (i32, i32) {
    %c0_i32 = arith.constant 0 : i32
    %c0_i32_0 = arith.constant 0 : i32
    %c0_i32_1 = arith.constant 0 : i32
    return %c0_i32, %c0_i32_0 : i32, i32
  }
  func.func @transform_4(%arg0: i32) -> (i32, i32) {
    %c0_i32 = arith.constant 0 : i32
    %c0_i32_0 = arith.constant 0 : i32
    %c0_i32_1 = arith.constant 0 : i32
    return %c0_i32, %c0_i32_0 : i32, i32
  }
  func.func @transform_5(%arg0: i32) -> (i32, i32) {
    %c0_i32 = arith.constant 0 : i32
    %c0_i32_0 = arith.constant 0 : i32
    %c0_i32_1 = arith.constant 0 : i32
    return %c0_i32, %c0_i32_0 : i32, i32
  }
  func.func @transform_6(%arg0: i32) -> (i32, i32) {
    %c0_i32 = arith.constant 0 : i32
    %c0_i32_0 = arith.constant 0 : i32
    %c0_i32_1 = arith.constant 0 : i32
    return %c0_i32, %c0_i32_0 : i32, i32
  }
  func.func @transform_7(%arg0: i32) -> (i32, i32) {
    %c0_i32 = arith.constant 0 : i32
    %c0_i32_0 = arith.constant 0 : i32
    %c0_i32_1 = arith.constant 0 : i32
    return %c0_i32, %c0_i32_0 : i32, i32
  }
  func.func @transform_8(%arg0: i32) -> (i32, i32) {
    %c0_i32 = arith.constant 0 : i32
    %c0_i32_0 = arith.constant 0 : i32
    %c0_i32_1 = arith.constant 0 : i32
    return %c0_i32, %c0_i32_0 : i32, i32
  }
  func.func @transform_9(%arg0: i32) -> (i32, i32) {
    %c0_i32 = arith.constant 0 : i32
    %c0_i32_0 = arith.constant 0 : i32
    %c0_i32_1 = arith.constant 0 : i32
    return %c0_i32, %c0_i32_0 : i32, i32
  }
  func.func @transform_10(%arg0: i32) -> (i32, i32) {
    %c0_i32 = arith.constant 0 : i32
    %c0_i32_0 = arith.constant 0 : i32
    return %arg0, %c0_i32 : i32, i32
  }
}

</mosaic_0001>

<bundles_post_ra>
// kernel: tpu_custom_call.1
= control target key start
LH: loop header
LB: loop body
LE: loop exit
PB: predicated region body
PF: predicated region fallthrough
CT: control target
= control target key end

     0   :  { %s10618_s0 = inlined_call_operand.hbm [shape: f32[2048,128], index: 0, kind: input, shape index: {}]   ;;  %s10619_s1 = inlined_call_operand.hbm [shape: f32[128,128], index: 1, kind: input, shape index: {}]   ;;  %s10620_s2 = inlined_call_operand.hbm [shape: f32[128,256], index: 2, kind: input, shape index: {}]   ;;  %s10621_s3 = inlined_call_operand.vmem [shape: f32[1,256], index: 3, kind: input, shape index: {}]   ;;  %s10622_s4 = inlined_call_operand.hbm [shape: f32[256,128], index: 4, kind: input, shape index: {}]   ;;  %s10623_s5 = inlined_call_operand.vmem [shape: f32[1,128], index: 5, kind: input, shape index: {}]   ;;  %s10624_s6 = inlined_call_operand.hbm [shape: f32[128,128], index: 6, kind: input, shape index: {}]   ;;  %s10625_s7 = inlined_call_operand.vmem [shape: f32[1,128], index: 7, kind: input, shape index: {}]   ;;  %s10626_s8 = inlined_call_operand.hbm [shape: f32[128,128], index: 8, kind: input, shape index: {}]   ;;  %s10627_s9 = inlined_call_operand.vmem [shape: f32[1,128], index: 9, kind: input, shape index: {}]   ;;  %s10628_s10 = inlined_call_operand.hbm [shape: f32[2048,128], index: 10, kind: output, shape index: {}]  }
   0x1   :  { %10633 = sst [smem:[#allocation169_spill]] %s10619_s1 }
   0x2   :  { %10634 = sst [smem:[#allocation170_spill]] %s10620_s2 }
   0x3   :  { %10635 = sst [smem:[#allocation171_spill]] %s10622_s4 }
   0x4   :  { %10636 = sst [smem:[#allocation172_spill]] %s10624_s6 }
   0x5   :  { %15 = vsyncpa [#allocation3], 0 }
   0x6   :  { %17 = vsyncpa [#allocation3 + $0x1], 0 }
   0x7   :  { %18 = vsyncpa [#allocation6], 0 }
   0x8   :  { %19 = vsyncpa [#allocation9], 0 }
   0x9   :  { %20 = vsyncpa [#allocation12], 0 }
   0xa   :  { %21 = vsyncpa [#allocation4], 0 }
   0xb   :  { %23 = vsyncpa [#allocation4 + $0x1], 0  ;;  %s7096_s13 = smov 0   ;;  %s7098_s14 = smov 0  }
   0xc   :  { %s7100_s15 = smov 0   ;;  %s7102_s16 = smov 0  }
   0xd LB: > { %s10637_s1 = sld [smem:[#allocation169_spill]]  ;;  %s7120_s20 = sadd.s32 4294967295, %s7028_s16   ;;  %s7028_s16 = sphi %s7102_s16, %s11105_s16   ;;  %s7024_s15 = sphi %s7100_s15, %s11104_s15   ;;  %s7020_s14 = sphi %s7098_s14, %s11103_s14   ;;  %s7016_s13 = sphi %s7096_s13, %s11102_s13  }
   0xe   : > { %p6373_p0 = scmp.ge.s32.totalorder %s7028_s16, 1  ;;  %p50_p1 = scmp.eq.s32.totalorder %s7120_s20, 0 }
   0xf   : > { %p275_p2 = scmp.lt.s32.totalorder %s7028_s16, 3  ;;  %s7030_s22 = smov [#allocation5]  }
  0x10   : > { %s288_s23 = sshll.u32 %s7030_s22, 4  ;;  %s10639_s4 = sld [smem:[#allocation171_spill]]  ;;  %s289_s23 = int_to_ptr.vmem [resolvable:$true] %s288_s23 }
  0x11   : > { %p7125_p3 = pnand %p6373_p0, %p275_p2  ;;  %s10641_s2 = sld [smem:[#allocation170_spill]] }
  0x12   : > { %s7031_s11 = smov [#allocation8]   ;;  %s10629_s17 = smov 128  }
  0x13   : > { %s286_s19 = sshll.u32 %s10637_s1, 4  ;;  %p6422_p4 = pneg %p7125_p3  ;;  %s287_s19 = int_to_ptr.hbm [resolvable:$true] %s286_s19 }
  0x14   : > { %s319_s12 = sshll.u32 %s7031_s11, 4  ;;  %s10630_s18 = smov 8   ;;  %s320_s12 = int_to_ptr.vmem [resolvable:$true] %s319_s12 }
  0x15   : > { %p7137_p6 = pnand %p6422_p4, %p50_p1  ;;  %s7034_s22 = smov [#allocation7]  }
  0x16   : > { %s317_s26 = sshll.u32 %s10639_s4, 4  ;;  %s302_s24 = sshll.u32 %s7034_s22, 4  ;;  %s318_s26 = int_to_ptr.hbm [resolvable:$true] %s317_s26  ;;  %s303_s24 = int_to_ptr.vmem [resolvable:$true] %s302_s24 }
  0x17   : > { %s300_s30 = sshll.u32 %s10641_s2, 4  ;;  %s10642_s6 = sld [smem:[#allocation172_spill]]  ;;  %s301_s30 = int_to_ptr.hbm [resolvable:$true] %s300_s30 }
  0x18   : > { %6425 = dma.hbm_to_vmem [thread:$0]  (!%p7137_p6), %s287_s19, 2048, %s289_s23, [#allocation6], %s10629_s17, %s10629_s17, %s10630_s18  }
  0x19   : > { %6431 = dma.hbm_to_vmem [thread:$0]  (!%p7137_p6), %s318_s26, 4096, %s320_s12, [#allocation9], %s10629_s17, %s10629_s17, %s10630_s18  }
  0x1a   : > { %s7035_s11 = smov 256   ;;  %s7036_s19 = smov 16  }
  0x1b   : > { %6428 = dma.hbm_to_vmem [thread:$0]  (!%p7137_p6), %s301_s30, 4096, %s303_s24, [#allocation6], %s7035_s11, %s7035_s11, %s7036_s19  }
  0x1c   : > { %s7037_s23 = smov [#allocation10]   ;;  %s351_s25 = sshll.u32 %s10626_s8, 4  ;;  %s352_s25 = int_to_ptr.hbm [resolvable:$true] %s351_s25 }
  0x1d   : > { %s334_s29 = sshll.u32 %s10642_s6, 4  ;;  %s336_s26 = sshll.u32 %s7037_s23, 4  ;;  %s335_s29 = int_to_ptr.hbm [resolvable:$true] %s334_s29  ;;  %s337_s26 = int_to_ptr.vmem [resolvable:$true] %s336_s26 }
  0x1e   : > { %6434 = dma.hbm_to_vmem [thread:$0]  (!%p7137_p6), %s335_s29, 2048, %s337_s26, [#allocation9], %s10629_s17, %s10629_s17, %s10630_s18  }
  0x1f   : > { %s7038_s30 = smov [#allocation11]   ;;  %s6372_s28 = sadd.s32 4294967294, %s7028_s16  }
  0x20   : > { %s353_s24 = sshll.u32 %s7038_s30, 4  ;;  %s7174_s11 = sadd.s32 1, %s7028_s16   ;;  %s354_s24 = int_to_ptr.vmem [resolvable:$true] %s353_s24 }
  0x21   : > { %6437 = dma.hbm_to_vmem [thread:$0]  (!%p7137_p6), %s352_s25, 2048, %s354_s24, [#allocation12], %s10629_s17, %s10629_s17, %s10630_s18  }
  0x22   : > { %s36_s19 = sadd.s32 1, %s7024_s15  ;;  %s33_s23 = ssub.s32 %s7028_s16, %s7174_s11 }
  0x23   : > { %p43_p7 = scmp.ne.s32.totalorder %s7024_s15, %s7020_s14  ;;  %p34_p8 = scmp.eq.s32.totalorder %s33_s23, 0 }
  0x24   : > { %p44_p9 = scmp.eq.s32.totalorder %s7028_s16, 0  ;;  %p49_p10 = scmp.ne.s32.totalorder %s7020_s14, %s7016_s13 }
  0x25   : > { %p262_p11 = scmp.eq.s32.totalorder %s7120_s20, 1  ;;  %p268_p0 = scmp.eq.s32.totalorder %s6372_s28, 1 }
  0x26   : > { %s7186_s29 = scalar_select %p34_p8, %s7024_s15, %s36_s19  }
  0x27   : > { %p7190_p12 = por %p50_p1, %p49_p10  ;;  %p7194_p13 = por %p262_p11, %p43_p7 }
  0x28   : > { %p45_p2 = por %p44_p9, %p43_p7  ;;  %s370_s12 = sand.u32 1, %s7024_s15  }
  0x29   : > { %p7199_p4 = por %p268_p0, %p49_p10  ;;  %p6451_p6 = scmp.lt.s32.totalorder %s7028_s16, 2 }
  0x2a   : > { %s6380_s25 = sshll.u32 %s370_s12, 10  ;;  %s6396_s30 = sshll.u32 %s7028_s16, 10 }
  0x2b   : > { %s379_s23 = scalar_lea.hbm %s10618_s0, %s6396_s30  ;;  %s374_s18 = scalar_lea.vmem [#allocation2], %s6380_s25 }
  0x2c   : > { %s380_s17 = sshll.u32 %s379_s23, 4  ;;  %s382_s1 = sshll.u32 %s374_s18, 4  ;;  %s381_s17 = int_to_ptr.hbm [resolvable:$true] %s380_s17  ;;  %s383_s1 = int_to_ptr.vmem [resolvable:$true] %s382_s1 }
  0x2d   : > { %p7208_p8 = pnand %p6451_p6, %p45_p2  ;;  %s371_s2 = scalar_lea.sflag [#allocation3], %s370_s12 }
  0x2e   : > { %s6920_s4 = sshra.s32 %s381_s17, 4  ;;  %s6927_s18 = scalar_lea.hbm %s10618_s0, 2048  ;;  %s6921_s4 = int_to_ptr.hbm [resolvable:$true] %s6920_s4 }
  0x2f   : > { %s6922_s6 = scalar_lea.hbm %s6921_s4, 1024  ;;  %p6924_p9 = pneg %p7208_p8 }
  0x30   : > { %p6923_p7 = scmp.ne.s32.totalorder %s6921_s4, %s6922_s6  ;;  %p6928_p0 = scmp.lt.s32.totalorder %s6921_s4, %s10618_s0 }
  0x31   : > { %p6929_p2 = scmp.lt.s32.totalorder %s6927_s18, %s6922_s6 }
  0x32   : > { %p6925_p10 = pnand %p6924_p9, %p6923_p7 }
  0x33   : > { %p6930_p6 = por %p6929_p2, %p6928_p0 }
  0x34   : > { %p6926_p11 = pneg %p6925_p10 }
  0x36   : > { %p6931_p5 = pnand %p6930_p6, %p6926_p11 }
  0x38   : > { %6934 = shalt.err (!%p6931_p5)
}
  0x39   : > { %s10647_s12 = smov 8   ;;  %s10648_s23 = smov 128  }
  0x3a   : > { %6441 = dma.hbm_to_vmem [thread:$0]  (!%p7208_p8), %s381_s17, 16384, %s383_s1, %s371_s2, %s10648_s23, %s10648_s23, %s10647_s12  }
  0x3b   : > { %394 = sbr.rel (%p7125_p3) target bundleno = 2698 (0xa8a), region = 60 }
  0x40   : > { %s7228_s30 = sand.u32 1, %s7020_s14  }
  0x41   : > { %s6384_s4 = sshll.u32 %s7228_s30, 10  ;;  %s397_s6 = scalar_lea.sflag [#allocation3], %s7228_s30 }
  0x42   : > { %s7234_s24 = scalar_lea.vmem [#allocation2], %s6384_s4 }
  0x43   : > { %6995 = dma.done.wait (%p7190_p12), %s397_s6, 16384  }
  0x44   : > { %6997 = vsyncadd (%p7190_p12), %s397_s6, 4294950912 }
  0x45   : > { %6999 = dma.done.wait (%p50_p1), [#allocation6], 6144  }
  0x46   : > { %7001 = vsyncadd (%p50_p1), [#allocation6], 4294961152 }
  0x47   : > { %7003 = dma.done.wait (%p50_p1), [#allocation9], 6144  }
  0x48   : > { %7005 = vsyncadd (%p50_p1), [#allocation9], 4294961152 }
  0x49   : > { %7007 = dma.done.wait (%p50_p1), [#allocation12], 2048  }
  0x4a   : > { %7009 = vsyncadd (%p50_p1), [#allocation12], 4294965248  ;;  %v608_v0 = vld [vmem:[#allocation5 + $0x78] sm:$0xff]  ;;  %v607_v1 = vld [vmem:[#allocation5 + $0x70] sm:$0xff]  ;;  %s9626_s23 = scalar_lea.vmem [#allocation13], %s6384_s4  ;;  %s6397_s21 = sshll.u32 %s7120_s20, 10 }
  0x4b   : > { %609 = vmatpush.msra.mxu0 %v608_v0  ;;  %1266 = vmatpush.msra.mxu1 %v608_v0  ;;  %v606_v2 = vld [vmem:[#allocation5 + $0x68] sm:$0xff]  ;;  %v605_v3 = vld [vmem:[#allocation5 + $0x60] sm:$0xff]  ;;  %v604_v4 = vld [vmem:[#allocation5 + $0x58] sm:$0xff]  ;;  %s6247_s28 = scalar_lea.hbm %s10628_s10, %s6397_s21  ;;  %s6248_s18 = sshll.u32 %s9626_s23, 4  ;;  %s6249_s18 = int_to_ptr.vmem [resolvable:$true] %s6248_s18 }
  0x4c   : > { %v603_v5 = vld [vmem:[#allocation5 + $0x50] sm:$0xff]  ;;  %v602_v6 = vld [vmem:[#allocation5 + $0x48] sm:$0xff]  ;;  %v601_v7 = vld [vmem:[#allocation5 + $0x40] sm:$0xff]  ;;  %s6250_s25 = sshll.u32 %s6247_s28, 4  ;;  %s6236_s19 = scalar_lea.sflag [#allocation4], %s7228_s30  ;;  %s6251_s25 = int_to_ptr.hbm [resolvable:$true] %s6250_s25 }
  0x4d   : > { %610 = vmatpush.msra.mxu0 %v607_v1  ;;  %1267 = vmatpush.msra.mxu1 %v607_v1  ;;  %v600_v8 = vld [vmem:[#allocation5 + $0x38] sm:$0xff]  ;;  %v599_v9 = vld [vmem:[#allocation5 + $0x30] sm:$0xff]  ;;  %v598_v10 = vld [vmem:[#allocation5 + $0x28] sm:$0xff]  ;;  %s6964_s12 = sshra.s32 %s6251_s25, 4  ;;  %s6965_s12 = int_to_ptr.hbm [resolvable:$true] %s6964_s12 }
  0x4e   : > { %v597_v11 = vld [vmem:[#allocation5 + $0x20] sm:$0xff]  ;;  %v596_v12 = vld [vmem:[#allocation5 + $0x18] sm:$0xff]  ;;  %v595_v13 = vld [vmem:[#allocation5 + $0x10] sm:$0xff]  ;;  %s6966_s20 = scalar_lea.hbm %s6965_s12, 1024  ;;  %p6971_p12 = scmp.lt.s32.totalorder %s6965_s12, %s10628_s10 }
  0x4f   : > { %611 = vmatpush.msra.mxu0 %v606_v2  ;;  %1268 = vmatpush.msra.mxu1 %v606_v2  ;;  %v594_v14 = vld [vmem:[#allocation5 + $0x8] sm:$0xff]  ;;  %v593_v15 = vld [vmem:[#allocation5] sm:$0xff]  ;;  %v467_v18 = vld [vmem:[%s7234_s24 + $0x10] sm:$0xff]  ;;  %p6967_p1 = scmp.ne.s32.totalorder %s6965_s12, %s6966_s20 }
  0x50   : > { %v465_v16 = vld [vmem:[%s7234_s24] sm:$0xff]  ;;  %v466_v17 = vld [vmem:[%s7234_s24 + $0x8] sm:$0xff]  ;;  %v468_v19 = vld [vmem:[%s7234_s24 + $0x18] sm:$0xff] }
  0x51   : > { %612 = vmatpush.msra.mxu0 %v605_v3  ;;  %1269 = vmatpush.msra.mxu1 %v605_v3  ;;  %v469_v20 = vld [vmem:[%s7234_s24 + $0x20] sm:$0xff]  ;;  %v470_v21 = vld [vmem:[%s7234_s24 + $0x28] sm:$0xff]  ;;  %v471_v22 = vld [vmem:[%s7234_s24 + $0x30] sm:$0xff]  ;;  %p6968_p3 = pnand %p6967_p1, %p7194_p13 }
  0x52   : > { %v7260_v23 = vld [vmem:[%s7234_s24 + $0x38] sm:$0xff]  ;;  %v7264_v24 = vld [vmem:[%s7234_s24 + $0x40] sm:$0xff]  ;;  %v7268_v25 = vld [vmem:[%s7234_s24 + $0x48] sm:$0xff] }
  0x53   : > { %613 = vmatpush.msra.mxu0 %v604_v4  ;;  %1270 = vmatpush.msra.mxu1 %v604_v4  ;;  %v7272_v26 = vld [vmem:[%s7234_s24 + $0x50] sm:$0xff]  ;;  %v7276_v27 = vld [vmem:[%s7234_s24 + $0x58] sm:$0xff]  ;;  %v7280_v28 = vld [vmem:[%s7234_s24 + $0x60] sm:$0xff]  ;;  %p6969_p5 = pneg %p6968_p3 }
  0x54   : > { %v7284_v29 = vld [vmem:[%s7234_s24 + $0x68] sm:$0xff]  ;;  %v7288_v30 = vld [vmem:[%s7234_s24 + $0x70] sm:$0xff]  ;;  %v4186_v31 = vld [vmem:[#allocation8 + $0x78] sm:$0xff] }
  0x55   : > { %614 = vmatpush.msra.mxu0 %v603_v5  ;;  %1271 = vmatpush.msra.mxu1 %v603_v5  ;;  %v4202_v32 = vld [vmem:[#allocation8 + $0xf8] sm:$0xff]  ;;  %v7296_v35 = vld [vmem:[%s7234_s24 + $0x80] sm:$0xff]  ;;  %v7304_v39 = vld [vmem:[%s7234_s24 + $0x88] sm:$0xff] }
  0x56   : > { %v7292_v33 = vld [vmem:[%s7234_s24 + $0x78] sm:$0xff]  ;;  %v7312_v43 = vld [vmem:[%s7234_s24 + $0x90] sm:$0xff]  ;;  %v7328_v51 = vld [vmem:[%s7234_s24 + $0xa0] sm:$0xff] }
  0x57   : > { %615 = vmatpush.msra.mxu0 %v602_v6  ;;  %1272 = vmatpush.msra.mxu1 %v602_v6  ;;  %v7320_v47 = vld [vmem:[%s7234_s24 + $0x98] sm:$0xff]  ;;  %v7336_v55 = vld [vmem:[%s7234_s24 + $0xa8] sm:$0xff]  ;;  %v7344_v59 = vld [vmem:[%s7234_s24 + $0xb0] sm:$0xff] }
  0x58   : > { %v4185_v62 = vld [vmem:[#allocation8 + $0x70] sm:$0xff]  ;;  %v7352_v1 = vld [vmem:[%s7234_s24 + $0xb8] sm:$0xff]  ;;  %v7361_v5 = vld [vmem:[%s7234_s24 + $0xc0] sm:$0xff] }
  0x59   : > { %616 = vmatpush.msra.mxu0 %v601_v7  ;;  %1273 = vmatpush.msra.mxu1 %v601_v7  ;;  %v4201_v63 = vld [vmem:[#allocation8 + $0xf0] sm:$0xff] }
  0x5b   : > { %617 = vmatpush.msra.mxu0 %v600_v8  ;;  %1274 = vmatpush.msra.mxu1 %v600_v8 }
  0x5d   : > { %618 = vmatpush.msra.mxu0 %v599_v9  ;;  %1275 = vmatpush.msra.mxu1 %v599_v9  ;;  %v7370_v9 = vld [vmem:[%s7234_s24 + $0xc8] sm:$0xff] }
  0x5f   : > { %619 = vmatpush.msra.mxu0 %v598_v10  ;;  %1276 = vmatpush.msra.mxu1 %v598_v10 }
  0x61   : > { %620 = vmatpush.msra.mxu0 %v597_v11  ;;  %1277 = vmatpush.msra.mxu1 %v597_v11 }
  0x63   : > { %621 = vmatpush.msra.mxu0 %v596_v12  ;;  %1278 = vmatpush.msra.mxu1 %v596_v12 }
  0x65   : > { %622 = vmatpush.msra.mxu0 %v595_v13  ;;  %1279 = vmatpush.msra.mxu1 %v595_v13  ;;  %v7379_v13 = vld [vmem:[%s7234_s24 + $0xd0] sm:$0xff] }
  0x67   : > { %623 = vmatpush.msra.mxu0 %v594_v14  ;;  %1280 = vmatpush.msra.mxu1 %v594_v14 }
  0x69   : > { %624 = vmatpush.msra.mxu0 %v593_v15  ;;  %1281 = vmatpush.msra.mxu1 %v593_v15 }
  0x6a   : > { %625 = vmatmul.f32.vlgmr.msra.gmra.mxu0 %v465_v16 }
  0x6b   : > { %4207 = vmatpush.msrb.mxu0 %v4186_v31  ;;  %4608 = vmatpush.msrb.mxu1 %v4202_v32  ;;  %v7397_v32 = vld [vmem:[%s7234_s24 + $0xe0] sm:$0xff] }
  0x6d   : > { %4208 = vmatpush.msrb.mxu0 %v4185_v62  ;;  %4609 = vmatpush.msrb.mxu1 %v4201_v63  ;;  %v3087_v63 = vld [vmem:[#allocation7 + $0x60] sm:$0xff] }
  0x72   : > { %628 = vmatmul.f32.gmra.mxu0 %v466_v17 }
  0x7a   : > { %631 = vmatmul.f32.gmra.mxu0 %v467_v18 }
  0x82   : > { %634 = vmatmul.f32.gmra.mxu0 %v468_v19 }
  0x8a   : > { %637 = vmatmul.f32.gmra.mxu0 %v469_v20 }
  0x92   : > { %640 = vmatmul.f32.gmra.mxu0 %v470_v21 }
  0x9a   : > { %643 = vmatmul.f32.gmra.mxu0 %v471_v22 }
  0xa2   : > { %646 = vmatmul.f32.gmra.mxu0 %v7260_v23 }
  0xaa   : > { %649 = vmatmul.f32.gmra.mxu0 %v7264_v24 }
  0xb2   : > { %652 = vmatmul.f32.gmra.mxu0 %v7268_v25 }
  0xba   : > { %655 = vmatmul.f32.gmra.mxu0 %v7272_v26 }
  0xc2   : > { %658 = vmatmul.f32.gmra.mxu0 %v7276_v27 }
  0xca   : > { %661 = vmatmul.f32.gmra.mxu0 %v7280_v28 }
  0xd2   : > { %664 = vmatmul.f32.gmra.mxu0 %v7284_v29 }
  0xda   : > { %667 = vmatmul.f32.gmra.mxu0 %v7288_v30 }
  0xe2   : > { %670 = vmatmul.f32.gmra.mxu0 %v7292_v33 }
  0xe7   : > { %v626_v34 = vpop.f32.mrf.mxu0 }
  0xe8   : > { %v7298_v36 = vsub.f32 %v465_v16, %v626_v34 }
  0xea   : > { %673 = vmatmul.f32.gmra.mxu0 %v7296_v35  ;;  %v1138_v37 = vmul.f32 %v7298_v36, %v7298_v36 }
  0xec   : > { %1282 = vmatmul.f32.vlgmr.msra.gmra.mxu1 %v1138_v37  ;;  %v3097_v37 = vld [vmem:[#allocation7 + $0xb0] sm:$0xff] }
  0xef   : > { %v629_v38 = vpop.f32.mrf.mxu0 }
  0xf0   : > { %v7306_v40 = vsub.f32 %v466_v17, %v629_v38  ;;  %v7388_v17 = vld [vmem:[%s7234_s24 + $0xd8] sm:$0xff] }
  0xf1   : > { %v3098_v38 = vld [vmem:[#allocation7 + $0xb8] sm:$0xff] }
  0xf2   : > { %676 = vmatmul.f32.gmra.mxu0 %v7304_v39  ;;  %v1139_v41 = vmul.f32 %v7306_v40, %v7306_v40 }
  0xf4   : > { %1285 = vmatmul.f32.gmra.mxu1 %v1139_v41 }
  0xf7   : > { %v632_v42 = vpop.f32.mrf.mxu0 }
  0xf8   : > { %v7314_v44 = vsub.f32 %v467_v18, %v632_v42  ;;  %v3095_v42 = vld [vmem:[#allocation7 + $0xa0] sm:$0xff] }
  0xfa   : > { %679 = vmatmul.f32.gmra.mxu0 %v7312_v43  ;;  %v1140_v45 = vmul.f32 %v7314_v44, %v7314_v44 }
  0xfc   : > { %1288 = vmatmul.f32.gmra.mxu1 %v1140_v45  ;;  %v3096_v45 = vld [vmem:[#allocation7 + $0xa8] sm:$0xff] }
  0xff   : > { %v635_v46 = vpop.f32.mrf.mxu0 }
 0x100   : > { %v7322_v48 = vsub.f32 %v468_v19, %v635_v46  ;;  %v3105_v19 = vld [vmem:[#allocation7 + $0xf0] sm:$0xff] }
 0x101   : > { %3113 = vmatpush.msra.mxu2 %v3105_v19  ;;  %v3093_v46 = vld [vmem:[#allocation7 + $0x90] sm:$0xff] }
 0x102   : > { %682 = vmatmul.f32.gmra.mxu0 %v7320_v47  ;;  %v1141_v49 = vmul.f32 %v7322_v48, %v7322_v48 }
 0x104   : > { %1291 = vmatmul.f32.gmra.mxu1 %v1141_v49  ;;  %v3094_v49 = vld [vmem:[#allocation7 + $0x98] sm:$0xff] }
 0x107   : > { %v638_v50 = vpop.f32.mrf.mxu0 }
 0x108   : > { %v7330_v52 = vsub.f32 %v469_v20, %v638_v50  ;;  %v3106_v20 = vld [vmem:[#allocation7 + $0xf8] sm:$0xff]  ;;  %v3092_v50 = vld [vmem:[#allocation7 + $0x88] sm:$0xff] }
 0x109   : > { %3514 = vmatpush.msra.mxu3 %v3106_v20  ;;  %v3079_v20 = vld [vmem:[#allocation7 + $0x20] sm:$0xff] }
 0x10a   : > { %685 = vmatmul.f32.gmra.mxu0 %v7328_v51  ;;  %v1142_v53 = vmul.f32 %v7330_v52, %v7330_v52 }
 0x10c   : > { %1294 = vmatmul.f32.gmra.mxu1 %v1142_v53 }
 0x10f   : > { %v641_v54 = vpop.f32.mrf.mxu0 }
 0x110   : > { %v7338_v56 = vsub.f32 %v470_v21, %v641_v54  ;;  %v7406_v54 = vld [vmem:[%s7234_s24 + $0xe8] sm:$0xff] }
 0x112   : > { %688 = vmatmul.f32.gmra.mxu0 %v7336_v55  ;;  %v1143_v57 = vmul.f32 %v7338_v56, %v7338_v56 }
 0x114   : > { %1297 = vmatmul.f32.gmra.mxu1 %v1143_v57 }
 0x117   : > { %v644_v58 = vpop.f32.mrf.mxu0 }
 0x118   : > { %v7346_v60 = vsub.f32 %v471_v22, %v644_v58  ;;  %v3103_v22 = vld [vmem:[#allocation7 + $0xe0] sm:$0xff]  ;;  %v3089_v58 = vld [vmem:[#allocation7 + $0x70] sm:$0xff] }
 0x119   : > { %3114 = vmatpush.msra.mxu2 %v3103_v22  ;;  %v3077_v22 = vld [vmem:[#allocation7 + $0x10] sm:$0xff] }
 0x11a   : > { %691 = vmatmul.f32.gmra.mxu0 %v7344_v59  ;;  %v1144_v61 = vmul.f32 %v7346_v60, %v7346_v60 }
 0x11c   : > { %1300 = vmatmul.f32.gmra.mxu1 %v1144_v61  ;;  %v3090_v61 = vld [vmem:[#allocation7 + $0x78] sm:$0xff] }
 0x11f   : > { %v647_v0 = vpop.f32.mrf.mxu0 }
 0x120   : > { %v7355_v2 = vsub.f32 %v7260_v23, %v647_v0  ;;  %v3104_v23 = vld [vmem:[#allocation7 + $0xe8] sm:$0xff] }
 0x121   : > { %3515 = vmatpush.msra.mxu3 %v3104_v23  ;;  %v3088_v0 = vld [vmem:[#allocation7 + $0x68] sm:$0xff]  ;;  %v3078_v23 = vld [vmem:[#allocation7 + $0x18] sm:$0xff] }
 0x122   : > { %694 = vmatmul.f32.gmra.mxu0 %v7352_v1  ;;  %v1145_v3 = vmul.f32 %v7355_v2, %v7355_v2 }
 0x124   : > { %1303 = vmatmul.f32.gmra.mxu1 %v1145_v3  ;;  %v3085_v3 = vld [vmem:[#allocation7 + $0x50] sm:$0xff] }
 0x127   : > { %v650_v4 = vpop.f32.mrf.mxu0 }
 0x128   : > { %v7364_v6 = vsub.f32 %v7264_v24, %v650_v4  ;;  %v3101_v24 = vld [vmem:[#allocation7 + $0xd0] sm:$0xff]  ;;  %v3086_v4 = vld [vmem:[#allocation7 + $0x58] sm:$0xff] }
 0x129   : > { %3115 = vmatpush.msra.mxu2 %v3101_v24  ;;  %v3076_v24 = vld [vmem:[#allocation7 + $0x8] sm:$0xff] }
 0x12a   : > { %697 = vmatmul.f32.gmra.mxu0 %v7361_v5  ;;  %v1146_v7 = vmul.f32 %v7364_v6, %v7364_v6 }
 0x12c   : > { %1306 = vmatmul.f32.gmra.mxu1 %v1146_v7  ;;  %v3084_v7 = vld [vmem:[#allocation7 + $0x48] sm:$0xff] }
 0x12f   : > { %v653_v8 = vpop.f32.mrf.mxu0 }
 0x130   : > { %v7373_v10 = vsub.f32 %v7268_v25, %v653_v8  ;;  %v3102_v25 = vld [vmem:[#allocation7 + $0xd8] sm:$0xff] }
 0x131   : > { %3516 = vmatpush.msra.mxu3 %v3102_v25 }
 0x132   : > { %700 = vmatmul.f32.gmra.mxu0 %v7370_v9  ;;  %v1147_v11 = vmul.f32 %v7373_v10, %v7373_v10 }
 0x134   : > { %1309 = vmatmul.f32.gmra.mxu1 %v1147_v11  ;;  %v7415_v11 = vld [vmem:[%s7234_s24 + $0xf0] sm:$0xff] }
 0x137   : > { %v656_v12 = vpop.f32.mrf.mxu0 }
 0x138   : > { %v7382_v14 = vsub.f32 %v7272_v26, %v656_v12  ;;  %v3099_v26 = vld [vmem:[#allocation7 + $0xc0] sm:$0xff] }
 0x139   : > { %3116 = vmatpush.msra.mxu2 %v3099_v26  ;;  %v7424_v26 = vld [vmem:[%s7234_s24 + $0xf8] sm:$0xff] }
 0x13a   : > { %703 = vmatmul.f32.gmra.mxu0 %v7379_v13  ;;  %v1148_v15 = vmul.f32 %v7382_v14, %v7382_v14 }
 0x13b   : > { %3117 = vmatpush.msra.mxu2 %v3097_v37  ;;  %v7433_v37 = vld [vmem:[%s7234_s24 + $0x100] sm:$0xff] }
 0x13c   : > { %1312 = vmatmul.f32.gmra.mxu1 %v1148_v15  ;;  %v3081_v15 = vld [vmem:[#allocation7 + $0x30] sm:$0xff] }
 0x13d   : > { %3118 = vmatpush.msra.mxu2 %v3095_v42  ;;  %v4200_v42 = vld [vmem:[#allocation8 + $0xe8] sm:$0xff] }
 0x13e   : > { %4610 = vmatpush.msrb.mxu1 %v4200_v42 }
 0x13f   : > { %v659_v16 = vpop.f32.mrf.mxu0  ;;  %3119 = vmatpush.msra.mxu2 %v3093_v46 }
 0x140   : > { %v7391_v18 = vsub.f32 %v7276_v27, %v659_v16  ;;  %v3100_v27 = vld [vmem:[#allocation7 + $0xc8] sm:$0xff]  ;;  %v3082_v16 = vld [vmem:[#allocation7 + $0x38] sm:$0xff] }
 0x141   : > { %3517 = vmatpush.msra.mxu3 %v3100_v27 }
 0x142   : > { %706 = vmatmul.f32.gmra.mxu0 %v7388_v17  ;;  %v1149_v21 = vmul.f32 %v7391_v18, %v7391_v18 }
 0x143   : > { %3518 = vmatpush.msra.mxu3 %v3098_v38 }
 0x144   : > { %1315 = vmatmul.f32.gmra.mxu1 %v1149_v21  ;;  %v3080_v21 = vld [vmem:[#allocation7 + $0x28] sm:$0xff] }
 0x145   : > { %3519 = vmatpush.msra.mxu3 %v3096_v45  ;;  %v5152_v45 = vld [vmem:[#allocation10 + $0x78] sm:$0xff] }
 0x147   : > { %v662_v31 = vpop.f32.mrf.mxu0  ;;  %3520 = vmatpush.msra.mxu3 %v3094_v49 }
 0x148   : > { %v7400_v34 = vsub.f32 %v7280_v28, %v662_v31  ;;  %v3091_v28 = vld [vmem:[#allocation7 + $0x80] sm:$0xff] }
 0x149   : > { %3120 = vmatpush.msra.mxu2 %v3091_v28  ;;  %3521 = vmatpush.msra.mxu3 %v3092_v50 }
 0x14a   : > { %709 = vmatmul.f32.gmra.mxu0 %v7397_v32  ;;  %v1150_v41 = vmul.f32 %v7400_v34, %v7400_v34 }
 0x14b   : > { %3121 = vmatpush.msra.mxu2 %v3089_v58  ;;  %3522 = vmatpush.msra.mxu3 %v3090_v61 }
 0x14c   : > { %1318 = vmatmul.f32.gmra.mxu1 %v1150_v41  ;;  %v4184_v41 = vld [vmem:[#allocation8 + $0x68] sm:$0xff] }
 0x14d   : > { %3122 = vmatpush.msra.mxu2 %v3087_v63  ;;  %3523 = vmatpush.msra.mxu3 %v3088_v0 }
 0x14e   : > { %4209 = vmatpush.msrb.mxu0 %v4184_v41 }
 0x14f   : > { %v665_v53 = vpop.f32.mrf.mxu0  ;;  %3123 = vmatpush.msra.mxu2 %v3085_v3  ;;  %3524 = vmatpush.msra.mxu3 %v3086_v4 }
 0x150   : > { %v7409_v57 = vsub.f32 %v7284_v29, %v665_v53  ;;  %v3083_v29 = vld [vmem:[#allocation7 + $0x40] sm:$0xff]  ;;  %v7442_v53 = vld [vmem:[%s7234_s24 + $0x108] sm:$0xff] }
 0x151   : > { %3124 = vmatpush.msra.mxu2 %v3083_v29  ;;  %3525 = vmatpush.msra.mxu3 %v3084_v7  ;;  %v7451_v7 = vld [vmem:[%s7234_s24 + $0x110] sm:$0xff] }
 0x152   : > { %712 = vmatmul.f32.gmra.mxu0 %v7406_v54  ;;  %v1151_v62 = vmul.f32 %v7409_v57, %v7409_v57 }
 0x153   : > { %3125 = vmatpush.msra.mxu2 %v3081_v15  ;;  %3526 = vmatpush.msra.mxu3 %v3082_v16 }
 0x154   : > { %1321 = vmatmul.f32.gmra.mxu1 %v1151_v62 }
 0x155   : > { %3126 = vmatpush.msra.mxu2 %v3079_v20  ;;  %3527 = vmatpush.msra.mxu3 %v3080_v21 }
 0x157   : > { %v668_v8 = vpop.f32.mrf.mxu0  ;;  %3127 = vmatpush.msra.mxu2 %v3077_v22  ;;  %3528 = vmatpush.msra.mxu3 %v3078_v23 }
 0x158   : > { %v7418_v12 = vsub.f32 %v7288_v30, %v668_v8  ;;  %v3075_v30 = vld [vmem:[#allocation7] sm:$0xff] }
 0x159   : > { %3128 = vmatpush.msra.mxu2 %v3075_v30  ;;  %3529 = vmatpush.msra.mxu3 %v3076_v24 }
 0x15a   : > { %715 = vmatmul.f32.gmra.mxu0 %v7415_v11  ;;  %v1152_v19 = vmul.f32 %v7418_v12, %v7418_v12 }
 0x15b   : > { %5157 = vmatpush.msrb.mxu2 %v5152_v45 }
 0x15c   : > { %1324 = vmatmul.f32.gmra.mxu1 %v1152_v19 }
 0x15f   : > { %v671_v25 = vpop.f32.mrf.mxu0 }
 0x160   : > { %v7427_v27 = vsub.f32 %v7292_v33, %v671_v25 }
 0x162   : > { %718 = vmatmul.f32.gmra.mxu0 %v7424_v26  ;;  %v1153_v31 = vmul.f32 %v7427_v27, %v7427_v27 }
 0x164   : > { %1327 = vmatmul.f32.gmra.mxu1 %v1153_v31  ;;  %v7461_v31 = vld [vmem:[%s7234_s24 + $0x118] sm:$0xff] }
 0x167   : > { %v674_v38 = vpop.f32.mrf.mxu0 }
 0x168   : > { %v7436_v46 = vsub.f32 %v7296_v35, %v674_v38 }
 0x169   : > { %v1283_v33 = vpop.f32.mrf.mxu1 }
 0x16a   : > { %v1284_v49 = vadd.f32 1e-05, %v1283_v33  ;;  %721 = vmatmul.f32.gmra.mxu0 %v7433_v37  ;;  %v1154_v28 = vmul.f32 %v7436_v46, %v7436_v46 }
 0x16c   : > { %6504 = vrsqrt.f32 %v1284_v49  ;;  %1330 = vmatmul.f32.gmra.mxu1 %v1154_v28  ;;  %vm1673_vm1 = vweird.f32 %v1284_v49 }
 0x16f   : > { %v677_v50 = vpop.f32.mrf.mxu0 }
 0x170   : > { %v7445_v58 = vsub.f32 %v7304_v39, %v677_v50 }
 0x171   : > { %v1286_v35 = vpop.f32.mrf.mxu1 }
 0x172   : > { %v6505_v61 = vpop.eup %6504  ;;  %v1287_v62 = vadd.f32 1e-05, %v1286_v35  ;;  %724 = vmatmul.f32.gmra.mxu0 %v7442_v53  ;;  %v1155_v63 = vmul.f32 %v7445_v58, %v7445_v58 }
 0x173   : > { %v1668_v0 = vmul.f32 %v6505_v61, %v1284_v49  ;;  %vm1674_vm0 = vweird.f32 %v6505_v61 }
 0x174   : > { %6506 = vrsqrt.f32 %v1287_v62  ;;  %1333 = vmatmul.f32.gmra.mxu1 %v1155_v63  ;;  %vm1675_vm2 = vmor %vm1673_vm1, %vm1674_vm0  ;;  %vm1683_vm4 = vweird.f32 %v1287_v62 }
 0x175   : > { %v1669_v3 = vmul.f32 %v6505_v61, %v1668_v0  ;;  %v7471_v0 = vld [vmem:[%s7234_s24 + $0x120] sm:$0xff] }
 0x177   : > { %v1670_v4 = vmul.f32 0.5, %v1669_v3  ;;  %v680_v29 = vpop.f32.mrf.mxu0 }
 0x178   : > { %v7454_v8 = vsub.f32 %v7312_v43, %v680_v29 }
 0x179   : > { %v1289_v39 = vpop.f32.mrf.mxu1  ;;  %v1671_v15 = vsub.f32 1.5, %v1670_v4 }
 0x17a   : > { %v6507_v16 = vpop.eup %6506  ;;  %v1290_v19 = vadd.f32 1e-05, %v1289_v39  ;;  %727 = vmatmul.f32.gmra.mxu0 %v7451_v7  ;;  %v1156_v20 = vmul.f32 %v7454_v8, %v7454_v8 }
 0x17b   : > { %v1678_v21 = vmul.f32 %v6507_v16, %v1287_v62  ;;  %v1672_v22 = vmul.f32 %v6505_v61, %v1671_v15  ;;  %vm1684_vm3 = vweird.f32 %v6507_v16 }
 0x17c   : > { %6508 = vrsqrt.f32 %v1290_v19  ;;  %1336 = vmatmul.f32.gmra.mxu1 %v1156_v20  ;;  %vm1685_vm5 = vmor %vm1683_vm4, %vm1684_vm3  ;;  %vm1693_vm7 = vweird.f32 %v1290_v19 }
 0x17d   : > { %v1679_v23 = vmul.f32 %v6507_v16, %v1678_v21  ;;  %v1676_v43 = vsel %vm1675_vm2, %v6505_v61, %v1672_v22 }
 0x17e   : > { %v2947_v30 = vmul.f32 %v1676_v43, %v7298_v36  ;;  %v7481_v43 = vld [vmem:[%s7234_s24 + $0x128] sm:$0xff] }
 0x17f   : > { %v1680_v24 = vmul.f32 0.5, %v1679_v23  ;;  %v683_v25 = vpop.f32.mrf.mxu0 }
 0x180   : > { %v7464_v38 = vsub.f32 %v7320_v47, %v683_v25  ;;  %3129 = vmatmul.f32.vlgmr.msra.gmra.mxu2 %v2947_v30  ;;  %3530 = vmatmul.f32.vlgmr.msra.gmra.mxu3 %v2947_v30 }
 0x181   : > { %v1292_v41 = vpop.f32.mrf.mxu1  ;;  %v1681_v42 = vsub.f32 1.5, %v1680_v24 }
 0x182   : > { %v6509_v45 = vpop.eup %6508  ;;  %v1293_v33 = vadd.f32 1e-05, %v1292_v41  ;;  %730 = vmatmul.f32.gmra.mxu0 %v7461_v31  ;;  %v1157_v36 = vmul.f32 %v7464_v38, %v7464_v38 }
 0x183   : > { %v1688_v49 = vmul.f32 %v6509_v45, %v1290_v19  ;;  %v1682_v28 = vmul.f32 %v6507_v16, %v1681_v42  ;;  %vm1694_vm6 = vweird.f32 %v6509_v45 }
 0x184   : > { %6510 = vrsqrt.f32 %v1293_v33  ;;  %1339 = vmatmul.f32.gmra.mxu1 %v1157_v36  ;;  %vm1695_vm8 = vmor %vm1693_vm7, %vm1694_vm6  ;;  %vm1703_vm10 = vweird.f32 %v1293_v33 }
 0x185   : > { %v1689_v47 = vmul.f32 %v6509_v45, %v1688_v49  ;;  %v1686_v50 = vsel %vm1685_vm5, %v6507_v16, %v1682_v28 }
 0x186   : > { %v2948_v35 = vmul.f32 %v1686_v50, %v7306_v40  ;;  %v7491_v50 = vld [vmem:[%s7234_s24 + $0x130] sm:$0xff] }
 0x187   : > { %v1690_v61 = vmul.f32 0.5, %v1689_v47  ;;  %v686_v63 = vpop.f32.mrf.mxu0 }
 0x188   : > { %v7474_v3 = vsub.f32 %v7328_v51, %v686_v63  ;;  %3132 = vmatmul.f32.gmra.mxu2 %v2948_v35  ;;  %3533 = vmatmul.f32.gmra.mxu3 %v2948_v35 }
 0x189   : > { %v1295_v4 = vpop.f32.mrf.mxu1  ;;  %v1691_v29 = vsub.f32 1.5, %v1690_v61 }
 0x18a   : > { %v6511_v62 = vpop.eup %6510  ;;  %v1296_v39 = vadd.f32 1e-05, %v1295_v4  ;;  %733 = vmatmul.f32.gmra.mxu0 %v7471_v0  ;;  %v1158_v40 = vmul.f32 %v7474_v3, %v7474_v3 }
 0x18b   : > { %v1698_v15 = vmul.f32 %v6511_v62, %v1293_v33  ;;  %v1692_v16 = vmul.f32 %v6509_v45, %v1691_v29  ;;  %vm1704_vm9 = vweird.f32 %v6511_v62 }
 0x18c   : > { %6512 = vrsqrt.f32 %v1296_v39  ;;  %1342 = vmatmul.f32.gmra.mxu1 %v1158_v40  ;;  %vm1705_vm11 = vmor %vm1703_vm10, %vm1704_vm9  ;;  %vm1713_vm13 = vweird.f32 %v1296_v39 }
 0x18d   : > { %v1699_v51 = vmul.f32 %v6511_v62, %v1698_v15  ;;  %v1696_v20 = vsel %vm1695_vm8, %v6509_v45, %v1692_v16 }
 0x18e   : > { %v2949_v21 = vmul.f32 %v1696_v20, %v7314_v44  ;;  %v7501_v20 = vld [vmem:[%s7234_s24 + $0x138] sm:$0xff] }
 0x18f   : > { %v1700_v22 = vmul.f32 0.5, %v1699_v51  ;;  %v689_v23 = vpop.f32.mrf.mxu0 }
 0x190   : > { %v7484_v30 = vsub.f32 %v7336_v55, %v689_v23  ;;  %3135 = vmatmul.f32.gmra.mxu2 %v2949_v21  ;;  %3536 = vmatmul.f32.gmra.mxu3 %v2949_v21 }
 0x191   : > { %v1298_v24 = vpop.f32.mrf.mxu1  ;;  %v1701_v25 = vsub.f32 1.5, %v1700_v22 }
 0x192   : > { %v6513_v19 = vpop.eup %6512  ;;  %v1299_v41 = vadd.f32 1e-05, %v1298_v24  ;;  %736 = vmatmul.f32.gmra.mxu0 %v7481_v43  ;;  %v1159_v44 = vmul.f32 %v7484_v30, %v7484_v30 }
 0x193   : > { %v1708_v42 = vmul.f32 %v6513_v19, %v1296_v39  ;;  %v1702_v45 = vmul.f32 %v6511_v62, %v1701_v25  ;;  %vm1714_vm12 = vweird.f32 %v6513_v19 }
 0x194   : > { %6514 = vrsqrt.f32 %v1299_v41  ;;  %1345 = vmatmul.f32.gmra.mxu1 %v1159_v44  ;;  %vm1715_vm14 = vmor %vm1713_vm13, %vm1714_vm12  ;;  %vm1723_vm0 = vweird.f32 %v1299_v41 }
 0x195   : > { %v1709_v55 = vmul.f32 %v6513_v19, %v1708_v42  ;;  %v1706_v36 = vsel %vm1705_vm11, %v6511_v62, %v1702_v45  ;;  %v7511_v45 = vld [vmem:[%s7234_s24 + $0x140] sm:$0xff] }
 0x196   : > { %v2950_v49 = vmul.f32 %v1706_v36, %v7322_v48 }
 0x197   : > { %v1710_v28 = vmul.f32 0.5, %v1709_v55  ;;  %v692_v47 = vpop.f32.mrf.mxu0 }
 0x198   : > { %v7494_v35 = vsub.f32 %v7344_v59, %v692_v47  ;;  %3138 = vmatmul.f32.gmra.mxu2 %v2950_v49  ;;  %3539 = vmatmul.f32.gmra.mxu3 %v2950_v49  ;;  %v4183_v49 = vld [vmem:[#allocation8 + $0x60] sm:$0xff]  ;;  %v5151_v47 = vld [vmem:[#allocation10 + $0x70] sm:$0xff] }
 0x199   : > { %v1301_v61 = vpop.f32.mrf.mxu1  ;;  %v1711_v63 = vsub.f32 1.5, %v1710_v28  ;;  %v4199_v28 = vld [vmem:[#allocation8 + $0xe0] sm:$0xff]  ;;  %4210 = vmatpush.msrb.mxu0 %v4183_v49  ;;  %5158 = vmatpush.msrb.mxu2 %v5151_v47 }
 0x19a   : > { %v6515_v33 = vpop.eup %6514  ;;  %v1302_v4 = vadd.f32 1e-05, %v1301_v61  ;;  %739 = vmatmul.f32.gmra.mxu0 %v7491_v50  ;;  %v1160_v48 = vmul.f32 %v7494_v35, %v7494_v35  ;;  %4611 = vmatpush.msrb.mxu1 %v4199_v28 }
 0x19b   : > { %v1718_v29 = vmul.f32 %v6515_v33, %v1299_v41  ;;  %v1712_v62 = vmul.f32 %v6513_v19, %v1711_v63  ;;  %vm1724_vm15 = vweird.f32 %v6515_v33 }
 0x19c   : > { %6516 = vrsqrt.f32 %v1302_v4  ;;  %1348 = vmatmul.f32.gmra.mxu1 %v1160_v48  ;;  %vm1725_vm1 = vmor %vm1723_vm0, %vm1724_vm15  ;;  %vm1733_vm3 = vweird.f32 %v1302_v4 }
 0x19d   : > { %v1719_v59 = vmul.f32 %v6515_v33, %v1718_v29  ;;  %v1716_v40 = vsel %vm1715_vm14, %v6513_v19, %v1712_v62 }
 0x19e   : > { %v2951_v15 = vmul.f32 %v1716_v40, %v7330_v52 }
 0x19f   : > { %v1720_v16 = vmul.f32 0.5, %v1719_v59  ;;  %v695_v51 = vpop.f32.mrf.mxu0 }
 0x1a0   : > { %v7504_v21 = vsub.f32 %v7352_v1, %v695_v51  ;;  %3141 = vmatmul.f32.gmra.mxu2 %v2951_v15  ;;  %3542 = vmatmul.f32.gmra.mxu3 %v2951_v15  ;;  %v7521_v51 = vld [vmem:[%s7234_s24 + $0x148] sm:$0xff] }
 0x1a1   : > { %v1304_v22 = vpop.f32.mrf.mxu1  ;;  %v1721_v23 = vsub.f32 1.5, %v1720_v16 }
 0x1a2   : > { %v6517_v39 = vpop.eup %6516  ;;  %v1305_v24 = vadd.f32 1e-05, %v1304_v22  ;;  %742 = vmatmul.f32.gmra.mxu0 %v7501_v20  ;;  %v1161_v52 = vmul.f32 %v7504_v21, %v7504_v21 }
 0x1a3   : > { %v1728_v25 = vmul.f32 %v6517_v39, %v1302_v4  ;;  %v1722_v19 = vmul.f32 %v6515_v33, %v1721_v23  ;;  %vm1734_vm2 = vweird.f32 %v6517_v39 }
 0x1a4   : > { %6518 = vrsqrt.f32 %v1305_v24  ;;  %1351 = vmatmul.f32.gmra.mxu1 %v1161_v52  ;;  %vm1735_vm4 = vmor %vm1733_vm3, %vm1734_vm2  ;;  %vm1743_vm6 = vweird.f32 %v1305_v24 }
 0x1a5   : > { %v1729_v1 = vmul.f32 %v6517_v39, %v1728_v25  ;;  %v1726_v44 = vsel %vm1725_vm1, %v6515_v33, %v1722_v19 }
 0x1a6   : > { %v2952_v42 = vmul.f32 %v1726_v44, %v7338_v56 }
 0x1a7   : > { %v1730_v55 = vmul.f32 0.5, %v1729_v1  ;;  %v698_v36 = vpop.f32.mrf.mxu0 }
 0x1a8   : > { %v7514_v61 = vsub.f32 %v7361_v5, %v698_v36  ;;  %3144 = vmatmul.f32.gmra.mxu2 %v2952_v42  ;;  %3545 = vmatmul.f32.gmra.mxu3 %v2952_v42  ;;  %v7531_v36 = vld [vmem:[%s7234_s24 + $0x150] sm:$0xff] }
 0x1a9   : > { %v1307_v41 = vpop.f32.mrf.mxu1  ;;  %v1731_v63 = vsub.f32 1.5, %v1730_v55 }
 0x1aa   : > { %v6519_v33 = vpop.eup %6518  ;;  %v1162_v56 = vmul.f32 %v7514_v61, %v7514_v61  ;;  %v1308_v48 = vadd.f32 1e-05, %v1307_v41  ;;  %745 = vmatmul.f32.gmra.mxu0 %v7511_v45 }
 0x1ab   : > { %v1738_v29 = vmul.f32 %v6519_v33, %v1305_v24  ;;  %v1732_v62 = vmul.f32 %v6517_v39, %v1731_v63  ;;  %vm1744_vm5 = vweird.f32 %v6519_v33 }
 0x1ac   : > { %6520 = vrsqrt.f32 %v1308_v48  ;;  %1354 = vmatmul.f32.gmra.mxu1 %v1162_v56  ;;  %vm1745_vm7 = vmor %vm1743_vm6, %vm1744_vm5  ;;  %vm1753_vm9 = vweird.f32 %v1308_v48 }
 0x1ad   : > { %v1739_v5 = vmul.f32 %v6519_v33, %v1738_v29  ;;  %v1736_v59 = vsel %vm1735_vm4, %v6517_v39, %v1732_v62 }
 0x1ae   : > { %v2953_v40 = vmul.f32 %v1736_v59, %v7346_v60  ;;  %v7541_v59 = vld [vmem:[%s7234_s24 + $0x158] sm:$0xff] }
 0x1af   : > { %v1740_v15 = vmul.f32 0.5, %v1739_v5  ;;  %v701_v16 = vpop.f32.mrf.mxu0 }
 0x1b0   : > { %v7524_v22 = vsub.f32 %v7370_v9, %v701_v16  ;;  %3147 = vmatmul.f32.gmra.mxu2 %v2953_v40  ;;  %3548 = vmatmul.f32.gmra.mxu3 %v2953_v40 }
 0x1b1   : > { %v1310_v23 = vpop.f32.mrf.mxu1  ;;  %v1741_v52 = vsub.f32 1.5, %v1740_v15 }
 0x1b2   : > { %v6521_v4 = vpop.eup %6520  ;;  %v1163_v25 = vmul.f32 %v7524_v22, %v7524_v22  ;;  %v1311_v39 = vadd.f32 1e-05, %v1310_v23  ;;  %748 = vmatmul.f32.gmra.mxu0 %v7521_v51 }
 0x1b3   : > { %v1748_v60 = vmul.f32 %v6521_v4, %v1308_v48  ;;  %v1742_v19 = vmul.f32 %v6519_v33, %v1741_v52  ;;  %vm1754_vm8 = vweird.f32 %v6521_v4 }
 0x1b4   : > { %6522 = vrsqrt.f32 %v1311_v39  ;;  %1357 = vmatmul.f32.gmra.mxu1 %v1163_v25  ;;  %vm1755_vm10 = vmor %vm1753_vm9, %vm1754_vm8  ;;  %vm1763_vm12 = vweird.f32 %v1311_v39 }
 0x1b5   : > { %v1749_v9 = vmul.f32 %v6521_v4, %v1748_v60  ;;  %v1746_v1 = vsel %vm1745_vm7, %v6519_v33, %v1742_v19 }
 0x1b6   : > { %v2954_v44 = vmul.f32 %v1746_v1, %v7355_v2  ;;  %v7551_v1 = vld [vmem:[%s7234_s24 + $0x160] sm:$0xff] }
 0x1b7   : > { %v1750_v42 = vmul.f32 0.5, %v1749_v9  ;;  %v704_v55 = vpop.f32.mrf.mxu0 }
 0x1b8   : > { %v7534_v49 = vsub.f32 %v7379_v13, %v704_v55  ;;  %3150 = vmatmul.f32.gmra.mxu2 %v2954_v44  ;;  %3551 = vmatmul.f32.gmra.mxu3 %v2954_v44 }
 0x1b9   : > { %v1313_v28 = vpop.f32.mrf.mxu1  ;;  %v1751_v47 = vsub.f32 1.5, %v1750_v42 }
 0x1ba   : > { %v6523_v24 = vpop.eup %6522  ;;  %v1164_v41 = vmul.f32 %v7534_v49, %v7534_v49  ;;  %v1314_v63 = vadd.f32 1e-05, %v1313_v28  ;;  %751 = vmatmul.f32.gmra.mxu0 %v7531_v36 }
 0x1bb   : > { %v1758_v2 = vmul.f32 %v6523_v24, %v1311_v39  ;;  %v1752_v33 = vmul.f32 %v6521_v4, %v1751_v47  ;;  %vm1764_vm11 = vweird.f32 %v6523_v24 }
 0x1bc   : > { %6524 = vrsqrt.f32 %v1314_v63  ;;  %1360 = vmatmul.f32.gmra.mxu1 %v1164_v41  ;;  %vm1765_vm13 = vmor %vm1763_vm12, %vm1764_vm11  ;;  %vm1773_vm15 = vweird.f32 %v1314_v63 }
 0x1bd   : > { %v1759_v13 = vmul.f32 %v6523_v24, %v1758_v2  ;;  %v1756_v56 = vsel %vm1755_vm10, %v6521_v4, %v1752_v33 }
 0x1be   : > { %v2955_v29 = vmul.f32 %v1756_v56, %v7364_v6  ;;  %v7561_v56 = vld [vmem:[%s7234_s24 + $0x168] sm:$0xff] }
 0x1bf   : > { %v1760_v62 = vmul.f32 0.5, %v1759_v13  ;;  %v707_v5 = vpop.f32.mrf.mxu0 }
 0x1c0   : > { %v7544_v40 = vsub.f32 %v7388_v17, %v707_v5  ;;  %3153 = vmatmul.f32.gmra.mxu2 %v2955_v29  ;;  %3554 = vmatmul.f32.gmra.mxu3 %v2955_v29 }
 0x1c1   : > { %v1316_v15 = vpop.f32.mrf.mxu1  ;;  %v1761_v16 = vsub.f32 1.5, %v1760_v62 }
 0x1c2   : > { %v6525_v48 = vpop.eup %6524  ;;  %v1165_v23 = vmul.f32 %v7544_v40, %v7544_v40  ;;  %v1317_v52 = vadd.f32 1e-05, %v1316_v15  ;;  %754 = vmatmul.f32.gmra.mxu0 %v7541_v59 }
 0x1c3   : > { %v1768_v6 = vmul.f32 %v6525_v48, %v1314_v63  ;;  %v1762_v4 = vmul.f32 %v6523_v24, %v1761_v16  ;;  %vm1774_vm14 = vweird.f32 %v6525_v48 }
 0x1c4   : > { %6526 = vrsqrt.f32 %v1317_v52  ;;  %1363 = vmatmul.f32.gmra.mxu1 %v1165_v23  ;;  %vm1775_vm0 = vmor %vm1773_vm15, %vm1774_vm14  ;;  %vm1783_vm2 = vweird.f32 %v1317_v52 }
 0x1c5   : > { %v1769_v17 = vmul.f32 %v6525_v48, %v1768_v6  ;;  %v1766_v25 = vsel %vm1765_vm13, %v6523_v24, %v1762_v4 }
 0x1c6   : > { %v2956_v60 = vmul.f32 %v1766_v25, %v7373_v10  ;;  %v7571_v25 = vld [vmem:[%s7234_s24 + $0x170] sm:$0xff] }
 0x1c7   : > { %v1770_v19 = vmul.f32 0.5, %v1769_v17  ;;  %v710_v9 = vpop.f32.mrf.mxu0 }
 0x1c8   : > { %v7554_v44 = vsub.f32 %v7397_v32, %v710_v9  ;;  %3156 = vmatmul.f32.gmra.mxu2 %v2956_v60  ;;  %3557 = vmatmul.f32.gmra.mxu3 %v2956_v60 }
 0x1c9   : > { %v1319_v42 = vpop.f32.mrf.mxu1  ;;  %v1771_v55 = vsub.f32 1.5, %v1770_v19 }
 0x1ca   : > { %v6527_v39 = vpop.eup %6526  ;;  %v1166_v28 = vmul.f32 %v7554_v44, %v7554_v44  ;;  %v1320_v47 = vadd.f32 1e-05, %v1319_v42  ;;  %757 = vmatmul.f32.gmra.mxu0 %v7551_v1 }
 0x1cb   : > { %v1778_v10 = vmul.f32 %v6527_v39, %v1317_v52  ;;  %v1772_v24 = vmul.f32 %v6525_v48, %v1771_v55  ;;  %vm1784_vm1 = vweird.f32 %v6527_v39 }
 0x1cc   : > { %6528 = vrsqrt.f32 %v1320_v47  ;;  %1366 = vmatmul.f32.gmra.mxu1 %v1166_v28  ;;  %vm1785_vm3 = vmor %vm1783_vm2, %vm1784_vm1  ;;  %vm1793_vm5 = vweird.f32 %v1320_v47 }
 0x1cd   : > { %v1779_v32 = vmul.f32 %v6527_v39, %v1778_v10  ;;  %v1776_v41 = vsel %vm1775_vm0, %v6525_v48, %v1772_v24 }
 0x1ce   : > { %v2957_v2 = vmul.f32 %v1776_v41, %v7382_v14  ;;  %v7581_v41 = vld [vmem:[%s7234_s24 + $0x178] sm:$0xff] }
 0x1cf   : > { %v1780_v33 = vmul.f32 0.5, %v1779_v32  ;;  %v713_v13 = vpop.f32.mrf.mxu0 }
 0x1d0   : > { %v7564_v29 = vsub.f32 %v7406_v54, %v713_v13  ;;  %3159 = vmatmul.f32.gmra.mxu2 %v2957_v2  ;;  %3560 = vmatmul.f32.gmra.mxu3 %v2957_v2 }
 0x1d1   : > { %v1322_v62 = vpop.f32.mrf.mxu1  ;;  %v1781_v5 = vsub.f32 1.5, %v1780_v33 }
 0x1d2   : > { %v6529_v63 = vpop.eup %6528  ;;  %v1167_v15 = vmul.f32 %v7564_v29, %v7564_v29  ;;  %v1323_v16 = vadd.f32 1e-05, %v1322_v62  ;;  %760 = vmatmul.f32.gmra.mxu0 %v7561_v56 }
 0x1d3   : > { %v1788_v14 = vmul.f32 %v6529_v63, %v1320_v47  ;;  %v1782_v48 = vmul.f32 %v6527_v39, %v1781_v5  ;;  %vm1794_vm4 = vweird.f32 %v6529_v63 }
 0x1d4   : > { %6530 = vrsqrt.f32 %v1323_v16  ;;  %1369 = vmatmul.f32.gmra.mxu1 %v1167_v15  ;;  %vm1795_vm6 = vmor %vm1793_vm5, %vm1794_vm4  ;;  %vm1803_vm8 = vweird.f32 %v1323_v16 }
 0x1d5   : > { %v1789_v54 = vmul.f32 %v6529_v63, %v1788_v14  ;;  %v1786_v23 = vsel %vm1785_vm3, %v6527_v39, %v1782_v48  ;;  %v7591_v48 = vld [vmem:[%s7234_s24 + $0x180] sm:$0xff] }
 0x1d6   : > { %v2958_v6 = vmul.f32 %v1786_v23, %v7391_v18 }
 0x1d7   : > { %v1790_v4 = vmul.f32 0.5, %v1789_v54  ;;  %v716_v17 = vpop.f32.mrf.mxu0 }
 0x1d8   : > { %v7574_v60 = vsub.f32 %v7415_v11, %v716_v17  ;;  %3162 = vmatmul.f32.gmra.mxu2 %v2958_v6  ;;  %3563 = vmatmul.f32.gmra.mxu3 %v2958_v6  ;;  %v4182_v6 = vld [vmem:[#allocation8 + $0x58] sm:$0xff]  ;;  %v5150_v17 = vld [vmem:[#allocation10 + $0x68] sm:$0xff] }
 0x1d9   : > { %v1325_v19 = vpop.f32.mrf.mxu1  ;;  %v1791_v9 = vsub.f32 1.5, %v1790_v4  ;;  %v4198_v4 = vld [vmem:[#allocation8 + $0xd8] sm:$0xff]  ;;  %4211 = vmatpush.msrb.mxu0 %v4182_v6  ;;  %5159 = vmatpush.msrb.mxu2 %v5150_v17  ;;  %v7611_v6 = vld [vmem:[%s7234_s24 + $0x190] sm:$0xff] }
 0x1da   : > { %v6531_v52 = vpop.eup %6530  ;;  %v1168_v42 = vmul.f32 %v7574_v60, %v7574_v60  ;;  %v1326_v55 = vadd.f32 1e-05, %v1325_v19  ;;  %763 = vmatmul.f32.gmra.mxu0 %v7571_v25  ;;  %4612 = vmatpush.msrb.mxu1 %v4198_v4 }
 0x1db   : > { %v1798_v18 = vmul.f32 %v6531_v52, %v1323_v16  ;;  %v1792_v39 = vmul.f32 %v6529_v63, %v1791_v9  ;;  %vm1804_vm7 = vweird.f32 %v6531_v52 }
 0x1dc   : > { %6532 = vrsqrt.f32 %v1326_v55  ;;  %1372 = vmatmul.f32.gmra.mxu1 %v1168_v42  ;;  %vm1805_vm9 = vmor %vm1803_vm8, %vm1804_vm7  ;;  %vm1813_vm11 = vweird.f32 %v1326_v55 }
 0x1dd   : > { %v1799_v11 = vmul.f32 %v6531_v52, %v1798_v18  ;;  %v1796_v28 = vsel %vm1795_vm6, %v6529_v63, %v1792_v39 }
 0x1de   : > { %v2959_v10 = vmul.f32 %v1796_v28, %v7400_v34 }
 0x1df   : > { %v1800_v24 = vmul.f32 0.5, %v1799_v11  ;;  %v719_v32 = vpop.f32.mrf.mxu0 }
 0x1e0   : > { %v7584_v2 = vsub.f32 %v7424_v26, %v719_v32  ;;  %3165 = vmatmul.f32.gmra.mxu2 %v2959_v10  ;;  %3566 = vmatmul.f32.gmra.mxu3 %v2959_v10  ;;  %v7601_v32 = vld [vmem:[%s7234_s24 + $0x188] sm:$0xff] }
 0x1e1   : > { %v1328_v33 = vpop.f32.mrf.mxu1  ;;  %v1801_v13 = vsub.f32 1.5, %v1800_v24 }
 0x1e2   : > { %v6533_v47 = vpop.eup %6532  ;;  %v1169_v62 = vmul.f32 %v7584_v2, %v7584_v2  ;;  %v1329_v5 = vadd.f32 1e-05, %v1328_v33  ;;  %766 = vmatmul.f32.gmra.mxu0 %v7581_v41  ;;  %v5701_v33 = vld [vmem:[#allocation11 + $0x78] sm:$0xff] }
 0x1e3   : > { %v1808_v34 = vmul.f32 %v6533_v47, %v1326_v55  ;;  %v1802_v63 = vmul.f32 %v6531_v52, %v1801_v13  ;;  %vm1814_vm10 = vweird.f32 %v6533_v47  ;;  %5706 = vmatpush.msrb.mxu3 %v5701_v33 }
 0x1e4   : > { %6534 = vrsqrt.f32 %v1329_v5  ;;  %1375 = vmatmul.f32.gmra.mxu1 %v1169_v62  ;;  %vm1815_vm12 = vmor %vm1813_vm11, %vm1814_vm10  ;;  %vm1823_vm14 = vweird.f32 %v1329_v5 }
 0x1e5   : > { %v1809_v26 = vmul.f32 %v6533_v47, %v1808_v34  ;;  %v1806_v15 = vsel %vm1805_vm9, %v6531_v52, %v1802_v63 }
 0x1e6   : > { %v2960_v14 = vmul.f32 %v1806_v15, %v7409_v57 }
 0x1e7   : > { %v1810_v54 = vmul.f32 0.5, %v1809_v26  ;;  %v722_v23 = vpop.f32.mrf.mxu0 }
 0x1e8   : > { %v7594_v19 = vsub.f32 %v7433_v37, %v722_v23  ;;  %3168 = vmatmul.f32.gmra.mxu2 %v2960_v14  ;;  %3569 = vmatmul.f32.gmra.mxu3 %v2960_v14 }
 0x1e9   : > { %v1331_v16 = vpop.f32.mrf.mxu1  ;;  %v1811_v9 = vsub.f32 1.5, %v1810_v54 }
 0x1ea   : > { %v6535_v52 = vpop.eup %6534  ;;  %v1170_v57 = vmul.f32 %v7594_v19, %v7594_v19  ;;  %v1332_v42 = vadd.f32 1e-05, %v1331_v16  ;;  %769 = vmatmul.f32.gmra.mxu0 %v7591_v48 }
 0x1eb   : > { %v1818_v18 = vmul.f32 %v6535_v52, %v1329_v5  ;;  %v1812_v39 = vmul.f32 %v6533_v47, %v1811_v9  ;;  %vm1824_vm13 = vweird.f32 %v6535_v52 }
 0x1ec   : > { %6536 = vrsqrt.f32 %v1332_v42  ;;  %1378 = vmatmul.f32.gmra.mxu1 %v1170_v57  ;;  %vm1825_vm15 = vmor %vm1823_vm14, %vm1824_vm13  ;;  %vm1833_vm1 = vweird.f32 %v1332_v42 }
 0x1ed   : > { %v1819_v37 = vmul.f32 %v6535_v52, %v1818_v18  ;;  %v1816_v11 = vsel %vm1815_vm12, %v6533_v47, %v1812_v39 }
 0x1ee   : > { %v2961_v28 = vmul.f32 %v1816_v11, %v7418_v12 }
 0x1ef   : > { %v1820_v10 = vmul.f32 0.5, %v1819_v37  ;;  %v725_v24 = vpop.f32.mrf.mxu0 }
 0x1f0   : > { %v7604_v13 = vsub.f32 %v7442_v53, %v725_v24  ;;  %3171 = vmatmul.f32.gmra.mxu2 %v2961_v28  ;;  %3572 = vmatmul.f32.gmra.mxu3 %v2961_v28  ;;  %v7621_v28 = vld [vmem:[%s7234_s24 + $0x198] sm:$0xff] }
 0x1f1   : > { %v1334_v62 = vpop.f32.mrf.mxu1  ;;  %v1821_v34 = vsub.f32 1.5, %v1820_v10 }
 0x1f2   : > { %v6537_v55 = vpop.eup %6536  ;;  %v1171_v47 = vmul.f32 %v7604_v13, %v7604_v13  ;;  %v1335_v12 = vadd.f32 1e-05, %v1334_v62  ;;  %772 = vmatmul.f32.gmra.mxu0 %v7601_v32 }
 0x1f3   : > { %v1828_v63 = vmul.f32 %v6537_v55, %v1332_v42  ;;  %v1822_v26 = vmul.f32 %v6535_v52, %v1821_v34  ;;  %vm1834_vm0 = vweird.f32 %v6537_v55 }
 0x1f4   : > { %6538 = vrsqrt.f32 %v1335_v12  ;;  %1381 = vmatmul.f32.gmra.mxu1 %v1171_v47  ;;  %vm1835_vm2 = vmor %vm1833_vm1, %vm1834_vm0  ;;  %vm1843_vm4 = vweird.f32 %v1335_v12 }
 0x1f5   : > { %v1829_v53 = vmul.f32 %v6537_v55, %v1828_v63  ;;  %v1826_v15 = vsel %vm1825_vm15, %v6535_v52, %v1822_v26 }
 0x1f6   : > { %v2962_v14 = vmul.f32 %v1826_v15, %v7427_v27 }
 0x1f7   : > { %v1830_v54 = vmul.f32 0.5, %v1829_v53  ;;  %v728_v23 = vpop.f32.mrf.mxu0 }
 0x1f8   : > { %v7614_v4 = vsub.f32 %v7451_v7, %v728_v23  ;;  %3174 = vmatmul.f32.gmra.mxu2 %v2962_v14  ;;  %3575 = vmatmul.f32.gmra.mxu3 %v2962_v14 }
 0x1f9   : > { %v1337_v17 = vpop.f32.mrf.mxu1  ;;  %v1831_v16 = vsub.f32 1.5, %v1830_v54  ;;  %v7635_v54 = vld [vmem:[%s7234_s24 + $0x1a0] sm:$0xff] }
 0x1fa   : > { %v6539_v5 = vpop.eup %6538  ;;  %v1172_v9 = vmul.f32 %v7614_v4, %v7614_v4  ;;  %v1338_v52 = vadd.f32 1e-05, %v1337_v17  ;;  %775 = vmatmul.f32.gmra.mxu0 %v7611_v6 }
 0x1fb   : > { %v1838_v27 = vmul.f32 %v6539_v5, %v1335_v12  ;;  %v1832_v57 = vmul.f32 %v6537_v55, %v1831_v16  ;;  %vm1844_vm3 = vweird.f32 %v6539_v5 }
 0x1fc   : > { %6540 = vrsqrt.f32 %v1338_v52  ;;  %1384 = vmatmul.f32.gmra.mxu1 %v1172_v9  ;;  %vm1845_vm5 = vmor %vm1843_vm4, %vm1844_vm3  ;;  %vm1853_vm7 = vweird.f32 %v1338_v52 }
 0x1fd   : > { %v1839_v7 = vmul.f32 %v6539_v5, %v1838_v27  ;;  %v1836_v18 = vsel %vm1835_vm2, %v6537_v55, %v1832_v57 }
 0x1fe   : > { %v2963_v39 = vmul.f32 %v1836_v18, %v7436_v46 }
 0x1ff   : > { %v1840_v37 = vmul.f32 0.5, %v1839_v7  ;;  %v731_v11 = vpop.f32.mrf.mxu0 }
 0x200   : > { %v7624_v10 = vsub.f32 %v7461_v31, %v731_v11  ;;  %3177 = vmatmul.f32.gmra.mxu2 %v2963_v39  ;;  %3578 = vmatmul.f32.gmra.mxu3 %v2963_v39 }
 0x201   : > { %v1340_v24 = vpop.f32.mrf.mxu1  ;;  %v1841_v33 = vsub.f32 1.5, %v1840_v37 }
 0x202   : > { %v6541_v42 = vpop.eup %6540  ;;  %v1173_v62 = vmul.f32 %v7624_v10, %v7624_v10  ;;  %v1341_v34 = vadd.f32 1e-05, %v1340_v24  ;;  %778 = vmatmul.f32.gmra.mxu0 %v7621_v28  ;;  %v7649_v24 = vld [vmem:[%s7234_s24 + $0x1a8] sm:$0xff] }
 0x203   : > { %v1848_v46 = vmul.f32 %v6541_v42, %v1338_v52  ;;  %v7629_v55 = vpop.f32.mrf.mxu2  ;;  %v7631_v47 = vpop.f32.mrf.mxu3  ;;  %v1842_v31 = vmul.f32 %v6539_v5, %v1841_v33  ;;  %vm1854_vm6 = vweird.f32 %v6541_v42 }
 0x204   : > { %10649 = vst [vmem:[#allocation19_spill] sm:$0xff] %v7631_v47  ;;  %6542 = vrsqrt.f32 %v1341_v34  ;;  %1387 = vmatmul.f32.gmra.mxu1 %v1173_v62  ;;  %vm1855_vm8 = vmor %vm1853_vm7, %vm1854_vm6  ;;  %vm1863_vm10 = vweird.f32 %v1341_v34 }
 0x205   : > { %v1849_v63 = vmul.f32 %v6541_v42, %v1848_v46  ;;  %v1846_v26 = vsel %vm1845_vm5, %v6539_v5, %v1842_v31 }
 0x206   : > { %v2964_v53 = vmul.f32 %v1846_v26, %v7445_v58 }
 0x207   : > { %v1850_v15 = vmul.f32 0.5, %v1849_v63  ;;  %v734_v14 = vpop.f32.mrf.mxu0 }
 0x208   : > { %v7638_v23 = vsub.f32 %v7471_v0, %v734_v14  ;;  %3180 = vmatmul.f32.gmra.mxu2 %v2964_v53  ;;  %3581 = vmatmul.f32.gmra.mxu3 %v2964_v53 }
 0x209   : > { %v1343_v17 = vpop.f32.mrf.mxu1  ;;  %v1851_v16 = vsub.f32 1.5, %v1850_v15 }
 0x20a   : > { %v6543_v12 = vpop.eup %6542  ;;  %v1174_v9 = vmul.f32 %v7638_v23, %v7638_v23  ;;  %v1344_v5 = vadd.f32 1e-05, %v1343_v17  ;;  %781 = vmatmul.f32.gmra.mxu0 %v7635_v54 }
 0x20b   : > { %v1858_v58 = vmul.f32 %v6543_v12, %v1341_v34  ;;  %v7643_v27 = vpop.f32.mrf.mxu2  ;;  %v7645_v57 = vpop.f32.mrf.mxu3  ;;  %v1852_v0 = vmul.f32 %v6541_v42, %v1851_v16  ;;  %vm1864_vm9 = vweird.f32 %v6543_v12 }
 0x20c   : > { %10650 = vst [vmem:[#allocation20_spill] sm:$0xff] %v7645_v57  ;;  %6544 = vrsqrt.f32 %v1344_v5  ;;  %1390 = vmatmul.f32.gmra.mxu1 %v1174_v9  ;;  %vm1865_vm11 = vmor %vm1863_vm10, %vm1864_vm9  ;;  %v7663_v9 = vld [vmem:[%s7234_s24 + $0x1b0] sm:$0xff]  ;;  %vm1873_vm13 = vweird.f32 %v1344_v5 }
 0x20d   : > { %v1859_v7 = vmul.f32 %v6543_v12, %v1858_v58  ;;  %v1856_v18 = vsel %vm1855_vm8, %v6541_v42, %v1852_v0 }
 0x20e   : > { %v2965_v39 = vmul.f32 %v1856_v18, %v7454_v8 }
 0x20f   : > { %v1860_v37 = vmul.f32 0.5, %v1859_v7  ;;  %v737_v11 = vpop.f32.mrf.mxu0 }
 0x210   : > { %v7652_v33 = vsub.f32 %v7481_v43, %v737_v11  ;;  %3183 = vmatmul.f32.gmra.mxu2 %v2965_v39  ;;  %3584 = vmatmul.f32.gmra.mxu3 %v2965_v39 }
 0x211   : > { %v1346_v62 = vpop.f32.mrf.mxu1  ;;  %v1861_v46 = vsub.f32 1.5, %v1860_v37 }
 0x212   : > { %v6545_v52 = vpop.eup %6544  ;;  %v1175_v31 = vmul.f32 %v7652_v33, %v7652_v33  ;;  %v1347_v42 = vadd.f32 1e-05, %v1346_v62  ;;  %784 = vmatmul.f32.gmra.mxu0 %v7649_v24 }
 0x213   : > { %v1868_v8 = vmul.f32 %v6545_v52, %v1344_v5  ;;  %v7657_v63 = vpop.f32.mrf.mxu2  ;;  %v7659_v26 = vpop.f32.mrf.mxu3  ;;  %v1862_v43 = vmul.f32 %v6543_v12, %v1861_v46  ;;  %vm1874_vm12 = vweird.f32 %v6545_v52 }
 0x214   : > { %10651 = vst [vmem:[#allocation21_spill] sm:$0xff] %v7659_v26  ;;  %6546 = vrsqrt.f32 %v1347_v42  ;;  %1393 = vmatmul.f32.gmra.mxu1 %v1175_v31  ;;  %vm1875_vm14 = vmor %vm1873_vm13, %vm1874_vm12  ;;  %vm1883_vm0 = vweird.f32 %v1347_v42 }
 0x215   : > { %v1869_v53 = vmul.f32 %v6545_v52, %v1868_v8  ;;  %v1866_v15 = vsel %vm1865_vm11, %v6543_v12, %v1862_v43  ;;  %v7680_v43 = vld [vmem:[%s7234_s24 + $0x1b8] sm:$0xff] }
 0x216   : > { %v2966_v14 = vmul.f32 %v1866_v15, %v7464_v38 }
 0x217   : > { %v1870_v17 = vmul.f32 0.5, %v1869_v53  ;;  %v740_v16 = vpop.f32.mrf.mxu0 }
 0x218   : > { %v7666_v58 = vsub.f32 %v7491_v50, %v740_v16  ;;  %3186 = vmatmul.f32.gmra.mxu2 %v2966_v14  ;;  %3587 = vmatmul.f32.gmra.mxu3 %v2966_v14 }
 0x219   : > { %v1349_v0 = vpop.f32.mrf.mxu1  ;;  %v1871_v7 = vsub.f32 1.5, %v1870_v17 }
 0x21a   : > { %v6547_v34 = vpop.eup %6546  ;;  %v1176_v18 = vmul.f32 %v7666_v58, %v7666_v58  ;;  %v7670_v12 = vadd.f32 1e-05, %v1349_v0  ;;  %787 = vmatmul.f32.gmra.mxu0 %v7663_v9 }
 0x21b   : > { %v1878_v38 = vmul.f32 %v6547_v34, %v1347_v42  ;;  %v7673_v39 = vpop.f32.mrf.mxu2  ;;  %v7675_v37 = vpop.f32.mrf.mxu3  ;;  %v1872_v50 = vmul.f32 %v6545_v52, %v1871_v7  ;;  %vm1884_vm15 = vweird.f32 %v6547_v34  ;;  %v4181_v42 = vld [vmem:[#allocation8 + $0x50] sm:$0xff] }
 0x21c   : > { %10652 = vst [vmem:[#allocation22_spill] sm:$0xff] %v7675_v37  ;;  %6548 = vrsqrt.f32 %v7670_v12  ;;  %1396 = vmatmul.f32.gmra.mxu1 %v1176_v18  ;;  %vm1885_vm1 = vmor %vm1883_vm0, %vm1884_vm15  ;;  %vm1893_vm3 = vweird.f32 %v7670_v12  ;;  %4212 = vmatpush.msrb.mxu0 %v4181_v42  ;;  %v5700_v42 = vld [vmem:[#allocation11 + $0x70] sm:$0xff] }
 0x21d   : > { %v1879_v11 = vmul.f32 %v6547_v34, %v1878_v38  ;;  %v1876_v62 = vsel %vm1875_vm14, %v6545_v52, %v1872_v50  ;;  %5707 = vmatpush.msrb.mxu3 %v5700_v42 }
 0x21e   : > { %v2967_v46 = vmul.f32 %v1876_v62, %v7474_v3  ;;  %v7698_v62 = vld [vmem:[%s7234_s24 + $0x1c0] sm:$0xff] }
 0x21f   : > { %v1880_v31 = vmul.f32 0.5, %v1879_v11  ;;  %v743_v8 = vpop.f32.mrf.mxu0 }
 0x220   : > { %v7683_v53 = vsub.f32 %v7501_v20, %v743_v8  ;;  %3189 = vmatmul.f32.gmra.mxu2 %v2967_v46  ;;  %3590 = vmatmul.f32.gmra.mxu3 %v2967_v46 }
 0x221   : > { %v1352_v15 = vpop.f32.mrf.mxu1  ;;  %v1881_v14 = vsub.f32 1.5, %v1880_v31 }
 0x222   : > { %v6549_v5 = vpop.eup %6548  ;;  %v1177_v17 = vmul.f32 %v7683_v53, %v7683_v53  ;;  %v7687_v52 = vadd.f32 1e-05, %v1352_v15  ;;  %790 = vmatmul.f32.gmra.mxu0 %v7680_v43  ;;  %v4197_v15 = vld [vmem:[#allocation8 + $0xd0] sm:$0xff] }
 0x223   : > { %v1888_v3 = vmul.f32 %v6549_v5, %v7670_v12  ;;  %v7691_v16 = vpop.f32.mrf.mxu2  ;;  %v7693_v20 = vpop.f32.mrf.mxu3  ;;  %v1882_v0 = vmul.f32 %v6547_v34, %v1881_v14  ;;  %vm1894_vm2 = vweird.f32 %v6549_v5  ;;  %v5149_v14 = vld [vmem:[#allocation10 + $0x60] sm:$0xff]  ;;  %4613 = vmatpush.msrb.mxu1 %v4197_v15  ;;  %v7715_v15 = vld [vmem:[%s7234_s24 + $0x1c8] sm:$0xff] }
 0x224   : > { %10653 = vst [vmem:[#allocation23_spill] sm:$0xff] %v7693_v20  ;;  %6550 = vrsqrt.f32 %v7687_v52  ;;  %1399 = vmatmul.f32.gmra.mxu1 %v1177_v17  ;;  %5160 = vmatpush.msrb.mxu2 %v5149_v14  ;;  %vm1895_vm4 = vmor %vm1893_vm3, %vm1894_vm2  ;;  %vm1903_vm6 = vweird.f32 %v7687_v52 }
 0x225   : > { %v1889_v7 = vmul.f32 %v6549_v5, %v1888_v3  ;;  %v1886_v18 = vsel %vm1885_vm1, %v6547_v34, %v1882_v0 }
 0x226   : > { %v2968_v38 = vmul.f32 %v1886_v18, %v7484_v30 }
 0x227   : > { %v1890_v50 = vmul.f32 0.5, %v1889_v7  ;;  %v746_v11 = vpop.f32.mrf.mxu0 }
 0x228   : > { %v7701_v46 = vsub.f32 %v7511_v45, %v746_v11  ;;  %3192 = vmatmul.f32.gmra.mxu2 %v2968_v38  ;;  %3593 = vmatmul.f32.gmra.mxu3 %v2968_v38 }
 0x229   : > { %v1355_v31 = vpop.f32.mrf.mxu1  ;;  %v1891_v8 = vsub.f32 1.5, %v1890_v50 }
 0x22a   : > { %v6551_v17 = vpop.eup %6550  ;;  %v1178_v34 = vmul.f32 %v7701_v46, %v7701_v46  ;;  %v1356_v30 = vadd.f32 1e-05, %v1355_v31  ;;  %793 = vmatmul.f32.gmra.mxu0 %v7698_v62 }
 0x22b   : > { %v1898_v45 = vmul.f32 %v6551_v17, %v7687_v52  ;;  %v7707_v3 = vpop.f32.mrf.mxu2  ;;  %v7709_v0 = vpop.f32.mrf.mxu3  ;;  %v1892_v7 = vmul.f32 %v6549_v5, %v1891_v8  ;;  %vm1904_vm5 = vweird.f32 %v6551_v17 }
 0x22c   : > { %10654 = vst [vmem:[#allocation24_spill] sm:$0xff] %v7709_v0  ;;  %6552 = vrsqrt.f32 %v1356_v30  ;;  %1402 = vmatmul.f32.gmra.mxu1 %v1178_v34  ;;  %vm1905_vm7 = vmor %vm1903_vm6, %vm1904_vm5  ;;  %vm1913_vm9 = vweird.f32 %v1356_v30  ;;  %v7744_v0 = vld [vmem:[%s7234_s24 + $0x1d8] sm:$0xff] }
 0x22d   : > { %v1899_v18 = vmul.f32 %v6551_v17, %v1898_v45  ;;  %v1896_v38 = vsel %vm1895_vm4, %v6549_v5, %v1892_v7 }
 0x22e   : > { %v2969_v50 = vmul.f32 %v1896_v38, %v7494_v35 }
 0x22f   : > { %v1900_v11 = vmul.f32 0.5, %v1899_v18  ;;  %v749_v31 = vpop.f32.mrf.mxu0 }
 0x230   : > { %v7718_v20 = vsub.f32 %v7521_v51, %v749_v31  ;;  %3195 = vmatmul.f32.gmra.mxu2 %v2969_v50  ;;  %3596 = vmatmul.f32.gmra.mxu3 %v2969_v50 }
 0x231   : > { %v1358_v12 = vpop.f32.mrf.mxu1  ;;  %v1901_v8 = vsub.f32 1.5, %v1900_v11 }
 0x232   : > { %v6553_v14 = vpop.eup %6552  ;;  %v1179_v34 = vmul.f32 %v7718_v20, %v7718_v20  ;;  %v1359_v5 = vadd.f32 1e-05, %v1358_v12  ;;  %796 = vmatmul.f32.gmra.mxu0 %v7715_v15  ;;  %v7730_v12 = vld [vmem:[%s7234_s24 + $0x1d0] sm:$0xff] }
 0x233   : > { %v1908_v35 = vmul.f32 %v6553_v14, %v1356_v30  ;;  %v7723_v45 = vpop.f32.mrf.mxu2  ;;  %v7725_v51 = vpop.f32.mrf.mxu3  ;;  %v1902_v7 = vmul.f32 %v6551_v17, %v1901_v8  ;;  %vm1914_vm8 = vweird.f32 %v6553_v14 }
 0x234   : > { %10655 = vst [vmem:[#allocation25_spill] sm:$0xff] %v7725_v51  ;;  %6554 = vrsqrt.f32 %v1359_v5  ;;  %1405 = vmatmul.f32.gmra.mxu1 %v1179_v34  ;;  %vm1915_vm10 = vmor %vm1913_vm9, %vm1914_vm8  ;;  %vm1923_vm12 = vweird.f32 %v1359_v5 }
 0x235   : > { %v1909_v18 = vmul.f32 %v6553_v14, %v1908_v35  ;;  %v1906_v38 = vsel %vm1905_vm7, %v6551_v17, %v1902_v7 }
 0x236   : > { %v2970_v50 = vmul.f32 %v1906_v38, %v7504_v21 }
 0x237   : > { %v1910_v11 = vmul.f32 0.5, %v1909_v18  ;;  %v752_v31 = vpop.f32.mrf.mxu0 }
 0x238   : > { %v7733_v42 = vsub.f32 %v7531_v36, %v752_v31  ;;  %3198 = vmatmul.f32.gmra.mxu2 %v2970_v50  ;;  %3599 = vmatmul.f32.gmra.mxu3 %v2970_v50 }
 0x239   : > { %v1911_v51 = vsub.f32 1.5, %v1910_v11  ;;  %v1361_v8 = vpop.f32.mrf.mxu1 }
 0x23a   : > { %v6555_v52 = vpop.eup %6554  ;;  %v1180_v34 = vmul.f32 %v7733_v42, %v7733_v42  ;;  %v1362_v17 = vadd.f32 1e-05, %v1361_v8  ;;  %799 = vmatmul.f32.gmra.mxu0 %v7730_v12 }
 0x23b   : > { %v1918_v21 = vmul.f32 %v6555_v52, %v1359_v5  ;;  %v7738_v35 = vpop.f32.mrf.mxu2  ;;  %v7740_v7 = vpop.f32.mrf.mxu3  ;;  %v1912_v36 = vmul.f32 %v6553_v14, %v1911_v51  ;;  %vm1924_vm11 = vweird.f32 %v6555_v52 }
 0x23c   : > { %10656 = vst [vmem:[#allocation26_spill] sm:$0xff] %v7740_v7  ;;  %6556 = vrsqrt.f32 %v1362_v17  ;;  %1408 = vmatmul.f32.gmra.mxu1 %v1180_v34  ;;  %vm1925_vm13 = vmor %vm1923_vm12, %vm1924_vm11  ;;  %v7758_v7 = vld [vmem:[%s7234_s24 + $0x1e0] sm:$0xff]  ;;  %vm1933_vm15 = vweird.f32 %v1362_v17 }
 0x23d   : > { %v1919_v18 = vmul.f32 %v6555_v52, %v1918_v21  ;;  %v1916_v38 = vsel %vm1915_vm10, %v6553_v14, %v1912_v36 }
 0x23e   : > { %v2971_v50 = vmul.f32 %v1916_v38, %v7514_v61 }
 0x23f   : > { %v1920_v11 = vmul.f32 0.5, %v1919_v18  ;;  %v755_v31 = vpop.f32.mrf.mxu0 }
 0x240   : > { %v7747_v8 = vsub.f32 %v7541_v59, %v755_v31  ;;  %3201 = vmatmul.f32.gmra.mxu2 %v2971_v50  ;;  %3602 = vmatmul.f32.gmra.mxu3 %v2971_v50 }
 0x241   : > { %v1921_v30 = vsub.f32 1.5, %v1920_v11  ;;  %v1364_v37 = vpop.f32.mrf.mxu1 }
 0x242   : > { %v6557_v51 = vpop.eup %6556  ;;  %v1181_v34 = vmul.f32 %v7747_v8, %v7747_v8  ;;  %v1365_v14 = vadd.f32 1e-05, %v1364_v37  ;;  %802 = vmatmul.f32.gmra.mxu0 %v7744_v0 }
 0x243   : > { %v1928_v61 = vmul.f32 %v6557_v51, %v1362_v17  ;;  %v7752_v21 = vpop.f32.mrf.mxu2  ;;  %v7754_v36 = vpop.f32.mrf.mxu3  ;;  %v1922_v59 = vmul.f32 %v6555_v52, %v1921_v30  ;;  %vm1934_vm14 = vweird.f32 %v6557_v51 }
 0x244   : > { %10657 = vst [vmem:[#allocation27_spill] sm:$0xff] %v7754_v36  ;;  %6558 = vrsqrt.f32 %v1365_v14  ;;  %1411 = vmatmul.f32.gmra.mxu1 %v1181_v34  ;;  %vm1935_vm0 = vmor %vm1933_vm15, %vm1934_vm14  ;;  %v7772_v36 = vld [vmem:[%s7234_s24 + $0x1e8] sm:$0xff]  ;;  %vm1943_vm2 = vweird.f32 %v1365_v14 }
 0x245   : > { %v1929_v18 = vmul.f32 %v6557_v51, %v1928_v61  ;;  %v1926_v38 = vsel %vm1925_vm13, %v6555_v52, %v1922_v59 }
 0x246   : > { %v2972_v50 = vmul.f32 %v1926_v38, %v7524_v22 }
 0x247   : > { %v1930_v11 = vmul.f32 0.5, %v1929_v18  ;;  %v758_v31 = vpop.f32.mrf.mxu0 }
 0x248   : > { %v7761_v37 = vsub.f32 %v7551_v1, %v758_v31  ;;  %3204 = vmatmul.f32.gmra.mxu2 %v2972_v50  ;;  %3605 = vmatmul.f32.gmra.mxu3 %v2972_v50 }
 0x249   : > { %v1931_v5 = vsub.f32 1.5, %v1930_v11  ;;  %v1367_v26 = vpop.f32.mrf.mxu1 }
 0x24a   : > { %v6559_v30 = vpop.eup %6558  ;;  %v1182_v34 = vmul.f32 %v7761_v37, %v7761_v37  ;;  %v1368_v52 = vadd.f32 1e-05, %v1367_v26  ;;  %805 = vmatmul.f32.gmra.mxu0 %v7758_v7 }
 0x24b   : > { %v1938_v22 = vmul.f32 %v6559_v30, %v1365_v14  ;;  %v7766_v61 = vpop.f32.mrf.mxu2  ;;  %v7768_v59 = vpop.f32.mrf.mxu3  ;;  %v1932_v1 = vmul.f32 %v6557_v51, %v1931_v5  ;;  %vm1944_vm1 = vweird.f32 %v6559_v30 }
 0x24c   : > { %10658 = vst [vmem:[#allocation28_spill] sm:$0xff] %v7768_v59  ;;  %6560 = vrsqrt.f32 %v1368_v52  ;;  %1414 = vmatmul.f32.gmra.mxu1 %v1182_v34  ;;  %vm1945_vm3 = vmor %vm1943_vm2, %vm1944_vm1  ;;  %v7786_v59 = vld [vmem:[%s7234_s24 + $0x1f0] sm:$0xff]  ;;  %vm1953_vm5 = vweird.f32 %v1368_v52 }
 0x24d   : > { %v1939_v18 = vmul.f32 %v6559_v30, %v1938_v22  ;;  %v1936_v38 = vsel %vm1935_vm0, %v6557_v51, %v1932_v1 }
 0x24e   : > { %v2973_v50 = vmul.f32 %v1936_v38, %v7534_v49 }
 0x24f   : > { %v1940_v11 = vmul.f32 0.5, %v1939_v18  ;;  %v761_v31 = vpop.f32.mrf.mxu0 }
 0x250   : > { %v7775_v26 = vsub.f32 %v7561_v56, %v761_v31  ;;  %3207 = vmatmul.f32.gmra.mxu2 %v2973_v50  ;;  %3608 = vmatmul.f32.gmra.mxu3 %v2973_v50 }
 0x251   : > { %v1941_v17 = vsub.f32 1.5, %v1940_v11  ;;  %v1370_v57 = vpop.f32.mrf.mxu1 }
 0x252   : > { %v6561_v5 = vpop.eup %6560  ;;  %v1183_v34 = vmul.f32 %v7775_v26, %v7775_v26  ;;  %v1371_v51 = vadd.f32 1e-05, %v1370_v57  ;;  %808 = vmatmul.f32.gmra.mxu0 %v7772_v36 }
 0x253   : > { %v1948_v49 = vmul.f32 %v6561_v5, %v1368_v52  ;;  %v7780_v22 = vpop.f32.mrf.mxu2  ;;  %v7782_v1 = vpop.f32.mrf.mxu3  ;;  %v1942_v56 = vmul.f32 %v6559_v30, %v1941_v17  ;;  %vm1954_vm4 = vweird.f32 %v6561_v5 }
 0x254   : > { %10659 = vst [vmem:[#allocation29_spill] sm:$0xff] %v7780_v22  ;;  %6562 = vrsqrt.f32 %v1371_v51  ;;  %1417 = vmatmul.f32.gmra.mxu1 %v1183_v34  ;;  %vm1955_vm6 = vmor %vm1953_vm5, %vm1954_vm4  ;;  %vm1963_vm8 = vweird.f32 %v1371_v51 }
 0x255   : > { %10660 = vst [vmem:[#allocation30_spill] sm:$0xff] %v7782_v1  ;;  %v1949_v18 = vmul.f32 %v6561_v5, %v1948_v49  ;;  %v1946_v38 = vsel %vm1945_vm3, %v6559_v30, %v1942_v56 }
 0x256   : > { %v2974_v50 = vmul.f32 %v1946_v38, %v7544_v40 }
 0x257   : > { %v1950_v11 = vmul.f32 0.5, %v1949_v18  ;;  %v764_v31 = vpop.f32.mrf.mxu0 }
 0x258   : > { %v7789_v57 = vsub.f32 %v7571_v25, %v764_v31  ;;  %3210 = vmatmul.f32.gmra.mxu2 %v2974_v50  ;;  %3611 = vmatmul.f32.gmra.mxu3 %v2974_v50  ;;  %v7803_v31 = vld [vmem:[%s7234_s24 + $0x1f8] sm:$0xff] }
 0x259   : > { %v1951_v14 = vsub.f32 1.5, %v1950_v11  ;;  %v1373_v47 = vpop.f32.mrf.mxu1 }
 0x25a   : > { %v6563_v17 = vpop.eup %6562  ;;  %v1184_v34 = vmul.f32 %v7789_v57, %v7789_v57  ;;  %v7793_v30 = vadd.f32 1e-05, %v1373_v47  ;;  %811 = vmatmul.f32.gmra.mxu0 %v7786_v59 }
 0x25b   : > { %v1958_v40 = vmul.f32 %v6563_v17, %v1371_v51  ;;  %v7796_v49 = vpop.f32.mrf.mxu2  ;;  %v7798_v25 = vpop.f32.mrf.mxu3  ;;  %v1952_v56 = vmul.f32 %v6561_v5, %v1951_v14  ;;  %vm1964_vm7 = vweird.f32 %v6563_v17 }
 0x25c   : > { %10661 = vst [vmem:[#allocation31_spill] sm:$0xff] %v7796_v49  ;;  %6564 = vrsqrt.f32 %v7793_v30  ;;  %1420 = vmatmul.f32.gmra.mxu1 %v1184_v34  ;;  %vm1965_vm9 = vmor %vm1963_vm8, %vm1964_vm7  ;;  %v4196_v49 = vld [vmem:[#allocation8 + $0xc8] sm:$0xff]  ;;  %vm1973_vm11 = vweird.f32 %v7793_v30 }
 0x25d   : > { %10662 = vst [vmem:[#allocation32_spill] sm:$0xff] %v7798_v25  ;;  %v1959_v18 = vmul.f32 %v6563_v17, %v1958_v40  ;;  %v1956_v38 = vsel %vm1955_vm6, %v6561_v5, %v1952_v56  ;;  %4614 = vmatpush.msrb.mxu1 %v4196_v49 }
 0x25e   : > { %v2975_v50 = vmul.f32 %v1956_v38, %v7554_v44 }
 0x25f   : > { %v1960_v11 = vmul.f32 0.5, %v1959_v18  ;;  %v767_v47 = vpop.f32.mrf.mxu0 }
 0x260   : > { %v7806_v52 = vsub.f32 %v7581_v41, %v767_v47  ;;  %3213 = vmatmul.f32.gmra.mxu2 %v2975_v50  ;;  %3614 = vmatmul.f32.gmra.mxu3 %v2975_v50  ;;  %v7821_v47 = vld [vmem:[%s7234_s24 + $0x200] sm:$0xff] }
 0x261   : > { %v1961_v1 = vsub.f32 1.5, %v1960_v11  ;;  %v1376_v25 = vpop.f32.mrf.mxu1 }
 0x262   : > { %v6565_v14 = vpop.eup %6564  ;;  %v1185_v34 = vmul.f32 %v7806_v52, %v7806_v52  ;;  %v7810_v5 = vadd.f32 1e-05, %v1376_v25  ;;  %814 = vmatmul.f32.gmra.mxu0 %v7803_v31 }
 0x263   : > { %v1968_v44 = vmul.f32 %v6565_v14, %v7793_v30  ;;  %v7814_v40 = vpop.f32.mrf.mxu2  ;;  %v7816_v41 = vpop.f32.mrf.mxu3  ;;  %v1962_v56 = vmul.f32 %v6563_v17, %v1961_v1  ;;  %vm1974_vm10 = vweird.f32 %v6565_v14  ;;  %v4180_v1 = vld [vmem:[#allocation8 + $0x48] sm:$0xff] }
 0x264   : > { %10663 = vst [vmem:[#allocation33_spill] sm:$0xff] %v7814_v40  ;;  %6566 = vrsqrt.f32 %v7810_v5  ;;  %1423 = vmatmul.f32.gmra.mxu1 %v1185_v34  ;;  %v5148_v34 = vld [vmem:[#allocation10 + $0x58] sm:$0xff]  ;;  %4213 = vmatpush.msrb.mxu0 %v4180_v1  ;;  %vm1975_vm12 = vmor %vm1973_vm11, %vm1974_vm10  ;;  %v7838_v30 = vld [vmem:[%s7234_s24 + $0x208] sm:$0xff]  ;;  %vm1983_vm14 = vweird.f32 %v7810_v5 }
 0x265   : > { %10664 = vst [vmem:[#allocation34_spill] sm:$0xff] %v7816_v41  ;;  %v1969_v18 = vmul.f32 %v6565_v14, %v1968_v44  ;;  %v1966_v38 = vsel %vm1965_vm9, %v6563_v17, %v1962_v56  ;;  %5161 = vmatpush.msrb.mxu2 %v5148_v34  ;;  %v5699_v34 = vld [vmem:[#allocation11 + $0x68] sm:$0xff] }
 0x266   : > { %v2976_v50 = vmul.f32 %v1966_v38, %v7564_v29  ;;  %5708 = vmatpush.msrb.mxu3 %v5699_v34 }
 0x267   : > { %v1970_v25 = vmul.f32 0.5, %v1969_v18  ;;  %v770_v11 = vpop.f32.mrf.mxu0 }
 0x268   : > { %v7824_v51 = vsub.f32 %v7591_v48, %v770_v11  ;;  %3216 = vmatmul.f32.gmra.mxu2 %v2976_v50  ;;  %3617 = vmatmul.f32.gmra.mxu3 %v2976_v50 }
 0x269   : > { %v1971_v40 = vsub.f32 1.5, %v1970_v25  ;;  %v1379_v41 = vpop.f32.mrf.mxu1 }
 0x26a   : > { %v6567_v22 = vpop.eup %6566  ;;  %v1186_v17 = vmul.f32 %v7824_v51, %v7824_v51  ;;  %v1380_v29 = vadd.f32 1e-05, %v1379_v41  ;;  %817 = vmatmul.f32.gmra.mxu0 %v7821_v47 }
 0x26b   : > { %v1978_v48 = vmul.f32 %v6567_v22, %v7810_v5  ;;  %v7831_v44 = vpop.f32.mrf.mxu2  ;;  %v7833_v56 = vpop.f32.mrf.mxu3  ;;  %v1972_v18 = vmul.f32 %v6565_v14, %v1971_v40  ;;  %vm1984_vm13 = vweird.f32 %v6567_v22 }
 0x26c   : > { %10665 = vst [vmem:[#allocation35_spill] sm:$0xff] %v7831_v44  ;;  %6568 = vrsqrt.f32 %v1380_v29  ;;  %1426 = vmatmul.f32.gmra.mxu1 %v1186_v17  ;;  %vm1985_vm15 = vmor %vm1983_vm14, %vm1984_vm13  ;;  %vm1993_vm1 = vweird.f32 %v1380_v29 }
 0x26d   : > { %10666 = vst [vmem:[#allocation36_spill] sm:$0xff] %v7833_v56  ;;  %v1979_v41 = vmul.f32 %v6567_v22, %v1978_v48  ;;  %v1976_v38 = vsel %vm1975_vm12, %v6565_v14, %v1972_v18  ;;  %v7853_v56 = vld [vmem:[%s7234_s24 + $0x210] sm:$0xff] }
 0x26e   : > { %v2977_v49 = vmul.f32 %v1976_v38, %v7574_v60 }
 0x26f   : > { %v1980_v50 = vmul.f32 0.5, %v1979_v41  ;;  %v773_v25 = vpop.f32.mrf.mxu0 }
 0x270   : > { %v7841_v11 = vsub.f32 %v7601_v32, %v773_v25  ;;  %3219 = vmatmul.f32.gmra.mxu2 %v2977_v49  ;;  %3620 = vmatmul.f32.gmra.mxu3 %v2977_v49 }
 0x271   : > { %v1981_v40 = vsub.f32 1.5, %v1980_v50  ;;  %v1382_v1 = vpop.f32.mrf.mxu1 }
 0x272   : > { %v6569_v17 = vpop.eup %6568  ;;  %v1187_v48 = vmul.f32 %v7841_v11, %v7841_v11  ;;  %v1383_v14 = vadd.f32 1e-05, %v1382_v1  ;;  %820 = vmatmul.f32.gmra.mxu0 %v7838_v30 }
 0x273   : > { %v1988_v60 = vmul.f32 %v6569_v17, %v1380_v29  ;;  %v7847_v32 = vpop.f32.mrf.mxu2  ;;  %v7849_v18 = vpop.f32.mrf.mxu3  ;;  %v1982_v41 = vmul.f32 %v6567_v22, %v1981_v40  ;;  %vm1994_vm0 = vweird.f32 %v6569_v17 }
 0x274   : > { %10667 = vst [vmem:[#allocation37_spill] sm:$0xff] %v7847_v32  ;;  %6570 = vrsqrt.f32 %v1383_v14  ;;  %1429 = vmatmul.f32.gmra.mxu1 %v1187_v48  ;;  %vm1995_vm2 = vmor %vm1993_vm1, %vm1994_vm0  ;;  %vm2003_vm4 = vweird.f32 %v1383_v14 }
 0x275   : > { %10668 = vst [vmem:[#allocation38_spill] sm:$0xff] %v7849_v18  ;;  %v1989_v38 = vmul.f32 %v6569_v17, %v1988_v60  ;;  %v1986_v49 = vsel %vm1985_vm15, %v6567_v22, %v1982_v41  ;;  %v7867_v18 = vld [vmem:[%s7234_s24 + $0x218] sm:$0xff] }
 0x276   : > { %v2978_v50 = vmul.f32 %v1986_v49, %v7584_v2 }
 0x277   : > { %v1990_v25 = vmul.f32 0.5, %v1989_v38  ;;  %v776_v1 = vpop.f32.mrf.mxu0 }
 0x278   : > { %v7856_v34 = vsub.f32 %v7611_v6, %v776_v1  ;;  %3222 = vmatmul.f32.gmra.mxu2 %v2978_v50  ;;  %3623 = vmatmul.f32.gmra.mxu3 %v2978_v50 }
 0x279   : > { %v1991_v5 = vsub.f32 1.5, %v1990_v25  ;;  %v1385_v32 = vpop.f32.mrf.mxu1 }
 0x27a   : > { %v6571_v40 = vpop.eup %6570  ;;  %v1188_v48 = vmul.f32 %v7856_v34, %v7856_v34  ;;  %v1386_v22 = vadd.f32 1e-05, %v1385_v32  ;;  %823 = vmatmul.f32.gmra.mxu0 %v7853_v56 }
 0x27b   : > { %v1998_v2 = vmul.f32 %v6571_v40, %v1383_v14  ;;  %v7861_v60 = vpop.f32.mrf.mxu2  ;;  %v7863_v41 = vpop.f32.mrf.mxu3  ;;  %v1992_v6 = vmul.f32 %v6569_v17, %v1991_v5  ;;  %vm2004_vm3 = vweird.f32 %v6571_v40 }
 0x27c   : > { %10669 = vst [vmem:[#allocation39_spill] sm:$0xff] %v7861_v60  ;;  %6572 = vrsqrt.f32 %v1386_v22  ;;  %1432 = vmatmul.f32.gmra.mxu1 %v1188_v48  ;;  %vm2005_vm5 = vmor %vm2003_vm4, %vm2004_vm3  ;;  %vm2013_vm7 = vweird.f32 %v1386_v22 }
 0x27d   : > { %10670 = vst [vmem:[#allocation40_spill] sm:$0xff] %v7863_v41  ;;  %v1999_v38 = vmul.f32 %v6571_v40, %v1998_v2  ;;  %v1996_v49 = vsel %vm1995_vm2, %v6569_v17, %v1992_v6  ;;  %v7881_v41 = vld [vmem:[%s7234_s24 + $0x220] sm:$0xff] }
 0x27e   : > { %v2979_v50 = vmul.f32 %v1996_v49, %v7594_v19 }
 0x27f   : > { %v2000_v25 = vmul.f32 0.5, %v1999_v38  ;;  %v779_v1 = vpop.f32.mrf.mxu0 }
 0x280   : > { %v7870_v32 = vsub.f32 %v7621_v28, %v779_v1  ;;  %3225 = vmatmul.f32.gmra.mxu2 %v2979_v50  ;;  %3626 = vmatmul.f32.gmra.mxu3 %v2979_v50 }
 0x281   : > { %v2001_v29 = vsub.f32 1.5, %v2000_v25  ;;  %v1388_v60 = vpop.f32.mrf.mxu1 }
 0x282   : > { %v6573_v5 = vpop.eup %6572  ;;  %v1189_v48 = vmul.f32 %v7870_v32, %v7870_v32  ;;  %v1389_v17 = vadd.f32 1e-05, %v1388_v60  ;;  %826 = vmatmul.f32.gmra.mxu0 %v7867_v18 }
 0x283   : > { %v2008_v19 = vmul.f32 %v6573_v5, %v1386_v22  ;;  %v7875_v2 = vpop.f32.mrf.mxu2  ;;  %v7877_v6 = vpop.f32.mrf.mxu3  ;;  %v2002_v28 = vmul.f32 %v6571_v40, %v2001_v29  ;;  %vm2014_vm6 = vweird.f32 %v6573_v5 }
 0x284   : > { %10671 = vst [vmem:[#allocation41_spill] sm:$0xff] %v7875_v2  ;;  %6574 = vrsqrt.f32 %v1389_v17  ;;  %1435 = vmatmul.f32.gmra.mxu1 %v1189_v48  ;;  %vm2015_vm8 = vmor %vm2013_vm7, %vm2014_vm6  ;;  %vm2023_vm10 = vweird.f32 %v1389_v17 }
 0x285   : > { %10672 = vst [vmem:[#allocation42_spill] sm:$0xff] %v7877_v6  ;;  %v2009_v38 = vmul.f32 %v6573_v5, %v2008_v19  ;;  %v2006_v49 = vsel %vm2005_vm5, %v6571_v40, %v2002_v28  ;;  %v7895_v6 = vld [vmem:[%s7234_s24 + $0x228] sm:$0xff] }
 0x286   : > { %v2980_v50 = vmul.f32 %v2006_v49, %v7604_v13 }
 0x287   : > { %v2010_v25 = vmul.f32 0.5, %v2009_v38  ;;  %v782_v1 = vpop.f32.mrf.mxu0 }
 0x288   : > { %v7884_v60 = vsub.f32 %v7635_v54, %v782_v1  ;;  %3228 = vmatmul.f32.gmra.mxu2 %v2980_v50  ;;  %3629 = vmatmul.f32.gmra.mxu3 %v2980_v50 }
 0x289   : > { %v2011_v14 = vsub.f32 1.5, %v2010_v25  ;;  %v1391_v2 = vpop.f32.mrf.mxu1 }
 0x28a   : > { %v6575_v29 = vpop.eup %6574  ;;  %v1190_v48 = vmul.f32 %v7884_v60, %v7884_v60  ;;  %v1392_v40 = vadd.f32 1e-05, %v1391_v2  ;;  %829 = vmatmul.f32.gmra.mxu0 %v7881_v41 }
 0x28b   : > { %v2018_v13 = vmul.f32 %v6575_v29, %v1389_v17  ;;  %v7889_v19 = vpop.f32.mrf.mxu2  ;;  %v7891_v28 = vpop.f32.mrf.mxu3  ;;  %v2012_v54 = vmul.f32 %v6573_v5, %v2011_v14  ;;  %vm2024_vm9 = vweird.f32 %v6575_v29 }
 0x28c   : > { %10673 = vst [vmem:[#allocation43_spill] sm:$0xff] %v7889_v19  ;;  %6576 = vrsqrt.f32 %v1392_v40  ;;  %1438 = vmatmul.f32.gmra.mxu1 %v1190_v48  ;;  %vm2025_vm11 = vmor %vm2023_vm10, %vm2024_vm9  ;;  %vm2033_vm13 = vweird.f32 %v1392_v40 }
 0x28d   : > { %10674 = vst [vmem:[#allocation44_spill] sm:$0xff] %v7891_v28  ;;  %v2019_v38 = vmul.f32 %v6575_v29, %v2018_v13  ;;  %v2016_v49 = vsel %vm2015_vm8, %v6573_v5, %v2012_v54  ;;  %v7909_v28 = vld [vmem:[%s7234_s24 + $0x230] sm:$0xff] }
 0x28e   : > { %v2981_v50 = vmul.f32 %v2016_v49, %v7614_v4 }
 0x28f   : > { %v2020_v25 = vmul.f32 0.5, %v2019_v38  ;;  %v785_v1 = vpop.f32.mrf.mxu0 }
 0x290   : > { %v7898_v2 = vsub.f32 %v7649_v24, %v785_v1  ;;  %3231 = vmatmul.f32.gmra.mxu2 %v2981_v50  ;;  %3632 = vmatmul.f32.gmra.mxu3 %v2981_v50 }
 0x291   : > { %v2021_v22 = vsub.f32 1.5, %v2020_v25  ;;  %v1394_v19 = vpop.f32.mrf.mxu1 }
 0x292   : > { %v6577_v14 = vpop.eup %6576  ;;  %v1191_v48 = vmul.f32 %v7898_v2, %v7898_v2  ;;  %v1395_v5 = vadd.f32 1e-05, %v1394_v19  ;;  %832 = vmatmul.f32.gmra.mxu0 %v7895_v6 }
 0x293   : > { %v2028_v4 = vmul.f32 %v6577_v14, %v1392_v40  ;;  %v7903_v13 = vpop.f32.mrf.mxu2  ;;  %v7905_v54 = vpop.f32.mrf.mxu3  ;;  %v2022_v24 = vmul.f32 %v6575_v29, %v2021_v22  ;;  %vm2034_vm12 = vweird.f32 %v6577_v14 }
 0x294   : > { %10675 = vst [vmem:[#allocation45_spill] sm:$0xff] %v7903_v13  ;;  %6578 = vrsqrt.f32 %v1395_v5  ;;  %1441 = vmatmul.f32.gmra.mxu1 %v1191_v48  ;;  %vm2035_vm14 = vmor %vm2033_vm13, %vm2034_vm12  ;;  %vm2043_vm0 = vweird.f32 %v1395_v5 }
 0x295   : > { %10676 = vst [vmem:[#allocation46_spill] sm:$0xff] %v7905_v54  ;;  %v2029_v38 = vmul.f32 %v6577_v14, %v2028_v4  ;;  %v2026_v49 = vsel %vm2025_vm11, %v6575_v29, %v2022_v24 }
 0x296   : > { %v2982_v50 = vmul.f32 %v2026_v49, %v7624_v10 }
 0x297   : > { %v2030_v25 = vmul.f32 0.5, %v2029_v38  ;;  %v788_v1 = vpop.f32.mrf.mxu0 }
 0x298   : > { %v7912_v19 = vsub.f32 %v7663_v9, %v788_v1  ;;  %3234 = vmatmul.f32.gmra.mxu2 %v2982_v50  ;;  %3635 = vmatmul.f32.gmra.mxu3 %v2982_v50  ;;  %v7926_v1 = vld [vmem:[%s7234_s24 + $0x238] sm:$0xff] }
 0x299   : > { %v2031_v17 = vsub.f32 1.5, %v2030_v25  ;;  %v1397_v13 = vpop.f32.mrf.mxu1 }
 0x29a   : > { %v6579_v22 = vpop.eup %6578  ;;  %v1192_v48 = vmul.f32 %v7912_v19, %v7912_v19  ;;  %v7916_v29 = vadd.f32 1e-05, %v1397_v13  ;;  %835 = vmatmul.f32.gmra.mxu0 %v7909_v28 }
 0x29b   : > { %v2038_v10 = vmul.f32 %v6579_v22, %v1395_v5  ;;  %v7919_v4 = vpop.f32.mrf.mxu2  ;;  %v7921_v9 = vpop.f32.mrf.mxu3  ;;  %v2032_v24 = vmul.f32 %v6577_v14, %v2031_v17  ;;  %vm2044_vm15 = vweird.f32 %v6579_v22 }
 0x29c   : > { %10677 = vst [vmem:[#allocation47_spill] sm:$0xff] %v7919_v4  ;;  %6580 = vrsqrt.f32 %v7916_v29  ;;  %1444 = vmatmul.f32.gmra.mxu1 %v1192_v48  ;;  %vm2045_vm1 = vmor %vm2043_vm0, %vm2044_vm15  ;;  %v4195_v4 = vld [vmem:[#allocation8 + $0xc0] sm:$0xff]  ;;  %vm2053_vm3 = vweird.f32 %v7916_v29 }
 0x29d   : > { %10678 = vst [vmem:[#allocation48_spill] sm:$0xff] %v7921_v9  ;;  %v2039_v38 = vmul.f32 %v6579_v22, %v2038_v10  ;;  %v2036_v49 = vsel %vm2035_vm14, %v6577_v14, %v2032_v24  ;;  %4615 = vmatpush.msrb.mxu1 %v4195_v4 }
 0x29e   : > { %v2983_v50 = vmul.f32 %v2036_v49, %v7638_v23 }
 0x29f   : > { %v2040_v25 = vmul.f32 0.5, %v2039_v38  ;;  %v791_v13 = vpop.f32.mrf.mxu0 }
 0x2a0   : > { %v7929_v40 = vsub.f32 %v7680_v43, %v791_v13  ;;  %3237 = vmatmul.f32.gmra.mxu2 %v2983_v50  ;;  %3638 = vmatmul.f32.gmra.mxu3 %v2983_v50  ;;  %v7944_v13 = vld [vmem:[%s7234_s24 + $0x240] sm:$0xff] }
 0x2a1   : > { %v2041_v54 = vsub.f32 1.5, %v2040_v25  ;;  %v1400_v9 = vpop.f32.mrf.mxu1 }
 0x2a2   : > { %v6581_v17 = vpop.eup %6580  ;;  %v1193_v48 = vmul.f32 %v7929_v40, %v7929_v40  ;;  %v7933_v14 = vadd.f32 1e-05, %v1400_v9  ;;  %838 = vmatmul.f32.gmra.mxu0 %v7926_v1 }
 0x2a3   : > { %v2048_v23 = vmul.f32 %v6581_v17, %v7916_v29  ;;  %v7937_v10 = vpop.f32.mrf.mxu2  ;;  %v7939_v43 = vpop.f32.mrf.mxu3  ;;  %v2042_v24 = vmul.f32 %v6579_v22, %v2041_v54  ;;  %vm2054_vm2 = vweird.f32 %v6581_v17  ;;  %v4179_v54 = vld [vmem:[#allocation8 + $0x40] sm:$0xff]  ;;  %v7961_v29 = vld [vmem:[%s7234_s24 + $0x248] sm:$0xff] }
 0x2a4   : > { %10679 = vst [vmem:[#allocation49_spill] sm:$0xff] %v7937_v10  ;;  %6582 = vrsqrt.f32 %v7933_v14  ;;  %1447 = vmatmul.f32.gmra.mxu1 %v1193_v48  ;;  %v5147_v48 = vld [vmem:[#allocation10 + $0x50] sm:$0xff]  ;;  %4214 = vmatpush.msrb.mxu0 %v4179_v54  ;;  %vm2055_vm4 = vmor %vm2053_vm3, %vm2054_vm2  ;;  %vm2063_vm6 = vweird.f32 %v7933_v14 }
 0x2a5   : > { %10680 = vst [vmem:[#allocation50_spill] sm:$0xff] %v7939_v43  ;;  %v2049_v38 = vmul.f32 %v6581_v17, %v2048_v23  ;;  %v2046_v49 = vsel %vm2045_vm1, %v6579_v22, %v2042_v24  ;;  %5162 = vmatpush.msrb.mxu2 %v5147_v48  ;;  %v5698_v48 = vld [vmem:[#allocation11 + $0x60] sm:$0xff] }
 0x2a6   : > { %v2984_v50 = vmul.f32 %v2046_v49, %v7652_v33  ;;  %5709 = vmatpush.msrb.mxu3 %v5698_v48 }
 0x2a7   : > { %v2050_v9 = vmul.f32 0.5, %v2049_v38  ;;  %v794_v25 = vpop.f32.mrf.mxu0 }
 0x2a8   : > { %v7947_v5 = vsub.f32 %v7698_v62, %v794_v25  ;;  %3240 = vmatmul.f32.gmra.mxu2 %v2984_v50  ;;  %3641 = vmatmul.f32.gmra.mxu3 %v2984_v50 }
 0x2a9   : > { %v2051_v10 = vsub.f32 1.5, %v2050_v9  ;;  %v1403_v43 = vpop.f32.mrf.mxu1 }
 0x2aa   : > { %v6583_v44 = vpop.eup %6582  ;;  %v1194_v22 = vmul.f32 %v7947_v5, %v7947_v5  ;;  %v1404_v33 = vadd.f32 1e-05, %v1403_v43  ;;  %841 = vmatmul.f32.gmra.mxu0 %v7944_v13 }
 0x2ab   : > { %v2058_v62 = vmul.f32 %v6583_v44, %v7933_v14  ;;  %v7954_v23 = vpop.f32.mrf.mxu2  ;;  %v7956_v24 = vpop.f32.mrf.mxu3  ;;  %v2052_v38 = vmul.f32 %v6581_v17, %v2051_v10  ;;  %vm2064_vm5 = vweird.f32 %v6583_v44 }
 0x2ac   : > { %10681 = vst [vmem:[#allocation51_spill] sm:$0xff] %v7954_v23  ;;  %6584 = vrsqrt.f32 %v1404_v33  ;;  %1450 = vmatmul.f32.gmra.mxu1 %v1194_v22  ;;  %vm2065_vm7 = vmor %vm2063_vm6, %vm2064_vm5  ;;  %vm2073_vm9 = vweird.f32 %v1404_v33 }
 0x2ad   : > { %10682 = vst [vmem:[#allocation52_spill] sm:$0xff] %v7956_v24  ;;  %v2059_v43 = vmul.f32 %v6583_v44, %v2058_v62  ;;  %v2056_v49 = vsel %vm2055_vm4, %v6581_v17, %v2052_v38  ;;  %v7976_v24 = vld [vmem:[%s7234_s24 + $0x250] sm:$0xff] }
 0x2ae   : > { %v2985_v4 = vmul.f32 %v2056_v49, %v7666_v58 }
 0x2af   : > { %v2060_v50 = vmul.f32 0.5, %v2059_v43  ;;  %v797_v9 = vpop.f32.mrf.mxu0 }
 0x2b0   : > { %v7964_v25 = vsub.f32 %v7715_v15, %v797_v9  ;;  %3243 = vmatmul.f32.gmra.mxu2 %v2985_v4  ;;  %3644 = vmatmul.f32.gmra.mxu3 %v2985_v4 }
 0x2b1   : > { %v2061_v10 = vsub.f32 1.5, %v2060_v50  ;;  %v1406_v54 = vpop.f32.mrf.mxu1 }
 0x2b2   : > { %v6585_v22 = vpop.eup %6584  ;;  %v1195_v62 = vmul.f32 %v7964_v25, %v7964_v25  ;;  %v1407_v17 = vadd.f32 1e-05, %v1406_v54  ;;  %844 = vmatmul.f32.gmra.mxu0 %v7961_v29 }
 0x2b3   : > { %v2068_v58 = vmul.f32 %v6585_v22, %v1404_v33  ;;  %v7970_v15 = vpop.f32.mrf.mxu2  ;;  %v7972_v38 = vpop.f32.mrf.mxu3  ;;  %v2062_v43 = vmul.f32 %v6583_v44, %v2061_v10  ;;  %vm2074_vm8 = vweird.f32 %v6585_v22 }
 0x2b4   : > { %10683 = vst [vmem:[#allocation53_spill] sm:$0xff] %v7970_v15  ;;  %6586 = vrsqrt.f32 %v1407_v17  ;;  %1453 = vmatmul.f32.gmra.mxu1 %v1195_v62  ;;  %vm2075_vm10 = vmor %vm2073_vm9, %vm2074_vm8  ;;  %vm2083_vm12 = vweird.f32 %v1407_v17 }
 0x2b5   : > { %10684 = vst [vmem:[#allocation54_spill] sm:$0xff] %v7972_v38  ;;  %v2069_v49 = vmul.f32 %v6585_v22, %v2068_v58  ;;  %v2066_v4 = vsel %vm2065_vm7, %v6583_v44, %v2062_v43  ;;  %v7990_v38 = vld [vmem:[%s7234_s24 + $0x258] sm:$0xff] }
 0x2b6   : > { %v2986_v50 = vmul.f32 %v2066_v4, %v7683_v53 }
 0x2b7   : > { %v2070_v9 = vmul.f32 0.5, %v2069_v49  ;;  %v800_v54 = vpop.f32.mrf.mxu0 }
 0x2b8   : > { %v7979_v48 = vsub.f32 %v7730_v12, %v800_v54  ;;  %3246 = vmatmul.f32.gmra.mxu2 %v2986_v50  ;;  %3647 = vmatmul.f32.gmra.mxu3 %v2986_v50 }
 0x2b9   : > { %v2071_v14 = vsub.f32 1.5, %v2070_v9  ;;  %v1409_v15 = vpop.f32.mrf.mxu1 }
 0x2ba   : > { %v6587_v10 = vpop.eup %6586  ;;  %v1196_v62 = vmul.f32 %v7979_v48, %v7979_v48  ;;  %v1410_v44 = vadd.f32 1e-05, %v1409_v15  ;;  %847 = vmatmul.f32.gmra.mxu0 %v7976_v24 }
 0x2bb   : > { %v2078_v53 = vmul.f32 %v6587_v10, %v1407_v17  ;;  %v7984_v58 = vpop.f32.mrf.mxu2  ;;  %v7986_v43 = vpop.f32.mrf.mxu3  ;;  %v2072_v12 = vmul.f32 %v6585_v22, %v2071_v14  ;;  %vm2084_vm11 = vweird.f32 %v6587_v10 }
 0x2bc   : > { %10685 = vst [vmem:[#allocation55_spill] sm:$0xff] %v7984_v58  ;;  %6588 = vrsqrt.f32 %v1410_v44  ;;  %1456 = vmatmul.f32.gmra.mxu1 %v1196_v62  ;;  %vm2085_vm13 = vmor %vm2083_vm12, %vm2084_vm11  ;;  %vm2093_vm15 = vweird.f32 %v1410_v44 }
 0x2bd   : > { %10686 = vst [vmem:[#allocation56_spill] sm:$0xff] %v7986_v43  ;;  %v2079_v49 = vmul.f32 %v6587_v10, %v2078_v53  ;;  %v2076_v4 = vsel %vm2075_vm10, %v6585_v22, %v2072_v12  ;;  %v8004_v43 = vld [vmem:[%s7234_s24 + $0x260] sm:$0xff] }
 0x2be   : > { %v2987_v50 = vmul.f32 %v2076_v4, %v7701_v46 }
 0x2bf   : > { %v2080_v9 = vmul.f32 0.5, %v2079_v49  ;;  %v803_v54 = vpop.f32.mrf.mxu0 }
 0x2c0   : > { %v7993_v15 = vsub.f32 %v7744_v0, %v803_v54  ;;  %3249 = vmatmul.f32.gmra.mxu2 %v2987_v50  ;;  %3650 = vmatmul.f32.gmra.mxu3 %v2987_v50 }
 0x2c1   : > { %v2081_v33 = vsub.f32 1.5, %v2080_v9  ;;  %v1412_v58 = vpop.f32.mrf.mxu1 }
 0x2c2   : > { %v6589_v14 = vpop.eup %6588  ;;  %v1197_v62 = vmul.f32 %v7993_v15, %v7993_v15  ;;  %v1413_v22 = vadd.f32 1e-05, %v1412_v58  ;;  %850 = vmatmul.f32.gmra.mxu0 %v7990_v38 }
 0x2c3   : > { %v2088_v46 = vmul.f32 %v6589_v14, %v1410_v44  ;;  %v7998_v53 = vpop.f32.mrf.mxu2  ;;  %v8000_v12 = vpop.f32.mrf.mxu3  ;;  %v2082_v0 = vmul.f32 %v6587_v10, %v2081_v33  ;;  %vm2094_vm14 = vweird.f32 %v6589_v14 }
 0x2c4   : > { %10687 = vst [vmem:[#allocation57_spill] sm:$0xff] %v7998_v53  ;;  %6590 = vrsqrt.f32 %v1413_v22  ;;  %1459 = vmatmul.f32.gmra.mxu1 %v1197_v62  ;;  %vm2095_vm0 = vmor %vm2093_vm15, %vm2094_vm14  ;;  %vm2103_vm2 = vweird.f32 %v1413_v22 }
 0x2c5   : > { %10688 = vst [vmem:[#allocation58_spill] sm:$0xff] %v8000_v12  ;;  %v2089_v49 = vmul.f32 %v6589_v14, %v2088_v46  ;;  %v2086_v4 = vsel %vm2085_vm13, %v6587_v10, %v2082_v0  ;;  %v8018_v12 = vld [vmem:[%s7234_s24 + $0x268] sm:$0xff] }
 0x2c6   : > { %v2988_v50 = vmul.f32 %v2086_v4, %v7718_v20 }
 0x2c7   : > { %v2090_v9 = vmul.f32 0.5, %v2089_v49  ;;  %v806_v54 = vpop.f32.mrf.mxu0 }
 0x2c8   : > { %v8007_v58 = vsub.f32 %v7758_v7, %v806_v54  ;;  %3252 = vmatmul.f32.gmra.mxu2 %v2988_v50  ;;  %3653 = vmatmul.f32.gmra.mxu3 %v2988_v50 }
 0x2c9   : > { %v2091_v17 = vsub.f32 1.5, %v2090_v9  ;;  %v1415_v53 = vpop.f32.mrf.mxu1 }
 0x2ca   : > { %v6591_v33 = vpop.eup %6590  ;;  %v1198_v62 = vmul.f32 %v8007_v58, %v8007_v58  ;;  %v1416_v10 = vadd.f32 1e-05, %v1415_v53  ;;  %853 = vmatmul.f32.gmra.mxu0 %v8004_v43 }
 0x2cb   : > { %v2098_v20 = vmul.f32 %v6591_v33, %v1413_v22  ;;  %v8012_v46 = vpop.f32.mrf.mxu2  ;;  %v8014_v0 = vpop.f32.mrf.mxu3  ;;  %v2092_v7 = vmul.f32 %v6589_v14, %v2091_v17  ;;  %vm2104_vm1 = vweird.f32 %v6591_v33 }
 0x2cc   : > { %10689 = vst [vmem:[#allocation59_spill] sm:$0xff] %v8012_v46  ;;  %6592 = vrsqrt.f32 %v1416_v10  ;;  %1462 = vmatmul.f32.gmra.mxu1 %v1198_v62  ;;  %vm2105_vm3 = vmor %vm2103_vm2, %vm2104_vm1  ;;  %vm2113_vm5 = vweird.f32 %v1416_v10 }
 0x2cd   : > { %10690 = vst [vmem:[#allocation60_spill] sm:$0xff] %v8014_v0  ;;  %v2099_v49 = vmul.f32 %v6591_v33, %v2098_v20  ;;  %v2096_v4 = vsel %vm2095_vm0, %v6589_v14, %v2092_v7  ;;  %v8032_v0 = vld [vmem:[%s7234_s24 + $0x270] sm:$0xff] }
 0x2ce   : > { %v2989_v50 = vmul.f32 %v2096_v4, %v7733_v42 }
 0x2cf   : > { %v2100_v9 = vmul.f32 0.5, %v2099_v49  ;;  %v809_v54 = vpop.f32.mrf.mxu0 }
 0x2d0   : > { %v8021_v53 = vsub.f32 %v7772_v36, %v809_v54  ;;  %3255 = vmatmul.f32.gmra.mxu2 %v2989_v50  ;;  %3656 = vmatmul.f32.gmra.mxu3 %v2989_v50 }
 0x2d1   : > { %v2101_v44 = vsub.f32 1.5, %v2100_v9  ;;  %v1418_v46 = vpop.f32.mrf.mxu1 }
 0x2d2   : > { %v6593_v17 = vpop.eup %6592  ;;  %v1199_v62 = vmul.f32 %v8021_v53, %v8021_v53  ;;  %v1419_v14 = vadd.f32 1e-05, %v1418_v46  ;;  %856 = vmatmul.f32.gmra.mxu0 %v8018_v12 }
 0x2d3   : > { %v2108_v42 = vmul.f32 %v6593_v17, %v1416_v10  ;;  %v8026_v20 = vpop.f32.mrf.mxu2  ;;  %v8028_v7 = vpop.f32.mrf.mxu3  ;;  %v2102_v36 = vmul.f32 %v6591_v33, %v2101_v44  ;;  %vm2114_vm4 = vweird.f32 %v6593_v17 }
 0x2d4   : > { %10691 = vst [vmem:[#allocation61_spill] sm:$0xff] %v8026_v20  ;;  %6594 = vrsqrt.f32 %v1419_v14  ;;  %1465 = vmatmul.f32.gmra.mxu1 %v1199_v62  ;;  %vm2115_vm6 = vmor %vm2113_vm5, %vm2114_vm4  ;;  %vm2123_vm8 = vweird.f32 %v1419_v14 }
 0x2d5   : > { %10692 = vst [vmem:[#allocation62_spill] sm:$0xff] %v8028_v7  ;;  %v2109_v49 = vmul.f32 %v6593_v17, %v2108_v42  ;;  %v2106_v4 = vsel %vm2105_vm3, %v6591_v33, %v2102_v36 }
 0x2d6   : > { %v2990_v50 = vmul.f32 %v2106_v4, %v7747_v8 }
 0x2d7   : > { %v2110_v9 = vmul.f32 0.5, %v2109_v49  ;;  %v812_v54 = vpop.f32.mrf.mxu0 }
 0x2d8   : > { %v8035_v46 = vsub.f32 %v7786_v59, %v812_v54  ;;  %3258 = vmatmul.f32.gmra.mxu2 %v2990_v50  ;;  %3659 = vmatmul.f32.gmra.mxu3 %v2990_v50  ;;  %v8049_v54 = vld [vmem:[%s7234_s24 + $0x278] sm:$0xff] }
 0x2d9   : > { %v2111_v22 = vsub.f32 1.5, %v2110_v9  ;;  %v1421_v20 = vpop.f32.mrf.mxu1 }
 0x2da   : > { %v6595_v44 = vpop.eup %6594  ;;  %v1200_v62 = vmul.f32 %v8035_v46, %v8035_v46  ;;  %v8039_v33 = vadd.f32 1e-05, %v1421_v20  ;;  %859 = vmatmul.f32.gmra.mxu0 %v8032_v0 }
 0x2db   : > { %v2118_v8 = vmul.f32 %v6595_v44, %v1419_v14  ;;  %v8042_v42 = vpop.f32.mrf.mxu2  ;;  %v8044_v59 = vpop.f32.mrf.mxu3  ;;  %v2112_v36 = vmul.f32 %v6593_v17, %v2111_v22  ;;  %vm2124_vm7 = vweird.f32 %v6595_v44 }
 0x2dc   : > { %10693 = vst [vmem:[#allocation63_spill] sm:$0xff] %v8042_v42  ;;  %6596 = vrsqrt.f32 %v8039_v33  ;;  %1468 = vmatmul.f32.gmra.mxu1 %v1200_v62  ;;  %vm2125_vm9 = vmor %vm2123_vm8, %vm2124_vm7  ;;  %v4194_v42 = vld [vmem:[#allocation8 + $0xb8] sm:$0xff]  ;;  %vm2133_vm11 = vweird.f32 %v8039_v33 }
 0x2dd   : > { %10694 = vst [vmem:[#allocation64_spill] sm:$0xff] %v8044_v59  ;;  %v2119_v49 = vmul.f32 %v6595_v44, %v2118_v8  ;;  %v2116_v4 = vsel %vm2115_vm6, %v6593_v17, %v2112_v36  ;;  %4616 = vmatpush.msrb.mxu1 %v4194_v42 }
 0x2de   : > { %v2991_v50 = vmul.f32 %v2116_v4, %v7761_v37 }
 0x2df   : > { %v2120_v9 = vmul.f32 0.5, %v2119_v49  ;;  %v815_v20 = vpop.f32.mrf.mxu0 }
 0x2e0   : > { %v8052_v10 = vsub.f32 %v7803_v31, %v815_v20  ;;  %3261 = vmatmul.f32.gmra.mxu2 %v2991_v50  ;;  %3662 = vmatmul.f32.gmra.mxu3 %v2991_v50  ;;  %v8067_v20 = vld [vmem:[%s7234_s24 + $0x280] sm:$0xff] }
 0x2e1   : > { %v2121_v7 = vsub.f32 1.5, %v2120_v9  ;;  %v1424_v59 = vpop.f32.mrf.mxu1 }
 0x2e2   : > { %v6597_v22 = vpop.eup %6596  ;;  %v1201_v62 = vmul.f32 %v8052_v10, %v8052_v10  ;;  %v8056_v17 = vadd.f32 1e-05, %v1424_v59  ;;  %862 = vmatmul.f32.gmra.mxu0 %v8049_v54 }
 0x2e3   : > { %v2128_v37 = vmul.f32 %v6597_v22, %v8039_v33  ;;  %v8060_v8 = vpop.f32.mrf.mxu2  ;;  %v8062_v31 = vpop.f32.mrf.mxu3  ;;  %v2122_v36 = vmul.f32 %v6595_v44, %v2121_v7  ;;  %vm2134_vm10 = vweird.f32 %v6597_v22  ;;  %v4178_v7 = vld [vmem:[#allocation8 + $0x38] sm:$0xff]  ;;  %v8084_v33 = vld [vmem:[%s7234_s24 + $0x288] sm:$0xff] }
 0x2e4   : > { %10695 = vst [vmem:[#allocation65_spill] sm:$0xff] %v8060_v8  ;;  %6598 = vrsqrt.f32 %v8056_v17  ;;  %1471 = vmatmul.f32.gmra.mxu1 %v1201_v62  ;;  %v5146_v62 = vld [vmem:[#allocation10 + $0x48] sm:$0xff]  ;;  %4215 = vmatpush.msrb.mxu0 %v4178_v7  ;;  %vm2135_vm12 = vmor %vm2133_vm11, %vm2134_vm10  ;;  %vm2143_vm14 = vweird.f32 %v8056_v17 }
 0x2e5   : > { %10696 = vst [vmem:[#allocation66_spill] sm:$0xff] %v8062_v31  ;;  %v2129_v49 = vmul.f32 %v6597_v22, %v2128_v37  ;;  %v2126_v4 = vsel %vm2125_vm9, %v6595_v44, %v2122_v36  ;;  %5163 = vmatpush.msrb.mxu2 %v5146_v62  ;;  %v5697_v62 = vld [vmem:[#allocation11 + $0x58] sm:$0xff] }
 0x2e6   : > { %v2992_v50 = vmul.f32 %v2126_v4, %v7775_v26  ;;  %5710 = vmatpush.msrb.mxu3 %v5697_v62 }
 0x2e7   : > { %v2130_v59 = vmul.f32 0.5, %v2129_v49  ;;  %v818_v9 = vpop.f32.mrf.mxu0 }
 0x2e8   : > { %v8070_v14 = vsub.f32 %v7821_v47, %v818_v9  ;;  %3264 = vmatmul.f32.gmra.mxu2 %v2992_v50  ;;  %3665 = vmatmul.f32.gmra.mxu3 %v2992_v50 }
 0x2e9   : > { %v2131_v8 = vsub.f32 1.5, %v2130_v59  ;;  %v1427_v31 = vpop.f32.mrf.mxu1 }
 0x2ea   : > { %v6599_v23 = vpop.eup %6598  ;;  %v1202_v44 = vmul.f32 %v8070_v14, %v8070_v14  ;;  %v1428_v26 = vadd.f32 1e-05, %v1427_v31  ;;  %865 = vmatmul.f32.gmra.mxu0 %v8067_v20 }
 0x2eb   : > { %v2138_v47 = vmul.f32 %v6599_v23, %v8056_v17  ;;  %v8077_v37 = vpop.f32.mrf.mxu2  ;;  %v8079_v36 = vpop.f32.mrf.mxu3  ;;  %v2132_v49 = vmul.f32 %v6597_v22, %v2131_v8  ;;  %vm2144_vm13 = vweird.f32 %v6599_v23 }
 0x2ec   : > { %10697 = vst [vmem:[#allocation67_spill] sm:$0xff] %v8077_v37  ;;  %6600 = vrsqrt.f32 %v1428_v26  ;;  %1474 = vmatmul.f32.gmra.mxu1 %v1202_v44  ;;  %vm2145_vm15 = vmor %vm2143_vm14, %vm2144_vm13  ;;  %vm2153_vm1 = vweird.f32 %v1428_v26 }
 0x2ed   : > { %10698 = vst [vmem:[#allocation68_spill] sm:$0xff] %v8079_v36  ;;  %v2139_v31 = vmul.f32 %v6599_v23, %v2138_v47  ;;  %v2136_v4 = vsel %vm2135_vm12, %v6597_v22, %v2132_v49  ;;  %v8099_v36 = vld [vmem:[%s7234_s24 + $0x290] sm:$0xff] }
 0x2ee   : > { %v2993_v42 = vmul.f32 %v2136_v4, %v7789_v57 }
 0x2ef   : > { %v2140_v50 = vmul.f32 0.5, %v2139_v31  ;;  %v821_v59 = vpop.f32.mrf.mxu0 }
 0x2f0   : > { %v8087_v9 = vsub.f32 %v7838_v30, %v821_v59  ;;  %3267 = vmatmul.f32.gmra.mxu2 %v2993_v42  ;;  %3668 = vmatmul.f32.gmra.mxu3 %v2993_v42 }
 0x2f1   : > { %v2141_v8 = vsub.f32 1.5, %v2140_v50  ;;  %v1430_v7 = vpop.f32.mrf.mxu1 }
 0x2f2   : > { %v6601_v44 = vpop.eup %6600  ;;  %v1203_v47 = vmul.f32 %v8087_v9, %v8087_v9  ;;  %v1431_v22 = vadd.f32 1e-05, %v1430_v7  ;;  %868 = vmatmul.f32.gmra.mxu0 %v8084_v33 }
 0x2f3   : > { %v2148_v57 = vmul.f32 %v6601_v44, %v1428_v26  ;;  %v8093_v30 = vpop.f32.mrf.mxu2  ;;  %v8095_v49 = vpop.f32.mrf.mxu3  ;;  %v2142_v31 = vmul.f32 %v6599_v23, %v2141_v8  ;;  %vm2154_vm0 = vweird.f32 %v6601_v44 }
 0x2f4   : > { %10699 = vst [vmem:[#allocation69_spill] sm:$0xff] %v8093_v30  ;;  %6602 = vrsqrt.f32 %v1431_v22  ;;  %1477 = vmatmul.f32.gmra.mxu1 %v1203_v47  ;;  %vm2155_vm2 = vmor %vm2153_vm1, %vm2154_vm0  ;;  %vm2163_vm4 = vweird.f32 %v1431_v22 }
 0x2f5   : > { %10700 = vst [vmem:[#allocation70_spill] sm:$0xff] %v8095_v49  ;;  %v2149_v4 = vmul.f32 %v6601_v44, %v2148_v57  ;;  %v2146_v42 = vsel %vm2145_vm15, %v6599_v23, %v2142_v31  ;;  %v8113_v49 = vld [vmem:[%s7234_s24 + $0x298] sm:$0xff] }
 0x2f6   : > { %v2994_v50 = vmul.f32 %v2146_v42, %v7806_v52 }
 0x2f7   : > { %v2150_v59 = vmul.f32 0.5, %v2149_v4  ;;  %v824_v7 = vpop.f32.mrf.mxu0 }
 0x2f8   : > { %v8102_v62 = vsub.f32 %v7853_v56, %v824_v7  ;;  %3270 = vmatmul.f32.gmra.mxu2 %v2994_v50  ;;  %3671 = vmatmul.f32.gmra.mxu3 %v2994_v50 }
 0x2f9   : > { %v2151_v17 = vsub.f32 1.5, %v2150_v59  ;;  %v1433_v30 = vpop.f32.mrf.mxu1 }
 0x2fa   : > { %v6603_v8 = vpop.eup %6602  ;;  %v1204_v47 = vmul.f32 %v8102_v62, %v8102_v62  ;;  %v1434_v23 = vadd.f32 1e-05, %v1433_v30  ;;  %871 = vmatmul.f32.gmra.mxu0 %v8099_v36 }
 0x2fb   : > { %v2158_v52 = vmul.f32 %v6603_v8, %v1431_v22  ;;  %v8107_v57 = vpop.f32.mrf.mxu2  ;;  %v8109_v31 = vpop.f32.mrf.mxu3  ;;  %v2152_v56 = vmul.f32 %v6601_v44, %v2151_v17  ;;  %vm2164_vm3 = vweird.f32 %v6603_v8 }
 0x2fc   : > { %10701 = vst [vmem:[#allocation71_spill] sm:$0xff] %v8107_v57  ;;  %6604 = vrsqrt.f32 %v1434_v23  ;;  %1480 = vmatmul.f32.gmra.mxu1 %v1204_v47  ;;  %vm2165_vm5 = vmor %vm2163_vm4, %vm2164_vm3  ;;  %vm2173_vm7 = vweird.f32 %v1434_v23 }
 0x2fd   : > { %10702 = vst [vmem:[#allocation72_spill] sm:$0xff] %v8109_v31  ;;  %v2159_v4 = vmul.f32 %v6603_v8, %v2158_v52  ;;  %v2156_v42 = vsel %vm2155_vm2, %v6601_v44, %v2152_v56  ;;  %v8127_v31 = vld [vmem:[%s7234_s24 + $0x2a0] sm:$0xff] }
 0x2fe   : > { %v2995_v50 = vmul.f32 %v2156_v42, %v7824_v51 }
 0x2ff   : > { %v2160_v59 = vmul.f32 0.5, %v2159_v4  ;;  %v827_v7 = vpop.f32.mrf.mxu0 }
 0x300   : > { %v8116_v30 = vsub.f32 %v7867_v18, %v827_v7  ;;  %3273 = vmatmul.f32.gmra.mxu2 %v2995_v50  ;;  %3674 = vmatmul.f32.gmra.mxu3 %v2995_v50 }
 0x301   : > { %v2161_v26 = vsub.f32 1.5, %v2160_v59  ;;  %v1436_v57 = vpop.f32.mrf.mxu1 }
 0x302   : > { %v6605_v17 = vpop.eup %6604  ;;  %v1205_v47 = vmul.f32 %v8116_v30, %v8116_v30  ;;  %v1437_v44 = vadd.f32 1e-05, %v1436_v57  ;;  %874 = vmatmul.f32.gmra.mxu0 %v8113_v49 }
 0x303   : > { %v2168_v51 = vmul.f32 %v6605_v17, %v1434_v23  ;;  %v8121_v52 = vpop.f32.mrf.mxu2  ;;  %v8123_v56 = vpop.f32.mrf.mxu3  ;;  %v2162_v18 = vmul.f32 %v6603_v8, %v2161_v26  ;;  %vm2174_vm6 = vweird.f32 %v6605_v17 }
 0x304   : > { %10703 = vst [vmem:[#allocation73_spill] sm:$0xff] %v8121_v52  ;;  %6606 = vrsqrt.f32 %v1437_v44  ;;  %1483 = vmatmul.f32.gmra.mxu1 %v1205_v47  ;;  %vm2175_vm8 = vmor %vm2173_vm7, %vm2174_vm6  ;;  %vm2183_vm10 = vweird.f32 %v1437_v44 }
 0x305   : > { %10704 = vst [vmem:[#allocation74_spill] sm:$0xff] %v8123_v56  ;;  %v2169_v4 = vmul.f32 %v6605_v17, %v2168_v51  ;;  %v2166_v42 = vsel %vm2165_vm5, %v6603_v8, %v2162_v18  ;;  %v8141_v56 = vld [vmem:[%s7234_s24 + $0x2a8] sm:$0xff] }
 0x306   : > { %v2996_v50 = vmul.f32 %v2166_v42, %v7841_v11 }
 0x307   : > { %v2170_v59 = vmul.f32 0.5, %v2169_v4  ;;  %v830_v7 = vpop.f32.mrf.mxu0 }
 0x308   : > { %v8130_v57 = vsub.f32 %v7881_v41, %v830_v7  ;;  %3276 = vmatmul.f32.gmra.mxu2 %v2996_v50  ;;  %3677 = vmatmul.f32.gmra.mxu3 %v2996_v50 }
 0x309   : > { %v2171_v22 = vsub.f32 1.5, %v2170_v59  ;;  %v1439_v52 = vpop.f32.mrf.mxu1 }
 0x30a   : > { %v6607_v26 = vpop.eup %6606  ;;  %v1206_v47 = vmul.f32 %v8130_v57, %v8130_v57  ;;  %v1440_v8 = vadd.f32 1e-05, %v1439_v52  ;;  %877 = vmatmul.f32.gmra.mxu0 %v8127_v31 }
 0x30b   : > { %v2178_v11 = vmul.f32 %v6607_v26, %v1437_v44  ;;  %v8135_v51 = vpop.f32.mrf.mxu2  ;;  %v8137_v18 = vpop.f32.mrf.mxu3  ;;  %v2172_v41 = vmul.f32 %v6605_v17, %v2171_v22  ;;  %vm2184_vm9 = vweird.f32 %v6607_v26 }
 0x30c   : > { %10705 = vst [vmem:[#allocation75_spill] sm:$0xff] %v8135_v51  ;;  %6608 = vrsqrt.f32 %v1440_v8  ;;  %1486 = vmatmul.f32.gmra.mxu1 %v1206_v47  ;;  %vm2185_vm11 = vmor %vm2183_vm10, %vm2184_vm9  ;;  %vm2193_vm13 = vweird.f32 %v1440_v8 }
 0x30d   : > { %10706 = vst [vmem:[#allocation76_spill] sm:$0xff] %v8137_v18  ;;  %v2179_v4 = vmul.f32 %v6607_v26, %v2178_v11  ;;  %v2176_v42 = vsel %vm2175_vm8, %v6605_v17, %v2172_v41  ;;  %v8155_v18 = vld [vmem:[%s7234_s24 + $0x2b0] sm:$0xff] }
 0x30e   : > { %v2997_v50 = vmul.f32 %v2176_v42, %v7856_v34 }
 0x30f   : > { %v2180_v59 = vmul.f32 0.5, %v2179_v4  ;;  %v833_v7 = vpop.f32.mrf.mxu0 }
 0x310   : > { %v8144_v52 = vsub.f32 %v7895_v6, %v833_v7  ;;  %3279 = vmatmul.f32.gmra.mxu2 %v2997_v50  ;;  %3680 = vmatmul.f32.gmra.mxu3 %v2997_v50 }
 0x311   : > { %v2181_v23 = vsub.f32 1.5, %v2180_v59  ;;  %v1442_v51 = vpop.f32.mrf.mxu1 }
 0x312   : > { %v6609_v22 = vpop.eup %6608  ;;  %v1207_v47 = vmul.f32 %v8144_v52, %v8144_v52  ;;  %v1443_v17 = vadd.f32 1e-05, %v1442_v51  ;;  %880 = vmatmul.f32.gmra.mxu0 %v8141_v56 }
 0x313   : > { %v2188_v34 = vmul.f32 %v6609_v22, %v1440_v8  ;;  %v8149_v11 = vpop.f32.mrf.mxu2  ;;  %v8151_v41 = vpop.f32.mrf.mxu3  ;;  %v2182_v6 = vmul.f32 %v6607_v26, %v2181_v23  ;;  %vm2194_vm12 = vweird.f32 %v6609_v22 }
 0x314   : > { %10707 = vst [vmem:[#allocation77_spill] sm:$0xff] %v8149_v11  ;;  %6610 = vrsqrt.f32 %v1443_v17  ;;  %1489 = vmatmul.f32.gmra.mxu1 %v1207_v47  ;;  %vm2195_vm14 = vmor %vm2193_vm13, %vm2194_vm12  ;;  %vm2203_vm0 = vweird.f32 %v1443_v17 }
 0x315   : > { %10708 = vst [vmem:[#allocation78_spill] sm:$0xff] %v8151_v41  ;;  %v2189_v4 = vmul.f32 %v6609_v22, %v2188_v34  ;;  %v2186_v42 = vsel %vm2185_vm11, %v6607_v26, %v2182_v6 }
 0x316   : > { %v2998_v50 = vmul.f32 %v2186_v42, %v7870_v32 }
 0x317   : > { %v2190_v59 = vmul.f32 0.5, %v2189_v4  ;;  %v836_v7 = vpop.f32.mrf.mxu0 }
 0x318   : > { %v8158_v51 = vsub.f32 %v7909_v28, %v836_v7  ;;  %3282 = vmatmul.f32.gmra.mxu2 %v2998_v50  ;;  %3683 = vmatmul.f32.gmra.mxu3 %v2998_v50  ;;  %v8172_v7 = vld [vmem:[%s7234_s24 + $0x2b8] sm:$0xff] }
 0x319   : > { %v2191_v44 = vsub.f32 1.5, %v2190_v59  ;;  %v1445_v11 = vpop.f32.mrf.mxu1 }
 0x31a   : > { %v6611_v23 = vpop.eup %6610  ;;  %v1208_v47 = vmul.f32 %v8158_v51, %v8158_v51  ;;  %v8162_v26 = vadd.f32 1e-05, %v1445_v11  ;;  %883 = vmatmul.f32.gmra.mxu0 %v8155_v18 }
 0x31b   : > { %v2198_v32 = vmul.f32 %v6611_v23, %v1443_v17  ;;  %v8165_v34 = vpop.f32.mrf.mxu2  ;;  %v8167_v28 = vpop.f32.mrf.mxu3  ;;  %v2192_v6 = vmul.f32 %v6609_v22, %v2191_v44  ;;  %vm2204_vm15 = vweird.f32 %v6611_v23 }
 0x31c   : > { %10709 = vst [vmem:[#allocation79_spill] sm:$0xff] %v8165_v34  ;;  %6612 = vrsqrt.f32 %v8162_v26  ;;  %1492 = vmatmul.f32.gmra.mxu1 %v1208_v47  ;;  %vm2205_vm1 = vmor %vm2203_vm0, %vm2204_vm15  ;;  %v4193_v34 = vld [vmem:[#allocation8 + $0xb0] sm:$0xff]  ;;  %vm2213_vm3 = vweird.f32 %v8162_v26 }
 0x31d   : > { %10710 = vst [vmem:[#allocation80_spill] sm:$0xff] %v8167_v28  ;;  %v2199_v4 = vmul.f32 %v6611_v23, %v2198_v32  ;;  %v2196_v42 = vsel %vm2195_vm14, %v6609_v22, %v2192_v6  ;;  %4617 = vmatpush.msrb.mxu1 %v4193_v34 }
 0x31e   : > { %v2999_v50 = vmul.f32 %v2196_v42, %v7884_v60 }
 0x31f   : > { %v2200_v59 = vmul.f32 0.5, %v2199_v4  ;;  %v839_v11 = vpop.f32.mrf.mxu0 }
 0x320   : > { %v8175_v8 = vsub.f32 %v7926_v1, %v839_v11  ;;  %3285 = vmatmul.f32.gmra.mxu2 %v2999_v50  ;;  %3686 = vmatmul.f32.gmra.mxu3 %v2999_v50  ;;  %v8190_v11 = vld [vmem:[%s7234_s24 + $0x2c0] sm:$0xff] }
 0x321   : > { %v2201_v41 = vsub.f32 1.5, %v2200_v59  ;;  %v1448_v28 = vpop.f32.mrf.mxu1 }
 0x322   : > { %v6613_v44 = vpop.eup %6612  ;;  %v1209_v47 = vmul.f32 %v8175_v8, %v8175_v8  ;;  %v8179_v22 = vadd.f32 1e-05, %v1448_v28  ;;  %886 = vmatmul.f32.gmra.mxu0 %v8172_v7 }
 0x323   : > { %v2208_v60 = vmul.f32 %v6613_v44, %v8162_v26  ;;  %v8183_v32 = vpop.f32.mrf.mxu2  ;;  %v8185_v1 = vpop.f32.mrf.mxu3  ;;  %v2202_v6 = vmul.f32 %v6611_v23, %v2201_v41  ;;  %vm2214_vm2 = vweird.f32 %v6613_v44  ;;  %v4177_v41 = vld [vmem:[#allocation8 + $0x30] sm:$0xff]  ;;  %v8207_v26 = vld [vmem:[%s7234_s24 + $0x2c8] sm:$0xff] }
 0x324   : > { %10711 = vst [vmem:[#allocation81_spill] sm:$0xff] %v8183_v32  ;;  %6614 = vrsqrt.f32 %v8179_v22  ;;  %1495 = vmatmul.f32.gmra.mxu1 %v1209_v47  ;;  %v5145_v47 = vld [vmem:[#allocation10 + $0x40] sm:$0xff]  ;;  %4216 = vmatpush.msrb.mxu0 %v4177_v41  ;;  %vm2215_vm4 = vmor %vm2213_vm3, %vm2214_vm2  ;;  %vm2223_vm6 = vweird.f32 %v8179_v22 }
 0x325   : > { %10712 = vst [vmem:[#allocation82_spill] sm:$0xff] %v8185_v1  ;;  %v2209_v4 = vmul.f32 %v6613_v44, %v2208_v60  ;;  %v2206_v42 = vsel %vm2205_vm1, %v6611_v23, %v2202_v6  ;;  %5164 = vmatpush.msrb.mxu2 %v5145_v47  ;;  %v5696_v47 = vld [vmem:[#allocation11 + $0x50] sm:$0xff] }
 0x326   : > { %v3000_v50 = vmul.f32 %v2206_v42, %v7898_v2  ;;  %5711 = vmatpush.msrb.mxu3 %v5696_v47 }
 0x327   : > { %v2210_v28 = vmul.f32 0.5, %v2209_v4  ;;  %v842_v59 = vpop.f32.mrf.mxu0 }
 0x328   : > { %v8193_v17 = vsub.f32 %v7944_v13, %v842_v59  ;;  %3288 = vmatmul.f32.gmra.mxu2 %v3000_v50  ;;  %3689 = vmatmul.f32.gmra.mxu3 %v3000_v50 }
 0x329   : > { %v2211_v32 = vsub.f32 1.5, %v2210_v28  ;;  %v1451_v1 = vpop.f32.mrf.mxu1 }
 0x32a   : > { %v6615_v37 = vpop.eup %6614  ;;  %v1210_v23 = vmul.f32 %v8193_v17, %v8193_v17  ;;  %v1452_v2 = vadd.f32 1e-05, %v1451_v1  ;;  %889 = vmatmul.f32.gmra.mxu0 %v8190_v11 }
 0x32b   : > { %v2218_v13 = vmul.f32 %v6615_v37, %v8179_v22  ;;  %v8200_v60 = vpop.f32.mrf.mxu2  ;;  %v8202_v6 = vpop.f32.mrf.mxu3  ;;  %v2212_v4 = vmul.f32 %v6613_v44, %v2211_v32  ;;  %vm2224_vm5 = vweird.f32 %v6615_v37 }
 0x32c   : > { %10713 = vst [vmem:[#allocation83_spill] sm:$0xff] %v8200_v60  ;;  %6616 = vrsqrt.f32 %v1452_v2  ;;  %1498 = vmatmul.f32.gmra.mxu1 %v1210_v23  ;;  %vm2225_vm7 = vmor %vm2223_vm6, %vm2224_vm5  ;;  %vm2233_vm9 = vweird.f32 %v1452_v2 }
 0x32d   : > { %10714 = vst [vmem:[#allocation84_spill] sm:$0xff] %v8202_v6  ;;  %v2219_v1 = vmul.f32 %v6615_v37, %v2218_v13  ;;  %v2216_v42 = vsel %vm2215_vm4, %v6613_v44, %v2212_v4  ;;  %v8222_v6 = vld [vmem:[%s7234_s24 + $0x2d0] sm:$0xff] }
 0x32e   : > { %v3001_v34 = vmul.f32 %v2216_v42, %v7912_v19 }
 0x32f   : > { %v2220_v50 = vmul.f32 0.5, %v2219_v1  ;;  %v845_v28 = vpop.f32.mrf.mxu0 }
 0x330   : > { %v8210_v59 = vsub.f32 %v7961_v29, %v845_v28  ;;  %3291 = vmatmul.f32.gmra.mxu2 %v3001_v34  ;;  %3692 = vmatmul.f32.gmra.mxu3 %v3001_v34 }
 0x331   : > { %v2221_v32 = vsub.f32 1.5, %v2220_v50  ;;  %v1454_v41 = vpop.f32.mrf.mxu1 }
 0x332   : > { %v6617_v23 = vpop.eup %6616  ;;  %v1211_v13 = vmul.f32 %v8210_v59, %v8210_v59  ;;  %v1455_v44 = vadd.f32 1e-05, %v1454_v41  ;;  %892 = vmatmul.f32.gmra.mxu0 %v8207_v26 }
 0x333   : > { %v2228_v19 = vmul.f32 %v6617_v23, %v1452_v2  ;;  %v8216_v29 = vpop.f32.mrf.mxu2  ;;  %v8218_v4 = vpop.f32.mrf.mxu3  ;;  %v2222_v1 = vmul.f32 %v6615_v37, %v2221_v32  ;;  %vm2234_vm8 = vweird.f32 %v6617_v23 }
 0x334   : > { %10715 = vst [vmem:[#allocation85_spill] sm:$0xff] %v8216_v29  ;;  %6618 = vrsqrt.f32 %v1455_v44  ;;  %1501 = vmatmul.f32.gmra.mxu1 %v1211_v13  ;;  %vm2235_vm10 = vmor %vm2233_vm9, %vm2234_vm8  ;;  %vm2243_vm12 = vweird.f32 %v1455_v44 }
 0x335   : > { %10716 = vst [vmem:[#allocation86_spill] sm:$0xff] %v8218_v4  ;;  %v2229_v42 = vmul.f32 %v6617_v23, %v2228_v19  ;;  %v2226_v34 = vsel %vm2225_vm7, %v6615_v37, %v2222_v1  ;;  %v8236_v4 = vld [vmem:[%s7234_s24 + $0x2d8] sm:$0xff] }
 0x336   : > { %v3002_v50 = vmul.f32 %v2226_v34, %v7929_v40 }
 0x337   : > { %v2230_v28 = vmul.f32 0.5, %v2229_v42  ;;  %v848_v41 = vpop.f32.mrf.mxu0 }
 0x338   : > { %v8225_v47 = vsub.f32 %v7976_v24, %v848_v41  ;;  %3294 = vmatmul.f32.gmra.mxu2 %v3002_v50  ;;  %3695 = vmatmul.f32.gmra.mxu3 %v3002_v50 }
 0x339   : > { %v2231_v22 = vsub.f32 1.5, %v2230_v28  ;;  %v1457_v29 = vpop.f32.mrf.mxu1 }
 0x33a   : > { %v6619_v32 = vpop.eup %6618  ;;  %v1212_v13 = vmul.f32 %v8225_v47, %v8225_v47  ;;  %v1458_v37 = vadd.f32 1e-05, %v1457_v29  ;;  %895 = vmatmul.f32.gmra.mxu0 %v8222_v6 }
 0x33b   : > { %v2238_v40 = vmul.f32 %v6619_v32, %v1455_v44  ;;  %v8230_v19 = vpop.f32.mrf.mxu2  ;;  %v8232_v1 = vpop.f32.mrf.mxu3  ;;  %v2232_v24 = vmul.f32 %v6617_v23, %v2231_v22  ;;  %vm2244_vm11 = vweird.f32 %v6619_v32 }
 0x33c   : > { %10717 = vst [vmem:[#allocation87_spill] sm:$0xff] %v8230_v19  ;;  %6620 = vrsqrt.f32 %v1458_v37  ;;  %1504 = vmatmul.f32.gmra.mxu1 %v1212_v13  ;;  %vm2245_vm13 = vmor %vm2243_vm12, %vm2244_vm11  ;;  %vm2253_vm15 = vweird.f32 %v1458_v37 }
 0x33d   : > { %10718 = vst [vmem:[#allocation88_spill] sm:$0xff] %v8232_v1  ;;  %v2239_v42 = vmul.f32 %v6619_v32, %v2238_v40  ;;  %v2236_v34 = vsel %vm2235_vm10, %v6617_v23, %v2232_v24  ;;  %v8250_v1 = vld [vmem:[%s7234_s24 + $0x2e0] sm:$0xff] }
 0x33e   : > { %v3003_v50 = vmul.f32 %v2236_v34, %v7947_v5 }
 0x33f   : > { %v2240_v28 = vmul.f32 0.5, %v2239_v42  ;;  %v851_v41 = vpop.f32.mrf.mxu0 }
 0x340   : > { %v8239_v29 = vsub.f32 %v7990_v38, %v851_v41  ;;  %3297 = vmatmul.f32.gmra.mxu2 %v3003_v50  ;;  %3698 = vmatmul.f32.gmra.mxu3 %v3003_v50 }
 0x341   : > { %v2241_v2 = vsub.f32 1.5, %v2240_v28  ;;  %v1460_v19 = vpop.f32.mrf.mxu1 }
 0x342   : > { %v6621_v22 = vpop.eup %6620  ;;  %v1213_v13 = vmul.f32 %v8239_v29, %v8239_v29  ;;  %v1461_v23 = vadd.f32 1e-05, %v1460_v19  ;;  %898 = vmatmul.f32.gmra.mxu0 %v8236_v4 }
 0x343   : > { %v2248_v5 = vmul.f32 %v6621_v22, %v1458_v37  ;;  %v8244_v40 = vpop.f32.mrf.mxu2  ;;  %v8246_v24 = vpop.f32.mrf.mxu3  ;;  %v2242_v38 = vmul.f32 %v6619_v32, %v2241_v2  ;;  %vm2254_vm14 = vweird.f32 %v6621_v22 }
 0x344   : > { %10719 = vst [vmem:[#allocation89_spill] sm:$0xff] %v8244_v40  ;;  %6622 = vrsqrt.f32 %v1461_v23  ;;  %1507 = vmatmul.f32.gmra.mxu1 %v1213_v13  ;;  %vm2255_vm0 = vmor %vm2253_vm15, %vm2254_vm14  ;;  %vm2263_vm2 = vweird.f32 %v1461_v23 }
 0x345   : > { %10720 = vst [vmem:[#allocation90_spill] sm:$0xff] %v8246_v24  ;;  %v2249_v42 = vmul.f32 %v6621_v22, %v2248_v5  ;;  %v2246_v34 = vsel %vm2245_vm13, %v6619_v32, %v2242_v38  ;;  %v8264_v24 = vld [vmem:[%s7234_s24 + $0x2e8] sm:$0xff] }
 0x346   : > { %v3004_v50 = vmul.f32 %v2246_v34, %v7964_v25 }
 0x347   : > { %v2250_v28 = vmul.f32 0.5, %v2249_v42  ;;  %v854_v41 = vpop.f32.mrf.mxu0 }
 0x348   : > { %v8253_v19 = vsub.f32 %v8004_v43, %v854_v41  ;;  %3300 = vmatmul.f32.gmra.mxu2 %v3004_v50  ;;  %3701 = vmatmul.f32.gmra.mxu3 %v3004_v50 }
 0x349   : > { %v2251_v44 = vsub.f32 1.5, %v2250_v28  ;;  %v1463_v40 = vpop.f32.mrf.mxu1 }
 0x34a   : > { %v6623_v2 = vpop.eup %6622  ;;  %v1214_v13 = vmul.f32 %v8253_v19, %v8253_v19  ;;  %v1464_v32 = vadd.f32 1e-05, %v1463_v40  ;;  %901 = vmatmul.f32.gmra.mxu0 %v8250_v1 }
 0x34b   : > { %v2258_v25 = vmul.f32 %v6623_v2, %v1461_v23  ;;  %v8258_v5 = vpop.f32.mrf.mxu2  ;;  %v8260_v38 = vpop.f32.mrf.mxu3  ;;  %v2252_v43 = vmul.f32 %v6621_v22, %v2251_v44  ;;  %vm2264_vm1 = vweird.f32 %v6623_v2 }
 0x34c   : > { %10721 = vst [vmem:[#allocation91_spill] sm:$0xff] %v8258_v5  ;;  %6624 = vrsqrt.f32 %v1464_v32  ;;  %1510 = vmatmul.f32.gmra.mxu1 %v1214_v13  ;;  %vm2265_vm3 = vmor %vm2263_vm2, %vm2264_vm1  ;;  %vm2273_vm5 = vweird.f32 %v1464_v32 }
 0x34d   : > { %10722 = vst [vmem:[#allocation92_spill] sm:$0xff] %v8260_v38  ;;  %v2259_v42 = vmul.f32 %v6623_v2, %v2258_v25  ;;  %v2256_v34 = vsel %vm2255_vm0, %v6621_v22, %v2252_v43  ;;  %v8278_v38 = vld [vmem:[%s7234_s24 + $0x2f0] sm:$0xff] }
 0x34e   : > { %v3005_v50 = vmul.f32 %v2256_v34, %v7979_v48 }
 0x34f   : > { %v2260_v28 = vmul.f32 0.5, %v2259_v42  ;;  %v857_v41 = vpop.f32.mrf.mxu0 }
 0x350   : > { %v8267_v40 = vsub.f32 %v8018_v12, %v857_v41  ;;  %3303 = vmatmul.f32.gmra.mxu2 %v3005_v50  ;;  %3704 = vmatmul.f32.gmra.mxu3 %v3005_v50 }
 0x351   : > { %v2261_v37 = vsub.f32 1.5, %v2260_v28  ;;  %v1466_v5 = vpop.f32.mrf.mxu1 }
 0x352   : > { %v6625_v44 = vpop.eup %6624  ;;  %v1215_v13 = vmul.f32 %v8267_v40, %v8267_v40  ;;  %v1467_v22 = vadd.f32 1e-05, %v1466_v5  ;;  %904 = vmatmul.f32.gmra.mxu0 %v8264_v24 }
 0x353   : > { %v2268_v48 = vmul.f32 %v6625_v44, %v1464_v32  ;;  %v8272_v25 = vpop.f32.mrf.mxu2  ;;  %v8274_v43 = vpop.f32.mrf.mxu3  ;;  %v2262_v12 = vmul.f32 %v6623_v2, %v2261_v37  ;;  %vm2274_vm4 = vweird.f32 %v6625_v44 }
 0x354   : > { %10723 = vst [vmem:[#allocation93_spill] sm:$0xff] %v8272_v25  ;;  %6626 = vrsqrt.f32 %v1467_v22  ;;  %1513 = vmatmul.f32.gmra.mxu1 %v1215_v13  ;;  %vm2275_vm6 = vmor %vm2273_vm5, %vm2274_vm4  ;;  %vm2283_vm8 = vweird.f32 %v1467_v22 }
 0x355   : > { %10724 = vst [vmem:[#allocation94_spill] sm:$0xff] %v8274_v43  ;;  %v2269_v42 = vmul.f32 %v6625_v44, %v2268_v48  ;;  %v2266_v34 = vsel %vm2265_vm3, %v6623_v2, %v2262_v12 }
 0x356   : > { %v3006_v50 = vmul.f32 %v2266_v34, %v7993_v15 }
 0x357   : > { %v2270_v28 = vmul.f32 0.5, %v2269_v42  ;;  %v860_v41 = vpop.f32.mrf.mxu0 }
 0x358   : > { %v8281_v5 = vsub.f32 %v8032_v0, %v860_v41  ;;  %3306 = vmatmul.f32.gmra.mxu2 %v3006_v50  ;;  %3707 = vmatmul.f32.gmra.mxu3 %v3006_v50  ;;  %v8295_v41 = vld [vmem:[%s7234_s24 + $0x2f8] sm:$0xff] }
 0x359   : > { %v2271_v23 = vsub.f32 1.5, %v2270_v28  ;;  %v1469_v25 = vpop.f32.mrf.mxu1 }
 0x35a   : > { %v6627_v37 = vpop.eup %6626  ;;  %v1216_v13 = vmul.f32 %v8281_v5, %v8281_v5  ;;  %v8285_v2 = vadd.f32 1e-05, %v1469_v25  ;;  %907 = vmatmul.f32.gmra.mxu0 %v8278_v38 }
 0x35b   : > { %v2278_v15 = vmul.f32 %v6627_v37, %v1467_v22  ;;  %v8288_v48 = vpop.f32.mrf.mxu2  ;;  %v8290_v0 = vpop.f32.mrf.mxu3  ;;  %v2272_v12 = vmul.f32 %v6625_v44, %v2271_v23  ;;  %vm2284_vm7 = vweird.f32 %v6627_v37 }
 0x35c   : > { %10725 = vst [vmem:[#allocation95_spill] sm:$0xff] %v8288_v48  ;;  %6628 = vrsqrt.f32 %v8285_v2  ;;  %1516 = vmatmul.f32.gmra.mxu1 %v1216_v13  ;;  %vm2285_vm9 = vmor %vm2283_vm8, %vm2284_vm7  ;;  %v4192_v48 = vld [vmem:[#allocation8 + $0xa8] sm:$0xff]  ;;  %vm2293_vm11 = vweird.f32 %v8285_v2 }
 0x35d   : > { %10726 = vst [vmem:[#allocation96_spill] sm:$0xff] %v8290_v0  ;;  %v2279_v42 = vmul.f32 %v6627_v37, %v2278_v15  ;;  %v2276_v34 = vsel %vm2275_vm6, %v6625_v44, %v2272_v12  ;;  %4618 = vmatpush.msrb.mxu1 %v4192_v48 }
 0x35e   : > { %v3007_v50 = vmul.f32 %v2276_v34, %v8007_v58 }
 0x35f   : > { %v2280_v28 = vmul.f32 0.5, %v2279_v42  ;;  %v863_v25 = vpop.f32.mrf.mxu0 }
 0x360   : > { %v8298_v32 = vsub.f32 %v8049_v54, %v863_v25  ;;  %3309 = vmatmul.f32.gmra.mxu2 %v3007_v50  ;;  %3710 = vmatmul.f32.gmra.mxu3 %v3007_v50  ;;  %v8313_v25 = vld [vmem:[%s7234_s24 + $0x300] sm:$0xff] }
 0x361   : > { %v2281_v43 = vsub.f32 1.5, %v2280_v28  ;;  %v1472_v0 = vpop.f32.mrf.mxu1 }
 0x362   : > { %v6629_v23 = vpop.eup %6628  ;;  %v1217_v13 = vmul.f32 %v8298_v32, %v8298_v32  ;;  %v8302_v44 = vadd.f32 1e-05, %v1472_v0  ;;  %910 = vmatmul.f32.gmra.mxu0 %v8295_v41 }
 0x363   : > { %v2288_v58 = vmul.f32 %v6629_v23, %v8285_v2  ;;  %v8306_v15 = vpop.f32.mrf.mxu2  ;;  %v8308_v54 = vpop.f32.mrf.mxu3  ;;  %v2282_v12 = vmul.f32 %v6627_v37, %v2281_v43  ;;  %vm2294_vm10 = vweird.f32 %v6629_v23  ;;  %v4176_v43 = vld [vmem:[#allocation8 + $0x28] sm:$0xff] }
 0x364   : > { %10727 = vst [vmem:[#allocation97_spill] sm:$0xff] %v8306_v15  ;;  %6630 = vrsqrt.f32 %v8302_v44  ;;  %1519 = vmatmul.f32.gmra.mxu1 %v1217_v13  ;;  %v5144_v13 = vld [vmem:[#allocation10 + $0x38] sm:$0xff]  ;;  %4217 = vmatpush.msrb.mxu0 %v4176_v43  ;;  %vm2295_vm12 = vmor %vm2293_vm11, %vm2294_vm10  ;;  %v8330_v2 = vld [vmem:[%s7234_s24 + $0x308] sm:$0xff]  ;;  %vm2303_vm14 = vweird.f32 %v8302_v44 }
 0x365   : > { %10728 = vst [vmem:[#allocation98_spill] sm:$0xff] %v8308_v54  ;;  %v2289_v42 = vmul.f32 %v6629_v23, %v2288_v58  ;;  %v2286_v34 = vsel %vm2285_vm9, %v6627_v37, %v2282_v12  ;;  %5165 = vmatpush.msrb.mxu2 %v5144_v13  ;;  %v5695_v13 = vld [vmem:[#allocation11 + $0x48] sm:$0xff] }
 0x366   : > { %v3008_v50 = vmul.f32 %v2286_v34, %v8021_v53  ;;  %5712 = vmatpush.msrb.mxu3 %v5695_v13 }
 0x367   : > { %v2290_v0 = vmul.f32 0.5, %v2289_v42  ;;  %v866_v28 = vpop.f32.mrf.mxu0 }
 0x368   : > { %v8316_v22 = vsub.f32 %v8067_v20, %v866_v28  ;;  %3312 = vmatmul.f32.gmra.mxu2 %v3008_v50  ;;  %3713 = vmatmul.f32.gmra.mxu3 %v3008_v50 }
 0x369   : > { %v2291_v15 = vsub.f32 1.5, %v2290_v0  ;;  %v1475_v54 = vpop.f32.mrf.mxu1 }
 0x36a   : > { %v6631_v60 = vpop.eup %6630  ;;  %v1218_v37 = vmul.f32 %v8316_v22, %v8316_v22  ;;  %v1476_v53 = vadd.f32 1e-05, %v1475_v54  ;;  %913 = vmatmul.f32.gmra.mxu0 %v8313_v25 }
 0x36b   : > { %v2298_v20 = vmul.f32 %v6631_v60, %v8302_v44  ;;  %v8323_v58 = vpop.f32.mrf.mxu2  ;;  %v8325_v12 = vpop.f32.mrf.mxu3  ;;  %v2292_v42 = vmul.f32 %v6629_v23, %v2291_v15  ;;  %vm2304_vm13 = vweird.f32 %v6631_v60 }
 0x36c   : > { %10729 = vst [vmem:[#allocation99_spill] sm:$0xff] %v8323_v58  ;;  %6632 = vrsqrt.f32 %v1476_v53  ;;  %1522 = vmatmul.f32.gmra.mxu1 %v1218_v37  ;;  %vm2305_vm15 = vmor %vm2303_vm14, %vm2304_vm13  ;;  %vm2313_vm1 = vweird.f32 %v1476_v53 }
 0x36d   : > { %10730 = vst [vmem:[#allocation100_spill] sm:$0xff] %v8325_v12  ;;  %v2299_v54 = vmul.f32 %v6631_v60, %v2298_v20  ;;  %v2296_v34 = vsel %vm2295_vm12, %v6629_v23, %v2292_v42  ;;  %v8345_v12 = vld [vmem:[%s7234_s24 + $0x310] sm:$0xff] }
 0x36e   : > { %v3009_v48 = vmul.f32 %v2296_v34, %v8035_v46 }
 0x36f   : > { %v2300_v50 = vmul.f32 0.5, %v2299_v54  ;;  %v869_v0 = vpop.f32.mrf.mxu0 }
 0x370   : > { %v8333_v28 = vsub.f32 %v8084_v33, %v869_v0  ;;  %3315 = vmatmul.f32.gmra.mxu2 %v3009_v48  ;;  %3716 = vmatmul.f32.gmra.mxu3 %v3009_v48 }
 0x371   : > { %v2301_v15 = vsub.f32 1.5, %v2300_v50  ;;  %v1478_v43 = vpop.f32.mrf.mxu1 }
 0x372   : > { %v6633_v37 = vpop.eup %6632  ;;  %v1219_v20 = vmul.f32 %v8333_v28, %v8333_v28  ;;  %v1479_v23 = vadd.f32 1e-05, %v1478_v43  ;;  %916 = vmatmul.f32.gmra.mxu0 %v8330_v2 }
 0x373   : > { %v2308_v46 = vmul.f32 %v6633_v37, %v1476_v53  ;;  %v8339_v33 = vpop.f32.mrf.mxu2  ;;  %v8341_v42 = vpop.f32.mrf.mxu3  ;;  %v2302_v54 = vmul.f32 %v6631_v60, %v2301_v15  ;;  %vm2314_vm0 = vweird.f32 %v6633_v37 }
 0x374   : > { %10731 = vst [vmem:[#allocation101_spill] sm:$0xff] %v8339_v33  ;;  %6634 = vrsqrt.f32 %v1479_v23  ;;  %1525 = vmatmul.f32.gmra.mxu1 %v1219_v20  ;;  %vm2315_vm2 = vmor %vm2313_vm1, %vm2314_vm0  ;;  %vm2323_vm4 = vweird.f32 %v1479_v23 }
 0x375   : > { %10732 = vst [vmem:[#allocation102_spill] sm:$0xff] %v8341_v42  ;;  %v2309_v34 = vmul.f32 %v6633_v37, %v2308_v46  ;;  %v2306_v48 = vsel %vm2305_vm15, %v6631_v60, %v2302_v54  ;;  %v8359_v42 = vld [vmem:[%s7234_s24 + $0x318] sm:$0xff] }
 0x376   : > { %v3010_v50 = vmul.f32 %v2306_v48, %v8052_v10 }
 0x377   : > { %v2310_v0 = vmul.f32 0.5, %v2309_v34  ;;  %v872_v43 = vpop.f32.mrf.mxu0 }
 0x378   : > { %v8348_v13 = vsub.f32 %v8099_v36, %v872_v43  ;;  %3318 = vmatmul.f32.gmra.mxu2 %v3010_v50  ;;  %3719 = vmatmul.f32.gmra.mxu3 %v3010_v50 }
 0x379   : > { %v2311_v44 = vsub.f32 1.5, %v2310_v0  ;;  %v1481_v33 = vpop.f32.mrf.mxu1 }
 0x37a   : > { %v6635_v15 = vpop.eup %6634  ;;  %v1220_v20 = vmul.f32 %v8348_v13, %v8348_v13  ;;  %v1482_v60 = vadd.f32 1e-05, %v1481_v33  ;;  %919 = vmatmul.f32.gmra.mxu0 %v8345_v12 }
 0x37b   : > { %v2318_v10 = vmul.f32 %v6635_v15, %v1479_v23  ;;  %v8353_v46 = vpop.f32.mrf.mxu2  ;;  %v8355_v54 = vpop.f32.mrf.mxu3  ;;  %v2312_v36 = vmul.f32 %v6633_v37, %v2311_v44  ;;  %vm2324_vm3 = vweird.f32 %v6635_v15 }
 0x37c   : > { %10733 = vst [vmem:[#allocation103_spill] sm:$0xff] %v8353_v46  ;;  %6636 = vrsqrt.f32 %v1482_v60  ;;  %1528 = vmatmul.f32.gmra.mxu1 %v1220_v20  ;;  %vm2325_vm5 = vmor %vm2323_vm4, %vm2324_vm3  ;;  %vm2333_vm7 = vweird.f32 %v1482_v60 }
 0x37d   : > { %10734 = vst [vmem:[#allocation104_spill] sm:$0xff] %v8355_v54  ;;  %v2319_v34 = vmul.f32 %v6635_v15, %v2318_v10  ;;  %v2316_v48 = vsel %vm2315_vm2, %v6633_v37, %v2312_v36  ;;  %v8373_v54 = vld [vmem:[%s7234_s24 + $0x320] sm:$0xff] }
 0x37e   : > { %v3011_v50 = vmul.f32 %v2316_v48, %v8070_v14 }
 0x37f   : > { %v2320_v0 = vmul.f32 0.5, %v2319_v34  ;;  %v875_v43 = vpop.f32.mrf.mxu0 }
 0x380   : > { %v8362_v33 = vsub.f32 %v8113_v49, %v875_v43  ;;  %3321 = vmatmul.f32.gmra.mxu2 %v3011_v50  ;;  %3722 = vmatmul.f32.gmra.mxu3 %v3011_v50 }
 0x381   : > { %v2321_v53 = vsub.f32 1.5, %v2320_v0  ;;  %v1484_v46 = vpop.f32.mrf.mxu1 }
 0x382   : > { %v6637_v44 = vpop.eup %6636  ;;  %v1221_v20 = vmul.f32 %v8362_v33, %v8362_v33  ;;  %v1485_v37 = vadd.f32 1e-05, %v1484_v46  ;;  %922 = vmatmul.f32.gmra.mxu0 %v8359_v42 }
 0x383   : > { %v2328_v14 = vmul.f32 %v6637_v44, %v1482_v60  ;;  %v8367_v10 = vpop.f32.mrf.mxu2  ;;  %v8369_v36 = vpop.f32.mrf.mxu3  ;;  %v2322_v49 = vmul.f32 %v6635_v15, %v2321_v53  ;;  %vm2334_vm6 = vweird.f32 %v6637_v44 }
 0x384   : > { %10735 = vst [vmem:[#allocation105_spill] sm:$0xff] %v8367_v10  ;;  %6638 = vrsqrt.f32 %v1485_v37  ;;  %1531 = vmatmul.f32.gmra.mxu1 %v1221_v20  ;;  %vm2335_vm8 = vmor %vm2333_vm7, %vm2334_vm6  ;;  %vm2343_vm10 = vweird.f32 %v1485_v37 }
 0x385   : > { %10736 = vst [vmem:[#allocation106_spill] sm:$0xff] %v8369_v36  ;;  %v2329_v34 = vmul.f32 %v6637_v44, %v2328_v14  ;;  %v2326_v48 = vsel %vm2325_vm5, %v6635_v15, %v2322_v49  ;;  %v8387_v36 = vld [vmem:[%s7234_s24 + $0x328] sm:$0xff] }
 0x386   : > { %v3012_v50 = vmul.f32 %v2326_v48, %v8087_v9 }
 0x387   : > { %v2330_v0 = vmul.f32 0.5, %v2329_v34  ;;  %v878_v43 = vpop.f32.mrf.mxu0 }
 0x388   : > { %v8376_v46 = vsub.f32 %v8127_v31, %v878_v43  ;;  %3324 = vmatmul.f32.gmra.mxu2 %v3012_v50  ;;  %3725 = vmatmul.f32.gmra.mxu3 %v3012_v50 }
 0x389   : > { %v2331_v23 = vsub.f32 1.5, %v2330_v0  ;;  %v1487_v10 = vpop.f32.mrf.mxu1 }
 0x38a   : > { %v6639_v53 = vpop.eup %6638  ;;  %v1222_v20 = vmul.f32 %v8376_v46, %v8376_v46  ;;  %v1488_v15 = vadd.f32 1e-05, %v1487_v10  ;;  %925 = vmatmul.f32.gmra.mxu0 %v8373_v54 }
 0x38b   : > { %v2338_v9 = vmul.f32 %v6639_v53, %v1485_v37  ;;  %v8381_v14 = vpop.f32.mrf.mxu2  ;;  %v8383_v49 = vpop.f32.mrf.mxu3  ;;  %v2332_v31 = vmul.f32 %v6637_v44, %v2331_v23  ;;  %vm2344_vm9 = vweird.f32 %v6639_v53 }
 0x38c   : > { %10737 = vst [vmem:[#allocation107_spill] sm:$0xff] %v8381_v14  ;;  %6640 = vrsqrt.f32 %v1488_v15  ;;  %1534 = vmatmul.f32.gmra.mxu1 %v1222_v20  ;;  %vm2345_vm11 = vmor %vm2343_vm10, %vm2344_vm9  ;;  %vm2353_vm13 = vweird.f32 %v1488_v15 }
 0x38d   : > { %10738 = vst [vmem:[#allocation108_spill] sm:$0xff] %v8383_v49  ;;  %v2339_v34 = vmul.f32 %v6639_v53, %v2338_v9  ;;  %v2336_v48 = vsel %vm2335_vm8, %v6637_v44, %v2332_v31  ;;  %v8401_v49 = vld [vmem:[%s7234_s24 + $0x330] sm:$0xff] }
 0x38e   : > { %v3013_v50 = vmul.f32 %v2336_v48, %v8102_v62 }
 0x38f   : > { %v2340_v0 = vmul.f32 0.5, %v2339_v34  ;;  %v881_v43 = vpop.f32.mrf.mxu0 }
 0x390   : > { %v8390_v10 = vsub.f32 %v8141_v56, %v881_v43  ;;  %3327 = vmatmul.f32.gmra.mxu2 %v3013_v50  ;;  %3728 = vmatmul.f32.gmra.mxu3 %v3013_v50 }
 0x391   : > { %v2341_v60 = vsub.f32 1.5, %v2340_v0  ;;  %v1490_v14 = vpop.f32.mrf.mxu1 }
 0x392   : > { %v6641_v23 = vpop.eup %6640  ;;  %v1223_v20 = vmul.f32 %v8390_v10, %v8390_v10  ;;  %v1491_v44 = vadd.f32 1e-05, %v1490_v14  ;;  %928 = vmatmul.f32.gmra.mxu0 %v8387_v36 }
 0x393   : > { %v2348_v62 = vmul.f32 %v6641_v23, %v1488_v15  ;;  %v8395_v9 = vpop.f32.mrf.mxu2  ;;  %v8397_v31 = vpop.f32.mrf.mxu3  ;;  %v2342_v56 = vmul.f32 %v6639_v53, %v2341_v60  ;;  %vm2354_vm12 = vweird.f32 %v6641_v23 }
 0x394   : > { %10739 = vst [vmem:[#allocation109_spill] sm:$0xff] %v8395_v9  ;;  %6642 = vrsqrt.f32 %v1491_v44  ;;  %1537 = vmatmul.f32.gmra.mxu1 %v1223_v20  ;;  %vm2355_vm14 = vmor %vm2353_vm13, %vm2354_vm12  ;;  %vm2363_vm0 = vweird.f32 %v1491_v44 }
 0x395   : > { %10740 = vst [vmem:[#allocation110_spill] sm:$0xff] %v8397_v31  ;;  %v2349_v34 = vmul.f32 %v6641_v23, %v2348_v62  ;;  %v2346_v48 = vsel %vm2345_vm11, %v6639_v53, %v2342_v56 }
 0x396   : > { %v3014_v50 = vmul.f32 %v2346_v48, %v8116_v30 }
 0x397   : > { %v2350_v0 = vmul.f32 0.5, %v2349_v34  ;;  %v884_v43 = vpop.f32.mrf.mxu0 }
 0x398   : > { %v8404_v14 = vsub.f32 %v8155_v18, %v884_v43  ;;  %3330 = vmatmul.f32.gmra.mxu2 %v3014_v50  ;;  %3731 = vmatmul.f32.gmra.mxu3 %v3014_v50  ;;  %v8418_v43 = vld [vmem:[%s7234_s24 + $0x338] sm:$0xff] }
 0x399   : > { %v2351_v37 = vsub.f32 1.5, %v2350_v0  ;;  %v1493_v9 = vpop.f32.mrf.mxu1 }
 0x39a   : > { %v6643_v60 = vpop.eup %6642  ;;  %v1224_v20 = vmul.f32 %v8404_v14, %v8404_v14  ;;  %v8408_v53 = vadd.f32 1e-05, %v1493_v9  ;;  %931 = vmatmul.f32.gmra.mxu0 %v8401_v49 }
 0x39b   : > { %v2358_v30 = vmul.f32 %v6643_v60, %v1491_v44  ;;  %v8411_v62 = vpop.f32.mrf.mxu2  ;;  %v8413_v18 = vpop.f32.mrf.mxu3  ;;  %v2352_v56 = vmul.f32 %v6641_v23, %v2351_v37  ;;  %vm2364_vm15 = vweird.f32 %v6643_v60 }
 0x39c   : > { %10741 = vst [vmem:[#allocation111_spill] sm:$0xff] %v8411_v62  ;;  %6644 = vrsqrt.f32 %v8408_v53  ;;  %1540 = vmatmul.f32.gmra.mxu1 %v1224_v20  ;;  %vm2365_vm1 = vmor %vm2363_vm0, %vm2364_vm15  ;;  %v4191_v62 = vld [vmem:[#allocation8 + $0xa0] sm:$0xff]  ;;  %vm2373_vm3 = vweird.f32 %v8408_v53 }
 0x39d   : > { %10742 = vst [vmem:[#allocation112_spill] sm:$0xff] %v8413_v18  ;;  %v2359_v34 = vmul.f32 %v6643_v60, %v2358_v30  ;;  %v2356_v48 = vsel %vm2355_vm14, %v6641_v23, %v2352_v56  ;;  %4619 = vmatpush.msrb.mxu1 %v4191_v62 }
 0x39e   : > { %v3015_v50 = vmul.f32 %v2356_v48, %v8130_v57 }
 0x39f   : > { %v2360_v0 = vmul.f32 0.5, %v2359_v34  ;;  %v887_v9 = vpop.f32.mrf.mxu0 }
 0x3a0   : > { %v8421_v15 = vsub.f32 %v8172_v7, %v887_v9  ;;  %3333 = vmatmul.f32.gmra.mxu2 %v3015_v50  ;;  %3734 = vmatmul.f32.gmra.mxu3 %v3015_v50  ;;  %v8436_v9 = vld [vmem:[%s7234_s24 + $0x340] sm:$0xff] }
 0x3a1   : > { %v2361_v31 = vsub.f32 1.5, %v2360_v0  ;;  %v1496_v18 = vpop.f32.mrf.mxu1 }
 0x3a2   : > { %v6645_v37 = vpop.eup %6644  ;;  %v1225_v20 = vmul.f32 %v8421_v15, %v8421_v15  ;;  %v8425_v23 = vadd.f32 1e-05, %v1496_v18  ;;  %934 = vmatmul.f32.gmra.mxu0 %v8418_v43 }
 0x3a3   : > { %v2368_v57 = vmul.f32 %v6645_v37, %v8408_v53  ;;  %v8429_v30 = vpop.f32.mrf.mxu2  ;;  %v8431_v7 = vpop.f32.mrf.mxu3  ;;  %v2362_v56 = vmul.f32 %v6643_v60, %v2361_v31  ;;  %vm2374_vm2 = vweird.f32 %v6645_v37  ;;  %v4175_v31 = vld [vmem:[#allocation8 + $0x20] sm:$0xff]  ;;  %v8453_v53 = vld [vmem:[%s7234_s24 + $0x348] sm:$0xff] }
 0x3a4   : > { %10743 = vst [vmem:[#allocation113_spill] sm:$0xff] %v8429_v30  ;;  %6646 = vrsqrt.f32 %v8425_v23  ;;  %1543 = vmatmul.f32.gmra.mxu1 %v1225_v20  ;;  %v5143_v20 = vld [vmem:[#allocation10 + $0x30] sm:$0xff]  ;;  %4218 = vmatpush.msrb.mxu0 %v4175_v31  ;;  %vm2375_vm4 = vmor %vm2373_vm3, %vm2374_vm2  ;;  %vm2383_vm6 = vweird.f32 %v8425_v23 }
 0x3a5   : > { %10744 = vst [vmem:[#allocation114_spill] sm:$0xff] %v8431_v7  ;;  %v2369_v34 = vmul.f32 %v6645_v37, %v2368_v57  ;;  %v2366_v48 = vsel %vm2365_vm1, %v6643_v60, %v2362_v56  ;;  %5166 = vmatpush.msrb.mxu2 %v5143_v20  ;;  %v5694_v20 = vld [vmem:[#allocation11 + $0x40] sm:$0xff] }
 0x3a6   : > { %v3016_v50 = vmul.f32 %v2366_v48, %v8144_v52  ;;  %5713 = vmatpush.msrb.mxu3 %v5694_v20 }
 0x3a7   : > { %v2370_v18 = vmul.f32 0.5, %v2369_v34  ;;  %v890_v0 = vpop.f32.mrf.mxu0 }
 0x3a8   : > { %v8439_v44 = vsub.f32 %v8190_v11, %v890_v0  ;;  %3336 = vmatmul.f32.gmra.mxu2 %v3016_v50  ;;  %3737 = vmatmul.f32.gmra.mxu3 %v3016_v50 }
 0x3a9   : > { %v2371_v30 = vsub.f32 1.5, %v2370_v18  ;;  %v1499_v7 = vpop.f32.mrf.mxu1 }
 0x3aa   : > { %v6647_v58 = vpop.eup %6646  ;;  %v1226_v60 = vmul.f32 %v8439_v44, %v8439_v44  ;;  %v1500_v52 = vadd.f32 1e-05, %v1499_v7  ;;  %937 = vmatmul.f32.gmra.mxu0 %v8436_v9 }
 0x3ab   : > { %v2378_v11 = vmul.f32 %v6647_v58, %v8425_v23  ;;  %v8446_v57 = vpop.f32.mrf.mxu2  ;;  %v8448_v56 = vpop.f32.mrf.mxu3  ;;  %v2372_v34 = vmul.f32 %v6645_v37, %v2371_v30  ;;  %vm2384_vm5 = vweird.f32 %v6647_v58 }
 0x3ac   : > { %10745 = vst [vmem:[#allocation115_spill] sm:$0xff] %v8446_v57  ;;  %6648 = vrsqrt.f32 %v1500_v52  ;;  %1546 = vmatmul.f32.gmra.mxu1 %v1226_v60  ;;  %vm2385_vm7 = vmor %vm2383_vm6, %vm2384_vm5  ;;  %vm2393_vm9 = vweird.f32 %v1500_v52 }
 0x3ad   : > { %10746 = vst [vmem:[#allocation116_spill] sm:$0xff] %v8448_v56  ;;  %v2379_v7 = vmul.f32 %v6647_v58, %v2378_v11  ;;  %v2376_v48 = vsel %vm2375_vm4, %v6645_v37, %v2372_v34  ;;  %v8468_v56 = vld [vmem:[%s7234_s24 + $0x350] sm:$0xff] }
 0x3ae   : > { %v3017_v62 = vmul.f32 %v2376_v48, %v8158_v51 }
 0x3af   : > { %v2380_v50 = vmul.f32 0.5, %v2379_v7  ;;  %v893_v18 = vpop.f32.mrf.mxu0 }
 0x3b0   : > { %v8456_v0 = vsub.f32 %v8207_v26, %v893_v18  ;;  %3339 = vmatmul.f32.gmra.mxu2 %v3017_v62  ;;  %3740 = vmatmul.f32.gmra.mxu3 %v3017_v62 }
 0x3b1   : > { %v2381_v30 = vsub.f32 1.5, %v2380_v50  ;;  %v1502_v31 = vpop.f32.mrf.mxu1 }
 0x3b2   : > { %v6649_v60 = vpop.eup %6648  ;;  %v1227_v11 = vmul.f32 %v8456_v0, %v8456_v0  ;;  %v1503_v37 = vadd.f32 1e-05, %v1502_v31  ;;  %940 = vmatmul.f32.gmra.mxu0 %v8453_v53 }
 0x3b3   : > { %v2388_v51 = vmul.f32 %v6649_v60, %v1500_v52  ;;  %v8462_v26 = vpop.f32.mrf.mxu2  ;;  %v8464_v34 = vpop.f32.mrf.mxu3  ;;  %v2382_v7 = vmul.f32 %v6647_v58, %v2381_v30  ;;  %vm2394_vm8 = vweird.f32 %v6649_v60 }
 0x3b4   : > { %10747 = vst [vmem:[#allocation117_spill] sm:$0xff] %v8462_v26  ;;  %6650 = vrsqrt.f32 %v1503_v37  ;;  %1549 = vmatmul.f32.gmra.mxu1 %v1227_v11  ;;  %vm2395_vm10 = vmor %vm2393_vm9, %vm2394_vm8  ;;  %vm2403_vm12 = vweird.f32 %v1503_v37 }
 0x3b5   : > { %10748 = vst [vmem:[#allocation118_spill] sm:$0xff] %v8464_v34  ;;  %v2389_v48 = vmul.f32 %v6649_v60, %v2388_v51  ;;  %v2386_v62 = vsel %vm2385_vm7, %v6647_v58, %v2382_v7  ;;  %v8482_v34 = vld [vmem:[%s7234_s24 + $0x358] sm:$0xff] }
 0x3b6   : > { %v3018_v50 = vmul.f32 %v2386_v62, %v8175_v8 }
 0x3b7   : > { %v2390_v18 = vmul.f32 0.5, %v2389_v48  ;;  %v896_v31 = vpop.f32.mrf.mxu0 }
 0x3b8   : > { %v8471_v20 = vsub.f32 %v8222_v6, %v896_v31  ;;  %3342 = vmatmul.f32.gmra.mxu2 %v3018_v50  ;;  %3743 = vmatmul.f32.gmra.mxu3 %v3018_v50 }
 0x3b9   : > { %v2391_v23 = vsub.f32 1.5, %v2390_v18  ;;  %v1505_v26 = vpop.f32.mrf.mxu1 }
 0x3ba   : > { %v6651_v30 = vpop.eup %6650  ;;  %v1228_v11 = vmul.f32 %v8471_v20, %v8471_v20  ;;  %v1506_v58 = vadd.f32 1e-05, %v1505_v26  ;;  %943 = vmatmul.f32.gmra.mxu0 %v8468_v56 }
 0x3bb   : > { %v2398_v8 = vmul.f32 %v6651_v30, %v1503_v37  ;;  %v8476_v51 = vpop.f32.mrf.mxu2  ;;  %v8478_v7 = vpop.f32.mrf.mxu3  ;;  %v2392_v6 = vmul.f32 %v6649_v60, %v2391_v23  ;;  %vm2404_vm11 = vweird.f32 %v6651_v30 }
 0x3bc   : > { %10749 = vst [vmem:[#allocation119_spill] sm:$0xff] %v8476_v51  ;;  %6652 = vrsqrt.f32 %v1506_v58  ;;  %1552 = vmatmul.f32.gmra.mxu1 %v1228_v11  ;;  %vm2405_vm13 = vmor %vm2403_vm12, %vm2404_vm11  ;;  %vm2413_vm15 = vweird.f32 %v1506_v58 }
 0x3bd   : > { %10750 = vst [vmem:[#allocation120_spill] sm:$0xff] %v8478_v7  ;;  %v2399_v48 = vmul.f32 %v6651_v30, %v2398_v8  ;;  %v2396_v62 = vsel %vm2395_vm10, %v6649_v60, %v2392_v6  ;;  %v8496_v7 = vld [vmem:[%s7234_s24 + $0x360] sm:$0xff] }
 0x3be   : > { %v3019_v50 = vmul.f32 %v2396_v62, %v8193_v17 }
 0x3bf   : > { %v2400_v18 = vmul.f32 0.5, %v2399_v48  ;;  %v899_v31 = vpop.f32.mrf.mxu0 }
 0x3c0   : > { %v8485_v26 = vsub.f32 %v8236_v4, %v899_v31  ;;  %3345 = vmatmul.f32.gmra.mxu2 %v3019_v50  ;;  %3746 = vmatmul.f32.gmra.mxu3 %v3019_v50 }
 0x3c1   : > { %v2401_v52 = vsub.f32 1.5, %v2400_v18  ;;  %v1508_v51 = vpop.f32.mrf.mxu1 }
 0x3c2   : > { %v6653_v23 = vpop.eup %6652  ;;  %v1229_v11 = vmul.f32 %v8485_v26, %v8485_v26  ;;  %v1509_v60 = vadd.f32 1e-05, %v1508_v51  ;;  %946 = vmatmul.f32.gmra.mxu0 %v8482_v34 }
 0x3c3   : > { %v2408_v17 = vmul.f32 %v6653_v23, %v1506_v58  ;;  %v8490_v8 = vpop.f32.mrf.mxu2  ;;  %v8492_v6 = vpop.f32.mrf.mxu3  ;;  %v2402_v4 = vmul.f32 %v6651_v30, %v2401_v52  ;;  %vm2414_vm14 = vweird.f32 %v6653_v23 }
 0x3c4   : > { %10751 = vst [vmem:[#allocation121_spill] sm:$0xff] %v8490_v8  ;;  %6654 = vrsqrt.f32 %v1509_v60  ;;  %1555 = vmatmul.f32.gmra.mxu1 %v1229_v11  ;;  %vm2415_vm0 = vmor %vm2413_vm15, %vm2414_vm14  ;;  %vm2423_vm2 = vweird.f32 %v1509_v60 }
 0x3c5   : > { %10752 = vst [vmem:[#allocation122_spill] sm:$0xff] %v8492_v6  ;;  %v2409_v48 = vmul.f32 %v6653_v23, %v2408_v17  ;;  %v2406_v62 = vsel %vm2405_vm13, %v6651_v30, %v2402_v4  ;;  %v8510_v6 = vld [vmem:[%s7234_s24 + $0x368] sm:$0xff] }
 0x3c6   : > { %v3020_v50 = vmul.f32 %v2406_v62, %v8210_v59 }
 0x3c7   : > { %v2410_v18 = vmul.f32 0.5, %v2409_v48  ;;  %v902_v31 = vpop.f32.mrf.mxu0 }
 0x3c8   : > { %v8499_v51 = vsub.f32 %v8250_v1, %v902_v31  ;;  %3348 = vmatmul.f32.gmra.mxu2 %v3020_v50  ;;  %3749 = vmatmul.f32.gmra.mxu3 %v3020_v50 }
 0x3c9   : > { %v2411_v37 = vsub.f32 1.5, %v2410_v18  ;;  %v1511_v8 = vpop.f32.mrf.mxu1 }
 0x3ca   : > { %v6655_v52 = vpop.eup %6654  ;;  %v1230_v11 = vmul.f32 %v8499_v51, %v8499_v51  ;;  %v1512_v30 = vadd.f32 1e-05, %v1511_v8  ;;  %949 = vmatmul.f32.gmra.mxu0 %v8496_v7 }
 0x3cb   : > { %v2418_v59 = vmul.f32 %v6655_v52, %v1509_v60  ;;  %v8504_v17 = vpop.f32.mrf.mxu2  ;;  %v8506_v4 = vpop.f32.mrf.mxu3  ;;  %v2412_v1 = vmul.f32 %v6653_v23, %v2411_v37  ;;  %vm2424_vm1 = vweird.f32 %v6655_v52 }
 0x3cc   : > { %10753 = vst [vmem:[#allocation123_spill] sm:$0xff] %v8504_v17  ;;  %6656 = vrsqrt.f32 %v1512_v30  ;;  %1558 = vmatmul.f32.gmra.mxu1 %v1230_v11  ;;  %vm2425_vm3 = vmor %vm2423_vm2, %vm2424_vm1  ;;  %vm2433_vm5 = vweird.f32 %v1512_v30 }
 0x3cd   : > { %10754 = vst [vmem:[#allocation124_spill] sm:$0xff] %v8506_v4  ;;  %v2419_v48 = vmul.f32 %v6655_v52, %v2418_v59  ;;  %v2416_v62 = vsel %vm2415_vm0, %v6653_v23, %v2412_v1  ;;  %v8524_v4 = vld [vmem:[%s7234_s24 + $0x370] sm:$0xff] }
 0x3ce   : > { %v3021_v50 = vmul.f32 %v2416_v62, %v8225_v47 }
 0x3cf   : > { %v2420_v18 = vmul.f32 0.5, %v2419_v48  ;;  %v905_v31 = vpop.f32.mrf.mxu0 }
 0x3d0   : > { %v8513_v8 = vsub.f32 %v8264_v24, %v905_v31  ;;  %3351 = vmatmul.f32.gmra.mxu2 %v3021_v50  ;;  %3752 = vmatmul.f32.gmra.mxu3 %v3021_v50 }
 0x3d1   : > { %v2421_v58 = vsub.f32 1.5, %v2420_v18  ;;  %v1514_v17 = vpop.f32.mrf.mxu1 }
 0x3d2   : > { %v6657_v37 = vpop.eup %6656  ;;  %v1231_v11 = vmul.f32 %v8513_v8, %v8513_v8  ;;  %v1515_v23 = vadd.f32 1e-05, %v1514_v17  ;;  %952 = vmatmul.f32.gmra.mxu0 %v8510_v6 }
 0x3d3   : > { %v2428_v47 = vmul.f32 %v6657_v37, %v1512_v30  ;;  %v8518_v59 = vpop.f32.mrf.mxu2  ;;  %v8520_v1 = vpop.f32.mrf.mxu3  ;;  %v2422_v24 = vmul.f32 %v6655_v52, %v2421_v58  ;;  %vm2434_vm4 = vweird.f32 %v6657_v37 }
 0x3d4   : > { %10755 = vst [vmem:[#allocation125_spill] sm:$0xff] %v8518_v59  ;;  %6658 = vrsqrt.f32 %v1515_v23  ;;  %1561 = vmatmul.f32.gmra.mxu1 %v1231_v11  ;;  %vm2435_vm6 = vmor %vm2433_vm5, %vm2434_vm4  ;;  %vm2443_vm8 = vweird.f32 %v1515_v23 }
 0x3d5   : > { %10756 = vst [vmem:[#allocation126_spill] sm:$0xff] %v8520_v1  ;;  %v2429_v48 = vmul.f32 %v6657_v37, %v2428_v47  ;;  %v2426_v62 = vsel %vm2425_vm3, %v6655_v52, %v2422_v24 }
 0x3d6   : > { %v3022_v50 = vmul.f32 %v2426_v62, %v8239_v29 }
 0x3d7   : > { %v2430_v18 = vmul.f32 0.5, %v2429_v48  ;;  %v908_v31 = vpop.f32.mrf.mxu0 }
 0x3d8   : > { %v8527_v17 = vsub.f32 %v8278_v38, %v908_v31  ;;  %3354 = vmatmul.f32.gmra.mxu2 %v3022_v50  ;;  %3755 = vmatmul.f32.gmra.mxu3 %v3022_v50  ;;  %v8541_v31 = vld [vmem:[%s7234_s24 + $0x378] sm:$0xff] }
 0x3d9   : > { %v2431_v60 = vsub.f32 1.5, %v2430_v18  ;;  %v1517_v59 = vpop.f32.mrf.mxu1 }
 0x3da   : > { %v6659_v58 = vpop.eup %6658  ;;  %v1232_v11 = vmul.f32 %v8527_v17, %v8527_v17  ;;  %v8531_v52 = vadd.f32 1e-05, %v1517_v59  ;;  %955 = vmatmul.f32.gmra.mxu0 %v8524_v4 }
 0x3db   : > { %v2438_v29 = vmul.f32 %v6659_v58, %v1515_v23  ;;  %v8534_v47 = vpop.f32.mrf.mxu2  ;;  %v8536_v38 = vpop.f32.mrf.mxu3  ;;  %v2432_v24 = vmul.f32 %v6657_v37, %v2431_v60  ;;  %vm2444_vm7 = vweird.f32 %v6659_v58 }
 0x3dc   : > { %10757 = vst [vmem:[#allocation127_spill] sm:$0xff] %v8534_v47  ;;  %6660 = vrsqrt.f32 %v8531_v52  ;;  %1564 = vmatmul.f32.gmra.mxu1 %v1232_v11  ;;  %vm2445_vm9 = vmor %vm2443_vm8, %vm2444_vm7  ;;  %v4190_v47 = vld [vmem:[#allocation8 + $0x98] sm:$0xff]  ;;  %vm2453_vm11 = vweird.f32 %v8531_v52 }
 0x3dd   : > { %10758 = vst [vmem:[#allocation128_spill] sm:$0xff] %v8536_v38  ;;  %v2439_v48 = vmul.f32 %v6659_v58, %v2438_v29  ;;  %v2436_v62 = vsel %vm2435_vm6, %v6657_v37, %v2432_v24  ;;  %4620 = vmatpush.msrb.mxu1 %v4190_v47 }
 0x3de   : > { %v3023_v50 = vmul.f32 %v2436_v62, %v8253_v19 }
 0x3df   : > { %v2440_v18 = vmul.f32 0.5, %v2439_v48  ;;  %v911_v59 = vpop.f32.mrf.mxu0 }
 0x3e0   : > { %v8544_v30 = vsub.f32 %v8295_v41, %v911_v59  ;;  %3357 = vmatmul.f32.gmra.mxu2 %v3023_v50  ;;  %3758 = vmatmul.f32.gmra.mxu3 %v3023_v50  ;;  %v8559_v59 = vld [vmem:[%s7234_s24 + $0x380] sm:$0xff] }
 0x3e1   : > { %v2441_v1 = vsub.f32 1.5, %v2440_v18  ;;  %v1520_v38 = vpop.f32.mrf.mxu1 }
 0x3e2   : > { %v6661_v60 = vpop.eup %6660  ;;  %v1233_v11 = vmul.f32 %v8544_v30, %v8544_v30  ;;  %v8548_v37 = vadd.f32 1e-05, %v1520_v38  ;;  %958 = vmatmul.f32.gmra.mxu0 %v8541_v31 }
 0x3e3   : > { %v2448_v19 = vmul.f32 %v6661_v60, %v8531_v52  ;;  %v8552_v29 = vpop.f32.mrf.mxu2  ;;  %v8554_v41 = vpop.f32.mrf.mxu3  ;;  %v2442_v24 = vmul.f32 %v6659_v58, %v2441_v1  ;;  %vm2454_vm10 = vweird.f32 %v6661_v60  ;;  %v4174_v1 = vld [vmem:[#allocation8 + $0x18] sm:$0xff]  ;;  %v8576_v52 = vld [vmem:[%s7234_s24 + $0x388] sm:$0xff] }
 0x3e4   : > { %10759 = vst [vmem:[#allocation129_spill] sm:$0xff] %v8552_v29  ;;  %6662 = vrsqrt.f32 %v8548_v37  ;;  %1567 = vmatmul.f32.gmra.mxu1 %v1233_v11  ;;  %v5142_v11 = vld [vmem:[#allocation10 + $0x28] sm:$0xff]  ;;  %4219 = vmatpush.msrb.mxu0 %v4174_v1  ;;  %vm2455_vm12 = vmor %vm2453_vm11, %vm2454_vm10  ;;  %vm2463_vm14 = vweird.f32 %v8548_v37 }
 0x3e5   : > { %10760 = vst [vmem:[#allocation130_spill] sm:$0xff] %v8554_v41  ;;  %v2449_v48 = vmul.f32 %v6661_v60, %v2448_v19  ;;  %v2446_v62 = vsel %vm2445_vm9, %v6659_v58, %v2442_v24  ;;  %5167 = vmatpush.msrb.mxu2 %v5142_v11  ;;  %v5693_v11 = vld [vmem:[#allocation11 + $0x38] sm:$0xff] }
 0x3e6   : > { %v3024_v50 = vmul.f32 %v2446_v62, %v8267_v40  ;;  %5714 = vmatpush.msrb.mxu3 %v5693_v11 }
 0x3e7   : > { %v2450_v38 = vmul.f32 0.5, %v2449_v48  ;;  %v914_v18 = vpop.f32.mrf.mxu0 }
 0x3e8   : > { %v8562_v23 = vsub.f32 %v8313_v25, %v914_v18  ;;  %3360 = vmatmul.f32.gmra.mxu2 %v3024_v50  ;;  %3761 = vmatmul.f32.gmra.mxu3 %v3024_v50 }
 0x3e9   : > { %v2451_v29 = vsub.f32 1.5, %v2450_v38  ;;  %v1523_v41 = vpop.f32.mrf.mxu1 }
 0x3ea   : > { %v6663_v57 = vpop.eup %6662  ;;  %v1234_v58 = vmul.f32 %v8562_v23, %v8562_v23  ;;  %v1524_v40 = vadd.f32 1e-05, %v1523_v41  ;;  %961 = vmatmul.f32.gmra.mxu0 %v8559_v59 }
 0x3eb   : > { %v2458_v25 = vmul.f32 %v6663_v57, %v8548_v37  ;;  %v8569_v19 = vpop.f32.mrf.mxu2  ;;  %v8571_v24 = vpop.f32.mrf.mxu3  ;;  %v2452_v48 = vmul.f32 %v6661_v60, %v2451_v29  ;;  %vm2464_vm13 = vweird.f32 %v6663_v57 }
 0x3ec   : > { %10761 = vst [vmem:[#allocation131_spill] sm:$0xff] %v8569_v19  ;;  %6664 = vrsqrt.f32 %v1524_v40  ;;  %1570 = vmatmul.f32.gmra.mxu1 %v1234_v58  ;;  %vm2465_vm15 = vmor %vm2463_vm14, %vm2464_vm13  ;;  %vm2473_vm1 = vweird.f32 %v1524_v40 }
 0x3ed   : > { %10762 = vst [vmem:[#allocation132_spill] sm:$0xff] %v8571_v24  ;;  %v2459_v41 = vmul.f32 %v6663_v57, %v2458_v25  ;;  %v2456_v62 = vsel %vm2455_vm12, %v6661_v60, %v2452_v48  ;;  %v8591_v24 = vld [vmem:[%s7234_s24 + $0x390] sm:$0xff] }
 0x3ee   : > { %v3025_v47 = vmul.f32 %v2456_v62, %v8281_v5 }
 0x3ef   : > { %v2460_v50 = vmul.f32 0.5, %v2459_v41  ;;  %v917_v38 = vpop.f32.mrf.mxu0 }
 0x3f0   : > { %v8579_v18 = vsub.f32 %v8330_v2, %v917_v38  ;;  %3363 = vmatmul.f32.gmra.mxu2 %v3025_v47  ;;  %3764 = vmatmul.f32.gmra.mxu3 %v3025_v47 }
 0x3f1   : > { %v2461_v29 = vsub.f32 1.5, %v2460_v50  ;;  %v1526_v1 = vpop.f32.mrf.mxu1 }
 0x3f2   : > { %v6665_v58 = vpop.eup %6664  ;;  %v1235_v25 = vmul.f32 %v8579_v18, %v8579_v18  ;;  %v1527_v60 = vadd.f32 1e-05, %v1526_v1  ;;  %964 = vmatmul.f32.gmra.mxu0 %v8576_v52 }
 0x3f3   : > { %v2468_v5 = vmul.f32 %v6665_v58, %v1524_v40  ;;  %v8585_v2 = vpop.f32.mrf.mxu2  ;;  %v8587_v48 = vpop.f32.mrf.mxu3  ;;  %v2462_v41 = vmul.f32 %v6663_v57, %v2461_v29  ;;  %vm2474_vm0 = vweird.f32 %v6665_v58 }
 0x3f4   : > { %10763 = vst [vmem:[#allocation133_spill] sm:$0xff] %v8585_v2  ;;  %6666 = vrsqrt.f32 %v1527_v60  ;;  %1573 = vmatmul.f32.gmra.mxu1 %v1235_v25  ;;  %vm2475_vm2 = vmor %vm2473_vm1, %vm2474_vm0  ;;  %vm2483_vm4 = vweird.f32 %v1527_v60 }
 0x3f5   : > { %10764 = vst [vmem:[#allocation134_spill] sm:$0xff] %v8587_v48  ;;  %v2469_v62 = vmul.f32 %v6665_v58, %v2468_v5  ;;  %v2466_v47 = vsel %vm2465_vm15, %v6663_v57, %v2462_v41  ;;  %v8605_v48 = vld [vmem:[%s7234_s24 + $0x398] sm:$0xff] }
 0x3f6   : > { %v3026_v50 = vmul.f32 %v2466_v47, %v8298_v32 }
 0x3f7   : > { %v2470_v38 = vmul.f32 0.5, %v2469_v62  ;;  %v920_v1 = vpop.f32.mrf.mxu0 }
 0x3f8   : > { %v8594_v11 = vsub.f32 %v8345_v12, %v920_v1  ;;  %3366 = vmatmul.f32.gmra.mxu2 %v3026_v50  ;;  %3767 = vmatmul.f32.gmra.mxu3 %v3026_v50 }
 0x3f9   : > { %v2471_v37 = vsub.f32 1.5, %v2470_v38  ;;  %v1529_v2 = vpop.f32.mrf.mxu1 }
 0x3fa   : > { %v6667_v29 = vpop.eup %6666  ;;  %v1236_v25 = vmul.f32 %v8594_v11, %v8594_v11  ;;  %v1530_v57 = vadd.f32 1e-05, %v1529_v2  ;;  %967 = vmatmul.f32.gmra.mxu0 %v8591_v24 }
 0x3fb   : > { %v2478_v32 = vmul.f32 %v6667_v29, %v1527_v60  ;;  %v8599_v5 = vpop.f32.mrf.mxu2  ;;  %v8601_v41 = vpop.f32.mrf.mxu3  ;;  %v2472_v12 = vmul.f32 %v6665_v58, %v2471_v37  ;;  %vm2484_vm3 = vweird.f32 %v6667_v29 }
 0x3fc   : > { %10765 = vst [vmem:[#allocation135_spill] sm:$0xff] %v8599_v5  ;;  %6668 = vrsqrt.f32 %v1530_v57  ;;  %1576 = vmatmul.f32.gmra.mxu1 %v1236_v25  ;;  %vm2485_vm5 = vmor %vm2483_vm4, %vm2484_vm3  ;;  %vm2493_vm7 = vweird.f32 %v1530_v57 }
 0x3fd   : > { %10766 = vst [vmem:[#allocation136_spill] sm:$0xff] %v8601_v41  ;;  %v2479_v62 = vmul.f32 %v6667_v29, %v2478_v32  ;;  %v2476_v47 = vsel %vm2475_vm2, %v6665_v58, %v2472_v12  ;;  %v8619_v41 = vld [vmem:[%s7234_s24 + $0x3a0] sm:$0xff] }
 0x3fe   : > { %v3027_v50 = vmul.f32 %v2476_v47, %v8316_v22 }
 0x3ff   : > { %v2480_v38 = vmul.f32 0.5, %v2479_v62  ;;  %v923_v1 = vpop.f32.mrf.mxu0 }
 0x400   : > { %v8608_v2 = vsub.f32 %v8359_v42, %v923_v1  ;;  %3369 = vmatmul.f32.gmra.mxu2 %v3027_v50  ;;  %3770 = vmatmul.f32.gmra.mxu3 %v3027_v50 }
 0x401   : > { %v2481_v40 = vsub.f32 1.5, %v2480_v38  ;;  %v1532_v5 = vpop.f32.mrf.mxu1 }
 0x402   : > { %v6669_v37 = vpop.eup %6668  ;;  %v1237_v25 = vmul.f32 %v8608_v2, %v8608_v2  ;;  %v1533_v58 = vadd.f32 1e-05, %v1532_v5  ;;  %970 = vmatmul.f32.gmra.mxu0 %v8605_v48 }
 0x403   : > { %v2488_v22 = vmul.f32 %v6669_v37, %v1530_v57  ;;  %v8613_v32 = vpop.f32.mrf.mxu2  ;;  %v8615_v12 = vpop.f32.mrf.mxu3  ;;  %v2482_v42 = vmul.f32 %v6667_v29, %v2481_v40  ;;  %vm2494_vm6 = vweird.f32 %v6669_v37 }
 0x404   : > { %10767 = vst [vmem:[#allocation137_spill] sm:$0xff] %v8613_v32  ;;  %6670 = vrsqrt.f32 %v1533_v58  ;;  %1579 = vmatmul.f32.gmra.mxu1 %v1237_v25  ;;  %vm2495_vm8 = vmor %vm2493_vm7, %vm2494_vm6  ;;  %vm2503_vm10 = vweird.f32 %v1533_v58 }
 0x405   : > { %10768 = vst [vmem:[#allocation138_spill] sm:$0xff] %v8615_v12  ;;  %v2489_v62 = vmul.f32 %v6669_v37, %v2488_v22  ;;  %v2486_v47 = vsel %vm2485_vm5, %v6667_v29, %v2482_v42  ;;  %v8633_v12 = vld [vmem:[%s7234_s24 + $0x3a8] sm:$0xff] }
 0x406   : > { %v3028_v50 = vmul.f32 %v2486_v47, %v8333_v28 }
 0x407   : > { %v2490_v38 = vmul.f32 0.5, %v2489_v62  ;;  %v926_v1 = vpop.f32.mrf.mxu0 }
 0x408   : > { %v8622_v5 = vsub.f32 %v8373_v54, %v926_v1  ;;  %3372 = vmatmul.f32.gmra.mxu2 %v3028_v50  ;;  %3773 = vmatmul.f32.gmra.mxu3 %v3028_v50 }
 0x409   : > { %v2491_v60 = vsub.f32 1.5, %v2490_v38  ;;  %v1535_v32 = vpop.f32.mrf.mxu1 }
 0x40a   : > { %v6671_v40 = vpop.eup %6670  ;;  %v1238_v25 = vmul.f32 %v8622_v5, %v8622_v5  ;;  %v1536_v29 = vadd.f32 1e-05, %v1535_v32  ;;  %973 = vmatmul.f32.gmra.mxu0 %v8619_v41 }
 0x40b   : > { %v2498_v28 = vmul.f32 %v6671_v40, %v1533_v58  ;;  %v8627_v22 = vpop.f32.mrf.mxu2  ;;  %v8629_v42 = vpop.f32.mrf.mxu3  ;;  %v2492_v54 = vmul.f32 %v6669_v37, %v2491_v60  ;;  %vm2504_vm9 = vweird.f32 %v6671_v40 }
 0x40c   : > { %10769 = vst [vmem:[#allocation139_spill] sm:$0xff] %v8627_v22  ;;  %6672 = vrsqrt.f32 %v1536_v29  ;;  %1582 = vmatmul.f32.gmra.mxu1 %v1238_v25  ;;  %vm2505_vm11 = vmor %vm2503_vm10, %vm2504_vm9  ;;  %vm2513_vm13 = vweird.f32 %v1536_v29 }
 0x40d   : > { %10770 = vst [vmem:[#allocation140_spill] sm:$0xff] %v8629_v42  ;;  %v2499_v62 = vmul.f32 %v6671_v40, %v2498_v28  ;;  %v2496_v47 = vsel %vm2495_vm8, %v6669_v37, %v2492_v54  ;;  %v8647_v42 = vld [vmem:[%s7234_s24 + $0x3b0] sm:$0xff] }
 0x40e   : > { %v3029_v50 = vmul.f32 %v2496_v47, %v8348_v13 }
 0x40f   : > { %v2500_v38 = vmul.f32 0.5, %v2499_v62  ;;  %v929_v1 = vpop.f32.mrf.mxu0 }
 0x410   : > { %v8636_v32 = vsub.f32 %v8387_v36, %v929_v1  ;;  %3375 = vmatmul.f32.gmra.mxu2 %v3029_v50  ;;  %3776 = vmatmul.f32.gmra.mxu3 %v3029_v50 }
 0x411   : > { %v2501_v57 = vsub.f32 1.5, %v2500_v38  ;;  %v1538_v22 = vpop.f32.mrf.mxu1 }
 0x412   : > { %v6673_v60 = vpop.eup %6672  ;;  %v1239_v25 = vmul.f32 %v8636_v32, %v8636_v32  ;;  %v1539_v37 = vadd.f32 1e-05, %v1538_v22  ;;  %976 = vmatmul.f32.gmra.mxu0 %v8633_v12 }
 0x413   : > { %v2508_v13 = vmul.f32 %v6673_v60, %v1536_v29  ;;  %v8641_v28 = vpop.f32.mrf.mxu2  ;;  %v8643_v54 = vpop.f32.mrf.mxu3  ;;  %v2502_v36 = vmul.f32 %v6671_v40, %v2501_v57  ;;  %vm2514_vm12 = vweird.f32 %v6673_v60 }
 0x414   : > { %10771 = vst [vmem:[#allocation141_spill] sm:$0xff] %v8641_v28  ;;  %6674 = vrsqrt.f32 %v1539_v37  ;;  %1585 = vmatmul.f32.gmra.mxu1 %v1239_v25  ;;  %vm2515_vm14 = vmor %vm2513_vm13, %vm2514_vm12  ;;  %vm2523_vm0 = vweird.f32 %v1539_v37 }
 0x415   : > { %10772 = vst [vmem:[#allocation142_spill] sm:$0xff] %v8643_v54  ;;  %v2509_v62 = vmul.f32 %v6673_v60, %v2508_v13  ;;  %v2506_v47 = vsel %vm2505_vm11, %v6671_v40, %v2502_v36 }
 0x416   : > { %v3030_v50 = vmul.f32 %v2506_v47, %v8362_v33 }
 0x417   : > { %v2510_v38 = vmul.f32 0.5, %v2509_v62  ;;  %v932_v1 = vpop.f32.mrf.mxu0 }
 0x418   : > { %v8650_v22 = vsub.f32 %v8401_v49, %v932_v1  ;;  %3378 = vmatmul.f32.gmra.mxu2 %v3030_v50  ;;  %3779 = vmatmul.f32.gmra.mxu3 %v3030_v50  ;;  %v8664_v1 = vld [vmem:[%s7234_s24 + $0x3b8] sm:$0xff] }
 0x419   : > { %v2511_v58 = vsub.f32 1.5, %v2510_v38  ;;  %v1541_v28 = vpop.f32.mrf.mxu1 }
 0x41a   : > { %v6675_v57 = vpop.eup %6674  ;;  %v1240_v25 = vmul.f32 %v8650_v22, %v8650_v22  ;;  %v8654_v40 = vadd.f32 1e-05, %v1541_v28  ;;  %979 = vmatmul.f32.gmra.mxu0 %v8647_v42 }
 0x41b   : > { %v2518_v33 = vmul.f32 %v6675_v57, %v1539_v37  ;;  %v8657_v13 = vpop.f32.mrf.mxu2  ;;  %v8659_v49 = vpop.f32.mrf.mxu3  ;;  %v2512_v36 = vmul.f32 %v6673_v60, %v2511_v58  ;;  %vm2524_vm15 = vweird.f32 %v6675_v57 }
 0x41c   : > { %10773 = vst [vmem:[#allocation143_spill] sm:$0xff] %v8657_v13  ;;  %6676 = vrsqrt.f32 %v8654_v40  ;;  %1588 = vmatmul.f32.gmra.mxu1 %v1240_v25  ;;  %vm2525_vm1 = vmor %vm2523_vm0, %vm2524_vm15  ;;  %v4189_v13 = vld [vmem:[#allocation8 + $0x90] sm:$0xff]  ;;  %vm2533_vm3 = vweird.f32 %v8654_v40 }
 0x41d   : > { %10774 = vst [vmem:[#allocation144_spill] sm:$0xff] %v8659_v49  ;;  %v2519_v62 = vmul.f32 %v6675_v57, %v2518_v33  ;;  %v2516_v47 = vsel %vm2515_vm14, %v6673_v60, %v2512_v36  ;;  %4621 = vmatpush.msrb.mxu1 %v4189_v13 }
 0x41e   : > { %v3031_v50 = vmul.f32 %v2516_v47, %v8376_v46 }
 0x41f   : > { %v2520_v38 = vmul.f32 0.5, %v2519_v62  ;;  %v935_v28 = vpop.f32.mrf.mxu0 }
 0x420   : > { %v8667_v29 = vsub.f32 %v8418_v43, %v935_v28  ;;  %3381 = vmatmul.f32.gmra.mxu2 %v3031_v50  ;;  %3782 = vmatmul.f32.gmra.mxu3 %v3031_v50  ;;  %v8682_v28 = vld [vmem:[%s7234_s24 + $0x3c0] sm:$0xff] }
 0x421   : > { %v2521_v54 = vsub.f32 1.5, %v2520_v38  ;;  %v1544_v49 = vpop.f32.mrf.mxu1 }
 0x422   : > { %v6677_v58 = vpop.eup %6676  ;;  %v1241_v25 = vmul.f32 %v8667_v29, %v8667_v29  ;;  %v8671_v60 = vadd.f32 1e-05, %v1544_v49  ;;  %982 = vmatmul.f32.gmra.mxu0 %v8664_v1 }
 0x423   : > { %v2528_v46 = vmul.f32 %v6677_v58, %v8654_v40  ;;  %v8675_v33 = vpop.f32.mrf.mxu2  ;;  %v8677_v43 = vpop.f32.mrf.mxu3  ;;  %v2522_v36 = vmul.f32 %v6675_v57, %v2521_v54  ;;  %vm2534_vm2 = vweird.f32 %v6677_v58  ;;  %v4173_v54 = vld [vmem:[#allocation8 + $0x10] sm:$0xff]  ;;  %v8699_v40 = vld [vmem:[%s7234_s24 + $0x3c8] sm:$0xff] }
 0x424   : > { %10775 = vst [vmem:[#allocation145_spill] sm:$0xff] %v8675_v33  ;;  %6678 = vrsqrt.f32 %v8671_v60  ;;  %1591 = vmatmul.f32.gmra.mxu1 %v1241_v25  ;;  %v5141_v25 = vld [vmem:[#allocation10 + $0x20] sm:$0xff]  ;;  %4220 = vmatpush.msrb.mxu0 %v4173_v54  ;;  %vm2535_vm4 = vmor %vm2533_vm3, %vm2534_vm2  ;;  %vm2543_vm6 = vweird.f32 %v8671_v60 }
 0x425   : > { %10776 = vst [vmem:[#allocation146_spill] sm:$0xff] %v8677_v43  ;;  %v2529_v62 = vmul.f32 %v6677_v58, %v2528_v46  ;;  %v2526_v47 = vsel %vm2525_vm1, %v6675_v57, %v2522_v36  ;;  %5168 = vmatpush.msrb.mxu2 %v5141_v25  ;;  %v5692_v25 = vld [vmem:[#allocation11 + $0x30] sm:$0xff] }
 0x426   : > { %v3032_v50 = vmul.f32 %v2526_v47, %v8390_v10  ;;  %5715 = vmatpush.msrb.mxu3 %v5692_v25 }
 0x427   : > { %v2530_v49 = vmul.f32 0.5, %v2529_v62  ;;  %v938_v38 = vpop.f32.mrf.mxu0 }
 0x428   : > { %v8685_v37 = vsub.f32 %v8436_v9, %v938_v38  ;;  %3384 = vmatmul.f32.gmra.mxu2 %v3032_v50  ;;  %3785 = vmatmul.f32.gmra.mxu3 %v3032_v50 }
 0x429   : > { %v2531_v33 = vsub.f32 1.5, %v2530_v49  ;;  %v1547_v43 = vpop.f32.mrf.mxu1 }
 0x42a   : > { %v6679_v19 = vpop.eup %6678  ;;  %v1242_v57 = vmul.f32 %v8685_v37, %v8685_v37  ;;  %v1548_v10 = vadd.f32 1e-05, %v1547_v43  ;;  %985 = vmatmul.f32.gmra.mxu0 %v8682_v28 }
 0x42b   : > { %v2538_v9 = vmul.f32 %v6679_v19, %v8671_v60  ;;  %v8692_v46 = vpop.f32.mrf.mxu2  ;;  %v8694_v36 = vpop.f32.mrf.mxu3  ;;  %v2532_v62 = vmul.f32 %v6677_v58, %v2531_v33  ;;  %vm2544_vm5 = vweird.f32 %v6679_v19 }
 0x42c   : > { %10777 = vst [vmem:[#allocation147_spill] sm:$0xff] %v8692_v46  ;;  %6680 = vrsqrt.f32 %v1548_v10  ;;  %1594 = vmatmul.f32.gmra.mxu1 %v1242_v57  ;;  %vm2545_vm7 = vmor %vm2543_vm6, %vm2544_vm5  ;;  %vm2553_vm9 = vweird.f32 %v1548_v10 }
 0x42d   : > { %10778 = vst [vmem:[#allocation148_spill] sm:$0xff] %v8694_v36  ;;  %v2539_v43 = vmul.f32 %v6679_v19, %v2538_v9  ;;  %v2536_v47 = vsel %vm2535_vm4, %v6677_v58, %v2532_v62  ;;  %v8714_v36 = vld [vmem:[%s7234_s24 + $0x3d0] sm:$0xff] }
 0x42e   : > { %v3033_v13 = vmul.f32 %v2536_v47, %v8404_v14 }
 0x42f   : > { %v2540_v50 = vmul.f32 0.5, %v2539_v43  ;;  %v941_v49 = vpop.f32.mrf.mxu0 }
 0x430   : > { %v8702_v38 = vsub.f32 %v8453_v53, %v941_v49  ;;  %3387 = vmatmul.f32.gmra.mxu2 %v3033_v13  ;;  %3788 = vmatmul.f32.gmra.mxu3 %v3033_v13 }
 0x431   : > { %v2541_v33 = vsub.f32 1.5, %v2540_v50  ;;  %v1550_v54 = vpop.f32.mrf.mxu1 }
 0x432   : > { %v6681_v57 = vpop.eup %6680  ;;  %v1243_v9 = vmul.f32 %v8702_v38, %v8702_v38  ;;  %v1551_v58 = vadd.f32 1e-05, %v1550_v54  ;;  %988 = vmatmul.f32.gmra.mxu0 %v8699_v40 }
 0x433   : > { %v2548_v14 = vmul.f32 %v6681_v57, %v1548_v10  ;;  %v8708_v53 = vpop.f32.mrf.mxu2  ;;  %v8710_v62 = vpop.f32.mrf.mxu3  ;;  %v2542_v43 = vmul.f32 %v6679_v19, %v2541_v33  ;;  %vm2554_vm8 = vweird.f32 %v6681_v57 }
 0x434   : > { %10779 = vst [vmem:[#allocation149_spill] sm:$0xff] %v8708_v53  ;;  %6682 = vrsqrt.f32 %v1551_v58  ;;  %1597 = vmatmul.f32.gmra.mxu1 %v1243_v9  ;;  %vm2555_vm10 = vmor %vm2553_vm9, %vm2554_vm8  ;;  %vm2563_vm12 = vweird.f32 %v1551_v58 }
 0x435   : > { %10780 = vst [vmem:[#allocation150_spill] sm:$0xff] %v8710_v62  ;;  %v2549_v47 = vmul.f32 %v6681_v57, %v2548_v14  ;;  %v2546_v13 = vsel %vm2545_vm7, %v6679_v19, %v2542_v43  ;;  %v8728_v62 = vld [vmem:[%s7234_s24 + $0x3d8] sm:$0xff] }
 0x436   : > { %v3034_v50 = vmul.f32 %v2546_v13, %v8421_v15 }
 0x437   : > { %v2550_v49 = vmul.f32 0.5, %v2549_v47  ;;  %v944_v54 = vpop.f32.mrf.mxu0 }
 0x438   : > { %v8717_v25 = vsub.f32 %v8468_v56, %v944_v54  ;;  %3390 = vmatmul.f32.gmra.mxu2 %v3034_v50  ;;  %3791 = vmatmul.f32.gmra.mxu3 %v3034_v50 }
 0x439   : > { %v2551_v60 = vsub.f32 1.5, %v2550_v49  ;;  %v1553_v53 = vpop.f32.mrf.mxu1 }
 0x43a   : > { %v6683_v33 = vpop.eup %6682  ;;  %v1244_v9 = vmul.f32 %v8717_v25, %v8717_v25  ;;  %v1554_v19 = vadd.f32 1e-05, %v1553_v53  ;;  %991 = vmatmul.f32.gmra.mxu0 %v8714_v36 }
 0x43b   : > { %v2558_v15 = vmul.f32 %v6683_v33, %v1551_v58  ;;  %v8722_v14 = vpop.f32.mrf.mxu2  ;;  %v8724_v43 = vpop.f32.mrf.mxu3  ;;  %v2552_v56 = vmul.f32 %v6681_v57, %v2551_v60  ;;  %vm2564_vm11 = vweird.f32 %v6683_v33 }
 0x43c   : > { %10781 = vst [vmem:[#allocation151_spill] sm:$0xff] %v8722_v14  ;;  %6684 = vrsqrt.f32 %v1554_v19  ;;  %1600 = vmatmul.f32.gmra.mxu1 %v1244_v9  ;;  %vm2565_vm13 = vmor %vm2563_vm12, %vm2564_vm11  ;;  %vm2573_vm15 = vweird.f32 %v1554_v19 }
 0x43d   : > { %10782 = vst [vmem:[#allocation152_spill] sm:$0xff] %v8724_v43  ;;  %v2559_v47 = vmul.f32 %v6683_v33, %v2558_v15  ;;  %v2556_v13 = vsel %vm2555_vm10, %v6681_v57, %v2552_v56  ;;  %v8742_v43 = vld [vmem:[%s7234_s24 + $0x3e0] sm:$0xff] }
 0x43e   : > { %v3035_v50 = vmul.f32 %v2556_v13, %v8439_v44 }
 0x43f   : > { %v2560_v49 = vmul.f32 0.5, %v2559_v47  ;;  %v947_v54 = vpop.f32.mrf.mxu0 }
 0x440   : > { %v8731_v53 = vsub.f32 %v8482_v34, %v947_v54  ;;  %3393 = vmatmul.f32.gmra.mxu2 %v3035_v50  ;;  %3794 = vmatmul.f32.gmra.mxu3 %v3035_v50 }
 0x441   : > { %v2561_v10 = vsub.f32 1.5, %v2560_v49  ;;  %v1556_v14 = vpop.f32.mrf.mxu1  ;;  %v4172_v49 = vld [vmem:[#allocation8 + $0x8] sm:$0xff] }
 0x442   : > { %v6685_v60 = vpop.eup %6684  ;;  %v1245_v9 = vmul.f32 %v8731_v53, %v8731_v53  ;;  %v1557_v15 = vadd.f32 1e-05, %v1556_v14  ;;  %994 = vmatmul.f32.gmra.mxu0 %v8728_v62 }
 0x443   : > { %v2568_v44 = vmul.f32 %v6685_v60, %v1554_v19  ;;  %v8736_v57 = vpop.f32.mrf.mxu2  ;;  %v8738_v56 = vpop.f32.mrf.mxu3  ;;  %v2562_v34 = vmul.f32 %v6683_v33, %v2561_v10  ;;  %4221 = vmatpush.msrb.mxu0 %v4172_v49  ;;  %vm2574_vm14 = vweird.f32 %v6685_v60 }
 0x444   : > { %10783 = vst [vmem:[#allocation153_spill] sm:$0xff] %v8736_v57  ;;  %6686 = vrsqrt.f32 %v1557_v15  ;;  %1603 = vmatmul.f32.gmra.mxu1 %v1245_v9  ;;  %vm2575_vm0 = vmor %vm2573_vm15, %vm2574_vm14  ;;  %vm2583_vm2 = vweird.f32 %v1557_v15 }
 0x445   : > { %10784 = vst [vmem:[#allocation154_spill] sm:$0xff] %v8738_v56  ;;  %v2569_v47 = vmul.f32 %v6685_v60, %v2568_v44  ;;  %v2566_v13 = vsel %vm2565_vm13, %v6683_v33, %v2562_v34  ;;  %v4171_v56 = vld [vmem:[#allocation8] sm:$0xff] }
 0x446   : > { %v3036_v50 = vmul.f32 %v2566_v13, %v8456_v0  ;;  %4222 = vmatpush.msrb.mxu0 %v4171_v56 }
 0x447   : > { %v2570_v54 = vmul.f32 0.5, %v2569_v47  ;;  %v950_v14 = vpop.f32.mrf.mxu0 }
 0x448   : > { %v8745_v58 = vsub.f32 %v8496_v7, %v950_v14  ;;  %3396 = vmatmul.f32.gmra.mxu2 %v3036_v50  ;;  %3797 = vmatmul.f32.gmra.mxu3 %v3036_v50  ;;  %v8756_v14 = vld [vmem:[%s7234_s24 + $0x3e8] sm:$0xff] }
 0x449   : > { %v2571_v10 = vsub.f32 1.5, %v2570_v54  ;;  %v1559_v57 = vpop.f32.mrf.mxu1 }
 0x44a   : > { %v6687_v9 = vpop.eup %6686  ;;  %v1246_v0 = vmul.f32 %v8745_v58, %v8745_v58  ;;  %v1560_v33 = vadd.f32 1e-05, %v1559_v57  ;;  %997 = vmatmul.f32.gmra.mxu0 %v8742_v43 }
 0x44b   : > { %v2578_v44 = vmul.f32 %v6687_v9, %v1557_v15  ;;  %v8750_v34 = vpop.f32.mrf.mxu2  ;;  %v2572_v7 = vmul.f32 %v6685_v60, %v2571_v10  ;;  %v8752_v47 = vpop.f32.mrf.mxu3  ;;  %vm2584_vm1 = vweird.f32 %v6687_v9 }
 0x44c   : > { %10785 = vst [vmem:[#allocation155_spill] sm:$0xff] %v8750_v34  ;;  %6688 = vrsqrt.f32 %v1560_v33  ;;  %1606 = vmatmul.f32.gmra.mxu1 %v1246_v0  ;;  %vm2585_vm3 = vmor %vm2583_vm2, %vm2584_vm1  ;;  %vm2593_vm5 = vweird.f32 %v1560_v33 }
 0x44d   : > { %10786 = vst [vmem:[#allocation156_spill] sm:$0xff] %v8752_v47  ;;  %v2579_v13 = vmul.f32 %v6687_v9, %v2578_v44  ;;  %v2576_v56 = vsel %vm2575_vm0, %v6685_v60, %v2572_v7  ;;  %v8770_v47 = vld [vmem:[%s7234_s24 + $0x3f0] sm:$0xff] }
 0x44e   : > { %v3037_v50 = vmul.f32 %v2576_v56, %v8471_v20 }
 0x44f   : > { %v2580_v49 = vmul.f32 0.5, %v2579_v13  ;;  %v953_v54 = vpop.f32.mrf.mxu0 }
 0x450   : > { %v8759_v57 = vsub.f32 %v8510_v6, %v953_v54  ;;  %3399 = vmatmul.f32.gmra.mxu2 %v3037_v50  ;;  %3800 = vmatmul.f32.gmra.mxu3 %v3037_v50 }
 0x451   : > { %v2581_v19 = vsub.f32 1.5, %v2580_v49  ;;  %v1562_v10 = vpop.f32.mrf.mxu1 }
 0x452   : > { %v6689_v34 = vpop.eup %6688  ;;  %v1247_v0 = vmul.f32 %v8759_v57, %v8759_v57  ;;  %v1563_v60 = vadd.f32 1e-05, %v1562_v10  ;;  %1000 = vmatmul.f32.gmra.mxu0 %v8756_v14 }
 0x453   : > { %v2588_v20 = vmul.f32 %v6689_v34, %v1560_v33  ;;  %v8764_v44 = vpop.f32.mrf.mxu2  ;;  %v2582_v7 = vmul.f32 %v6687_v9, %v2581_v19  ;;  %v8766_v56 = vpop.f32.mrf.mxu3  ;;  %vm2594_vm4 = vweird.f32 %v6689_v34  ;;  %v8790_v33 = vld [vmem:[%s7234_s24 + $0x3f8] sm:$0xff]  ;;  %s6970_s24 = scalar_lea.hbm %s10628_s10, 2048 }
 0x454   : > { %10787 = vst [vmem:[#allocation157_spill] sm:$0xff] %v8764_v44  ;;  %6690 = vrsqrt.f32 %v1563_v60  ;;  %1609 = vmatmul.f32.gmra.mxu1 %v1247_v0  ;;  %vm2595_vm6 = vmor %vm2593_vm5, %vm2594_vm4  ;;  %vm2603_vm8 = vweird.f32 %v1563_v60  ;;  %p6972_p8 = scmp.lt.s32.totalorder %s6970_s24, %s6966_s20 }
 0x455   : > { %v2589_v6 = vmul.f32 %v6689_v34, %v2588_v20  ;;  %v2586_v13 = vsel %vm2585_vm3, %v6687_v9, %v2582_v7  ;;  %10788 = vst [vmem:[#allocation158_spill] sm:$0xff] %v8766_v56 }
 0x456   : > { %v3038_v50 = vmul.f32 %v2586_v13, %v8485_v26  ;;  %p6973_p7 = por %p6972_p8, %p6971_p12 }
 0x457   : > { %v2590_v49 = vmul.f32 0.5, %v2589_v6  ;;  %v956_v54 = vpop.f32.mrf.mxu0  ;;  %v8786_v6 = vld [vmem:[%s10621_s3] sm:$0x3] }
 0x458   : > { %v8773_v10 = vsub.f32 %v8524_v4, %v956_v54  ;;  %3402 = vmatmul.f32.gmra.mxu2 %v3038_v50  ;;  %3803 = vmatmul.f32.gmra.mxu3 %v3038_v50  ;;  %v8793_v56 = vperm.slane %v8786_v6, 0  ;;  %p6974_p9 = pnand %p6973_p7, %p6969_p5 }
 0x459   : > { %v2591_v15 = vsub.f32 1.5, %v2590_v49  ;;  %v1565_v19 = vpop.f32.mrf.mxu1 }
 0x45a   : > { %10789 = vst [vmem:[#allocation159_spill] sm:$0xff] %v8773_v10  ;;  %v6691_v0 = vpop.eup %6690  ;;  %v1248_v9 = vmul.f32 %v8773_v10, %v8773_v10  ;;  %v8777_v20 = vadd.f32 1e-05, %v1565_v19  ;;  %1003 = vmatmul.f32.gmra.mxu0 %v8770_v47 }
 0x45b   : > { %v2598_v26 = vmul.f32 %v6691_v0, %v1563_v60  ;;  %v8780_v7 = vpop.f32.mrf.mxu2  ;;  %v2592_v4 = vmul.f32 %v6689_v34, %v2591_v15  ;;  %v8795_v15 = vpop.f32.mrf.mxu3  ;;  %vm2604_vm7 = vweird.f32 %v6691_v0 }
 0x45c   : > { %10790 = vst [vmem:[#allocation160_spill] sm:$0xff] %v8780_v7  ;;  %6692 = vrsqrt.f32 %v8777_v20  ;;  %1612 = vmatmul.f32.gmra.mxu1 %v1248_v9  ;;  %vm2605_vm9 = vmor %vm2603_vm8, %vm2604_vm7  ;;  %vm2613_vm11 = vweird.f32 %v8777_v20 }
 0x45d   : > { %v2599_v13 = vmul.f32 %v6691_v0, %v2598_v26  ;;  %v2596_v50 = vsel %vm2595_vm6, %v6689_v34, %v2592_v4  ;;  %10791 = vst [vmem:[#allocation161_spill] sm:$0xff] %v8795_v15 }
 0x45e   : > { %v3039_v49 = vmul.f32 %v2596_v50, %v8499_v51  ;;  %v3131_v50 = vadd.f32 %v7629_v55, %v8793_v56  ;;  %v4188_v55 = vld [vmem:[#allocation8 + $0x88] sm:$0xff] }
 0x45f   : > { %v2600_v54 = vmul.f32 0.5, %v2599_v13  ;;  %v959_v19 = vpop.f32.mrf.mxu0  ;;  %4622 = vmatpush.msrb.mxu1 %v4188_v55 }
 0x460   : > { %v8798_v9 = vsub.f32 %v8541_v31, %v959_v19  ;;  %3405 = vmatmul.f32.gmra.mxu2 %v3039_v49  ;;  %3806 = vmatmul.f32.gmra.mxu3 %v3039_v49  ;;  %v3915_v46 = vmax.f32 %v3131_v50, 0.0 }
 0x461   : > { %v2601_v7 = vsub.f32 1.5, %v2600_v54  ;;  %v1568_v44 = vpop.f32.mrf.mxu1 }
 0x462   : > { %10792 = vst [vmem:[#allocation162_spill] sm:$0xff] %v8798_v9  ;;  %v6693_v34 = vpop.eup %6692  ;;  %v1249_v51 = vmul.f32 %v8798_v9, %v8798_v9  ;;  %v8802_v26 = vadd.f32 1e-05, %v1568_v44  ;;  %1006 = vmatmul.f32.gmra.mxu0 %v8790_v33  ;;  %v5140_v9 = vld [vmem:[#allocation10 + $0x18] sm:$0xff] }
 0x463   : > { %v2608_v4 = vmul.f32 %v6693_v34, %v8777_v20  ;;  %v8806_v13 = vpop.f32.mrf.mxu2  ;;  %v2602_v31 = vmul.f32 %v6691_v0, %v2601_v7  ;;  %vm2614_vm10 = vweird.f32 %v6693_v34  ;;  %5169 = vmatpush.msrb.mxu2 %v5140_v9 }
 0x464   : > { %10793 = vst [vmem:[#allocation163_spill] sm:$0xff] %v8806_v13  ;;  %6694 = vrsqrt.f32 %v8802_v26  ;;  %1615 = vmatmul.f32.gmra.mxu1 %v1249_v51  ;;  %v8815_v51 = vpop.f32.mrf.mxu3  ;;  %vm2615_vm12 = vmor %vm2613_vm11, %vm2614_vm10  ;;  %vm2623_vm14 = vweird.f32 %v8802_v26 }
 0x465   : > { %v2609_v49 = vmul.f32 %v6693_v34, %v2608_v4  ;;  %v2606_v54 = vsel %vm2605_vm9, %v6691_v0, %v2602_v31  ;;  %v3134_v31 = vadd.f32 %v7643_v27, %v8793_v56  ;;  %v5691_v27 = vld [vmem:[#allocation11 + $0x28] sm:$0xff] }
 0x466   : > { %v3040_v44 = vmul.f32 %v2606_v54, %v8513_v8  ;;  %5716 = vmatpush.msrb.mxu3 %v5691_v27 }
 0x467   : > { %v2610_v19 = vmul.f32 0.5, %v2609_v49  ;;  %v962_v15 = vpop.f32.mrf.mxu0  ;;  %v3917_v20 = vmax.f32 %v3134_v31, 0.0 }
 0x468   : > { %v8813_v60 = vsub.f32 %v8559_v59, %v962_v15  ;;  %3408 = vmatmul.f32.gmra.mxu2 %v3040_v44  ;;  %3809 = vmatmul.f32.gmra.mxu3 %v3040_v44 }
 0x469   : > { %v2611_v7 = vsub.f32 1.5, %v2610_v19  ;;  %v1571_v13 = vpop.f32.mrf.mxu1 }
 0x46a   : > { %v6695_v10 = vpop.eup %6694  ;;  %v1250_v0 = vmul.f32 %v8813_v60, %v8813_v60  ;;  %v1572_v8 = vadd.f32 1e-05, %v1571_v13  ;;  %4223 = vmatmul.f32.vlgmr.msrb.gmra.mxu0 %v3915_v46 }
 0x46b   : > { %v2618_v59 = vmul.f32 %v6695_v10, %v8802_v26  ;;  %v8821_v15 = vpop.f32.mrf.mxu2  ;;  %v2612_v4 = vmul.f32 %v6693_v34, %v2611_v7  ;;  %vm2624_vm13 = vweird.f32 %v6695_v10 }
 0x46c   : > { %6696 = vrsqrt.f32 %v1572_v8  ;;  %1618 = vmatmul.f32.gmra.mxu1 %v1250_v0  ;;  %vm2625_vm15 = vmor %vm2623_vm14, %vm2624_vm13  ;;  %vm2633_vm1 = vweird.f32 %v1572_v8 }
 0x46d   : > { %v2619_v50 = vmul.f32 %v6695_v10, %v2618_v59  ;;  %v2616_v49 = vsel %vm2615_vm12, %v6693_v34, %v2612_v4  ;;  %v3137_v59 = vadd.f32 %v7657_v63, %v8793_v56  ;;  %v8837_v4 = vpop.f32.mrf.mxu3 }
 0x46e   : > { %v3041_v46 = vmul.f32 %v2616_v49, %v8527_v17 }
 0x46f   : > { %v2620_v13 = vmul.f32 0.5, %v2619_v50  ;;  %v965_v54 = vpop.f32.mrf.mxu0  ;;  %v3919_v26 = vmax.f32 %v3137_v59, 0.0 }
 0x470   : > { %v8828_v44 = vsub.f32 %v8576_v52, %v965_v54  ;;  %3411 = vmatmul.f32.gmra.mxu2 %v3041_v46  ;;  %3812 = vmatmul.f32.gmra.mxu3 %v3041_v46 }
 0x471   : > { %v2621_v9 = vsub.f32 1.5, %v2620_v13  ;;  %v1574_v19 = vpop.f32.mrf.mxu1 }
 0x472   : > { %v6697_v7 = vpop.eup %6696  ;;  %v1251_v55 = vmul.f32 %v8828_v44, %v8828_v44  ;;  %v1575_v0 = vadd.f32 1e-05, %v1574_v19  ;;  %4226 = vmatmul.f32.gmra.mxu0 %v3917_v20 }
 0x473   : > { %v2628_v17 = vmul.f32 %v6697_v7, %v1572_v8  ;;  %v8833_v34 = vpop.f32.mrf.mxu2  ;;  %v2622_v52 = vmul.f32 %v6695_v10, %v2621_v9  ;;  %vm2634_vm0 = vweird.f32 %v6697_v7 }
 0x474   : > { %6698 = vrsqrt.f32 %v1575_v0  ;;  %1621 = vmatmul.f32.gmra.mxu1 %v1251_v55  ;;  %vm2635_vm2 = vmor %vm2633_vm1, %vm2634_vm0  ;;  %vm2643_vm4 = vweird.f32 %v1575_v0 }
 0x475   : > { %v2629_v31 = vmul.f32 %v6697_v7, %v2628_v17  ;;  %v2626_v50 = vsel %vm2625_vm15, %v6695_v10, %v2622_v52  ;;  %v8850_v59 = vpop.f32.mrf.mxu3 }
 0x476   : > { %v3042_v49 = vmul.f32 %v2626_v50, %v8544_v30 }
 0x477   : > { %v2630_v46 = vmul.f32 0.5, %v2629_v31  ;;  %v968_v13 = vpop.f32.mrf.mxu0 }
 0x478   : > { %v8842_v54 = vsub.f32 %v8591_v24, %v968_v13  ;;  %3414 = vmatmul.f32.gmra.mxu2 %v3042_v49  ;;  %3815 = vmatmul.f32.gmra.mxu3 %v3042_v49  ;;  %v3140_v24 = vadd.f32 %v7673_v39, %v8793_v56 }
 0x479   : > { %v2631_v20 = vsub.f32 1.5, %v2630_v46  ;;  %v1577_v63 = vpop.f32.mrf.mxu1 }
 0x47a   : > { %v6699_v9 = vpop.eup %6698  ;;  %v1252_v19 = vmul.f32 %v8842_v54, %v8842_v54  ;;  %v1578_v27 = vadd.f32 1e-05, %v1577_v63  ;;  %4229 = vmatmul.f32.gmra.mxu0 %v3919_v26  ;;  %v3921_v46 = vmax.f32 %v3140_v24, 0.0 }
 0x47b   : > { %v2638_v10 = vmul.f32 %v6699_v9, %v1575_v0  ;;  %v8846_v30 = vpop.f32.mrf.mxu2  ;;  %v2632_v55 = vmul.f32 %v6697_v7, %v2631_v20  ;;  %vm2644_vm3 = vweird.f32 %v6699_v9 }
 0x47c   : > { %6700 = vrsqrt.f32 %v1578_v27  ;;  %1624 = vmatmul.f32.gmra.mxu1 %v1252_v19  ;;  %vm2645_vm5 = vmor %vm2643_vm4, %vm2644_vm3  ;;  %vm2653_vm7 = vweird.f32 %v1578_v27 }
 0x47d   : > { %v2639_v17 = vmul.f32 %v6699_v9, %v2638_v10  ;;  %v2636_v52 = vsel %vm2635_vm2, %v6697_v7, %v2632_v55 }
 0x47e   : > { %v3043_v31 = vmul.f32 %v2636_v52, %v8562_v23 }
 0x47f   : > { %v2640_v50 = vmul.f32 0.5, %v2639_v17  ;;  %v971_v49 = vpop.f32.mrf.mxu0 }
 0x480   : > { %v8854_v8 = vsub.f32 %v8605_v48, %v971_v49  ;;  %3417 = vmatmul.f32.gmra.mxu2 %v3043_v31  ;;  %3818 = vmatmul.f32.gmra.mxu3 %v3043_v31  ;;  %v3143_v48 = vadd.f32 %v7691_v16, %v8793_v56 }
 0x481   : > { %v2641_v13 = vsub.f32 1.5, %v2640_v50  ;;  %v1580_v26 = vpop.f32.mrf.mxu1  ;;  %v8863_v50 = vpop.f32.mrf.mxu3 }
 0x482   : > { %v6701_v39 = vpop.eup %6700  ;;  %v1253_v20 = vmul.f32 %v8854_v8, %v8854_v8  ;;  %v1581_v7 = vadd.f32 1e-05, %v1580_v26  ;;  %4232 = vmatmul.f32.gmra.mxu0 %v3921_v46  ;;  %v3923_v31 = vmax.f32 %v3143_v48, 0.0  ;;  %10794 = vst [vmem:[#allocation164_spill] sm:$0xff] %v8863_v50 }
 0x483   : > { %v2648_v63 = vmul.f32 %v6701_v39, %v1578_v27  ;;  %v8858_v23 = vpop.f32.mrf.mxu2  ;;  %v2642_v19 = vmul.f32 %v6699_v9, %v2641_v13  ;;  %vm2654_vm6 = vweird.f32 %v6701_v39 }
 0x484   : > { %6702 = vrsqrt.f32 %v1581_v7  ;;  %1627 = vmatmul.f32.gmra.mxu1 %v1253_v20  ;;  %vm2655_vm8 = vmor %vm2653_vm7, %vm2654_vm6  ;;  %vm2663_vm10 = vweird.f32 %v1581_v7 }
 0x485   : > { %v2649_v10 = vmul.f32 %v6701_v39, %v2648_v63  ;;  %v2646_v55 = vsel %vm2645_vm5, %v6699_v9, %v2642_v19 }
 0x486   : > { %v3044_v24 = vmul.f32 %v2646_v55, %v8579_v18 }
 0x487   : > { %v2650_v17 = vmul.f32 0.5, %v2649_v10  ;;  %v974_v52 = vpop.f32.mrf.mxu0 }
 0x488   : > { %v8866_v0 = vsub.f32 %v8619_v41, %v974_v52  ;;  %3420 = vmatmul.f32.gmra.mxu2 %v3044_v24  ;;  %3821 = vmatmul.f32.gmra.mxu3 %v3044_v24  ;;  %v3146_v41 = vadd.f32 %v7707_v3, %v8793_v56 }
 0x489   : > { %v2651_v49 = vsub.f32 1.5, %v2650_v17  ;;  %v1583_v46 = vpop.f32.mrf.mxu1  ;;  %v8878_v3 = vpop.f32.mrf.mxu3 }
 0x48a   : > { %v6703_v16 = vpop.eup %6702  ;;  %v1254_v13 = vmul.f32 %v8866_v0, %v8866_v0  ;;  %v1584_v9 = vadd.f32 1e-05, %v1583_v46  ;;  %4235 = vmatmul.f32.gmra.mxu0 %v3923_v31  ;;  %v3925_v24 = vmax.f32 %v3146_v41, 0.0  ;;  %10795 = vst [vmem:[#allocation165_spill] sm:$0xff] %v8878_v3 }
 0x48b   : > { %v2658_v18 = vmul.f32 %v6703_v16, %v1581_v7  ;;  %v8870_v26 = vpop.f32.mrf.mxu2  ;;  %v2652_v20 = vmul.f32 %v6701_v39, %v2651_v49  ;;  %vm2664_vm9 = vweird.f32 %v6703_v16 }
 0x48c   : > { %6704 = vrsqrt.f32 %v1584_v9  ;;  %1630 = vmatmul.f32.gmra.mxu1 %v1254_v13  ;;  %vm2665_vm11 = vmor %vm2663_vm10, %vm2664_vm9  ;;  %vm2673_vm13 = vweird.f32 %v1584_v9 }
 0x48d   : > { %v2659_v63 = vmul.f32 %v6703_v16, %v2658_v18  ;;  %v2656_v19 = vsel %vm2655_vm8, %v6701_v39, %v2652_v20 }
 0x48e   : > { %v3045_v48 = vmul.f32 %v2656_v19, %v8594_v11 }
 0x48f   : > { %v2660_v10 = vmul.f32 0.5, %v2659_v63  ;;  %v977_v55 = vpop.f32.mrf.mxu0 }
 0x490   : > { %v8876_v17 = vsub.f32 %v8633_v12, %v977_v55  ;;  %3423 = vmatmul.f32.gmra.mxu2 %v3045_v48  ;;  %3824 = vmatmul.f32.gmra.mxu3 %v3045_v48  ;;  %v3149_v12 = vadd.f32 %v7723_v45, %v8793_v56 }
 0x491   : > { %v2661_v27 = vsub.f32 1.5, %v2660_v10  ;;  %v1586_v52 = vpop.f32.mrf.mxu1 }
 0x492   : > { %v6705_v31 = vpop.eup %6704  ;;  %v1255_v49 = vmul.f32 %v8876_v17, %v8876_v17  ;;  %v1587_v39 = vadd.f32 1e-05, %v1586_v52  ;;  %4238 = vmatmul.f32.gmra.mxu0 %v3925_v24  ;;  %v3927_v48 = vmax.f32 %v3149_v12, 0.0 }
 0x493   : > { %v2668_v11 = vmul.f32 %v6705_v31, %v1584_v9  ;;  %v8882_v46 = vpop.f32.mrf.mxu2  ;;  %v2662_v13 = vmul.f32 %v6703_v16, %v2661_v27  ;;  %vm2674_vm12 = vweird.f32 %v6705_v31 }
 0x494   : > { %6706 = vrsqrt.f32 %v1587_v39  ;;  %1633 = vmatmul.f32.gmra.mxu1 %v1255_v49  ;;  %v8898_v49 = vpop.f32.mrf.mxu3  ;;  %vm2675_vm14 = vmor %vm2673_vm13, %vm2674_vm12  ;;  %vm2683_vm0 = vweird.f32 %v1587_v39 }
 0x495   : > { %v2669_v18 = vmul.f32 %v6705_v31, %v2668_v11  ;;  %v2666_v20 = vsel %vm2665_vm11, %v6703_v16, %v2662_v13  ;;  %10796 = vst [vmem:[#allocation166_spill] sm:$0xff] %v8898_v49 }
 0x496   : > { %v3046_v41 = vmul.f32 %v2666_v20, %v8608_v2 }
 0x497   : > { %v2670_v63 = vmul.f32 0.5, %v2669_v18  ;;  %v980_v19 = vpop.f32.mrf.mxu0 }
 0x498   : > { %v8888_v10 = vsub.f32 %v8647_v42, %v980_v19  ;;  %3426 = vmatmul.f32.gmra.mxu2 %v3046_v41  ;;  %3827 = vmatmul.f32.gmra.mxu3 %v3046_v41  ;;  %v3152_v42 = vadd.f32 %v7738_v35, %v8793_v56 }
 0x499   : > { %v2671_v7 = vsub.f32 1.5, %v2670_v63  ;;  %v1589_v55 = vpop.f32.mrf.mxu1 }
 0x49a   : > { %v6707_v24 = vpop.eup %6706  ;;  %v1256_v45 = vmul.f32 %v8888_v10, %v8888_v10  ;;  %v8892_v27 = vadd.f32 1e-05, %v1589_v55  ;;  %4241 = vmatmul.f32.gmra.mxu0 %v3927_v48  ;;  %v3929_v9 = vmax.f32 %v3152_v42, 0.0 }
 0x49b   : > { %v2678_v2 = vmul.f32 %v6707_v24, %v1587_v39  ;;  %v8894_v16 = vpop.f32.mrf.mxu2  ;;  %v2672_v52 = vmul.f32 %v6705_v31, %v2671_v7  ;;  %vm2684_vm15 = vweird.f32 %v6707_v24 }
 0x49c   : > { %6708 = vrsqrt.f32 %v8892_v27  ;;  %1636 = vmatmul.f32.gmra.mxu1 %v1256_v45  ;;  %vm2685_vm1 = vmor %vm2683_vm0, %vm2684_vm15  ;;  %vm2693_vm3 = vweird.f32 %v8892_v27 }
 0x49d   : > { %v2679_v11 = vmul.f32 %v6707_v24, %v2678_v2  ;;  %v2676_v13 = vsel %vm2675_vm14, %v6705_v31, %v2672_v52  ;;  %v8915_v52 = vpop.f32.mrf.mxu3 }
 0x49e   : > { %v3047_v12 = vmul.f32 %v2676_v13, %v8622_v5  ;;  %10797 = vst [vmem:[#allocation167_spill] sm:$0xff] %v8915_v52 }
 0x49f   : > { %v2680_v18 = vmul.f32 0.5, %v2679_v11  ;;  %v983_v20 = vpop.f32.mrf.mxu0 }
 0x4a0   : > { %v8903_v41 = vsub.f32 %v8664_v1, %v983_v20  ;;  %3429 = vmatmul.f32.gmra.mxu2 %v3047_v12  ;;  %3830 = vmatmul.f32.gmra.mxu3 %v3047_v12  ;;  %v3155_v1 = vadd.f32 %v7752_v21, %v8793_v56  ;;  %v4187_v20 = vld [vmem:[#allocation8 + $0x80] sm:$0xff] }
 0x4a1   : > { %v2681_v63 = vsub.f32 1.5, %v2680_v18  ;;  %v1592_v35 = vpop.f32.mrf.mxu1  ;;  %4623 = vmatpush.msrb.mxu1 %v4187_v20 }
 0x4a2   : > { %v6709_v19 = vpop.eup %6708  ;;  %v1257_v48 = vmul.f32 %v8903_v41, %v8903_v41  ;;  %v8907_v7 = vadd.f32 1e-05, %v1592_v35  ;;  %4244 = vmatmul.f32.gmra.mxu0 %v3929_v9  ;;  %v3931_v13 = vmax.f32 %v3155_v1, 0.0  ;;  %v5139_v9 = vld [vmem:[#allocation10 + $0x10] sm:$0xff] }
 0x4a3   : > { %v2688_v5 = vmul.f32 %v6709_v19, %v8892_v27  ;;  %v8910_v31 = vpop.f32.mrf.mxu2  ;;  %v2682_v55 = vmul.f32 %v6707_v24, %v2681_v63  ;;  %vm2694_vm2 = vweird.f32 %v6709_v19  ;;  %5170 = vmatpush.msrb.mxu2 %v5139_v9 }
 0x4a4   : > { %6710 = vrsqrt.f32 %v8907_v7  ;;  %1639 = vmatmul.f32.gmra.mxu1 %v1257_v48  ;;  %vm2695_vm4 = vmor %vm2693_vm3, %vm2694_vm2  ;;  %vm2703_vm6 = vweird.f32 %v8907_v7 }
 0x4a5   : > { %v2689_v45 = vmul.f32 %v6709_v19, %v2688_v5  ;;  %v2686_v2 = vsel %vm2685_vm1, %v6707_v24, %v2682_v55  ;;  %v3158_v5 = vadd.f32 %v7766_v61, %v8793_v56 }
 0x4a6   : > { %v3048_v42 = vmul.f32 %v2686_v2, %v8636_v32 }
 0x4a7   : > { %v2690_v11 = vmul.f32 0.5, %v2689_v45  ;;  %v986_v39 = vpop.f32.mrf.mxu0 }
 0x4a8   : > { %v8919_v12 = vsub.f32 %v8682_v28, %v986_v39  ;;  %3432 = vmatmul.f32.gmra.mxu2 %v3048_v42  ;;  %3833 = vmatmul.f32.gmra.mxu3 %v3048_v42  ;;  %v3933_v42 = vmax.f32 %v3158_v5, 0.0 }
 0x4a9   : > { %v2691_v18 = vsub.f32 1.5, %v2690_v11  ;;  %v1595_v21 = vpop.f32.mrf.mxu1  ;;  %v8934_v11 = vpop.f32.mrf.mxu3 }
 0x4aa   : > { %v6711_v63 = vpop.eup %6710  ;;  %v1258_v24 = vmul.f32 %v8919_v12, %v8919_v12  ;;  %v8923_v35 = vadd.f32 1e-05, %v1595_v21  ;;  %4247 = vmatmul.f32.gmra.mxu0 %v3931_v13  ;;  %10798 = vst [vmem:[#allocation168_spill] sm:$0xff] %v8934_v11 }
 0x4ab   : > { %v2698_v32 = vmul.f32 %v6711_v63, %v8907_v7  ;;  %v8927_v28 = vpop.f32.mrf.mxu2  ;;  %v2692_v48 = vmul.f32 %v6709_v19, %v2691_v18  ;;  %vm2704_vm5 = vweird.f32 %v6711_v63  ;;  %v5690_v18 = vld [vmem:[#allocation11 + $0x20] sm:$0xff] }
 0x4ac   : > { %6712 = vrsqrt.f32 %v8923_v35  ;;  %1642 = vmatmul.f32.gmra.mxu1 %v1258_v24  ;;  %5717 = vmatpush.msrb.mxu3 %v5690_v18  ;;  %v10799_v24 = vld [vmem:[#allocation29_spill] sm:$0xff]  ;;  %vm2705_vm7 = vmor %vm2703_vm6, %vm2704_vm5  ;;  %vm2713_vm9 = vweird.f32 %v8923_v35 }
 0x4ad   : > { %v2699_v55 = vmul.f32 %v6711_v63, %v2698_v32  ;;  %v2696_v1 = vsel %vm2695_vm4, %v6709_v19, %v2692_v48  ;;  %v3161_v32 = vadd.f32 %v10799_v24, %v8793_v56 }
 0x4ae   : > { %v3049_v45 = vmul.f32 %v2696_v1, %v8650_v22 }
 0x4af   : > { %v2700_v2 = vmul.f32 0.5, %v2699_v55  ;;  %v989_v27 = vpop.f32.mrf.mxu0 }
 0x4b0   : > { %v8937_v39 = vsub.f32 %v8699_v40, %v989_v27  ;;  %3435 = vmatmul.f32.gmra.mxu2 %v3049_v45  ;;  %3836 = vmatmul.f32.gmra.mxu3 %v3049_v45 }
 0x4b1   : > { %v2701_v61 = vsub.f32 1.5, %v2700_v2  ;;  %v1598_v13 = vpop.f32.mrf.mxu1  ;;  %v3935_v2 = vmax.f32 %v3161_v32, 0.0 }
 0x4b2   : > { %v6713_v21 = vpop.eup %6712  ;;  %v1259_v19 = vmul.f32 %v8937_v39, %v8937_v39  ;;  %v1599_v20 = vadd.f32 1e-05, %v1598_v13  ;;  %4250 = vmatmul.f32.gmra.mxu0 %v3933_v42  ;;  %v8951_v13 = vpop.f32.mrf.mxu3 }
 0x4b3   : > { %v2708_v22 = vmul.f32 %v6713_v21, %v8923_v35  ;;  %v8943_v9 = vpop.f32.mrf.mxu2  ;;  %v2702_v40 = vmul.f32 %v6711_v63, %v2701_v61  ;;  %vm2714_vm8 = vweird.f32 %v6713_v21  ;;  %10800 = vst [vmem:[#allocation29_spill] sm:$0xff] %v8951_v13 }
 0x4b4   : > { %6714 = vrsqrt.f32 %v1599_v20  ;;  %1645 = vmatmul.f32.gmra.mxu1 %v1259_v19  ;;  %vm2715_vm10 = vmor %vm2713_vm9, %vm2714_vm8  ;;  %vm2723_vm12 = vweird.f32 %v1599_v20 }
 0x4b5   : > { %v2709_v48 = vmul.f32 %v6713_v21, %v2708_v22  ;;  %v2706_v5 = vsel %vm2705_vm7, %v6711_v63, %v2702_v40  ;;  %v10801_v22 = vld [vmem:[#allocation31_spill] sm:$0xff] }
 0x4b6   : > { %v3050_v55 = vmul.f32 %v2706_v5, %v8667_v29  ;;  %v3164_v40 = vadd.f32 %v10801_v22, %v8793_v56 }
 0x4b7   : > { %v2710_v1 = vmul.f32 0.5, %v2709_v48  ;;  %v992_v45 = vpop.f32.mrf.mxu0 }
 0x4b8   : > { %v8949_v7 = vsub.f32 %v8714_v36, %v992_v45  ;;  %3438 = vmatmul.f32.gmra.mxu2 %v3050_v55  ;;  %3839 = vmatmul.f32.gmra.mxu3 %v3050_v55 }
 0x4b9   : > { %v2711_v27 = vsub.f32 1.5, %v2710_v1  ;;  %v1601_v42 = vpop.f32.mrf.mxu1  ;;  %v3937_v1 = vmax.f32 %v3164_v40, 0.0 }
 0x4ba   : > { %v6715_v61 = vpop.eup %6714  ;;  %v1260_v18 = vmul.f32 %v8949_v7, %v8949_v7  ;;  %v1602_v63 = vadd.f32 1e-05, %v1601_v42  ;;  %4253 = vmatmul.f32.gmra.mxu0 %v3935_v2  ;;  %v8970_v22 = vpop.f32.mrf.mxu3 }
 0x4bb   : > { %v2718_v29 = vmul.f32 %v6715_v61, %v1599_v20  ;;  %v8956_v19 = vpop.f32.mrf.mxu2  ;;  %v2712_v36 = vmul.f32 %v6713_v21, %v2711_v27  ;;  %vm2724_vm11 = vweird.f32 %v6715_v61  ;;  %10803 = vst [vmem:[#allocation31_spill] sm:$0xff] %v8970_v22 }
 0x4bc   : > { %6716 = vrsqrt.f32 %v1602_v63  ;;  %1648 = vmatmul.f32.gmra.mxu1 %v1260_v18  ;;  %vm2725_vm13 = vmor %vm2723_vm12, %vm2724_vm11  ;;  %vm2733_vm15 = vweird.f32 %v1602_v63 }
 0x4bd   : > { %v2719_v24 = vmul.f32 %v6715_v61, %v2718_v29  ;;  %v2716_v32 = vsel %vm2715_vm10, %v6713_v21, %v2712_v36  ;;  %v10802_v36 = vld [vmem:[#allocation33_spill] sm:$0xff] }
 0x4be   : > { %v3051_v48 = vmul.f32 %v2716_v32, %v8685_v37 }
 0x4bf   : > { %v2720_v5 = vmul.f32 0.5, %v2719_v24  ;;  %v995_v55 = vpop.f32.mrf.mxu0 }
 0x4c0   : > { %v8962_v45 = vsub.f32 %v8728_v62, %v995_v55  ;;  %3441 = vmatmul.f32.gmra.mxu2 %v3051_v48  ;;  %3842 = vmatmul.f32.gmra.mxu3 %v3051_v48  ;;  %v3167_v62 = vadd.f32 %v10802_v36, %v8793_v56 }
 0x4c1   : > { %v2721_v35 = vsub.f32 1.5, %v2720_v5  ;;  %v1604_v2 = vpop.f32.mrf.mxu1 }
 0x4c2   : > { %v6717_v27 = vpop.eup %6716  ;;  %v1261_v42 = vmul.f32 %v8962_v45, %v8962_v45  ;;  %v1605_v18 = vadd.f32 1e-05, %v1604_v2  ;;  %4256 = vmatmul.f32.gmra.mxu0 %v3937_v1  ;;  %v3939_v55 = vmax.f32 %v3167_v62, 0.0 }
 0x4c3   : > { %v2728_v21 = vmul.f32 %v6717_v27, %v1602_v63  ;;  %v8966_v37 = vpop.f32.mrf.mxu2  ;;  %v2722_v29 = vmul.f32 %v6715_v61, %v2721_v35  ;;  %vm2734_vm14 = vweird.f32 %v6717_v27 }
 0x4c4   : > { %6718 = vrsqrt.f32 %v1605_v18  ;;  %1651 = vmatmul.f32.gmra.mxu1 %v1261_v42  ;;  %vm2735_vm0 = vmor %vm2733_vm15, %vm2734_vm14  ;;  %vm2743_vm2 = vweird.f32 %v1605_v18 }
 0x4c5   : > { %v2729_v40 = vmul.f32 %v6717_v27, %v2728_v21  ;;  %v2726_v24 = vsel %vm2725_vm13, %v6715_v61, %v2722_v29  ;;  %v10804_v29 = vld [vmem:[#allocation35_spill] sm:$0xff] }
 0x4c6   : > { %v3052_v32 = vmul.f32 %v2726_v24, %v8702_v38  ;;  %v8982_v24 = vpop.f32.mrf.mxu3 }
 0x4c7   : > { %v2730_v48 = vmul.f32 0.5, %v2729_v40  ;;  %v998_v5 = vpop.f32.mrf.mxu0  ;;  %10805 = vst [vmem:[#allocation33_spill] sm:$0xff] %v8982_v24 }
 0x4c8   : > { %v8974_v20 = vsub.f32 %v8742_v43, %v998_v5  ;;  %3444 = vmatmul.f32.gmra.mxu2 %v3052_v32  ;;  %3845 = vmatmul.f32.gmra.mxu3 %v3052_v32  ;;  %v3170_v43 = vadd.f32 %v10804_v29, %v8793_v56 }
 0x4c9   : > { %v2731_v1 = vsub.f32 1.5, %v2730_v48  ;;  %v1607_v35 = vpop.f32.mrf.mxu1 }
 0x4ca   : > { %v6719_v2 = vpop.eup %6718  ;;  %v1262_v42 = vmul.f32 %v8974_v20, %v8974_v20  ;;  %v1608_v36 = vadd.f32 1e-05, %v1607_v35  ;;  %4259 = vmatmul.f32.gmra.mxu0 %v3939_v55  ;;  %v3941_v55 = vmax.f32 %v3170_v43, 0.0  ;;  %v10806_v43 = vld [vmem:[#allocation37_spill] sm:$0xff] }
 0x4cb   : > { %v2738_v61 = vmul.f32 %v6719_v2, %v1605_v18  ;;  %v8978_v38 = vpop.f32.mrf.mxu2  ;;  %v2732_v21 = vmul.f32 %v6717_v27, %v2731_v1  ;;  %vm2744_vm1 = vweird.f32 %v6719_v2 }
 0x4cc   : > { %6720 = vrsqrt.f32 %v1608_v36  ;;  %1654 = vmatmul.f32.gmra.mxu1 %v1262_v42  ;;  %vm2745_vm3 = vmor %vm2743_vm2, %vm2744_vm1  ;;  %vm2753_vm5 = vweird.f32 %v1608_v36 }
 0x4cd   : > { %v2739_v62 = vmul.f32 %v6719_v2, %v2738_v61  ;;  %v2736_v40 = vsel %vm2735_vm0, %v6717_v27, %v2732_v21 }
 0x4ce   : > { %v3053_v32 = vmul.f32 %v2736_v40, %v8717_v25 }
 0x4cf   : > { %v2740_v48 = vmul.f32 0.5, %v2739_v62  ;;  %v1001_v5 = vpop.f32.mrf.mxu0 }
 0x4d0   : > { %v8986_v63 = vsub.f32 %v8756_v14, %v1001_v5  ;;  %3447 = vmatmul.f32.gmra.mxu2 %v3053_v32  ;;  %3848 = vmatmul.f32.gmra.mxu3 %v3053_v32  ;;  %v3173_v14 = vadd.f32 %v10806_v43, %v8793_v56 }
 0x4d1   : > { %v2741_v1 = vsub.f32 1.5, %v2740_v48  ;;  %v1610_v35 = vpop.f32.mrf.mxu1 }
 0x4d2   : > { %v6721_v29 = vpop.eup %6720  ;;  %v1263_v42 = vmul.f32 %v8986_v63, %v8986_v63  ;;  %v1611_v27 = vadd.f32 1e-05, %v1610_v35  ;;  %4262 = vmatmul.f32.gmra.mxu0 %v3941_v55  ;;  %v3943_v24 = vmax.f32 %v3173_v14, 0.0  ;;  %v8995_v35 = vpop.f32.mrf.mxu3  ;;  %v10808_v14 = vld [vmem:[#allocation39_spill] sm:$0xff] }
 0x4d3   : > { %v2748_v61 = vmul.f32 %v6721_v29, %v1608_v36  ;;  %v8990_v25 = vpop.f32.mrf.mxu2  ;;  %v2742_v21 = vmul.f32 %v6719_v2, %v2741_v1  ;;  %10807 = vst [vmem:[#allocation35_spill] sm:$0xff] %v8995_v35  ;;  %vm2754_vm4 = vweird.f32 %v6721_v29 }
 0x4d4   : > { %6722 = vrsqrt.f32 %v1611_v27  ;;  %1657 = vmatmul.f32.gmra.mxu1 %v1263_v42  ;;  %vm2755_vm6 = vmor %vm2753_vm5, %vm2754_vm4  ;;  %vm2763_vm8 = vweird.f32 %v1611_v27 }
 0x4d5   : > { %v2749_v62 = vmul.f32 %v6721_v29, %v2748_v61  ;;  %v2746_v40 = vsel %vm2745_vm3, %v6719_v2, %v2742_v21 }
 0x4d6   : > { %v3054_v32 = vmul.f32 %v2746_v40, %v8731_v53 }
 0x4d7   : > { %v2750_v48 = vmul.f32 0.5, %v2749_v62  ;;  %v1004_v5 = vpop.f32.mrf.mxu0 }
 0x4d8   : > { %v8998_v18 = vsub.f32 %v8770_v47, %v1004_v5  ;;  %3450 = vmatmul.f32.gmra.mxu2 %v3054_v32  ;;  %3851 = vmatmul.f32.gmra.mxu3 %v3054_v32  ;;  %v3176_v47 = vadd.f32 %v10808_v14, %v8793_v56  ;;  %v9011_v14 = vperm.slane %v8786_v6, 1 }
 0x4d9   : > { %v2751_v55 = vsub.f32 1.5, %v2750_v48  ;;  %v1613_v1 = vpop.f32.mrf.mxu1 }
 0x4da   : > { %v6723_v43 = vpop.eup %6722  ;;  %v1264_v42 = vmul.f32 %v8998_v18, %v8998_v18  ;;  %v1614_v2 = vadd.f32 1e-05, %v1613_v1  ;;  %4265 = vmatmul.f32.gmra.mxu0 %v3943_v24  ;;  %v3945_v35 = vmax.f32 %v3176_v47, 0.0  ;;  %v10810_v47 = vld [vmem:[#allocation41_spill] sm:$0xff] }
 0x4db   : > { %v2758_v53 = vmul.f32 %v6723_v43, %v1611_v27  ;;  %v9002_v61 = vpop.f32.mrf.mxu2  ;;  %v2752_v21 = vmul.f32 %v6721_v29, %v2751_v55  ;;  %vm2764_vm7 = vweird.f32 %v6723_v43 }
 0x4dc   : > { %6724 = vrsqrt.f32 %v1614_v2  ;;  %1660 = vmatmul.f32.gmra.mxu1 %v1264_v42  ;;  %v9013_v42 = vpop.f32.mrf.mxu3  ;;  %vm2765_vm9 = vmor %vm2763_vm8, %vm2764_vm7  ;;  %vm2773_vm11 = vweird.f32 %v1614_v2 }
 0x4dd   : > { %v2759_v62 = vmul.f32 %v6723_v43, %v2758_v53  ;;  %v2756_v40 = vsel %vm2755_vm6, %v6721_v29, %v2752_v21  ;;  %10809 = vst [vmem:[#allocation37_spill] sm:$0xff] %v9013_v42 }
 0x4de   : > { %v3055_v32 = vmul.f32 %v2756_v40, %v8745_v58 }
 0x4df   : > { %v2760_v48 = vmul.f32 0.5, %v2759_v62  ;;  %v1007_v5 = vpop.f32.mrf.mxu0  ;;  %v3179_v62 = vadd.f32 %v10810_v47, %v8793_v56  ;;  %v5138_v47 = vld [vmem:[#allocation10 + $0x8] sm:$0xff] }
 0x4e0   : > { %v9008_v24 = vsub.f32 %v8790_v33, %v1007_v5  ;;  %3453 = vmatmul.f32.gmra.mxu2 %v3055_v32  ;;  %3854 = vmatmul.f32.gmra.mxu3 %v3055_v32  ;;  %v10811_v32 = vld [vmem:[#allocation19_spill] sm:$0xff] }
 0x4e1   : > { %v2761_v36 = vsub.f32 1.5, %v2760_v48  ;;  %v1616_v55 = vpop.f32.mrf.mxu1  ;;  %v3532_v48 = vadd.f32 %v10811_v32, %v9011_v14  ;;  %v3947_v27 = vmax.f32 %v3179_v62, 0.0  ;;  %5171 = vmatpush.msrb.mxu2 %v5138_v47 }
 0x4e2   : > { %v6725_v1 = vpop.eup %6724  ;;  %v1265_v58 = vmul.f32 %v9008_v24, %v9008_v24  ;;  %v1617_v29 = vadd.f32 1e-05, %v1616_v55  ;;  %4268 = vmatmul.f32.gmra.mxu0 %v3945_v35 }
 0x4e3   : > { %v2768_v53 = vmul.f32 %v6725_v1, %v1614_v2  ;;  %v9017_v33 = vpop.f32.mrf.mxu2  ;;  %v2762_v21 = vmul.f32 %v6723_v43, %v2761_v36  ;;  %vm2774_vm10 = vweird.f32 %v6725_v1 }
 0x4e4   : > { %6726 = vrsqrt.f32 %v1617_v29  ;;  %1663 = vmatmul.f32.gmra.mxu1 %v1265_v58  ;;  %v3916_v58 = vmax.f32 %v3532_v48, 0.0  ;;  %v9030_v62 = vpop.f32.mrf.mxu3  ;;  %vm2775_vm12 = vmor %vm2773_vm11, %vm2774_vm10  ;;  %vm2783_vm14 = vweird.f32 %v1617_v29 }
 0x4e5   : > { %v2769_v6 = vmul.f32 %v6725_v1, %v2768_v53  ;;  %v2766_v40 = vsel %vm2765_vm9, %v6723_v43, %v2762_v21  ;;  %v10812_v21 = vld [vmem:[#allocation43_spill] sm:$0xff]  ;;  %10813 = vst [vmem:[#allocation39_spill] sm:$0xff] %v9030_v62  ;;  %v5689_v62 = vld [vmem:[#allocation11 + $0x18] sm:$0xff] }
 0x4e6   : > { %v3056_v5 = vmul.f32 %v2766_v40, %v8759_v57  ;;  %5718 = vmatpush.msrb.mxu3 %v5689_v62 }
 0x4e7   : > { %v2770_v55 = vmul.f32 0.5, %v2769_v6  ;;  %v9024_v35 = vpop.f32.mrf.mxu0  ;;  %v3182_v6 = vadd.f32 %v10812_v21, %v8793_v56 }
 0x4e8   : > { %3456 = vmatmul.f32.gmra.mxu2 %v3056_v5  ;;  %3857 = vmatmul.f32.gmra.mxu3 %v3056_v5  ;;  %v10815_v5 = vld [vmem:[#allocation159_spill] sm:$0xff] }
 0x4e9   : > { %v2771_v36 = vsub.f32 1.5, %v2770_v55  ;;  %v1619_v42 = vpop.f32.mrf.mxu1 }
 0x4ea   : > { %v6727_v22 = vpop.eup %6726  ;;  %v1620_v13 = vadd.f32 1e-05, %v1619_v42  ;;  %4271 = vmatmul.f32.gmra.mxu0 %v3947_v27  ;;  %v10814_v42 = vld [vmem:[#allocation20_spill] sm:$0xff] }
 0x4eb   : > { %v2778_v43 = vmul.f32 %v6727_v22, %v1617_v29  ;;  %v9026_v53 = vpop.f32.mrf.mxu2  ;;  %v2772_v57 = vmul.f32 %v6725_v1, %v2771_v36  ;;  %v3535_v48 = vadd.f32 %v10814_v42, %v9011_v14  ;;  %v3949_v36 = vmax.f32 %v3182_v6, 0.0 }
 0x4ec   : > { %6728 = vrsqrt.f32 %v1620_v13  ;;  %4624 = vmatmul.f32.vlgmr.msrb.gmra.mxu1 %v3916_v58  ;;  %vm2784_vm13 = vweird.f32 %v6727_v22  ;;  %vm2793_vm1 = vweird.f32 %v1620_v13 }
 0x4ed   : > { %v2779_v40 = vmul.f32 %v6727_v22, %v2778_v43  ;;  %v2776_v32 = vsel %vm2775_vm12, %v6725_v1, %v2772_v57  ;;  %v3918_v11 = vmax.f32 %v3535_v48, 0.0  ;;  %vm2785_vm15 = vmor %vm2783_vm14, %vm2784_vm13  ;;  %v9044_v48 = vpop.f32.mrf.mxu3 }
 0x4ee   : > { %v3057_v2 = vmul.f32 %v2776_v32, %v10815_v5  ;;  %v10817_v5 = vld [vmem:[#allocation21_spill] sm:$0xff]  ;;  %10818 = vst [vmem:[#allocation41_spill] sm:$0xff] %v9044_v48 }
 0x4ef   : > { %v2780_v55 = vmul.f32 0.5, %v2779_v40  ;;  %v9036_v27 = vpop.f32.mrf.mxu0  ;;  %v10816_v40 = vld [vmem:[#allocation45_spill] sm:$0xff] }
 0x4f0   : > { %3459 = vmatmul.f32.gmra.mxu2 %v3057_v2  ;;  %3860 = vmatmul.f32.gmra.mxu3 %v3057_v2  ;;  %v3185_v32 = vadd.f32 %v10816_v40, %v8793_v56  ;;  %v3538_v2 = vadd.f32 %v10817_v5, %v9011_v14 }
 0x4f1   : > { %v2781_v47 = vsub.f32 1.5, %v2780_v55  ;;  %v1622_v21 = vpop.f32.mrf.mxu1  ;;  %v10819_v55 = vld [vmem:[#allocation162_spill] sm:$0xff] }
 0x4f2   : > { %v6729_v58 = vpop.eup %6728  ;;  %v1623_v52 = vadd.f32 1e-05, %v1622_v21  ;;  %4274 = vmatmul.f32.gmra.mxu0 %v3949_v36  ;;  %v3951_v21 = vmax.f32 %v3185_v32, 0.0  ;;  %v3920_v49 = vmax.f32 %v3538_v2, 0.0 }
 0x4f3   : > { %v2788_v1 = vmul.f32 %v6729_v58, %v1620_v13  ;;  %v9038_v43 = vpop.f32.mrf.mxu2  ;;  %v2782_v57 = vmul.f32 %v6727_v22, %v2781_v47  ;;  %vm2794_vm0 = vweird.f32 %v6729_v58 }
 0x4f4   : > { %6730 = vrsqrt.f32 %v1623_v52  ;;  %4627 = vmatmul.f32.gmra.mxu1 %v3918_v11  ;;  %vm2795_vm2 = vmor %vm2793_vm1, %vm2794_vm0  ;;  %vm2803_vm4 = vweird.f32 %v1623_v52 }
 0x4f5   : > { %v2789_v6 = vmul.f32 %v6729_v58, %v2788_v1  ;;  %v2786_v42 = vsel %vm2785_vm15, %v6727_v22, %v2782_v57  ;;  %v9058_v48 = vpop.f32.mrf.mxu3 }
 0x4f6   : > { %v3058_v62 = vmul.f32 %v2786_v42, %v10819_v55  ;;  %v10820_v42 = vld [vmem:[#allocation47_spill] sm:$0xff]  ;;  %10822 = vst [vmem:[#allocation19_spill] sm:$0xff] %v9058_v48 }
 0x4f7   : > { %v2790_v29 = vmul.f32 0.5, %v2789_v6  ;;  %v9047_v36 = vpop.f32.mrf.mxu0  ;;  %v3188_v6 = vadd.f32 %v10820_v42, %v8793_v56 }
 0x4f8   : > { %3462 = vmatmul.f32.gmra.mxu2 %v3058_v62  ;;  %3863 = vmatmul.f32.gmra.mxu3 %v3058_v62  ;;  %v10821_v62 = vld [vmem:[#allocation22_spill] sm:$0xff] }
 0x4f9   : > { %v2791_v47 = vsub.f32 1.5, %v2790_v29  ;;  %v1625_v40 = vpop.f32.mrf.mxu1  ;;  %v3541_v29 = vadd.f32 %v10821_v62, %v9011_v14  ;;  %v3953_v13 = vmax.f32 %v3188_v6, 0.0 }
 0x4fa   : > { %v6731_v11 = vpop.eup %6730  ;;  %v1626_v1 = vadd.f32 1e-05, %v1625_v40  ;;  %4277 = vmatmul.f32.gmra.mxu0 %v3951_v21 }
 0x4fb   : > { %v2798_v22 = vmul.f32 %v6731_v11, %v1623_v52  ;;  %v9049_v57 = vpop.f32.mrf.mxu2  ;;  %v2792_v5 = vmul.f32 %v6729_v58, %v2791_v47  ;;  %vm2804_vm3 = vweird.f32 %v6731_v11  ;;  %v3922_v3 = vmax.f32 %v3541_v29, 0.0 }
 0x4fc   : > { %6732 = vrsqrt.f32 %v1626_v1  ;;  %4630 = vmatmul.f32.gmra.mxu1 %v3920_v49  ;;  %vm2805_vm5 = vmor %vm2803_vm4, %vm2804_vm3  ;;  %vm2813_vm7 = vweird.f32 %v1626_v1 }
 0x4fd   : > { %v2799_v32 = vmul.f32 %v6731_v11, %v2798_v22  ;;  %v2796_v55 = vsel %vm2795_vm2, %v6729_v58, %v2792_v5 }
 0x4fe   : > { %v3059_v2 = vmul.f32 %v2796_v55, %v8813_v60 }
 0x4ff   : > { %v2800_v40 = vmul.f32 0.5, %v2799_v32  ;;  %v9056_v21 = vpop.f32.mrf.mxu0  ;;  %v10824_v32 = vld [vmem:[#allocation49_spill] sm:$0xff] }
 0x500   : > { %3465 = vmatmul.f32.gmra.mxu2 %v3059_v2  ;;  %3866 = vmatmul.f32.gmra.mxu3 %v3059_v2  ;;  %v3191_v55 = vadd.f32 %v10824_v32, %v8793_v56  ;;  %v10825_v2 = vld [vmem:[#allocation23_spill] sm:$0xff] }
 0x501   : > { %v2801_v47 = vsub.f32 1.5, %v2800_v40  ;;  %v1628_v42 = vpop.f32.mrf.mxu1  ;;  %v3544_v40 = vadd.f32 %v10825_v2, %v9011_v14 }
 0x502   : > { %v6733_v49 = vpop.eup %6732  ;;  %v1629_v22 = vadd.f32 1e-05, %v1628_v42  ;;  %4280 = vmatmul.f32.gmra.mxu0 %v3953_v13  ;;  %v3955_v52 = vmax.f32 %v3191_v55, 0.0 }
 0x503   : > { %v2808_v58 = vmul.f32 %v6733_v49, %v1626_v1  ;;  %v9060_v5 = vpop.f32.mrf.mxu2  ;;  %v2802_v60 = vmul.f32 %v6731_v11, %v2801_v47  ;;  %vm2814_vm6 = vweird.f32 %v6733_v49 }
 0x504   : > { %10823 = vst [vmem:[#allocation43_spill] sm:$0xff] %v9060_v5  ;;  %6734 = vrsqrt.f32 %v1629_v22  ;;  %4633 = vmatmul.f32.gmra.mxu1 %v3922_v3  ;;  %v3924_v5 = vmax.f32 %v3544_v40, 0.0  ;;  %v9069_v3 = vpop.f32.mrf.mxu3  ;;  %vm2815_vm8 = vmor %vm2813_vm7, %vm2814_vm6  ;;  %vm2823_vm10 = vweird.f32 %v1629_v22 }
 0x505   : > { %v2809_v6 = vmul.f32 %v6733_v49, %v2808_v58  ;;  %v2806_v62 = vsel %vm2805_vm5, %v6731_v11, %v2802_v60  ;;  %10826 = vst [vmem:[#allocation20_spill] sm:$0xff] %v9069_v3 }
 0x506   : > { %v3060_v29 = vmul.f32 %v2806_v62, %v8828_v44 }
 0x507   : > { %v2810_v42 = vmul.f32 0.5, %v2809_v6  ;;  %v9067_v13 = vpop.f32.mrf.mxu0  ;;  %v10828_v6 = vld [vmem:[#allocation51_spill] sm:$0xff] }
 0x508   : > { %3468 = vmatmul.f32.gmra.mxu2 %v3060_v29  ;;  %3869 = vmatmul.f32.gmra.mxu3 %v3060_v29  ;;  %v3194_v62 = vadd.f32 %v10828_v6, %v8793_v56  ;;  %v10829_v29 = vld [vmem:[#allocation24_spill] sm:$0xff] }
 0x509   : > { %v2811_v47 = vsub.f32 1.5, %v2810_v42  ;;  %v1631_v48 = vpop.f32.mrf.mxu1  ;;  %v3547_v40 = vadd.f32 %v10829_v29, %v9011_v14 }
 0x50a   : > { %v6735_v32 = vpop.eup %6734  ;;  %v1632_v58 = vadd.f32 1e-05, %v1631_v48  ;;  %4283 = vmatmul.f32.gmra.mxu0 %v3955_v52  ;;  %v3957_v1 = vmax.f32 %v3194_v62, 0.0 }
 0x50b   : > { %v2818_v11 = vmul.f32 %v6735_v32, %v1629_v22  ;;  %v9071_v60 = vpop.f32.mrf.mxu2  ;;  %v2812_v44 = vmul.f32 %v6733_v49, %v2811_v47  ;;  %vm2824_vm9 = vweird.f32 %v6735_v32 }
 0x50c   : > { %10827 = vst [vmem:[#allocation159_spill] sm:$0xff] %v9071_v60  ;;  %6736 = vrsqrt.f32 %v1632_v58  ;;  %4636 = vmatmul.f32.gmra.mxu1 %v3924_v5  ;;  %v3926_v60 = vmax.f32 %v3547_v40, 0.0  ;;  %vm2825_vm11 = vmor %vm2823_vm10, %vm2824_vm9  ;;  %vm2833_vm13 = vweird.f32 %v1632_v58 }
 0x50d   : > { %v2819_v55 = vmul.f32 %v6735_v32, %v2818_v11  ;;  %v2816_v2 = vsel %vm2815_vm8, %v6733_v49, %v2812_v44 }
 0x50e   : > { %v3061_v42 = vmul.f32 %v2816_v2, %v8842_v54  ;;  %v10831_v54 = vld [vmem:[#allocation53_spill] sm:$0xff]  ;;  %v9084_v2 = vpop.f32.mrf.mxu3 }
 0x50f   : > { %v2820_v48 = vmul.f32 0.5, %v2819_v55  ;;  %v9078_v52 = vpop.f32.mrf.mxu0  ;;  %v3197_v55 = vadd.f32 %v10831_v54, %v8793_v56  ;;  %10832 = vst [vmem:[#allocation21_spill] sm:$0xff] %v9084_v2 }
 0x510   : > { %3471 = vmatmul.f32.gmra.mxu2 %v3061_v42  ;;  %3872 = vmatmul.f32.gmra.mxu3 %v3061_v42  ;;  %v10833_v42 = vld [vmem:[#allocation25_spill] sm:$0xff] }
 0x511   : > { %v2821_v47 = vsub.f32 1.5, %v2820_v48  ;;  %v1634_v3 = vpop.f32.mrf.mxu1  ;;  %v3550_v40 = vadd.f32 %v10833_v42, %v9011_v14  ;;  %v10836_v42 = vld [vmem:[#allocation26_spill] sm:$0xff] }
 0x512   : > { %v6737_v6 = vpop.eup %6736  ;;  %v1635_v5 = vadd.f32 1e-05, %v1634_v3  ;;  %4286 = vmatmul.f32.gmra.mxu0 %v3957_v1  ;;  %v3959_v1 = vmax.f32 %v3197_v55, 0.0 }
 0x513   : > { %v2828_v49 = vmul.f32 %v6737_v6, %v1632_v58  ;;  %v9080_v11 = vpop.f32.mrf.mxu2  ;;  %v2822_v44 = vmul.f32 %v6735_v32, %v2821_v47  ;;  %vm2834_vm12 = vweird.f32 %v6737_v6 }
 0x514   : > { %10830 = vst [vmem:[#allocation45_spill] sm:$0xff] %v9080_v11  ;;  %6738 = vrsqrt.f32 %v1635_v5  ;;  %4639 = vmatmul.f32.gmra.mxu1 %v3926_v60  ;;  %v3928_v11 = vmax.f32 %v3550_v40, 0.0  ;;  %vm2835_vm14 = vmor %vm2833_vm13, %vm2834_vm12  ;;  %vm2843_vm0 = vweird.f32 %v1635_v5 }
 0x515   : > { %v2829_v62 = vmul.f32 %v6737_v6, %v2828_v49  ;;  %v2826_v29 = vsel %vm2825_vm11, %v6735_v32, %v2822_v44 }
 0x516   : > { %v3062_v3 = vmul.f32 %v2826_v29, %v8854_v8  ;;  %v10835_v8 = vld [vmem:[#allocation55_spill] sm:$0xff] }
 0x517   : > { %v2830_v22 = vmul.f32 0.5, %v2829_v62  ;;  %v9089_v48 = vpop.f32.mrf.mxu0  ;;  %v3200_v62 = vadd.f32 %v10835_v8, %v8793_v56 }
 0x518   : > { %3474 = vmatmul.f32.gmra.mxu2 %v3062_v3  ;;  %3875 = vmatmul.f32.gmra.mxu3 %v3062_v3  ;;  %v3553_v3 = vadd.f32 %v10836_v42, %v9011_v14 }
 0x519   : > { %v2831_v47 = vsub.f32 1.5, %v2830_v22  ;;  %v1637_v54 = vpop.f32.mrf.mxu1  ;;  %v9097_v22 = vpop.f32.mrf.mxu3 }
 0x51a   : > { %v6739_v2 = vpop.eup %6738  ;;  %v1638_v60 = vadd.f32 1e-05, %v1637_v54  ;;  %4289 = vmatmul.f32.gmra.mxu0 %v3959_v1  ;;  %10837 = vst [vmem:[#allocation47_spill] sm:$0xff] %v9097_v22  ;;  %v3961_v54 = vmax.f32 %v3200_v62, 0.0 }
 0x51b   : > { %v2838_v32 = vmul.f32 %v6739_v2, %v1635_v5  ;;  %v9091_v49 = vpop.f32.mrf.mxu2  ;;  %v2832_v44 = vmul.f32 %v6737_v6, %v2831_v47  ;;  %vm2844_vm15 = vweird.f32 %v6739_v2 }
 0x51c   : > { %10834 = vst [vmem:[#allocation162_spill] sm:$0xff] %v9091_v49  ;;  %6740 = vrsqrt.f32 %v1638_v60  ;;  %4642 = vmatmul.f32.gmra.mxu1 %v3928_v11  ;;  %v3930_v49 = vmax.f32 %v3553_v3, 0.0  ;;  %vm2845_vm1 = vmor %vm2843_vm0, %vm2844_vm15  ;;  %vm2853_vm3 = vweird.f32 %v1638_v60 }
 0x51d   : > { %v2839_v55 = vmul.f32 %v6739_v2, %v2838_v32  ;;  %v2836_v29 = vsel %vm2835_vm14, %v6737_v6, %v2832_v44 }
 0x51e   : > { %v3063_v40 = vmul.f32 %v2836_v29, %v8866_v0  ;;  %v10839_v0 = vld [vmem:[#allocation57_spill] sm:$0xff] }
 0x51f   : > { %v2840_v58 = vmul.f32 0.5, %v2839_v55  ;;  %v9100_v1 = vpop.f32.mrf.mxu0  ;;  %v3203_v55 = vadd.f32 %v10839_v0, %v8793_v56 }
 0x520   : > { %3477 = vmatmul.f32.gmra.mxu2 %v3063_v40  ;;  %3878 = vmatmul.f32.gmra.mxu3 %v3063_v40  ;;  %v10840_v40 = vld [vmem:[#allocation27_spill] sm:$0xff] }
 0x521   : > { %v2841_v47 = vsub.f32 1.5, %v2840_v58  ;;  %v1640_v8 = vpop.f32.mrf.mxu1  ;;  %v3556_v3 = vadd.f32 %v10840_v40, %v9011_v14  ;;  %v9114_v22 = vpop.f32.mrf.mxu3 }
 0x522   : > { %v6741_v11 = vpop.eup %6740  ;;  %v9102_v32 = vadd.f32 1e-05, %v1640_v8  ;;  %4292 = vmatmul.f32.gmra.mxu0 %v3961_v54  ;;  %v3963_v8 = vmax.f32 %v3203_v55, 0.0  ;;  %10841 = vst [vmem:[#allocation49_spill] sm:$0xff] %v9114_v22  ;;  %v10843_v55 = vld [vmem:[#allocation59_spill] sm:$0xff] }
 0x523   : > { %v2848_v6 = vmul.f32 %v6741_v11, %v1638_v60  ;;  %v9104_v44 = vpop.f32.mrf.mxu2  ;;  %v2842_v42 = vmul.f32 %v6739_v2, %v2841_v47  ;;  %vm2854_vm2 = vweird.f32 %v6741_v11 }
 0x524   : > { %10838 = vst [vmem:[#allocation22_spill] sm:$0xff] %v9104_v44  ;;  %6742 = vrsqrt.f32 %v9102_v32  ;;  %4645 = vmatmul.f32.gmra.mxu1 %v3930_v49  ;;  %v5137_v49 = vld [vmem:[#allocation10] sm:$0xff]  ;;  %vm2855_vm4 = vmor %vm2853_vm3, %vm2854_vm2  ;;  %vm2863_vm6 = vweird.f32 %v9102_v32 }
 0x525   : > { %v2849_v62 = vmul.f32 %v6741_v11, %v2848_v6  ;;  %v2846_v29 = vsel %vm2845_vm1, %v6739_v2, %v2842_v42  ;;  %v3932_v6 = vmax.f32 %v3556_v3, 0.0  ;;  %5172 = vmatpush.msrb.mxu2 %v5137_v49 }
 0x526   : > { %v3064_v58 = vmul.f32 %v2846_v29, %v8876_v17  ;;  %v3206_v29 = vadd.f32 %v10843_v55, %v8793_v56  ;;  %v5688_v55 = vld [vmem:[#allocation11 + $0x10] sm:$0xff] }
 0x527   : > { %v2850_v54 = vmul.f32 0.5, %v2849_v62  ;;  %v9112_v5 = vpop.f32.mrf.mxu0  ;;  %5719 = vmatpush.msrb.mxu3 %v5688_v55 }
 0x528   : > { %3480 = vmatmul.f32.gmra.mxu2 %v3064_v58  ;;  %3881 = vmatmul.f32.gmra.mxu3 %v3064_v58  ;;  %v3965_v49 = vmax.f32 %v3206_v29, 0.0  ;;  %v10847_v29 = vld [vmem:[#allocation61_spill] sm:$0xff] }
 0x529   : > { %v2851_v47 = vsub.f32 1.5, %v2850_v54  ;;  %v1643_v0 = vpop.f32.mrf.mxu1  ;;  %v10844_v54 = vld [vmem:[#allocation28_spill] sm:$0xff]  ;;  %v9126_v50 = vpop.f32.mrf.mxu3 }
 0x52a   : > { %v6743_v44 = vpop.eup %6742  ;;  %v1644_v2 = vadd.f32 1e-05, %v1643_v0  ;;  %4295 = vmatmul.f32.gmra.mxu0 %v3963_v8  ;;  %v3559_v3 = vadd.f32 %v10844_v54, %v9011_v14  ;;  %10845 = vst [vmem:[#allocation51_spill] sm:$0xff] %v9126_v50 }
 0x52b   : > { %v2858_v17 = vmul.f32 %v6743_v44, %v9102_v32  ;;  %v9117_v42 = vpop.f32.mrf.mxu2  ;;  %v2852_v62 = vmul.f32 %v6741_v11, %v2851_v47  ;;  %vm2864_vm5 = vweird.f32 %v6743_v44 }
 0x52c   : > { %10842 = vst [vmem:[#allocation23_spill] sm:$0xff] %v9117_v42  ;;  %6744 = vrsqrt.f32 %v1644_v2  ;;  %4648 = vmatmul.f32.gmra.mxu1 %v3932_v6  ;;  %v3934_v6 = vmax.f32 %v3559_v3, 0.0  ;;  %vm2865_vm7 = vmor %vm2863_vm6, %vm2864_vm5  ;;  %v10848_v3 = vld [vmem:[#allocation30_spill] sm:$0xff]  ;;  %vm2873_vm9 = vweird.f32 %v1644_v2 }
 0x52d   : > { %v2859_v40 = vmul.f32 %v6743_v44, %v2858_v17  ;;  %v2856_v58 = vsel %vm2855_vm4, %v6741_v11, %v2852_v62 }
 0x52e   : > { %v3065_v8 = vmul.f32 %v2856_v58, %v8888_v10 }
 0x52f   : > { %v2860_v0 = vmul.f32 0.5, %v2859_v40  ;;  %v9124_v60 = vpop.f32.mrf.mxu0  ;;  %v3209_v40 = vadd.f32 %v10847_v29, %v8793_v56 }
 0x530   : > { %3483 = vmatmul.f32.gmra.mxu2 %v3065_v8  ;;  %3884 = vmatmul.f32.gmra.mxu3 %v3065_v8 }
 0x531   : > { %v2861_v47 = vsub.f32 1.5, %v2860_v0  ;;  %v1646_v22 = vpop.f32.mrf.mxu1 }
 0x532   : > { %v6745_v42 = vpop.eup %6744  ;;  %v1647_v11 = vadd.f32 1e-05, %v1646_v22  ;;  %4298 = vmatmul.f32.gmra.mxu0 %v3965_v49  ;;  %v3562_v22 = vadd.f32 %v10848_v3, %v9011_v14  ;;  %v3967_v49 = vmax.f32 %v3209_v40, 0.0 }
 0x533   : > { %v2868_v10 = vmul.f32 %v6745_v42, %v1644_v2  ;;  %v9129_v17 = vpop.f32.mrf.mxu2  ;;  %v2862_v62 = vmul.f32 %v6743_v44, %v2861_v47  ;;  %vm2874_vm8 = vweird.f32 %v6745_v42 }
 0x534   : > { %10846 = vst [vmem:[#allocation24_spill] sm:$0xff] %v9129_v17  ;;  %6746 = vrsqrt.f32 %v1647_v11  ;;  %4651 = vmatmul.f32.gmra.mxu1 %v3934_v6  ;;  %v3936_v6 = vmax.f32 %v3562_v22, 0.0  ;;  %vm2875_vm10 = vmor %vm2873_vm9, %vm2874_vm8  ;;  %vm2883_vm12 = vweird.f32 %v1647_v11 }
 0x535   : > { %v2869_v58 = vmul.f32 %v6745_v42, %v2868_v10  ;;  %v2866_v54 = vsel %vm2865_vm7, %v6743_v44, %v2862_v62 }
 0x536   : > { %v3066_v8 = vmul.f32 %v2866_v54, %v8903_v41  ;;  %v10850_v41 = vld [vmem:[#allocation63_spill] sm:$0xff]  ;;  %v9143_v54 = vpop.f32.mrf.mxu3 }
 0x537   : > { %v2870_v0 = vmul.f32 0.5, %v2869_v58  ;;  %v9137_v32 = vpop.f32.mrf.mxu0  ;;  %v3212_v58 = vadd.f32 %v10850_v41, %v8793_v56  ;;  %10851 = vst [vmem:[#allocation25_spill] sm:$0xff] %v9143_v54 }
 0x538   : > { %3486 = vmatmul.f32.gmra.mxu2 %v3066_v8  ;;  %3887 = vmatmul.f32.gmra.mxu3 %v3066_v8  ;;  %v10852_v8 = vld [vmem:[#allocation32_spill] sm:$0xff] }
 0x539   : > { %v2871_v47 = vsub.f32 1.5, %v2870_v0  ;;  %v1649_v55 = vpop.f32.mrf.mxu1  ;;  %v3565_v22 = vadd.f32 %v10852_v8, %v9011_v14  ;;  %v10855_v8 = vld [vmem:[#allocation34_spill] sm:$0xff] }
 0x53a   : > { %v6747_v29 = vpop.eup %6746  ;;  %v1650_v50 = vadd.f32 1e-05, %v1649_v55  ;;  %4301 = vmatmul.f32.gmra.mxu0 %v3967_v49  ;;  %v3969_v55 = vmax.f32 %v3212_v58, 0.0 }
 0x53b   : > { %v2878_v44 = vmul.f32 %v6747_v29, %v1647_v11  ;;  %v9139_v10 = vpop.f32.mrf.mxu2  ;;  %v2872_v62 = vmul.f32 %v6745_v42, %v2871_v47  ;;  %vm2884_vm11 = vweird.f32 %v6747_v29 }
 0x53c   : > { %10849 = vst [vmem:[#allocation53_spill] sm:$0xff] %v9139_v10  ;;  %6748 = vrsqrt.f32 %v1650_v50  ;;  %4654 = vmatmul.f32.gmra.mxu1 %v3936_v6  ;;  %v3938_v10 = vmax.f32 %v3565_v22, 0.0  ;;  %vm2885_vm13 = vmor %vm2883_vm12, %vm2884_vm11  ;;  %vm2893_vm15 = vweird.f32 %v1650_v50 }
 0x53d   : > { %v2879_v40 = vmul.f32 %v6747_v29, %v2878_v44  ;;  %v2876_v3 = vsel %vm2875_vm10, %v6745_v42, %v2872_v62 }
 0x53e   : > { %v3067_v0 = vmul.f32 %v2876_v3, %v8919_v12  ;;  %v10854_v12 = vld [vmem:[#allocation65_spill] sm:$0xff] }
 0x53f   : > { %v2880_v2 = vmul.f32 0.5, %v2879_v40  ;;  %v9148_v49 = vpop.f32.mrf.mxu0  ;;  %v3215_v40 = vadd.f32 %v10854_v12, %v8793_v56 }
 0x540   : > { %3489 = vmatmul.f32.gmra.mxu2 %v3067_v0  ;;  %3890 = vmatmul.f32.gmra.mxu3 %v3067_v0  ;;  %v3568_v0 = vadd.f32 %v10855_v8, %v9011_v14 }
 0x541   : > { %v2881_v47 = vsub.f32 1.5, %v2880_v2  ;;  %v1652_v41 = vpop.f32.mrf.mxu1  ;;  %v9156_v2 = vpop.f32.mrf.mxu3 }
 0x542   : > { %v6749_v54 = vpop.eup %6748  ;;  %v1653_v6 = vadd.f32 1e-05, %v1652_v41  ;;  %4304 = vmatmul.f32.gmra.mxu0 %v3969_v55  ;;  %10856 = vst [vmem:[#allocation26_spill] sm:$0xff] %v9156_v2  ;;  %v3971_v41 = vmax.f32 %v3215_v40, 0.0 }
 0x543   : > { %v2888_v42 = vmul.f32 %v6749_v54, %v1650_v50  ;;  %v9150_v44 = vpop.f32.mrf.mxu2  ;;  %v2882_v62 = vmul.f32 %v6747_v29, %v2881_v47  ;;  %vm2894_vm14 = vweird.f32 %v6749_v54 }
 0x544   : > { %10853 = vst [vmem:[#allocation55_spill] sm:$0xff] %v9150_v44  ;;  %6750 = vrsqrt.f32 %v1653_v6  ;;  %4657 = vmatmul.f32.gmra.mxu1 %v3938_v10  ;;  %v3940_v44 = vmax.f32 %v3568_v0, 0.0  ;;  %vm2895_vm0 = vmor %vm2893_vm15, %vm2894_vm14  ;;  %vm2903_vm2 = vweird.f32 %v1653_v6 }
 0x545   : > { %v2889_v58 = vmul.f32 %v6749_v54, %v2888_v42  ;;  %v2886_v3 = vsel %vm2885_vm13, %v6747_v29, %v2882_v62 }
 0x546   : > { %v3068_v22 = vmul.f32 %v2886_v3, %v8937_v39  ;;  %v10858_v39 = vld [vmem:[#allocation67_spill] sm:$0xff] }
 0x547   : > { %v2890_v11 = vmul.f32 0.5, %v2889_v58  ;;  %v9159_v55 = vpop.f32.mrf.mxu0  ;;  %v3218_v58 = vadd.f32 %v10858_v39, %v8793_v56 }
 0x548   : > { %3492 = vmatmul.f32.gmra.mxu2 %v3068_v22  ;;  %3893 = vmatmul.f32.gmra.mxu3 %v3068_v22  ;;  %v10859_v22 = vld [vmem:[#allocation36_spill] sm:$0xff] }
 0x549   : > { %v2891_v47 = vsub.f32 1.5, %v2890_v11  ;;  %v1655_v12 = vpop.f32.mrf.mxu1  ;;  %v3571_v11 = vadd.f32 %v10859_v22, %v9011_v14  ;;  %v3973_v50 = vmax.f32 %v3218_v58, 0.0  ;;  %v9170_v2 = vpop.f32.mrf.mxu3 }
 0x54a   : > { %v6751_v10 = vpop.eup %6750  ;;  %v1656_v42 = vadd.f32 1e-05, %v1655_v12  ;;  %4307 = vmatmul.f32.gmra.mxu0 %v3971_v41  ;;  %10860 = vst [vmem:[#allocation27_spill] sm:$0xff] %v9170_v2 }
 0x54b   : > { %v2898_v29 = vmul.f32 %v6751_v10, %v1653_v6  ;;  %v9161_v62 = vpop.f32.mrf.mxu2  ;;  %v2892_v8 = vmul.f32 %v6749_v54, %v2891_v47  ;;  %vm2904_vm1 = vweird.f32 %v6751_v10 }
 0x54c   : > { %10857 = vst [vmem:[#allocation57_spill] sm:$0xff] %v9161_v62  ;;  %6752 = vrsqrt.f32 %v1656_v42  ;;  %4660 = vmatmul.f32.gmra.mxu1 %v3940_v44  ;;  %v3942_v62 = vmax.f32 %v3571_v11, 0.0  ;;  %vm2905_vm3 = vmor %vm2903_vm2, %vm2904_vm1  ;;  %vm2913_vm5 = vweird.f32 %v1656_v42 }
 0x54d   : > { %v2899_v40 = vmul.f32 %v6751_v10, %v2898_v29  ;;  %v2896_v3 = vsel %vm2895_vm0, %v6749_v54, %v2892_v8 }
 0x54e   : > { %v3069_v0 = vmul.f32 %v2896_v3, %v8949_v7 }
 0x54f   : > { %v2900_v12 = vmul.f32 0.5, %v2899_v40  ;;  %v9168_v41 = vpop.f32.mrf.mxu0  ;;  %v10862_v40 = vld [vmem:[#allocation69_spill] sm:$0xff] }
 0x550   : > { %3495 = vmatmul.f32.gmra.mxu2 %v3069_v0  ;;  %3896 = vmatmul.f32.gmra.mxu3 %v3069_v0  ;;  %v3221_v3 = vadd.f32 %v10862_v40, %v8793_v56  ;;  %v10863_v0 = vld [vmem:[#allocation38_spill] sm:$0xff] }
 0x551   : > { %v2901_v47 = vsub.f32 1.5, %v2900_v12  ;;  %v1658_v39 = vpop.f32.mrf.mxu1  ;;  %v3574_v12 = vadd.f32 %v10863_v0, %v9011_v14 }
 0x552   : > { %v6753_v44 = vpop.eup %6752  ;;  %v1659_v29 = vadd.f32 1e-05, %v1658_v39  ;;  %4310 = vmatmul.f32.gmra.mxu0 %v3973_v50  ;;  %v3975_v6 = vmax.f32 %v3221_v3, 0.0 }
 0x553   : > { %v2908_v54 = vmul.f32 %v6753_v44, %v1656_v42  ;;  %v9172_v8 = vpop.f32.mrf.mxu2  ;;  %v2902_v7 = vmul.f32 %v6751_v10, %v2901_v47  ;;  %vm2914_vm4 = vweird.f32 %v6753_v44 }
 0x554   : > { %10861 = vst [vmem:[#allocation59_spill] sm:$0xff] %v9172_v8  ;;  %6754 = vrsqrt.f32 %v1659_v29  ;;  %4663 = vmatmul.f32.gmra.mxu1 %v3942_v62  ;;  %v3944_v8 = vmax.f32 %v3574_v12, 0.0  ;;  %v9181_v62 = vpop.f32.mrf.mxu3  ;;  %vm2915_vm6 = vmor %vm2913_vm5, %vm2914_vm4  ;;  %vm2923_vm8 = vweird.f32 %v1659_v29 }
 0x555   : > { %v2909_v58 = vmul.f32 %v6753_v44, %v2908_v54  ;;  %v2906_v22 = vsel %vm2905_vm3, %v6751_v10, %v2902_v7  ;;  %10864 = vst [vmem:[#allocation28_spill] sm:$0xff] %v9181_v62 }
 0x556   : > { %v3070_v11 = vmul.f32 %v2906_v22, %v8962_v45 }
 0x557   : > { %v2910_v39 = vmul.f32 0.5, %v2909_v58  ;;  %v9179_v50 = vpop.f32.mrf.mxu0  ;;  %v10866_v58 = vld [vmem:[#allocation71_spill] sm:$0xff] }
 0x558   : > { %3498 = vmatmul.f32.gmra.mxu2 %v3070_v11  ;;  %3899 = vmatmul.f32.gmra.mxu3 %v3070_v11  ;;  %v3224_v22 = vadd.f32 %v10866_v58, %v8793_v56  ;;  %v10867_v11 = vld [vmem:[#allocation40_spill] sm:$0xff] }
 0x559   : > { %v2911_v47 = vsub.f32 1.5, %v2910_v39  ;;  %v1661_v2 = vpop.f32.mrf.mxu1  ;;  %v3577_v12 = vadd.f32 %v10867_v11, %v9011_v14 }
 0x55a   : > { %v6755_v40 = vpop.eup %6754  ;;  %v1662_v54 = vadd.f32 1e-05, %v1661_v2  ;;  %4313 = vmatmul.f32.gmra.mxu0 %v3975_v6  ;;  %v3977_v42 = vmax.f32 %v3224_v22, 0.0 }
 0x55b   : > { %v2918_v10 = vmul.f32 %v6755_v40, %v1659_v29  ;;  %v9183_v7 = vpop.f32.mrf.mxu2  ;;  %v2912_v45 = vmul.f32 %v6753_v44, %v2911_v47  ;;  %vm2924_vm7 = vweird.f32 %v6755_v40 }
 0x55c   : > { %10865 = vst [vmem:[#allocation61_spill] sm:$0xff] %v9183_v7  ;;  %6756 = vrsqrt.f32 %v1662_v54  ;;  %4666 = vmatmul.f32.gmra.mxu1 %v3944_v8  ;;  %v3946_v7 = vmax.f32 %v3577_v12, 0.0  ;;  %vm2925_vm9 = vmor %vm2923_vm8, %vm2924_vm7  ;;  %vm2933_vm11 = vweird.f32 %v1662_v54 }
 0x55d   : > { %v2919_v3 = vmul.f32 %v6755_v40, %v2918_v10  ;;  %v2916_v0 = vsel %vm2915_vm6, %v6753_v44, %v2912_v45 }
 0x55e   : > { %v3071_v39 = vmul.f32 %v2916_v0, %v8974_v20  ;;  %v10869_v20 = vld [vmem:[#allocation73_spill] sm:$0xff]  ;;  %v9196_v0 = vpop.f32.mrf.mxu3 }
 0x55f   : > { %v2920_v2 = vmul.f32 0.5, %v2919_v3  ;;  %v9190_v6 = vpop.f32.mrf.mxu0  ;;  %v3227_v3 = vadd.f32 %v10869_v20, %v8793_v56  ;;  %10870 = vst [vmem:[#allocation63_spill] sm:$0xff] %v9196_v0 }
 0x560   : > { %3501 = vmatmul.f32.gmra.mxu2 %v3071_v39  ;;  %3902 = vmatmul.f32.gmra.mxu3 %v3071_v39  ;;  %v10871_v39 = vld [vmem:[#allocation42_spill] sm:$0xff] }
 0x561   : > { %v2921_v47 = vsub.f32 1.5, %v2920_v2  ;;  %v1664_v62 = vpop.f32.mrf.mxu1  ;;  %v3580_v12 = vadd.f32 %v10871_v39, %v9011_v14  ;;  %v10874_v39 = vld [vmem:[#allocation44_spill] sm:$0xff] }
 0x562   : > { %v6757_v58 = vpop.eup %6756  ;;  %v1665_v8 = vadd.f32 1e-05, %v1664_v62  ;;  %4316 = vmatmul.f32.gmra.mxu0 %v3977_v42  ;;  %v3979_v42 = vmax.f32 %v3227_v3, 0.0 }
 0x563   : > { %v2928_v44 = vmul.f32 %v6757_v58, %v1662_v54  ;;  %v9192_v10 = vpop.f32.mrf.mxu2  ;;  %v2922_v45 = vmul.f32 %v6755_v40, %v2921_v47  ;;  %v5687_v47 = vld [vmem:[#allocation11 + $0x8] sm:$0xff]  ;;  %vm2934_vm10 = vweird.f32 %v6757_v58  ;;  %v3948_v0 = vmax.f32 %v3580_v12, 0.0 }
 0x564   : > { %10868 = vst [vmem:[#allocation30_spill] sm:$0xff] %v9192_v10  ;;  %6758 = vrsqrt.f32 %v1665_v8  ;;  %4669 = vmatmul.f32.gmra.mxu1 %v3946_v7  ;;  %5720 = vmatpush.msrb.mxu3 %v5687_v47  ;;  %vm2935_vm12 = vmor %vm2933_vm11, %vm2934_vm10  ;;  %vm2943_vm14 = vweird.f32 %v1665_v8 }
 0x565   : > { %v2929_v22 = vmul.f32 %v6757_v58, %v2928_v44  ;;  %v2926_v11 = vsel %vm2925_vm9, %v6755_v40, %v2922_v45 }
 0x566   : > { %v3072_v62 = vmul.f32 %v2926_v11, %v8986_v63  ;;  %v10873_v63 = vld [vmem:[#allocation75_spill] sm:$0xff] }
 0x567   : > { %v2930_v29 = vmul.f32 0.5, %v2929_v22  ;;  %v9201_v2 = vpop.f32.mrf.mxu0  ;;  %v3230_v22 = vadd.f32 %v10873_v63, %v8793_v56 }
 0x568   : > { %3504 = vmatmul.f32.gmra.mxu2 %v3072_v62  ;;  %3905 = vmatmul.f32.gmra.mxu3 %v3072_v62  ;;  %v3583_v62 = vadd.f32 %v10874_v39, %v9011_v14 }
 0x569   : > { %v2931_v20 = vsub.f32 1.5, %v2930_v29  ;;  %v4625_v10 = vpop.f32.mrf.mxu1  ;;  %v9209_v29 = vpop.f32.mrf.mxu3  ;;  %v3981_v47 = vmax.f32 %v3230_v22, 0.0 }
 0x56a   : > { %v6759_v7 = vpop.eup %6758  ;;  %4319 = vmatmul.f32.gmra.mxu0 %v3979_v42  ;;  %10875 = vst [vmem:[#allocation65_spill] sm:$0xff] %v9209_v29 }
 0x56b   : > { %v2938_v40 = vmul.f32 %v6759_v7, %v1665_v8  ;;  %v9203_v44 = vpop.f32.mrf.mxu2  ;;  %v2932_v45 = vmul.f32 %v6757_v58, %v2931_v20  ;;  %vm2944_vm13 = vweird.f32 %v6759_v7 }
 0x56c   : > { %10872 = vst [vmem:[#allocation32_spill] sm:$0xff] %v9203_v44  ;;  %4672 = vmatmul.f32.gmra.mxu1 %v3948_v0  ;;  %v3950_v0 = vmax.f32 %v3583_v62, 0.0  ;;  %vm2945_vm15 = vmor %vm2943_vm14, %vm2944_vm13 }
 0x56d   : > { %v2939_v3 = vmul.f32 %v6759_v7, %v2938_v40  ;;  %v2936_v11 = vsel %vm2935_vm12, %v6757_v58, %v2932_v45  ;;  %v10877_v45 = vld [vmem:[#allocation77_spill] sm:$0xff] }
 0x56e   : > { %v3073_v12 = vmul.f32 %v2936_v11, %v8998_v18  ;;  %v3233_v63 = vadd.f32 %v10877_v45, %v8793_v56  ;;  %v9221_v18 = vld [vmem:[%s10623_s5] ss:$0 sm:$0xff] }
 0x56f   : > { %v2940_v42 = vmul.f32 0.5, %v2939_v3  ;;  %v9212_v54 = vpop.f32.mrf.mxu0  ;;  %v10878_v3 = vld [vmem:[#allocation46_spill] sm:$0xff] }
 0x570   : > { %3507 = vmatmul.f32.gmra.mxu2 %v3073_v12  ;;  %3908 = vmatmul.f32.gmra.mxu3 %v3073_v12  ;;  %v3586_v11 = vadd.f32 %v10878_v3, %v9011_v14  ;;  %v3983_v62 = vmax.f32 %v3233_v63, 0.0  ;;  %v4225_v12 = vadd.f32 %v9221_v18, %v9024_v35 }
 0x571   : > { %v2941_v20 = vsub.f32 1.5, %v2940_v42  ;;  %v4628_v44 = vpop.f32.mrf.mxu1  ;;  %v9230_v42 = vpop.f32.mrf.mxu3 }
 0x572   : > { %4322 = vmatmul.f32.gmra.mxu0 %v3981_v47  ;;  %10879 = vst [vmem:[#allocation67_spill] sm:$0xff] %v9230_v42 }
 0x573   : > { %v9214_v58 = vpop.f32.mrf.mxu2  ;;  %v2942_v40 = vmul.f32 %v6759_v7, %v2941_v20  ;;  %v3952_v20 = vmax.f32 %v3586_v11, 0.0 }
 0x574   : > { %10876 = vst [vmem:[#allocation34_spill] sm:$0xff] %v9214_v58  ;;  %4675 = vmatmul.f32.gmra.mxu1 %v3950_v0  ;;  %v4626_v0 = vadd.f32 %v4625_v10, %v4225_v12 }
 0x575   : > { %v2946_v22 = vsel %vm2945_vm15, %v6759_v7, %v2942_v40  ;;  %v10881_v40 = vld [vmem:[#allocation79_spill] sm:$0xff] }
 0x576   : > { %v3074_v39 = vmul.f32 %v2946_v22, %v9008_v24  ;;  %v3236_v45 = vadd.f32 %v10881_v40, %v8793_v56  ;;  %v10882_v24 = vld [vmem:[#allocation48_spill] sm:$0xff]  ;;  %v5009_v22 = vmax.f32 %v4626_v0, 0.0  ;;  %v10884_v40 = vld [vmem:[#allocation81_spill] sm:$0xff] }
 0x577   : > { %v9226_v8 = vpop.f32.mrf.mxu0  ;;  %v3589_v63 = vadd.f32 %v10882_v24, %v9011_v14  ;;  %v10885_v24 = vld [vmem:[#allocation50_spill] sm:$0xff] }
 0x578   : > { %3510 = vmatmul.f32.gmra.mxu2 %v3074_v39  ;;  %3911 = vmatmul.f32.gmra.mxu3 %v3074_v39  ;;  %v3985_v35 = vmax.f32 %v3236_v45, 0.0  ;;  %v4228_v39 = vadd.f32 %v9221_v18, %v9036_v27  ;;  %v3592_v0 = vadd.f32 %v10885_v24, %v9011_v14  ;;  %v4231_v27 = vadd.f32 %v9221_v18, %v9047_v36 }
 0x579   : > { %v4631_v47 = vpop.f32.mrf.mxu1  ;;  %v3954_v10 = vmax.f32 %v3589_v63, 0.0  ;;  %v4234_v36 = vadd.f32 %v9221_v18, %v9056_v21  ;;  %v4237_v21 = vadd.f32 %v9221_v18, %v9067_v13 }
 0x57a   : > { %4325 = vmatmul.f32.gmra.mxu0 %v3983_v62  ;;  %v4629_v62 = vadd.f32 %v4628_v44, %v4228_v39  ;;  %v3956_v44 = vmax.f32 %v3592_v0, 0.0  ;;  %v10887_v39 = vld [vmem:[#allocation83_spill] sm:$0xff] }
 0x57b   : > { %v9232_v7 = vpop.f32.mrf.mxu2 }
 0x57c   : > { %10880 = vst [vmem:[#allocation36_spill] sm:$0xff] %v9232_v7  ;;  %4678 = vmatmul.f32.gmra.mxu1 %v3952_v20  ;;  %v3239_v20 = vadd.f32 %v10884_v40, %v8793_v56  ;;  %v5010_v42 = vmax.f32 %v4629_v62, 0.0  ;;  %v10888_v40 = vld [vmem:[#allocation52_spill] sm:$0xff] }
 0x57d   : > { %v3595_v62 = vadd.f32 %v10888_v40, %v9011_v14 }
 0x57e   : > { %v3987_v45 = vmax.f32 %v3239_v20, 0.0 }
 0x57f   : > { %v9238_v3 = vpop.f32.mrf.mxu0 }
 0x580   : > { %5173 = vmatmul.f32.vlgmr.msrb.gmra.mxu2 %v5009_v22  ;;  %v4632_v22 = vadd.f32 %v4631_v47, %v4231_v27  ;;  %v3958_v47 = vmax.f32 %v3595_v62, 0.0  ;;  %v10890_v27 = vld [vmem:[#allocation85_spill] sm:$0xff] }
 0x581   : > { %v4634_v11 = vpop.f32.mrf.mxu1 }
 0x582   : > { %4328 = vmatmul.f32.gmra.mxu0 %v3985_v35  ;;  %v5011_v24 = vmax.f32 %v4632_v22, 0.0  ;;  %v4635_v0 = vadd.f32 %v4634_v11, %v4234_v36  ;;  %v10893_v36 = vld [vmem:[#allocation87_spill] sm:$0xff] }
 0x583   : > { %v9242_v12 = vpop.f32.mrf.mxu2 }
 0x584   : > { %10883 = vst [vmem:[#allocation69_spill] sm:$0xff] %v9242_v12  ;;  %4681 = vmatmul.f32.gmra.mxu1 %v3954_v10  ;;  %v3242_v10 = vadd.f32 %v10887_v39, %v8793_v56  ;;  %v10891_v39 = vld [vmem:[#allocation54_spill] sm:$0xff]  ;;  %v5012_v40 = vmax.f32 %v4635_v0, 0.0  ;;  %v10895_v0 = vld [vmem:[#allocation56_spill] sm:$0xff] }
 0x585   : > { %v3598_v22 = vadd.f32 %v10891_v39, %v9011_v14  ;;  %v3601_v39 = vadd.f32 %v10895_v0, %v9011_v14  ;;  %v10898_v0 = vld [vmem:[#allocation58_spill] sm:$0xff] }
 0x586   : > { %v3989_v20 = vmax.f32 %v3242_v10, 0.0 }
 0x587   : > { %v9248_v29 = vpop.f32.mrf.mxu0  ;;  %v3960_v11 = vmax.f32 %v3598_v22, 0.0  ;;  %v4240_v22 = vadd.f32 %v9221_v18, %v9078_v52 }
 0x588   : > { %5176 = vmatmul.f32.gmra.mxu2 %v5010_v42 }
 0x589   : > { %v4637_v63 = vpop.f32.mrf.mxu1 }
 0x58a   : > { %4331 = vmatmul.f32.gmra.mxu0 %v3987_v45 }
 0x58b   : > { %v9252_v35 = vpop.f32.mrf.mxu2 }
 0x58c   : > { %10886 = vst [vmem:[#allocation38_spill] sm:$0xff] %v9252_v35  ;;  %4684 = vmatmul.f32.gmra.mxu1 %v3956_v44  ;;  %v3245_v44 = vadd.f32 %v10890_v27, %v8793_v56  ;;  %v9276_v27 = vpop.f32.mrf.mxu3 }
 0x58d   : > { %10894 = vst [vmem:[#allocation73_spill] sm:$0xff] %v9276_v27 }
 0x58e   : > { %v3991_v10 = vmax.f32 %v3245_v44, 0.0 }
 0x58f   : > { %v9258_v12 = vpop.f32.mrf.mxu0 }
 0x590   : > { %5179 = vmatmul.f32.gmra.mxu2 %v5011_v24  ;;  %v4638_v24 = vadd.f32 %v4637_v63, %v4237_v21 }
 0x591   : > { %v4640_v42 = vpop.f32.mrf.mxu1 }
 0x592   : > { %4334 = vmatmul.f32.gmra.mxu0 %v3989_v20  ;;  %v5013_v44 = vmax.f32 %v4638_v24, 0.0  ;;  %v3604_v24 = vadd.f32 %v10898_v0, %v9011_v14  ;;  %v10902_v0 = vld [vmem:[#allocation60_spill] sm:$0xff] }
 0x593   : > { %v9262_v45 = vpop.f32.mrf.mxu2 }
 0x594   : > { %10889 = vst [vmem:[#allocation71_spill] sm:$0xff] %v9262_v45  ;;  %4687 = vmatmul.f32.gmra.mxu1 %v3958_v47  ;;  %v3248_v47 = vadd.f32 %v10893_v36, %v8793_v56 }
 0x596   : > { %v3993_v13 = vmax.f32 %v3248_v47, 0.0 }
 0x597   : > { %v9268_v35 = vpop.f32.mrf.mxu0 }
 0x598   : > { %5182 = vmatmul.f32.gmra.mxu2 %v5012_v40  ;;  %v3962_v40 = vmax.f32 %v3601_v39, 0.0  ;;  %v4243_v39 = vadd.f32 %v9221_v18, %v9089_v48 }
 0x599   : > { %v4643_v62 = vpop.f32.mrf.mxu1 }
 0x59a   : > { %4337 = vmatmul.f32.gmra.mxu0 %v3991_v10  ;;  %v4641_v10 = vadd.f32 %v4640_v42, %v4240_v22  ;;  %v5686_v42 = vld [vmem:[#allocation11] sm:$0xff]  ;;  %v4644_v22 = vadd.f32 %v4643_v62, %v4243_v39 }
 0x59b   : > { %v9272_v20 = vpop.f32.mrf.mxu2  ;;  %5721 = vmatpush.msrb.mxu3 %v5686_v42 }
 0x59c   : > { %10892 = vst [vmem:[#allocation40_spill] sm:$0xff] %v9272_v20  ;;  %4690 = vmatmul.f32.gmra.mxu1 %v3960_v11  ;;  %v10897_v11 = vld [vmem:[#allocation89_spill] sm:$0xff]  ;;  %v5014_v27 = vmax.f32 %v4641_v10, 0.0  ;;  %v9290_v20 = vpop.f32.mrf.mxu3 }
 0x59d   : > { %v3251_v36 = vadd.f32 %v10897_v11, %v8793_v56  ;;  %10899 = vst [vmem:[#allocation75_spill] sm:$0xff] %v9290_v20  ;;  %v10901_v11 = vld [vmem:[#allocation91_spill] sm:$0xff]  ;;  %v3607_v20 = vadd.f32 %v10902_v0, %v9011_v14 }
 0x59e   : > { %v3254_v10 = vadd.f32 %v10901_v11, %v8793_v56 }
 0x59f   : > { %v9280_v45 = vpop.f32.mrf.mxu0  ;;  %v3995_v52 = vmax.f32 %v3251_v36, 0.0  ;;  %v5015_v36 = vmax.f32 %v4644_v22, 0.0  ;;  %v10906_v22 = vld [vmem:[#allocation62_spill] sm:$0xff] }
 0x5a0   : > { %5185 = vmatmul.f32.gmra.mxu2 %v5013_v44  ;;  %v3997_v48 = vmax.f32 %v3254_v10, 0.0  ;;  %v3610_v0 = vadd.f32 %v10906_v22, %v9011_v14 }
 0x5a1   : > { %v4646_v63 = vpop.f32.mrf.mxu1 }
 0x5a2   : > { %4340 = vmatmul.f32.gmra.mxu0 %v3993_v13  ;;  %v3964_v13 = vmax.f32 %v3604_v24, 0.0 }
 0x5a3   : > { %v9284_v21 = vpop.f32.mrf.mxu2 }
 0x5a4   : > { %10896 = vst [vmem:[#allocation42_spill] sm:$0xff] %v9284_v21  ;;  %4693 = vmatmul.f32.gmra.mxu1 %v3962_v40  ;;  %v9306_v24 = vpop.f32.mrf.mxu3 }
 0x5a5   : > { %10903 = vst [vmem:[#allocation77_spill] sm:$0xff] %v9306_v24 }
 0x5a7   : > { %v9292_v47 = vpop.f32.mrf.mxu0 }
 0x5a8   : > { %5188 = vmatmul.f32.gmra.mxu2 %v5014_v27  ;;  %v4246_v27 = vadd.f32 %v9221_v18, %v9100_v1 }
 0x5a9   : > { %v4649_v44 = vpop.f32.mrf.mxu1 }
 0x5aa   : > { %4343 = vmatmul.f32.gmra.mxu0 %v3995_v52  ;;  %v3966_v52 = vmax.f32 %v3607_v20, 0.0  ;;  %v4647_v39 = vadd.f32 %v4646_v63, %v4246_v27  ;;  %v3968_v63 = vmax.f32 %v3610_v0, 0.0  ;;  %v4252_v0 = vadd.f32 %v9221_v18, %v9124_v60 }
 0x5ab   : > { %v9296_v40 = vpop.f32.mrf.mxu2 }
 0x5ac   : > { %10900 = vst [vmem:[#allocation44_spill] sm:$0xff] %v9296_v40  ;;  %4696 = vmatmul.f32.gmra.mxu1 %v3964_v13  ;;  %v10905_v13 = vld [vmem:[#allocation93_spill] sm:$0xff]  ;;  %v5016_v10 = vmax.f32 %v4647_v39, 0.0  ;;  %v9318_v27 = vpop.f32.mrf.mxu3  ;;  %v10910_v39 = vld [vmem:[#allocation64_spill] sm:$0xff] }
 0x5ad   : > { %v3257_v11 = vadd.f32 %v10905_v13, %v8793_v56  ;;  %10907 = vst [vmem:[#allocation79_spill] sm:$0xff] %v9318_v27  ;;  %v3613_v22 = vadd.f32 %v10910_v39, %v9011_v14 }
 0x5af   : > { %v9302_v21 = vpop.f32.mrf.mxu0  ;;  %v3999_v1 = vmax.f32 %v3257_v11, 0.0 }
 0x5b0   : > { %5191 = vmatmul.f32.gmra.mxu2 %v5015_v36  ;;  %v4249_v36 = vadd.f32 %v9221_v18, %v9112_v5 }
 0x5b1   : > { %v4652_v62 = vpop.f32.mrf.mxu1 }
 0x5b2   : > { %4346 = vmatmul.f32.gmra.mxu0 %v3997_v48  ;;  %v4650_v48 = vadd.f32 %v4649_v44, %v4249_v36 }
 0x5b3   : > { %v9308_v42 = vpop.f32.mrf.mxu2 }
 0x5b4   : > { %10904 = vst [vmem:[#allocation46_spill] sm:$0xff] %v9308_v42  ;;  %4699 = vmatmul.f32.gmra.mxu1 %v3966_v52  ;;  %v10909_v52 = vld [vmem:[#allocation95_spill] sm:$0xff]  ;;  %v5017_v11 = vmax.f32 %v4650_v48, 0.0  ;;  %v9334_v27 = vpop.f32.mrf.mxu3  ;;  %v10914_v48 = vld [vmem:[#allocation66_spill] sm:$0xff] }
 0x5b5   : > { %v3260_v13 = vadd.f32 %v10909_v52, %v8793_v56  ;;  %v10912_v52 = vld [vmem:[#allocation97_spill] sm:$0xff]  ;;  %10913 = vst [vmem:[#allocation50_spill] sm:$0xff] %v9334_v27  ;;  %v3616_v39 = vadd.f32 %v10914_v48, %v9011_v14  ;;  %v10917_v48 = vld [vmem:[#allocation68_spill] sm:$0xff] }
 0x5b7   : > { %v9314_v40 = vpop.f32.mrf.mxu0  ;;  %v4001_v5 = vmax.f32 %v3260_v13, 0.0 }
 0x5b8   : > { %5194 = vmatmul.f32.gmra.mxu2 %v5016_v10  ;;  %v3970_v10 = vmax.f32 %v3613_v22, 0.0  ;;  %v4255_v22 = vadd.f32 %v9221_v18, %v9137_v32 }
 0x5b9   : > { %v4655_v20 = vpop.f32.mrf.mxu1 }
 0x5ba   : > { %4349 = vmatmul.f32.gmra.mxu0 %v3999_v1  ;;  %v4653_v1 = vadd.f32 %v4652_v62, %v4252_v0 }
 0x5bb   : > { %v9320_v24 = vpop.f32.mrf.mxu2 }
 0x5bc   : > { %10908 = vst [vmem:[#allocation48_spill] sm:$0xff] %v9320_v24  ;;  %4702 = vmatmul.f32.gmra.mxu1 %v3968_v63  ;;  %v3263_v63 = vadd.f32 %v10912_v52, %v8793_v56  ;;  %v5018_v13 = vmax.f32 %v4653_v1, 0.0  ;;  %v3619_v1 = vadd.f32 %v10917_v48, %v9011_v14 }
 0x5be   : > { %v4003_v60 = vmax.f32 %v3263_v63, 0.0 }
 0x5bf   : > { %v9326_v42 = vpop.f32.mrf.mxu0 }
 0x5c0   : > { %5197 = vmatmul.f32.gmra.mxu2 %v5017_v11  ;;  %v3972_v11 = vmax.f32 %v3616_v39, 0.0  ;;  %v4258_v39 = vadd.f32 %v9221_v18, %v9148_v49  ;;  %v4261_v49 = vadd.f32 %v9221_v18, %v9159_v55 }
 0x5c1   : > { %v4658_v44 = vpop.f32.mrf.mxu1 }
 0x5c2   : > { %4352 = vmatmul.f32.gmra.mxu0 %v4001_v5  ;;  %v4656_v5 = vadd.f32 %v4655_v20, %v4255_v22 }
 0x5c3   : > { %v9330_v36 = vpop.f32.mrf.mxu2 }
 0x5c4   : > { %10911 = vst [vmem:[#allocation81_spill] sm:$0xff] %v9330_v36  ;;  %4705 = vmatmul.f32.gmra.mxu1 %v3970_v10  ;;  %v10916_v10 = vld [vmem:[#allocation99_spill] sm:$0xff]  ;;  %v5019_v27 = vmax.f32 %v4656_v5, 0.0  ;;  %v9348_v36 = vpop.f32.mrf.mxu3  ;;  %v10921_v5 = vld [vmem:[#allocation70_spill] sm:$0xff] }
 0x5c5   : > { %v3266_v52 = vadd.f32 %v10916_v10, %v8793_v56  ;;  %10918 = vst [vmem:[#allocation52_spill] sm:$0xff] %v9348_v36  ;;  %v3622_v48 = vadd.f32 %v10921_v5, %v9011_v14 }
 0x5c7   : > { %v9338_v24 = vpop.f32.mrf.mxu0  ;;  %v4005_v32 = vmax.f32 %v3266_v52, 0.0 }
 0x5c8   : > { %5200 = vmatmul.f32.gmra.mxu2 %v5018_v13  ;;  %v3974_v13 = vmax.f32 %v3619_v1, 0.0  ;;  %v3976_v1 = vmax.f32 %v3622_v48, 0.0 }
 0x5c9   : > { %v4661_v62 = vpop.f32.mrf.mxu1 }
 0x5ca   : > { %4355 = vmatmul.f32.gmra.mxu0 %v4003_v60  ;;  %v4659_v60 = vadd.f32 %v4658_v44, %v4258_v39 }
 0x5cb   : > { %v9342_v0 = vpop.f32.mrf.mxu2 }
 0x5cc   : > { %10915 = vst [vmem:[#allocation83_spill] sm:$0xff] %v9342_v0  ;;  %4708 = vmatmul.f32.gmra.mxu1 %v3972_v11  ;;  %v10920_v11 = vld [vmem:[#allocation101_spill] sm:$0xff]  ;;  %v5020_v36 = vmax.f32 %v4659_v60, 0.0  ;;  %v10925_v60 = vld [vmem:[#allocation72_spill] sm:$0xff] }
 0x5cd   : > { %v3269_v10 = vadd.f32 %v10920_v11, %v8793_v56  ;;  %v3625_v5 = vadd.f32 %v10925_v60, %v9011_v14 }
 0x5cf   : > { %v9350_v63 = vpop.f32.mrf.mxu0  ;;  %v4007_v52 = vmax.f32 %v3269_v10, 0.0 }
 0x5d0   : > { %5203 = vmatmul.f32.gmra.mxu2 %v5019_v27  ;;  %v9364_v27 = vpop.f32.mrf.mxu3 }
 0x5d1   : > { %v4664_v20 = vpop.f32.mrf.mxu1  ;;  %10922 = vst [vmem:[#allocation54_spill] sm:$0xff] %v9364_v27 }
 0x5d2   : > { %4358 = vmatmul.f32.gmra.mxu0 %v4005_v32  ;;  %v4662_v32 = vadd.f32 %v4661_v62, %v4261_v49  ;;  %v3978_v62 = vmax.f32 %v3625_v5, 0.0  ;;  %v4267_v5 = vadd.f32 %v9221_v18, %v9179_v50 }
 0x5d3   : > { %v9354_v22 = vpop.f32.mrf.mxu2 }
 0x5d4   : > { %10919 = vst [vmem:[#allocation85_spill] sm:$0xff] %v9354_v22  ;;  %4711 = vmatmul.f32.gmra.mxu1 %v3974_v13  ;;  %v10924_v13 = vld [vmem:[#allocation103_spill] sm:$0xff]  ;;  %v5021_v10 = vmax.f32 %v4662_v32, 0.0  ;;  %v10929_v32 = vld [vmem:[#allocation74_spill] sm:$0xff] }
 0x5d5   : > { %v3272_v11 = vadd.f32 %v10924_v13, %v8793_v56  ;;  %v3628_v60 = vadd.f32 %v10929_v32, %v9011_v14 }
 0x5d7   : > { %v9360_v0 = vpop.f32.mrf.mxu0  ;;  %v4009_v55 = vmax.f32 %v3272_v11, 0.0 }
 0x5d8   : > { %5206 = vmatmul.f32.gmra.mxu2 %v5020_v36  ;;  %v4264_v36 = vadd.f32 %v9221_v18, %v9168_v41  ;;  %v9376_v49 = vpop.f32.mrf.mxu3 }
 0x5d9   : > { %v4667_v44 = vpop.f32.mrf.mxu1  ;;  %10926 = vst [vmem:[#allocation56_spill] sm:$0xff] %v9376_v49 }
 0x5da   : > { %4361 = vmatmul.f32.gmra.mxu0 %v4007_v52  ;;  %v4665_v52 = vadd.f32 %v4664_v20, %v4264_v36 }
 0x5db   : > { %v9366_v39 = vpop.f32.mrf.mxu2 }
 0x5dc   : > { %10923 = vst [vmem:[#allocation87_spill] sm:$0xff] %v9366_v39  ;;  %4714 = vmatmul.f32.gmra.mxu1 %v3976_v1  ;;  %v10928_v1 = vld [vmem:[#allocation105_spill] sm:$0xff]  ;;  %v5022_v11 = vmax.f32 %v4665_v52, 0.0  ;;  %v10933_v52 = vld [vmem:[#allocation76_spill] sm:$0xff] }
 0x5dd   : > { %v3275_v13 = vadd.f32 %v10928_v1, %v8793_v56  ;;  %v10931_v1 = vld [vmem:[#allocation107_spill] sm:$0xff]  ;;  %v3631_v32 = vadd.f32 %v10933_v52, %v9011_v14  ;;  %v10936_v52 = vld [vmem:[#allocation78_spill] sm:$0xff] }
 0x5df   : > { %v9372_v22 = vpop.f32.mrf.mxu0  ;;  %v4011_v41 = vmax.f32 %v3275_v13, 0.0 }
 0x5e0   : > { %5209 = vmatmul.f32.gmra.mxu2 %v5021_v10  ;;  %v3980_v10 = vmax.f32 %v3628_v60, 0.0  ;;  %v9392_v49 = vpop.f32.mrf.mxu3  ;;  %v4270_v60 = vadd.f32 %v9221_v18, %v9190_v6 }
 0x5e1   : > { %v4670_v48 = vpop.f32.mrf.mxu1  ;;  %10932 = vst [vmem:[#allocation91_spill] sm:$0xff] %v9392_v49 }
 0x5e2   : > { %4364 = vmatmul.f32.gmra.mxu0 %v4009_v55  ;;  %v4668_v55 = vadd.f32 %v4667_v44, %v4267_v5 }
 0x5e3   : > { %v9378_v27 = vpop.f32.mrf.mxu2 }
 0x5e4   : > { %10927 = vst [vmem:[#allocation89_spill] sm:$0xff] %v9378_v27  ;;  %4717 = vmatmul.f32.gmra.mxu1 %v3978_v62  ;;  %v3278_v62 = vadd.f32 %v10931_v1, %v8793_v56  ;;  %v5023_v13 = vmax.f32 %v4668_v55, 0.0  ;;  %v3634_v55 = vadd.f32 %v10936_v52, %v9011_v14 }
 0x5e6   : > { %v4013_v50 = vmax.f32 %v3278_v62, 0.0 }
 0x5e7   : > { %v9384_v39 = vpop.f32.mrf.mxu0 }
 0x5e8   : > { %5212 = vmatmul.f32.gmra.mxu2 %v5022_v11  ;;  %v3982_v11 = vmax.f32 %v3631_v32, 0.0  ;;  %v4273_v32 = vadd.f32 %v9221_v18, %v9201_v2  ;;  %v4276_v2 = vadd.f32 %v9221_v18, %v9212_v54  ;;  %v10943_v54 = vld [vmem:[#allocation82_spill] sm:$0xff] }
 0x5e9   : > { %v4673_v20 = vpop.f32.mrf.mxu1 }
 0x5ea   : > { %4367 = vmatmul.f32.gmra.mxu0 %v4011_v41  ;;  %v4671_v41 = vadd.f32 %v4670_v48, %v4270_v60 }
 0x5eb   : > { %v9388_v36 = vpop.f32.mrf.mxu2 }
 0x5ec   : > { %10930 = vst [vmem:[#allocation58_spill] sm:$0xff] %v9388_v36  ;;  %4720 = vmatmul.f32.gmra.mxu1 %v3980_v10  ;;  %v10935_v10 = vld [vmem:[#allocation109_spill] sm:$0xff]  ;;  %v5024_v49 = vmax.f32 %v4671_v41, 0.0  ;;  %v9406_v36 = vpop.f32.mrf.mxu3  ;;  %v10940_v41 = vld [vmem:[#allocation80_spill] sm:$0xff] }
 0x5ed   : > { %v3281_v1 = vadd.f32 %v10935_v10, %v8793_v56  ;;  %10937 = vst [vmem:[#allocation93_spill] sm:$0xff] %v9406_v36  ;;  %v3637_v52 = vadd.f32 %v10940_v41, %v9011_v14 }
 0x5ef   : > { %v9396_v27 = vpop.f32.mrf.mxu0  ;;  %v4015_v6 = vmax.f32 %v3281_v1, 0.0 }
 0x5f0   : > { %5215 = vmatmul.f32.gmra.mxu2 %v5023_v13  ;;  %v3984_v13 = vmax.f32 %v3634_v55, 0.0 }
 0x5f1   : > { %v4676_v44 = vpop.f32.mrf.mxu1 }
 0x5f2   : > { %4370 = vmatmul.f32.gmra.mxu0 %v4013_v50  ;;  %v4674_v50 = vadd.f32 %v4673_v20, %v4273_v32  ;;  %v4677_v32 = vadd.f32 %v4676_v44, %v4276_v2 }
 0x5f3   : > { %v9400_v5 = vpop.f32.mrf.mxu2 }
 0x5f4   : > { %10934 = vst [vmem:[#allocation60_spill] sm:$0xff] %v9400_v5  ;;  %4723 = vmatmul.f32.gmra.mxu1 %v3982_v11  ;;  %v10939_v11 = vld [vmem:[#allocation111_spill] sm:$0xff]  ;;  %v5025_v36 = vmax.f32 %v4674_v50, 0.0  ;;  %v9427_v20 = vpop.f32.mrf.mxu3  ;;  %v10942_v50 = vld [vmem:[#allocation113_spill] sm:$0xff]  ;;  %v5026_v41 = vmax.f32 %v4677_v32, 0.0 }
 0x5f5   : > { %v3284_v10 = vadd.f32 %v10939_v11, %v8793_v56  ;;  %10941 = vst [vmem:[#allocation95_spill] sm:$0xff] %v9427_v20  ;;  %v3287_v11 = vadd.f32 %v10942_v50, %v8793_v56 }
 0x5f7   : > { %v9408_v62 = vpop.f32.mrf.mxu0  ;;  %v4017_v1 = vmax.f32 %v3284_v10, 0.0  ;;  %v4019_v58 = vmax.f32 %v3287_v11, 0.0  ;;  %v10946_v11 = vld [vmem:[#allocation84_spill] sm:$0xff] }
 0x5f8   : > { %5218 = vmatmul.f32.gmra.mxu2 %v5024_v49  ;;  %v9425_v49 = vld [vmem:[%s10625_s7] ss:$0 sm:$0xff] }
 0x5f9   : > { %v4679_v48 = vpop.f32.mrf.mxu1 }
 0x5fa   : > { %4373 = vmatmul.f32.gmra.mxu0 %v4015_v6  ;;  %v3986_v6 = vmax.f32 %v3637_v52, 0.0  ;;  %v4279_v52 = vadd.f32 %v9221_v18, %v9226_v8 }
 0x5fb   : > { %v9412_v60 = vpop.f32.mrf.mxu2 }
 0x5fc   : > { %10938 = vst [vmem:[#allocation62_spill] sm:$0xff] %v9412_v60  ;;  %4726 = vmatmul.f32.gmra.mxu1 %v3984_v13  ;;  %v4680_v2 = vadd.f32 %v4679_v48, %v4279_v52  ;;  %v9438_v50 = vpop.f32.mrf.mxu3 }
 0x5fd   : > { %10944 = vst [vmem:[#allocation64_spill] sm:$0xff] %v9438_v50 }
 0x5fe   : > { %v5027_v20 = vmax.f32 %v4680_v2, 0.0 }
 0x5ff   : > { %v9418_v5 = vpop.f32.mrf.mxu0 }
 0x600   : > { %5221 = vmatmul.f32.gmra.mxu2 %v5025_v36  ;;  %v3640_v36 = vadd.f32 %v10943_v54, %v9011_v14 }
 0x601   : > { %v4682_v55 = vpop.f32.mrf.mxu1 }
 0x602   : > { %4376 = vmatmul.f32.gmra.mxu0 %v4017_v1  ;;  %v3988_v1 = vmax.f32 %v3640_v36, 0.0 }
 0x603   : > { %v5174_v13 = vpop.f32.mrf.mxu2 }
 0x604   : > { %v5175_v10 = vadd.f32 %v9425_v49, %v5174_v13  ;;  %4729 = vmatmul.f32.gmra.mxu1 %v3986_v6  ;;  %v10945_v13 = vld [vmem:[#allocation115_spill] sm:$0xff]  ;;  %v9452_v2 = vpop.f32.mrf.mxu3 }
 0x605   : > { %v3290_v54 = vadd.f32 %v10945_v13, %v8793_v56  ;;  %10948 = vst [vmem:[#allocation97_spill] sm:$0xff] %v9452_v2 }
 0x606   : > { %v5558_v60 = vmax.f32 %v5175_v10, 0.0  ;;  %v3643_v10 = vadd.f32 %v10946_v11, %v9011_v14 }
 0x607   : > { %v9434_v7 = vpop.f32.mrf.mxu0 }
 0x608   : > { %5224 = vmatmul.f32.gmra.mxu2 %v5026_v41  ;;  %5722 = vmatmul.f32.vlgmr.msrb.gmra.mxu3 %v5558_v60  ;;  %v4021_v60 = vmax.f32 %v3290_v54, 0.0  ;;  %v3990_v36 = vmax.f32 %v3643_v10, 0.0  ;;  %v10949_v54 = vld [vmem:[#allocation86_spill] sm:$0xff] }
 0x609   : > { %v4685_v44 = vpop.f32.mrf.mxu1 }
 0x60a   : > { %4379 = vmatmul.f32.gmra.mxu0 %v4019_v58  ;;  %v4282_v58 = vadd.f32 %v9221_v18, %v9238_v3 }
 0x60b   : > { %v5177_v6 = vpop.f32.mrf.mxu2 }
 0x60c   : > { %v5178_v32 = vadd.f32 %v9425_v49, %v5177_v6  ;;  %4732 = vmatmul.f32.gmra.mxu1 %v3988_v1  ;;  %v4683_v52 = vadd.f32 %v4682_v55, %v4282_v58  ;;  %v10947_v1 = vld [vmem:[#allocation117_spill] sm:$0xff]  ;;  %v4285_v55 = vadd.f32 %v9221_v18, %v9248_v29  ;;  %v9465_v17 = vpop.f32.mrf.mxu3 }
 0x60d   : > { %v3293_v6 = vadd.f32 %v10947_v1, %v8793_v56  ;;  %10952 = vst [vmem:[#allocation66_spill] sm:$0xff] %v9465_v17 }
 0x60e   : > { %v5559_v8 = vmax.f32 %v5178_v32, 0.0  ;;  %v3646_v32 = vadd.f32 %v10949_v54, %v9011_v14  ;;  %v5028_v50 = vmax.f32 %v4683_v52, 0.0  ;;  %v4686_v58 = vadd.f32 %v4685_v44, %v4285_v55  ;;  %v10951_v52 = vld [vmem:[#allocation88_spill] sm:$0xff] }
 0x60f   : > { %v9445_v41 = vpop.f32.mrf.mxu0  ;;  %v4288_v44 = vadd.f32 %v9221_v18, %v9258_v12 }
 0x610   : > { %5227 = vmatmul.f32.gmra.mxu2 %v5027_v20  ;;  %5725 = vmatmul.f32.gmra.mxu3 %v5559_v8  ;;  %v4023_v8 = vmax.f32 %v3293_v6, 0.0  ;;  %v5029_v6 = vmax.f32 %v4686_v58, 0.0 }
 0x611   : > { %v4688_v48 = vpop.f32.mrf.mxu1 }
 0x612   : > { %4382 = vmatmul.f32.gmra.mxu0 %v4021_v60  ;;  %v3992_v60 = vmax.f32 %v3646_v32, 0.0 }
 0x613   : > { %v5180_v13 = vpop.f32.mrf.mxu2 }
 0x614   : > { %v5181_v11 = vadd.f32 %v9425_v49, %v5180_v13  ;;  %4735 = vmatmul.f32.gmra.mxu1 %v3990_v36  ;;  %v10950_v13 = vld [vmem:[#allocation119_spill] sm:$0xff] }
 0x615   : > { %v3296_v1 = vadd.f32 %v10950_v13, %v8793_v56  ;;  %v10954_v13 = vld [vmem:[#allocation90_spill] sm:$0xff] }
 0x616   : > { %v5560_v3 = vmax.f32 %v5181_v11, 0.0  ;;  %v3649_v11 = vadd.f32 %v10951_v52, %v9011_v14 }
 0x617   : > { %v9456_v20 = vpop.f32.mrf.mxu0 }
 0x618   : > { %5230 = vmatmul.f32.gmra.mxu2 %v5028_v50  ;;  %5728 = vmatmul.f32.gmra.mxu3 %v5560_v3  ;;  %v4025_v50 = vmax.f32 %v3296_v1, 0.0  ;;  %v3994_v3 = vmax.f32 %v3649_v11, 0.0 }
 0x619   : > { %v4691_v10 = vpop.f32.mrf.mxu1 }
 0x61a   : > { %4385 = vmatmul.f32.gmra.mxu0 %v4023_v8  ;;  %v4689_v8 = vadd.f32 %v4688_v48, %v4288_v44  ;;  %v9480_v48 = vpop.f32.mrf.mxu3 }
 0x61b   : > { %v5183_v36 = vpop.f32.mrf.mxu2  ;;  %10955 = vst [vmem:[#allocation99_spill] sm:$0xff] %v9480_v48 }
 0x61c   : > { %v5184_v54 = vadd.f32 %v9425_v49, %v5183_v36  ;;  %4738 = vmatmul.f32.gmra.mxu1 %v3992_v60  ;;  %v10953_v60 = vld [vmem:[#allocation121_spill] sm:$0xff]  ;;  %v5030_v1 = vmax.f32 %v4689_v8, 0.0 }
 0x61d   : > { %v3299_v36 = vadd.f32 %v10953_v60, %v8793_v56  ;;  %v10957_v60 = vld [vmem:[#allocation92_spill] sm:$0xff] }
 0x61e   : > { %v5561_v2 = vmax.f32 %v5184_v54, 0.0  ;;  %v3652_v54 = vadd.f32 %v10954_v13, %v9011_v14 }
 0x61f   : > { %v9467_v29 = vpop.f32.mrf.mxu0  ;;  %v4027_v12 = vmax.f32 %v3299_v36, 0.0  ;;  %v3655_v36 = vadd.f32 %v10957_v60, %v9011_v14 }
 0x620   : > { %5233 = vmatmul.f32.gmra.mxu2 %v5029_v6  ;;  %5731 = vmatmul.f32.gmra.mxu3 %v5561_v2  ;;  %v4291_v2 = vadd.f32 %v9221_v18, %v9268_v35  ;;  %v3996_v6 = vmax.f32 %v3652_v54, 0.0  ;;  %v4294_v54 = vadd.f32 %v9221_v18, %v9280_v45 }
 0x621   : > { %v4694_v32 = vpop.f32.mrf.mxu1 }
 0x622   : > { %4388 = vmatmul.f32.gmra.mxu0 %v4025_v50  ;;  %v4692_v50 = vadd.f32 %v4691_v10, %v4291_v2  ;;  %v9491_v2 = vpop.f32.mrf.mxu3 }
 0x623   : > { %v5186_v55 = vpop.f32.mrf.mxu2  ;;  %10958 = vst [vmem:[#allocation68_spill] sm:$0xff] %v9491_v2 }
 0x624   : > { %v5187_v58 = vadd.f32 %v9425_v49, %v5186_v55  ;;  %4741 = vmatmul.f32.gmra.mxu1 %v3994_v3  ;;  %v10956_v3 = vld [vmem:[#allocation123_spill] sm:$0xff] }
 0x625   : > { %v3302_v55 = vadd.f32 %v10956_v3, %v8793_v56 }
 0x626   : > { %v5562_v52 = vmax.f32 %v5187_v58, 0.0  ;;  %v5031_v58 = vmax.f32 %v4692_v50, 0.0 }
 0x627   : > { %v9476_v17 = vpop.f32.mrf.mxu0 }
 0x628   : > { %5236 = vmatmul.f32.gmra.mxu2 %v5030_v1  ;;  %5734 = vmatmul.f32.gmra.mxu3 %v5562_v52  ;;  %v4029_v1 = vmax.f32 %v3302_v55, 0.0  ;;  %v3998_v52 = vmax.f32 %v3655_v36, 0.0  ;;  %v10960_v55 = vld [vmem:[#allocation94_spill] sm:$0xff] }
 0x629   : > { %v4697_v11 = vpop.f32.mrf.mxu1 }
 0x62a   : > { %4391 = vmatmul.f32.gmra.mxu0 %v4027_v12  ;;  %v4695_v12 = vadd.f32 %v4694_v32, %v4294_v54  ;;  %v4297_v32 = vadd.f32 %v9221_v18, %v9292_v47 }
 0x62b   : > { %v5189_v44 = vpop.f32.mrf.mxu2 }
 0x62c   : > { %v5190_v8 = vadd.f32 %v9425_v49, %v5189_v44  ;;  %4744 = vmatmul.f32.gmra.mxu1 %v3996_v6  ;;  %v10959_v44 = vld [vmem:[#allocation125_spill] sm:$0xff]  ;;  %v5032_v60 = vmax.f32 %v4695_v12, 0.0  ;;  %v4698_v54 = vadd.f32 %v4697_v11, %v4297_v32  ;;  %v9505_v12 = vpop.f32.mrf.mxu3  ;;  %v4300_v11 = vadd.f32 %v9221_v18, %v9302_v21 }
 0x62d   : > { %v3305_v3 = vadd.f32 %v10959_v44, %v8793_v56  ;;  %10962 = vst [vmem:[#allocation101_spill] sm:$0xff] %v9505_v12 }
 0x62e   : > { %v5563_v35 = vmax.f32 %v5190_v8, 0.0  ;;  %v3658_v8 = vadd.f32 %v10960_v55, %v9011_v14  ;;  %v5033_v2 = vmax.f32 %v4698_v54, 0.0  ;;  %v10965_v54 = vld [vmem:[#allocation98_spill] sm:$0xff] }
 0x62f   : > { %v9487_v13 = vpop.f32.mrf.mxu0 }
 0x630   : > { %5239 = vmatmul.f32.gmra.mxu2 %v5031_v58  ;;  %5737 = vmatmul.f32.gmra.mxu3 %v5563_v35  ;;  %v4031_v35 = vmax.f32 %v3305_v3, 0.0  ;;  %v10963_v3 = vld [vmem:[#allocation96_spill] sm:$0xff] }
 0x631   : > { %v4700_v10 = vpop.f32.mrf.mxu1 }
 0x632   : > { %4394 = vmatmul.f32.gmra.mxu0 %v4029_v1  ;;  %v4000_v1 = vmax.f32 %v3658_v8, 0.0  ;;  %v4701_v32 = vadd.f32 %v4700_v10, %v4300_v11  ;;  %v4303_v10 = vadd.f32 %v9221_v18, %v9314_v40 }
 0x633   : > { %v5192_v6 = vpop.f32.mrf.mxu2 }
 0x634   : > { %v5193_v50 = vadd.f32 %v9425_v49, %v5192_v6  ;;  %4747 = vmatmul.f32.gmra.mxu1 %v3998_v52  ;;  %v10961_v52 = vld [vmem:[#allocation127_spill] sm:$0xff]  ;;  %v9518_v48 = vpop.f32.mrf.mxu3 }
 0x635   : > { %v3308_v6 = vadd.f32 %v10961_v52, %v8793_v56  ;;  %10966 = vst [vmem:[#allocation70_spill] sm:$0xff] %v9518_v48 }
 0x636   : > { %v5564_v45 = vmax.f32 %v5193_v50, 0.0  ;;  %v3661_v50 = vadd.f32 %v10963_v3, %v9011_v14 }
 0x637   : > { %v9498_v58 = vpop.f32.mrf.mxu0 }
 0x638   : > { %5242 = vmatmul.f32.gmra.mxu2 %v5032_v60  ;;  %5740 = vmatmul.f32.gmra.mxu3 %v5564_v45  ;;  %v4033_v45 = vmax.f32 %v3308_v6, 0.0  ;;  %v5034_v6 = vmax.f32 %v4701_v32, 0.0 }
 0x639   : > { %v4703_v36 = vpop.f32.mrf.mxu1 }
 0x63a   : > { %4397 = vmatmul.f32.gmra.mxu0 %v4031_v35  ;;  %v4002_v35 = vmax.f32 %v3661_v50, 0.0 }
 0x63b   : > { %v5195_v44 = vpop.f32.mrf.mxu2 }
 0x63c   : > { %v5196_v55 = vadd.f32 %v9425_v49, %v5195_v44  ;;  %4750 = vmatmul.f32.gmra.mxu1 %v4000_v1  ;;  %v10964_v44 = vld [vmem:[#allocation129_spill] sm:$0xff] }
 0x63d   : > { %v3311_v52 = vadd.f32 %v10964_v44, %v8793_v56  ;;  %v10968_v44 = vld [vmem:[#allocation100_spill] sm:$0xff] }
 0x63e   : > { %v5565_v47 = vmax.f32 %v5196_v55, 0.0  ;;  %v3664_v55 = vadd.f32 %v10965_v54, %v9011_v14 }
 0x63f   : > { %v9509_v60 = vpop.f32.mrf.mxu0 }
 0x640   : > { %5245 = vmatmul.f32.gmra.mxu2 %v5033_v2  ;;  %5743 = vmatmul.f32.gmra.mxu3 %v5565_v47  ;;  %v4035_v2 = vmax.f32 %v3311_v52, 0.0  ;;  %v4004_v47 = vmax.f32 %v3664_v55, 0.0 }
 0x641   : > { %v4706_v8 = vpop.f32.mrf.mxu1 }
 0x642   : > { %4400 = vmatmul.f32.gmra.mxu0 %v4033_v45  ;;  %v4704_v45 = vadd.f32 %v4703_v36, %v4303_v10  ;;  %v9533_v36 = vpop.f32.mrf.mxu3 }
 0x643   : > { %v5198_v1 = vpop.f32.mrf.mxu2  ;;  %10969 = vst [vmem:[#allocation103_spill] sm:$0xff] %v9533_v36 }
 0x644   : > { %v5199_v3 = vadd.f32 %v9425_v49, %v5198_v1  ;;  %4753 = vmatmul.f32.gmra.mxu1 %v4002_v35  ;;  %v10967_v35 = vld [vmem:[#allocation131_spill] sm:$0xff]  ;;  %v5035_v52 = vmax.f32 %v4704_v45, 0.0 }
 0x645   : > { %v3314_v1 = vadd.f32 %v10967_v35, %v8793_v56  ;;  %v10971_v35 = vld [vmem:[#allocation102_spill] sm:$0xff] }
 0x646   : > { %v5566_v12 = vmax.f32 %v5199_v3, 0.0  ;;  %v3667_v3 = vadd.f32 %v10968_v44, %v9011_v14 }
 0x647   : > { %v9520_v21 = vpop.f32.mrf.mxu0  ;;  %v4037_v40 = vmax.f32 %v3314_v1, 0.0  ;;  %v3670_v1 = vadd.f32 %v10971_v35, %v9011_v14 }
 0x648   : > { %5248 = vmatmul.f32.gmra.mxu2 %v5034_v6  ;;  %5746 = vmatmul.f32.gmra.mxu3 %v5566_v12  ;;  %v4306_v12 = vadd.f32 %v9221_v18, %v9326_v42  ;;  %v4006_v6 = vmax.f32 %v3667_v3, 0.0  ;;  %v4309_v3 = vadd.f32 %v9221_v18, %v9338_v24 }
 0x649   : > { %v4709_v50 = vpop.f32.mrf.mxu1 }
 0x64a   : > { %4403 = vmatmul.f32.gmra.mxu0 %v4035_v2  ;;  %v4707_v2 = vadd.f32 %v4706_v8, %v4306_v12  ;;  %v9544_v12 = vpop.f32.mrf.mxu3 }
 0x64b   : > { %v5201_v11 = vpop.f32.mrf.mxu2  ;;  %10972 = vst [vmem:[#allocation72_spill] sm:$0xff] %v9544_v12 }
 0x64c   : > { %v5202_v32 = vadd.f32 %v9425_v49, %v5201_v11  ;;  %4756 = vmatmul.f32.gmra.mxu1 %v4004_v47  ;;  %v10970_v47 = vld [vmem:[#allocation133_spill] sm:$0xff] }
 0x64d   : > { %v3317_v11 = vadd.f32 %v10970_v47, %v8793_v56 }
 0x64e   : > { %v5567_v54 = vmax.f32 %v5202_v32, 0.0  ;;  %v5036_v32 = vmax.f32 %v4707_v2, 0.0 }
 0x64f   : > { %v9529_v48 = vpop.f32.mrf.mxu0 }
 0x650   : > { %5251 = vmatmul.f32.gmra.mxu2 %v5035_v52  ;;  %5749 = vmatmul.f32.gmra.mxu3 %v5567_v54  ;;  %v4039_v52 = vmax.f32 %v3317_v11, 0.0  ;;  %v4008_v54 = vmax.f32 %v3670_v1, 0.0  ;;  %v10974_v11 = vld [vmem:[#allocation104_spill] sm:$0xff] }
 0x651   : > { %v4712_v55 = vpop.f32.mrf.mxu1 }
 0x652   : > { %4406 = vmatmul.f32.gmra.mxu0 %v4037_v40  ;;  %v4710_v40 = vadd.f32 %v4709_v50, %v4309_v3  ;;  %v4312_v50 = vadd.f32 %v9221_v18, %v9350_v63 }
 0x653   : > { %v5204_v10 = vpop.f32.mrf.mxu2 }
 0x654   : > { %v5205_v45 = vadd.f32 %v9425_v49, %v5204_v10  ;;  %4759 = vmatmul.f32.gmra.mxu1 %v4006_v6  ;;  %v10973_v10 = vld [vmem:[#allocation135_spill] sm:$0xff]  ;;  %v5037_v35 = vmax.f32 %v4710_v40, 0.0  ;;  %v4713_v3 = vadd.f32 %v4712_v55, %v4312_v50  ;;  %v9558_v40 = vpop.f32.mrf.mxu3  ;;  %v4315_v55 = vadd.f32 %v9221_v18, %v9360_v0 }
 0x655   : > { %v3320_v47 = vadd.f32 %v10973_v10, %v8793_v56  ;;  %10976 = vst [vmem:[#allocation105_spill] sm:$0xff] %v9558_v40 }
 0x656   : > { %v5568_v42 = vmax.f32 %v5205_v45, 0.0  ;;  %v3673_v45 = vadd.f32 %v10974_v11, %v9011_v14  ;;  %v5038_v12 = vmax.f32 %v4713_v3, 0.0  ;;  %v10979_v3 = vld [vmem:[#allocation108_spill] sm:$0xff] }
 0x657   : > { %v9540_v44 = vpop.f32.mrf.mxu0 }
 0x658   : > { %5254 = vmatmul.f32.gmra.mxu2 %v5036_v32  ;;  %5752 = vmatmul.f32.gmra.mxu3 %v5568_v42  ;;  %v4041_v42 = vmax.f32 %v3320_v47, 0.0  ;;  %v10977_v47 = vld [vmem:[#allocation106_spill] sm:$0xff] }
 0x659   : > { %v4715_v8 = vpop.f32.mrf.mxu1 }
 0x65a   : > { %4409 = vmatmul.f32.gmra.mxu0 %v4039_v52  ;;  %v4010_v52 = vmax.f32 %v3673_v45, 0.0  ;;  %v4716_v50 = vadd.f32 %v4715_v8, %v4315_v55  ;;  %v4318_v8 = vadd.f32 %v9221_v18, %v9372_v22 }
 0x65b   : > { %v5207_v6 = vpop.f32.mrf.mxu2 }
 0x65c   : > { %v5208_v2 = vadd.f32 %v9425_v49, %v5207_v6  ;;  %4762 = vmatmul.f32.gmra.mxu1 %v4008_v54  ;;  %v10975_v54 = vld [vmem:[#allocation137_spill] sm:$0xff]  ;;  %v9571_v36 = vpop.f32.mrf.mxu3 }
 0x65d   : > { %v3323_v6 = vadd.f32 %v10975_v54, %v8793_v56  ;;  %10980 = vst [vmem:[#allocation74_spill] sm:$0xff] %v9571_v36 }
 0x65e   : > { %v5569_v24 = vmax.f32 %v5208_v2, 0.0  ;;  %v3676_v2 = vadd.f32 %v10977_v47, %v9011_v14 }
 0x65f   : > { %v9551_v32 = vpop.f32.mrf.mxu0 }
 0x660   : > { %5257 = vmatmul.f32.gmra.mxu2 %v5037_v35  ;;  %5755 = vmatmul.f32.gmra.mxu3 %v5569_v24  ;;  %v4043_v24 = vmax.f32 %v3323_v6, 0.0  ;;  %v5039_v6 = vmax.f32 %v4716_v50, 0.0 }
 0x661   : > { %v4718_v1 = vpop.f32.mrf.mxu1 }
 0x662   : > { %4412 = vmatmul.f32.gmra.mxu0 %v4041_v42  ;;  %v4012_v42 = vmax.f32 %v3676_v2, 0.0 }
 0x663   : > { %v5210_v10 = vpop.f32.mrf.mxu2 }
 0x664   : > { %v5211_v11 = vadd.f32 %v9425_v49, %v5210_v10  ;;  %4765 = vmatmul.f32.gmra.mxu1 %v4010_v52  ;;  %v10978_v10 = vld [vmem:[#allocation139_spill] sm:$0xff] }
 0x665   : > { %v3326_v54 = vadd.f32 %v10978_v10, %v8793_v56  ;;  %v10982_v10 = vld [vmem:[#allocation110_spill] sm:$0xff] }
 0x666   : > { %v5570_v63 = vmax.f32 %v5211_v11, 0.0  ;;  %v3679_v11 = vadd.f32 %v10979_v3, %v9011_v14 }
 0x667   : > { %v9562_v35 = vpop.f32.mrf.mxu0 }
 0x668   : > { %5260 = vmatmul.f32.gmra.mxu2 %v5038_v12  ;;  %5758 = vmatmul.f32.gmra.mxu3 %v5570_v63  ;;  %v4045_v12 = vmax.f32 %v3326_v54, 0.0  ;;  %v4014_v63 = vmax.f32 %v3679_v11, 0.0 }
 0x669   : > { %v4721_v45 = vpop.f32.mrf.mxu1 }
 0x66a   : > { %4415 = vmatmul.f32.gmra.mxu0 %v4043_v24  ;;  %v4719_v24 = vadd.f32 %v4718_v1, %v4318_v8  ;;  %v9586_v1 = vpop.f32.mrf.mxu3 }
 0x66b   : > { %v5213_v52 = vpop.f32.mrf.mxu2  ;;  %10983 = vst [vmem:[#allocation107_spill] sm:$0xff] %v9586_v1 }
 0x66c   : > { %v5214_v47 = vadd.f32 %v9425_v49, %v5213_v52  ;;  %4768 = vmatmul.f32.gmra.mxu1 %v4012_v42  ;;  %v10981_v42 = vld [vmem:[#allocation141_spill] sm:$0xff]  ;;  %v5040_v54 = vmax.f32 %v4719_v24, 0.0 }
 0x66d   : > { %v3329_v52 = vadd.f32 %v10981_v42, %v8793_v56  ;;  %v10985_v42 = vld [vmem:[#allocation112_spill] sm:$0xff] }
 0x66e   : > { %v5571_v40 = vmax.f32 %v5214_v47, 0.0  ;;  %v3682_v47 = vadd.f32 %v10982_v10, %v9011_v14 }
 0x66f   : > { %v9573_v0 = vpop.f32.mrf.mxu0  ;;  %v4047_v22 = vmax.f32 %v3329_v52, 0.0  ;;  %v3685_v52 = vadd.f32 %v10985_v42, %v9011_v14 }
 0x670   : > { %5263 = vmatmul.f32.gmra.mxu2 %v5039_v6  ;;  %5761 = vmatmul.f32.gmra.mxu3 %v5571_v40  ;;  %v4321_v40 = vadd.f32 %v9221_v18, %v9384_v39  ;;  %v4016_v6 = vmax.f32 %v3682_v47, 0.0 }
 0x671   : > { %v4724_v2 = vpop.f32.mrf.mxu1 }
 0x672   : > { %4418 = vmatmul.f32.gmra.mxu0 %v4045_v12  ;;  %v4722_v12 = vadd.f32 %v4721_v45, %v4321_v40  ;;  %v9598_v45 = vld [vmem:[%s10623_s5] ss:$0 sm:$0xff]  ;;  %v9602_v40 = vpop.f32.mrf.mxu3 }
 0x673   : > { %v5216_v55 = vpop.f32.mrf.mxu2  ;;  %v4324_v47 = vadd.f32 %v9598_v45, %v9396_v27  ;;  %10986 = vst [vmem:[#allocation76_spill] sm:$0xff] %v9602_v40 }
 0x674   : > { %v5217_v50 = vadd.f32 %v9425_v49, %v5216_v55  ;;  %4771 = vmatmul.f32.gmra.mxu1 %v4014_v63  ;;  %v10984_v63 = vld [vmem:[#allocation143_spill] sm:$0xff] }
 0x675   : > { %v3332_v55 = vadd.f32 %v10984_v63, %v8793_v56 }
 0x676   : > { %v5572_v3 = vmax.f32 %v5217_v50, 0.0  ;;  %v5041_v50 = vmax.f32 %v4722_v12, 0.0  ;;  %v10987_v12 = vld [vmem:[#allocation145_spill] sm:$0xff] }
 0x677   : > { %v9582_v36 = vpop.f32.mrf.mxu0  ;;  %v4049_v10 = vmax.f32 %v3332_v55, 0.0  ;;  %v10988_v55 = vld [vmem:[#allocation114_spill] sm:$0xff] }
 0x678   : > { %5266 = vmatmul.f32.gmra.mxu2 %v5040_v54  ;;  %5764 = vmatmul.f32.gmra.mxu3 %v5572_v3  ;;  %v4018_v3 = vmax.f32 %v3685_v52, 0.0  ;;  %v9616_v52 = vld [vmem:[%s10627_s9] ss:$0 sm:$0xff] }
 0x679   : > { %v4727_v11 = vpop.f32.mrf.mxu1 }
 0x67a   : > { %4421 = vmatmul.f32.gmra.mxu0 %v4047_v22  ;;  %v4725_v22 = vadd.f32 %v4724_v2, %v4324_v47  ;;  %v4327_v2 = vadd.f32 %v9598_v45, %v9408_v62 }
 0x67b   : > { %v5219_v8 = vpop.f32.mrf.mxu2 }
 0x67c   : > { %v5220_v24 = vadd.f32 %v9425_v49, %v5219_v8  ;;  %4774 = vmatmul.f32.gmra.mxu1 %v4016_v6  ;;  %v3335_v8 = vadd.f32 %v10987_v12, %v8793_v56  ;;  %v5042_v42 = vmax.f32 %v4725_v22, 0.0  ;;  %v10989_v12 = vld [vmem:[#allocation147_spill] sm:$0xff] }
 0x67e   : > { %v5573_v18 = vmax.f32 %v5220_v24, 0.0  ;;  %v3688_v24 = vadd.f32 %v10988_v55, %v9011_v14  ;;  %v10990_v55 = vld [vmem:[#allocation116_spill] sm:$0xff] }
 0x67f   : > { %v9593_v39 = vpop.f32.mrf.mxu0 }
 0x680   : > { %5269 = vmatmul.f32.gmra.mxu2 %v5041_v50  ;;  %5767 = vmatmul.f32.gmra.mxu3 %v5573_v18  ;;  %v4051_v18 = vmax.f32 %v3335_v8, 0.0  ;;  %v4020_v47 = vmax.f32 %v3688_v24, 0.0  ;;  %v3338_v8 = vadd.f32 %v10989_v12, %v8793_v56  ;;  %v10991_v12 = vld [vmem:[#allocation149_spill] sm:$0xff] }
 0x681   : > { %v4730_v54 = vpop.f32.mrf.mxu1 }
 0x682   : > { %4424 = vmatmul.f32.gmra.mxu0 %v4049_v10  ;;  %v4053_v24 = vmax.f32 %v3338_v8, 0.0  ;;  %v10992_v8 = vld [vmem:[#allocation118_spill] sm:$0xff] }
 0x683   : > { %v5222_v6 = vpop.f32.mrf.mxu2 }
 0x684   : > { %v5223_v63 = vadd.f32 %v9425_v49, %v5222_v6  ;;  %4777 = vmatmul.f32.gmra.mxu1 %v4018_v3  ;;  %v4728_v3 = vadd.f32 %v4727_v11, %v4327_v2 }
 0x686   : > { %v5574_v27 = vmax.f32 %v5223_v63, 0.0 }
 0x687   : > { %v9609_v50 = vpop.f32.mrf.mxu0 }
 0x688   : > { %5272 = vmatmul.f32.gmra.mxu2 %v5042_v42  ;;  %5770 = vmatmul.f32.gmra.mxu3 %v5574_v27  ;;  %v3691_v42 = vadd.f32 %v10990_v55, %v9011_v14  ;;  %v5043_v27 = vmax.f32 %v4728_v3, 0.0 }
 0x689   : > { %v4733_v10 = vpop.f32.mrf.mxu1 }
 0x68a   : > { %4427 = vmatmul.f32.gmra.mxu0 %v4051_v18  ;;  %v4330_v18 = vadd.f32 %v9598_v45, %v9418_v5  ;;  %v3694_v5 = vadd.f32 %v10992_v8, %v9011_v14 }
 0x68b   : > { %v5225_v22 = vpop.f32.mrf.mxu2  ;;  %v5723_v6 = vpop.f32.mrf.mxu3 }
 0x68c   : > { %v5226_v63 = vadd.f32 %v9425_v49, %v5225_v22  ;;  %v5724_v62 = vadd.f32 %v9616_v52, %v5723_v6  ;;  %4780 = vmatmul.f32.gmra.mxu1 %v4020_v47  ;;  %v4022_v47 = vmax.f32 %v3691_v42, 0.0  ;;  %v4731_v22 = vadd.f32 %v4730_v54, %v4330_v18 }
 0x68d   : > { %v4333_v42 = vadd.f32 %v9598_v45, %v9434_v7  ;;  %v4024_v18 = vmax.f32 %v3694_v5, 0.0  ;;  %v4336_v5 = vadd.f32 %v9598_v45, %v9445_v41 }
 0x68e   : > { %v5575_v40 = vmax.f32 %v5226_v63, 0.0  ;;  %6107 = vst [vmem:[%s9626_s23] sm:$0xff] %v5724_v62  ;;  %v3341_v63 = vadd.f32 %v10991_v12, %v8793_v56  ;;  %v5044_v1 = vmax.f32 %v4731_v22, 0.0  ;;  %v10993_v12 = vld [vmem:[#allocation151_spill] sm:$0xff] }
 0x68f   : > { %v9629_v11 = vpop.f32.mrf.mxu0  ;;  %v3344_v22 = vadd.f32 %v10993_v12, %v8793_v56  ;;  %v10995_v12 = vld [vmem:[#allocation153_spill] sm:$0xff] }
 0x690   : > { %5275 = vmatmul.f32.gmra.mxu2 %v5043_v27  ;;  %5773 = vmatmul.f32.gmra.mxu3 %v5575_v40  ;;  %v4055_v54 = vmax.f32 %v3341_v63, 0.0  ;;  %v10994_v63 = vld [vmem:[#allocation120_spill] sm:$0xff] }
 0x691   : > { %v4736_v2 = vpop.f32.mrf.mxu1  ;;  %v3697_v7 = vadd.f32 %v10994_v63, %v9011_v14 }
 0x692   : > { %4430 = vmatmul.f32.gmra.mxu0 %v4053_v24 }
 0x693   : > { %v5228_v3 = vpop.f32.mrf.mxu2  ;;  %v5726_v6 = vpop.f32.mrf.mxu3 }
 0x694   : > { %v5229_v62 = vadd.f32 %v9425_v49, %v5228_v3  ;;  %v5727_v55 = vadd.f32 %v9616_v52, %v5726_v6  ;;  %4783 = vmatmul.f32.gmra.mxu1 %v4022_v47  ;;  %v4734_v3 = vadd.f32 %v4733_v10, %v4333_v42  ;;  %v4057_v10 = vmax.f32 %v3344_v22, 0.0  ;;  %v10996_v22 = vld [vmem:[#allocation122_spill] sm:$0xff] }
 0x695   : > { %v4026_v42 = vmax.f32 %v3697_v7, 0.0  ;;  %v3700_v41 = vadd.f32 %v10996_v22, %v9011_v14  ;;  %v4339_v7 = vadd.f32 %v9598_v45, %v9456_v20 }
 0x696   : > { %v5576_v27 = vmax.f32 %v5229_v62, 0.0  ;;  %6108 = vst [vmem:[%s9626_s23 + $0x8] sm:$0xff] %v5727_v55  ;;  %v5045_v8 = vmax.f32 %v4734_v3, 0.0  ;;  %v3347_v3 = vadd.f32 %v10995_v12, %v8793_v56  ;;  %v10997_v12 = vld [vmem:[#allocation155_spill] sm:$0xff] }
 0x697   : > { %v9640_v40 = vpop.f32.mrf.mxu0 }
 0x698   : > { %5278 = vmatmul.f32.gmra.mxu2 %v5044_v1  ;;  %5776 = vmatmul.f32.gmra.mxu3 %v5576_v27 }
 0x699   : > { %v4739_v24 = vpop.f32.mrf.mxu1 }
 0x69a   : > { %4433 = vmatmul.f32.gmra.mxu0 %v4055_v54 }
 0x69b   : > { %v5231_v47 = vpop.f32.mrf.mxu2  ;;  %v5729_v6 = vpop.f32.mrf.mxu3 }
 0x69c   : > { %v5232_v62 = vadd.f32 %v9425_v49, %v5231_v47  ;;  %v5730_v55 = vadd.f32 %v9616_v52, %v5729_v6  ;;  %4786 = vmatmul.f32.gmra.mxu1 %v4024_v18  ;;  %v4737_v47 = vadd.f32 %v4736_v2, %v4336_v5  ;;  %v4059_v2 = vmax.f32 %v3347_v3, 0.0  ;;  %v10998_v3 = vld [vmem:[#allocation124_spill] sm:$0xff] }
 0x69d   : > { %v4028_v5 = vmax.f32 %v3700_v41, 0.0  ;;  %v3703_v20 = vadd.f32 %v10998_v3, %v9011_v14  ;;  %v4342_v41 = vadd.f32 %v9598_v45, %v9467_v29 }
 0x69e   : > { %v5577_v1 = vmax.f32 %v5232_v62, 0.0  ;;  %6109 = vst [vmem:[%s9626_s23 + $0x10] sm:$0xff] %v5730_v55  ;;  %v5046_v63 = vmax.f32 %v4737_v47, 0.0  ;;  %v3350_v47 = vadd.f32 %v10997_v12, %v8793_v56  ;;  %v10999_v12 = vld [vmem:[#allocation157_spill] sm:$0xff] }
 0x69f   : > { %v9651_v27 = vpop.f32.mrf.mxu0 }
 0x6a0   : > { %5281 = vmatmul.f32.gmra.mxu2 %v5045_v8  ;;  %5779 = vmatmul.f32.gmra.mxu3 %v5577_v1 }
 0x6a1   : > { %v4742_v54 = vpop.f32.mrf.mxu1 }
 0x6a2   : > { %4436 = vmatmul.f32.gmra.mxu0 %v4057_v10 }
 0x6a3   : > { %v5234_v18 = vpop.f32.mrf.mxu2  ;;  %v5732_v6 = vpop.f32.mrf.mxu3 }
 0x6a4   : > { %v5235_v62 = vadd.f32 %v9425_v49, %v5234_v18  ;;  %v5733_v55 = vadd.f32 %v9616_v52, %v5732_v6  ;;  %4789 = vmatmul.f32.gmra.mxu1 %v4026_v42  ;;  %v4740_v18 = vadd.f32 %v4739_v24, %v4339_v7  ;;  %v4061_v24 = vmax.f32 %v3350_v47, 0.0  ;;  %v11000_v47 = vld [vmem:[#allocation126_spill] sm:$0xff] }
 0x6a5   : > { %v4030_v7 = vmax.f32 %v3703_v20, 0.0  ;;  %v3706_v29 = vadd.f32 %v11000_v47, %v9011_v14  ;;  %v4345_v20 = vadd.f32 %v9598_v45, %v9476_v17 }
 0x6a6   : > { %v5578_v8 = vmax.f32 %v5235_v62, 0.0  ;;  %6110 = vst [vmem:[%s9626_s23 + $0x18] sm:$0xff] %v5733_v55  ;;  %v5047_v22 = vmax.f32 %v4740_v18, 0.0  ;;  %v3353_v18 = vadd.f32 %v10999_v12, %v8793_v56  ;;  %v11001_v12 = vld [vmem:[#allocation160_spill] sm:$0xff] }
 0x6a7   : > { %v9662_v1 = vpop.f32.mrf.mxu0 }
 0x6a8   : > { %5284 = vmatmul.f32.gmra.mxu2 %v5046_v63  ;;  %5782 = vmatmul.f32.gmra.mxu3 %v5578_v8 }
 0x6a9   : > { %v4745_v10 = vpop.f32.mrf.mxu1 }
 0x6aa   : > { %4439 = vmatmul.f32.gmra.mxu0 %v4059_v2 }
 0x6ab   : > { %v5237_v42 = vpop.f32.mrf.mxu2  ;;  %v5735_v6 = vpop.f32.mrf.mxu3 }
 0x6ac   : > { %v5238_v62 = vadd.f32 %v9425_v49, %v5237_v42  ;;  %v5736_v55 = vadd.f32 %v9616_v52, %v5735_v6  ;;  %4792 = vmatmul.f32.gmra.mxu1 %v4028_v5  ;;  %v4743_v42 = vadd.f32 %v4742_v54, %v4342_v41  ;;  %v4063_v54 = vmax.f32 %v3353_v18, 0.0  ;;  %v11002_v18 = vld [vmem:[#allocation128_spill] sm:$0xff] }
 0x6ad   : > { %v4032_v41 = vmax.f32 %v3706_v29, 0.0  ;;  %v3709_v17 = vadd.f32 %v11002_v18, %v9011_v14  ;;  %v4348_v29 = vadd.f32 %v9598_v45, %v9487_v13 }
 0x6ae   : > { %v5579_v63 = vmax.f32 %v5238_v62, 0.0  ;;  %6111 = vst [vmem:[%s9626_s23 + $0x20] sm:$0xff] %v5736_v55  ;;  %v5048_v3 = vmax.f32 %v4743_v42, 0.0  ;;  %v3356_v42 = vadd.f32 %v11001_v12, %v8793_v56  ;;  %v11003_v12 = vld [vmem:[#allocation163_spill] sm:$0xff] }
 0x6af   : > { %v9673_v8 = vpop.f32.mrf.mxu0 }
 0x6b0   : > { %5287 = vmatmul.f32.gmra.mxu2 %v5047_v22  ;;  %5785 = vmatmul.f32.gmra.mxu3 %v5579_v63 }
 0x6b1   : > { %v4748_v2 = vpop.f32.mrf.mxu1 }
 0x6b2   : > { %4442 = vmatmul.f32.gmra.mxu0 %v4061_v24 }
 0x6b3   : > { %v5240_v5 = vpop.f32.mrf.mxu2  ;;  %v5738_v6 = vpop.f32.mrf.mxu3 }
 0x6b4   : > { %v5241_v62 = vadd.f32 %v9425_v49, %v5240_v5  ;;  %v5739_v55 = vadd.f32 %v9616_v52, %v5738_v6  ;;  %4795 = vmatmul.f32.gmra.mxu1 %v4030_v7  ;;  %v4746_v5 = vadd.f32 %v4745_v10, %v4345_v20  ;;  %v4065_v10 = vmax.f32 %v3356_v42, 0.0  ;;  %v11004_v42 = vld [vmem:[#allocation130_spill] sm:$0xff] }
 0x6b5   : > { %v4034_v20 = vmax.f32 %v3709_v17, 0.0  ;;  %v3712_v13 = vadd.f32 %v11004_v42, %v9011_v14  ;;  %v4351_v17 = vadd.f32 %v9598_v45, %v9498_v58 }
 0x6b6   : > { %v5580_v22 = vmax.f32 %v5241_v62, 0.0  ;;  %6112 = vst [vmem:[%s9626_s23 + $0x28] sm:$0xff] %v5739_v55  ;;  %v5049_v47 = vmax.f32 %v4746_v5, 0.0  ;;  %v3359_v5 = vadd.f32 %v11003_v12, %v8793_v56 }
 0x6b7   : > { %v9684_v63 = vpop.f32.mrf.mxu0 }
 0x6b8   : > { %5290 = vmatmul.f32.gmra.mxu2 %v5048_v3  ;;  %5788 = vmatmul.f32.gmra.mxu3 %v5580_v22 }
 0x6b9   : > { %v4751_v24 = vpop.f32.mrf.mxu1 }
 0x6ba   : > { %4445 = vmatmul.f32.gmra.mxu0 %v4063_v54 }
 0x6bb   : > { %v5243_v7 = vpop.f32.mrf.mxu2  ;;  %v5741_v6 = vpop.f32.mrf.mxu3 }
 0x6bc   : > { %v5244_v62 = vadd.f32 %v9425_v49, %v5243_v7  ;;  %v5742_v55 = vadd.f32 %v9616_v52, %v5741_v6  ;;  %4798 = vmatmul.f32.gmra.mxu1 %v4032_v41  ;;  %v4749_v7 = vadd.f32 %v4748_v2, %v4348_v29  ;;  %v4067_v2 = vmax.f32 %v3359_v5, 0.0  ;;  %v11005_v5 = vld [vmem:[#allocation132_spill] sm:$0xff] }
 0x6bd   : > { %v4036_v29 = vmax.f32 %v3712_v13, 0.0  ;;  %v3715_v58 = vadd.f32 %v11005_v5, %v9011_v14  ;;  %v4354_v13 = vadd.f32 %v9598_v45, %v9509_v60 }
 0x6be   : > { %v5581_v3 = vmax.f32 %v5244_v62, 0.0  ;;  %6113 = vst [vmem:[%s9626_s23 + $0x30] sm:$0xff] %v5742_v55  ;;  %v5050_v18 = vmax.f32 %v4749_v7, 0.0  ;;  %v3362_v7 = vadd.f32 %v8821_v15, %v8793_v56 }
 0x6bf   : > { %v9695_v22 = vpop.f32.mrf.mxu0 }
 0x6c0   : > { %5293 = vmatmul.f32.gmra.mxu2 %v5049_v47  ;;  %5791 = vmatmul.f32.gmra.mxu3 %v5581_v3 }
 0x6c1   : > { %v4754_v54 = vpop.f32.mrf.mxu1 }
 0x6c2   : > { %4448 = vmatmul.f32.gmra.mxu0 %v4065_v10 }
 0x6c3   : > { %v5246_v41 = vpop.f32.mrf.mxu2  ;;  %v5744_v6 = vpop.f32.mrf.mxu3 }
 0x6c4   : > { %v5247_v62 = vadd.f32 %v9425_v49, %v5246_v41  ;;  %v5745_v55 = vadd.f32 %v9616_v52, %v5744_v6  ;;  %4801 = vmatmul.f32.gmra.mxu1 %v4034_v20  ;;  %v4752_v41 = vadd.f32 %v4751_v24, %v4351_v17  ;;  %v4069_v24 = vmax.f32 %v3362_v7, 0.0  ;;  %v11006_v7 = vld [vmem:[#allocation134_spill] sm:$0xff] }
 0x6c5   : > { %v3718_v60 = vadd.f32 %v11006_v7, %v9011_v14  ;;  %v4360_v7 = vadd.f32 %v9598_v45, %v9529_v48 }
 0x6c6   : > { %v5582_v47 = vmax.f32 %v5247_v62, 0.0  ;;  %6114 = vst [vmem:[%s9626_s23 + $0x38] sm:$0xff] %v5745_v55  ;;  %v5051_v55 = vmax.f32 %v4752_v41, 0.0  ;;  %v3365_v41 = vadd.f32 %v8833_v34, %v8793_v56 }
 0x6c7   : > { %v9706_v3 = vpop.f32.mrf.mxu0 }
 0x6c8   : > { %5296 = vmatmul.f32.gmra.mxu2 %v5050_v18  ;;  %5794 = vmatmul.f32.gmra.mxu3 %v5582_v47  ;;  %v4038_v47 = vmax.f32 %v3715_v58, 0.0  ;;  %v4357_v58 = vadd.f32 %v9598_v45, %v9520_v21 }
 0x6c9   : > { %v4757_v10 = vpop.f32.mrf.mxu1 }
 0x6ca   : > { %4451 = vmatmul.f32.gmra.mxu0 %v4067_v2  ;;  %v4755_v2 = vadd.f32 %v4754_v54, %v4354_v13  ;;  %v4071_v54 = vmax.f32 %v3365_v41, 0.0 }
 0x6cb   : > { %v5249_v20 = vpop.f32.mrf.mxu2  ;;  %v5747_v6 = vpop.f32.mrf.mxu3 }
 0x6cc   : > { %v5250_v12 = vadd.f32 %v9425_v49, %v5249_v20  ;;  %v5748_v62 = vadd.f32 %v9616_v52, %v5747_v6  ;;  %4804 = vmatmul.f32.gmra.mxu1 %v4036_v29 }
 0x6ce   : > { %v5583_v42 = vmax.f32 %v5250_v12, 0.0  ;;  %6115 = vst [vmem:[%s9626_s23 + $0x40] sm:$0xff] %v5748_v62  ;;  %v5052_v12 = vmax.f32 %v4755_v2, 0.0 }
 0x6cf   : > { %v9717_v18 = vpop.f32.mrf.mxu0 }
 0x6d0   : > { %5299 = vmatmul.f32.gmra.mxu2 %v5051_v55  ;;  %5797 = vmatmul.f32.gmra.mxu3 %v5583_v42  ;;  %v4040_v55 = vmax.f32 %v3718_v60, 0.0  ;;  %v4758_v42 = vadd.f32 %v4757_v10, %v4357_v58  ;;  %v3371_v58 = vadd.f32 %v8858_v23, %v8793_v56 }
 0x6d1   : > { %v4760_v15 = vpop.f32.mrf.mxu1 }
 0x6d2   : > { %4454 = vmatmul.f32.gmra.mxu0 %v4069_v24  ;;  %v5053_v41 = vmax.f32 %v4758_v42, 0.0 }
 0x6d3   : > { %v5252_v17 = vpop.f32.mrf.mxu2  ;;  %v5750_v29 = vpop.f32.mrf.mxu3 }
 0x6d4   : > { %v5253_v20 = vadd.f32 %v9425_v49, %v5252_v17  ;;  %v5751_v6 = vadd.f32 %v9616_v52, %v5750_v29  ;;  %4807 = vmatmul.f32.gmra.mxu1 %v4038_v47  ;;  %v3368_v47 = vadd.f32 %v8846_v30, %v8793_v56  ;;  %v11007_v29 = vld [vmem:[#allocation136_spill] sm:$0xff] }
 0x6d5   : > { %v3721_v21 = vadd.f32 %v11007_v29, %v9011_v14 }
 0x6d6   : > { %v5584_v62 = vmax.f32 %v5253_v20, 0.0  ;;  %6116 = vst [vmem:[%s9626_s23 + $0x48] sm:$0xff] %v5751_v6  ;;  %v4073_v10 = vmax.f32 %v3368_v47, 0.0 }
 0x6d7   : > { %v9728_v5 = vpop.f32.mrf.mxu0  ;;  %v4042_v60 = vmax.f32 %v3721_v21, 0.0 }
 0x6d8   : > { %5302 = vmatmul.f32.gmra.mxu2 %v5052_v12  ;;  %5800 = vmatmul.f32.gmra.mxu3 %v5584_v62  ;;  %v4761_v12 = vadd.f32 %v4760_v15, %v4360_v7  ;;  %v4075_v15 = vmax.f32 %v3371_v58, 0.0 }
 0x6d9   : > { %v4763_v34 = vpop.f32.mrf.mxu1 }
 0x6da   : > { %4457 = vmatmul.f32.gmra.mxu0 %v4071_v54 }
 0x6db   : > { %v5255_v24 = vpop.f32.mrf.mxu2  ;;  %v5753_v13 = vpop.f32.mrf.mxu3 }
 0x6dc   : > { %v5256_v2 = vadd.f32 %v9425_v49, %v5255_v24  ;;  %v5754_v17 = vadd.f32 %v9616_v52, %v5753_v13  ;;  %4810 = vmatmul.f32.gmra.mxu1 %v4040_v55  ;;  %v11008_v24 = vld [vmem:[#allocation138_spill] sm:$0xff]  ;;  %v5054_v13 = vmax.f32 %v4761_v12, 0.0 }
 0x6dd   : > { %v3724_v48 = vadd.f32 %v11008_v24, %v9011_v14 }
 0x6de   : > { %v5585_v20 = vmax.f32 %v5256_v2, 0.0  ;;  %6117 = vst [vmem:[%s9626_s23 + $0x50] sm:$0xff] %v5754_v17  ;;  %v4363_v17 = vadd.f32 %v9598_v45, %v9540_v44 }
 0x6df   : > { %v9739_v6 = vpop.f32.mrf.mxu0 }
 0x6e0   : > { %5305 = vmatmul.f32.gmra.mxu2 %v5053_v41  ;;  %5803 = vmatmul.f32.gmra.mxu3 %v5585_v20  ;;  %v4764_v29 = vadd.f32 %v4763_v34, %v4363_v17  ;;  %v3374_v20 = vadd.f32 %v8870_v26, %v8793_v56  ;;  %v4366_v26 = vadd.f32 %v9598_v45, %v9551_v32 }
 0x6e1   : > { %v4766_v30 = vpop.f32.mrf.mxu1 }
 0x6e2   : > { %4460 = vmatmul.f32.gmra.mxu0 %v4073_v10  ;;  %v9759_v10 = vld [vmem:[%s10625_s7] ss:$0 sm:$0xff]  ;;  %v5055_v34 = vmax.f32 %v4764_v29, 0.0  ;;  %v4077_v58 = vmax.f32 %v3374_v20, 0.0  ;;  %v4767_v24 = vadd.f32 %v4766_v30, %v4366_v26  ;;  %v4369_v20 = vadd.f32 %v9598_v45, %v9562_v35  ;;  %v11011_v26 = vld [vmem:[#allocation144_spill] sm:$0xff] }
 0x6e3   : > { %v5258_v62 = vpop.f32.mrf.mxu2  ;;  %v5756_v54 = vpop.f32.mrf.mxu3  ;;  %v3733_v35 = vadd.f32 %v11011_v26, %v9011_v14  ;;  %v3386_v26 = vadd.f32 %v8927_v28, %v8793_v56 }
 0x6e4   : > { %v5259_v55 = vadd.f32 %v9425_v49, %v5258_v62  ;;  %v5757_v42 = vadd.f32 %v9616_v52, %v5756_v54  ;;  %4813 = vmatmul.f32.gmra.mxu1 %v4042_v60  ;;  %v4044_v49 = vmax.f32 %v3724_v48, 0.0  ;;  %v11009_v60 = vld [vmem:[#allocation140_spill] sm:$0xff]  ;;  %v5056_v29 = vmax.f32 %v4767_v24, 0.0 }
 0x6e5   : > { %v3727_v12 = vadd.f32 %v11009_v60, %v9011_v14 }
 0x6e6   : > { %v5586_v47 = vmax.f32 %v5259_v55, 0.0  ;;  %6118 = vst [vmem:[%s9626_s23 + $0x58] sm:$0xff] %v5757_v42 }
 0x6e7   : > { %v9750_v2 = vpop.f32.mrf.mxu0  ;;  %v4046_v42 = vmax.f32 %v3727_v12, 0.0 }
 0x6e8   : > { %5308 = vmatmul.f32.gmra.mxu2 %v5054_v13  ;;  %5806 = vmatmul.f32.gmra.mxu3 %v5586_v47  ;;  %v3377_v47 = vadd.f32 %v8882_v46, %v8793_v56 }
 0x6e9   : > { %v4769_v23 = vpop.f32.mrf.mxu1 }
 0x6ea   : > { %4463 = vmatmul.f32.gmra.mxu0 %v4075_v15  ;;  %v4079_v30 = vmax.f32 %v3377_v47, 0.0  ;;  %v4050_v47 = vmax.f32 %v3733_v35, 0.0 }
 0x6eb   : > { %v5261_v21 = vpop.f32.mrf.mxu2  ;;  %v5759_v41 = vpop.f32.mrf.mxu3 }
 0x6ec   : > { %v5262_v7 = vadd.f32 %v9759_v10, %v5261_v21  ;;  %v5760_v44 = vadd.f32 %v9616_v52, %v5759_v41  ;;  %4816 = vmatmul.f32.gmra.mxu1 %v4044_v49  ;;  %v11010_v49 = vld [vmem:[#allocation142_spill] sm:$0xff] }
 0x6ed   : > { %v3730_v32 = vadd.f32 %v11010_v49, %v9011_v14 }
 0x6ee   : > { %v5587_v62 = vmax.f32 %v5262_v7, 0.0  ;;  %6119 = vst [vmem:[%s9626_s23 + $0x60] sm:$0xff] %v5760_v44  ;;  %v4770_v44 = vadd.f32 %v4769_v23, %v4369_v20 }
 0x6ef   : > { %v9766_v54 = vpop.f32.mrf.mxu0  ;;  %v4048_v7 = vmax.f32 %v3730_v32, 0.0  ;;  %v3383_v32 = vadd.f32 %v8910_v31, %v8793_v56 }
 0x6f0   : > { %5311 = vmatmul.f32.gmra.mxu2 %v5055_v34  ;;  %5809 = vmatmul.f32.gmra.mxu3 %v5587_v62  ;;  %v3380_v34 = vadd.f32 %v8894_v16, %v8793_v56 }
 0x6f1   : > { %v4772_v55 = vpop.f32.mrf.mxu1 }
 0x6f2   : > { %4466 = vmatmul.f32.gmra.mxu0 %v4077_v58  ;;  %v4081_v23 = vmax.f32 %v3380_v34, 0.0 }
 0x6f3   : > { %v5264_v48 = vpop.f32.mrf.mxu2  ;;  %v5762_v13 = vpop.f32.mrf.mxu3 }
 0x6f4   : > { %v5265_v15 = vadd.f32 %v9759_v10, %v5264_v48  ;;  %v5763_v17 = vadd.f32 %v9616_v52, %v5762_v13  ;;  %4819 = vmatmul.f32.gmra.mxu1 %v4046_v42  ;;  %v5057_v42 = vmax.f32 %v4770_v44, 0.0  ;;  %v4372_v13 = vadd.f32 %v9598_v45, %v9573_v0 }
 0x6f6   : > { %v5588_v21 = vmax.f32 %v5265_v15, 0.0  ;;  %6120 = vst [vmem:[%s9626_s23 + $0x68] sm:$0xff] %v5763_v17  ;;  %v4773_v15 = vadd.f32 %v4772_v55, %v4372_v13  ;;  %v4083_v55 = vmax.f32 %v3383_v32, 0.0 }
 0x6f7   : > { %v9777_v41 = vpop.f32.mrf.mxu0 }
 0x6f8   : > { %5314 = vmatmul.f32.gmra.mxu2 %v5056_v29  ;;  %5812 = vmatmul.f32.gmra.mxu3 %v5588_v21  ;;  %v5058_v20 = vmax.f32 %v4773_v15, 0.0  ;;  %v4378_v15 = vadd.f32 %v9598_v45, %v9593_v39 }
 0x6f9   : > { %v4775_v46 = vpop.f32.mrf.mxu1 }
 0x6fa   : > { %4469 = vmatmul.f32.gmra.mxu0 %v4079_v30  ;;  %v11012_v30 = vld [vmem:[#allocation146_spill] sm:$0xff] }
 0x6fb   : > { %v5267_v60 = vpop.f32.mrf.mxu2  ;;  %v5765_v12 = vpop.f32.mrf.mxu3  ;;  %v3736_v0 = vadd.f32 %v11012_v30, %v9011_v14 }
 0x6fc   : > { %v5268_v62 = vadd.f32 %v9759_v10, %v5267_v60  ;;  %v5766_v58 = vadd.f32 %v9616_v52, %v5765_v12  ;;  %4822 = vmatmul.f32.gmra.mxu1 %v4048_v7  ;;  %v4375_v60 = vadd.f32 %v9598_v45, %v9582_v36 }
 0x6fd   : > { %v4052_v12 = vmax.f32 %v3736_v0, 0.0 }
 0x6fe   : > { %v5589_v24 = vmax.f32 %v5268_v62, 0.0  ;;  %6121 = vst [vmem:[%s9626_s23 + $0x70] sm:$0xff] %v5766_v58  ;;  %v4776_v34 = vadd.f32 %v4775_v46, %v4375_v60  ;;  %v4085_v46 = vmax.f32 %v3386_v26, 0.0 }
 0x6ff   : > { %v9788_v48 = vpop.f32.mrf.mxu0 }
 0x700   : > { %5317 = vmatmul.f32.gmra.mxu2 %v5057_v42  ;;  %5815 = vmatmul.f32.gmra.mxu3 %v5589_v24  ;;  %v11013_v24 = vld [vmem:[#allocation148_spill] sm:$0xff] }
 0x701   : > { %v4778_v16 = vpop.f32.mrf.mxu1  ;;  %v3739_v36 = vadd.f32 %v11013_v24, %v9011_v14 }
 0x702   : > { %4472 = vmatmul.f32.gmra.mxu0 %v4081_v23  ;;  %v5059_v23 = vmax.f32 %v4776_v34, 0.0 }
 0x703   : > { %v5270_v17 = vpop.f32.mrf.mxu2  ;;  %v5768_v49 = vpop.f32.mrf.mxu3 }
 0x704   : > { %v5271_v29 = vadd.f32 %v9759_v10, %v5270_v17  ;;  %v5769_v21 = vadd.f32 %v9616_v52, %v5768_v49  ;;  %4825 = vmatmul.f32.gmra.mxu1 %v4050_v47  ;;  %v4054_v17 = vmax.f32 %v3739_v36, 0.0  ;;  %v4779_v49 = vadd.f32 %v4778_v16, %v4378_v15 }
 0x705   : > { %v4381_v16 = vadd.f32 %v9598_v45, %v9609_v50  ;;  %v11015_v50 = vld [vmem:[#allocation152_spill] sm:$0xff] }
 0x706   : > { %v5590_v7 = vmax.f32 %v5271_v29, 0.0  ;;  %6122 = vst [vmem:[%s9626_s23 + $0x78] sm:$0xff] %v5769_v21  ;;  %v3389_v21 = vadd.f32 %v8943_v9, %v8793_v56  ;;  %v3745_v36 = vadd.f32 %v11015_v50, %v9011_v14 }
 0x707   : > { %v9799_v44 = vpop.f32.mrf.mxu0 }
 0x708   : > { %5320 = vmatmul.f32.gmra.mxu2 %v5058_v20  ;;  %5818 = vmatmul.f32.gmra.mxu3 %v5590_v7  ;;  %v11014_v20 = vld [vmem:[#allocation150_spill] sm:$0xff]  ;;  %v5060_v7 = vmax.f32 %v4779_v49, 0.0  ;;  %v4087_v60 = vmax.f32 %v3389_v21, 0.0  ;;  %v3395_v21 = vadd.f32 %v8966_v37, %v8793_v56 }
 0x709   : > { %v4781_v31 = vpop.f32.mrf.mxu1  ;;  %v3742_v39 = vadd.f32 %v11014_v20, %v9011_v14 }
 0x70a   : > { %4475 = vmatmul.f32.gmra.mxu0 %v4083_v55 }
 0x70b   : > { %v5273_v62 = vpop.f32.mrf.mxu2  ;;  %v5771_v58 = vpop.f32.mrf.mxu3  ;;  %v4056_v34 = vmax.f32 %v3742_v39, 0.0 }
 0x70c   : > { %v5274_v35 = vadd.f32 %v9759_v10, %v5273_v62  ;;  %v5772_v42 = vadd.f32 %v9616_v52, %v5771_v58  ;;  %4828 = vmatmul.f32.gmra.mxu1 %v4052_v12  ;;  %v4782_v62 = vadd.f32 %v4781_v31, %v4381_v16  ;;  %v4384_v31 = vadd.f32 %v9598_v45, %v9629_v11  ;;  %v11016_v11 = vld [vmem:[#allocation154_spill] sm:$0xff] }
 0x70d   : > { %v3748_v20 = vadd.f32 %v11016_v11, %v9011_v14 }
 0x70e   : > { %v5591_v13 = vmax.f32 %v5274_v35, 0.0  ;;  %6123 = vst [vmem:[%s9626_s23 + $0x80] sm:$0xff] %v5772_v42  ;;  %v3392_v35 = vadd.f32 %v8956_v19, %v8793_v56  ;;  %v4058_v19 = vmax.f32 %v3745_v36, 0.0 }
 0x70f   : > { %v9810_v47 = vpop.f32.mrf.mxu0  ;;  %v4060_v37 = vmax.f32 %v3748_v20, 0.0  ;;  %v4393_v20 = vadd.f32 %v9598_v45, %v9662_v1 }
 0x710   : > { %5323 = vmatmul.f32.gmra.mxu2 %v5059_v23  ;;  %5821 = vmatmul.f32.gmra.mxu3 %v5591_v13  ;;  %v5061_v23 = vmax.f32 %v4782_v62, 0.0 }
 0x711   : > { %v4784_v28 = vpop.f32.mrf.mxu1 }
 0x712   : > { %4478 = vmatmul.f32.gmra.mxu0 %v4085_v46  ;;  %v4089_v46 = vmax.f32 %v3392_v35, 0.0 }
 0x713   : > { %v5276_v32 = vpop.f32.mrf.mxu2  ;;  %v5774_v29 = vpop.f32.mrf.mxu3 }
 0x714   : > { %v5277_v30 = vadd.f32 %v9759_v10, %v5276_v32  ;;  %v5775_v0 = vadd.f32 %v9616_v52, %v5774_v29  ;;  %4831 = vmatmul.f32.gmra.mxu1 %v4054_v17  ;;  %v4785_v17 = vadd.f32 %v4784_v28, %v4384_v31  ;;  %v4091_v28 = vmax.f32 %v3395_v21, 0.0  ;;  %v11018_v21 = vld [vmem:[#allocation158_spill] sm:$0xff] }
 0x716   : > { %v5592_v55 = vmax.f32 %v5277_v30, 0.0  ;;  %6124 = vst [vmem:[%s9626_s23 + $0x88] sm:$0xff] %v5775_v0  ;;  %v5062_v39 = vmax.f32 %v4785_v17, 0.0  ;;  %v3401_v17 = vadd.f32 %v8990_v25, %v8793_v56 }
 0x717   : > { %v9823_v12 = vpop.f32.mrf.mxu0 }
 0x718   : > { %5326 = vmatmul.f32.gmra.mxu2 %v5060_v7  ;;  %5824 = vmatmul.f32.gmra.mxu3 %v5592_v55  ;;  %v4387_v55 = vadd.f32 %v9598_v45, %v9640_v40  ;;  %v11017_v40 = vld [vmem:[#allocation156_spill] sm:$0xff] }
 0x719   : > { %v4787_v9 = vpop.f32.mrf.mxu1 }
 0x71a   : > { %4481 = vmatmul.f32.gmra.mxu0 %v4087_v60  ;;  %v4788_v16 = vadd.f32 %v4787_v9, %v4387_v55 }
 0x71b   : > { %v5279_v58 = vpop.f32.mrf.mxu2  ;;  %v5777_v26 = vpop.f32.mrf.mxu3 }
 0x71c   : > { %v5280_v42 = vadd.f32 %v9759_v10, %v5279_v58  ;;  %v5778_v24 = vadd.f32 %v9616_v52, %v5777_v26  ;;  %4834 = vmatmul.f32.gmra.mxu1 %v4056_v34  ;;  %v3398_v58 = vadd.f32 %v8978_v38, %v8793_v56  ;;  %v5063_v50 = vmax.f32 %v4788_v16, 0.0 }
 0x71e   : > { %v5593_v13 = vmax.f32 %v5280_v42, 0.0  ;;  %6125 = vst [vmem:[%s9626_s23 + $0x90] sm:$0xff] %v5778_v24  ;;  %v3751_v24 = vadd.f32 %v11017_v40, %v9011_v14  ;;  %v4093_v9 = vmax.f32 %v3398_v58, 0.0 }
 0x71f   : > { %v9834_v49 = vpop.f32.mrf.mxu0 }
 0x720   : > { %5329 = vmatmul.f32.gmra.mxu2 %v5061_v23  ;;  %5827 = vmatmul.f32.gmra.mxu3 %v5593_v13  ;;  %v4390_v23 = vadd.f32 %v9598_v45, %v9651_v27  ;;  %v4062_v13 = vmax.f32 %v3751_v24, 0.0  ;;  %v3754_v27 = vadd.f32 %v11018_v21, %v9011_v14 }
 0x721   : > { %v4790_v15 = vpop.f32.mrf.mxu1 }
 0x722   : > { %4484 = vmatmul.f32.gmra.mxu0 %v4089_v46  ;;  %v4791_v46 = vadd.f32 %v4790_v15, %v4390_v23  ;;  %v4095_v15 = vmax.f32 %v3401_v17, 0.0  ;;  %v3407_v23 = vadd.f32 %v9017_v33, %v8793_v56 }
 0x723   : > { %v5282_v32 = vpop.f32.mrf.mxu2  ;;  %v5780_v29 = vpop.f32.mrf.mxu3 }
 0x724   : > { %v5283_v30 = vadd.f32 %v9759_v10, %v5282_v32  ;;  %v5781_v0 = vadd.f32 %v9616_v52, %v5780_v29  ;;  %4837 = vmatmul.f32.gmra.mxu1 %v4058_v19  ;;  %v4099_v17 = vmax.f32 %v3407_v23, 0.0 }
 0x726   : > { %v5594_v7 = vmax.f32 %v5283_v30, 0.0  ;;  %6126 = vst [vmem:[%s9626_s23 + $0x98] sm:$0xff] %v5781_v0  ;;  %v5064_v30 = vmax.f32 %v4791_v46, 0.0 }
 0x727   : > { %v9847_v26 = vpop.f32.mrf.mxu0 }
 0x728   : > { %5332 = vmatmul.f32.gmra.mxu2 %v5062_v39  ;;  %5830 = vmatmul.f32.gmra.mxu3 %v5594_v7  ;;  %v4064_v39 = vmax.f32 %v3754_v27, 0.0 }
 0x729   : > { %v4793_v60 = vpop.f32.mrf.mxu1 }
 0x72a   : > { %4487 = vmatmul.f32.gmra.mxu0 %v4091_v28  ;;  %v4794_v7 = vadd.f32 %v4793_v60, %v4393_v20  ;;  %v4396_v60 = vadd.f32 %v9598_v45, %v9673_v8  ;;  %v3760_v8 = vadd.f32 %v8815_v51, %v9011_v14  ;;  %v3410_v51 = vadd.f32 %v9026_v53, %v8793_v56 }
 0x72b   : > { %v5285_v34 = vpop.f32.mrf.mxu2  ;;  %v5783_v62 = vpop.f32.mrf.mxu3 }
 0x72c   : > { %v5286_v35 = vadd.f32 %v9759_v10, %v5285_v34  ;;  %v5784_v42 = vadd.f32 %v9616_v52, %v5783_v62  ;;  %4840 = vmatmul.f32.gmra.mxu1 %v4060_v37  ;;  %v3404_v37 = vadd.f32 %v9002_v61, %v8793_v56  ;;  %v11019_v62 = vld [vmem:[#allocation161_spill] sm:$0xff]  ;;  %v5065_v58 = vmax.f32 %v4794_v7, 0.0 }
 0x72d   : > { %v3757_v1 = vadd.f32 %v11019_v62, %v9011_v14  ;;  %v4068_v33 = vmax.f32 %v3760_v8, 0.0  ;;  %v4402_v7 = vadd.f32 %v9598_v45, %v9695_v22  ;;  %v3766_v22 = vadd.f32 %v8850_v59, %v9011_v14 }
 0x72e   : > { %v5595_v36 = vmax.f32 %v5286_v35, 0.0  ;;  %6127 = vst [vmem:[%s9626_s23 + $0xa0] sm:$0xff] %v5784_v42  ;;  %v4097_v42 = vmax.f32 %v3404_v37, 0.0 }
 0x72f   : > { %v9862_v0 = vpop.f32.mrf.mxu0  ;;  %v4066_v24 = vmax.f32 %v3757_v1, 0.0 }
 0x730   : > { %5335 = vmatmul.f32.gmra.mxu2 %v5063_v50  ;;  %5833 = vmatmul.f32.gmra.mxu3 %v5595_v36 }
 0x731   : > { %v4796_v38 = vpop.f32.mrf.mxu1 }
 0x732   : > { %4490 = vmatmul.f32.gmra.mxu0 %v4093_v9  ;;  %v4797_v50 = vadd.f32 %v4796_v38, %v4396_v60  ;;  %v4399_v38 = vadd.f32 %v9598_v45, %v9684_v63  ;;  %v3763_v63 = vadd.f32 %v8837_v4, %v9011_v14  ;;  %v4405_v60 = vadd.f32 %v9598_v45, %v9706_v3 }
 0x733   : > { %v5288_v31 = vpop.f32.mrf.mxu2  ;;  %v5786_v19 = vpop.f32.mrf.mxu3 }
 0x734   : > { %v5289_v32 = vadd.f32 %v9759_v10, %v5288_v31  ;;  %v5787_v29 = vadd.f32 %v9616_v52, %v5786_v19  ;;  %4843 = vmatmul.f32.gmra.mxu1 %v4062_v13  ;;  %v5066_v31 = vmax.f32 %v4797_v50, 0.0  ;;  %v4070_v53 = vmax.f32 %v3763_v63, 0.0 }
 0x736   : > { %v5596_v11 = vmax.f32 %v5289_v32, 0.0  ;;  %6128 = vst [vmem:[%s9626_s23 + $0xa8] sm:$0xff] %v5787_v29 }
 0x737   : > { %v9876_v40 = vpop.f32.mrf.mxu0 }
 0x738   : > { %5338 = vmatmul.f32.gmra.mxu2 %v5064_v30  ;;  %5836 = vmatmul.f32.gmra.mxu3 %v5596_v11 }
 0x739   : > { %v4799_v25 = vpop.f32.mrf.mxu1 }
 0x73a   : > { %4493 = vmatmul.f32.gmra.mxu0 %v4095_v15  ;;  %v4800_v29 = vadd.f32 %v4799_v25, %v4399_v38  ;;  %v4101_v25 = vmax.f32 %v3410_v51, 0.0  ;;  %v9931_v51 = vld [vmem:[%s10627_s9] ss:$0 sm:$0xff] }
 0x73b   : > { %v5291_v28 = vpop.f32.mrf.mxu2  ;;  %v5789_v55 = vpop.f32.mrf.mxu3 }
 0x73c   : > { %v5292_v16 = vadd.f32 %v9759_v10, %v5291_v28  ;;  %v5790_v34 = vadd.f32 %v9616_v52, %v5789_v55  ;;  %4846 = vmatmul.f32.gmra.mxu1 %v4064_v39  ;;  %v5067_v20 = vmax.f32 %v4800_v29, 0.0  ;;  %v11021_v29 = vld [vmem:[#allocation43_spill] sm:$0xff] }
 0x73e   : > { %v5597_v35 = vmax.f32 %v5292_v16, 0.0  ;;  %6129 = vst [vmem:[%s9626_s23 + $0xb0] sm:$0xff] %v5790_v34  ;;  %v3413_v34 = vadd.f32 %v9038_v43, %v8793_v56 }
 0x73f   : > { %v9887_v21 = vpop.f32.mrf.mxu0 }
 0x740   : > { %5341 = vmatmul.f32.gmra.mxu2 %v5065_v58  ;;  %5839 = vmatmul.f32.gmra.mxu3 %v5597_v35 }
 0x741   : > { %v4802_v61 = vpop.f32.mrf.mxu1 }
 0x742   : > { %4496 = vmatmul.f32.gmra.mxu0 %v4097_v42  ;;  %v4803_v55 = vadd.f32 %v4802_v61, %v4402_v7  ;;  %v4103_v42 = vmax.f32 %v3413_v34, 0.0  ;;  %v4072_v61 = vmax.f32 %v3766_v22, 0.0  ;;  %v11023_v34 = vld [vmem:[#allocation159_spill] sm:$0xff] }
 0x743   : > { %v5294_v36 = vpop.f32.mrf.mxu2  ;;  %v5792_v9 = vpop.f32.mrf.mxu3 }
 0x744   : > { %v5295_v13 = vadd.f32 %v9759_v10, %v5294_v36  ;;  %v5793_v46 = vadd.f32 %v9616_v52, %v5792_v9  ;;  %4849 = vmatmul.f32.gmra.mxu1 %v4066_v24  ;;  %v5068_v58 = vmax.f32 %v4803_v55, 0.0  ;;  %v3416_v9 = vadd.f32 %v9049_v57, %v8793_v56 }
 0x746   : > { %v5598_v19 = vmax.f32 %v5295_v13, 0.0  ;;  %6130 = vst [vmem:[%s9626_s23 + $0xb8] sm:$0xff] %v5793_v46  ;;  %v11020_v13 = vld [vmem:[#allocation164_spill] sm:$0xff] }
 0x747   : > { %v9900_v4 = vpop.f32.mrf.mxu0  ;;  %v3769_v45 = vadd.f32 %v11020_v13, %v9011_v14 }
 0x748   : > { %5344 = vmatmul.f32.gmra.mxu2 %v5066_v31  ;;  %5842 = vmatmul.f32.gmra.mxu3 %v5598_v19  ;;  %v4105_v31 = vmax.f32 %v3416_v9, 0.0  ;;  %v9921_v19 = vld [vmem:[%s10623_s5] ss:$0 sm:$0xff] }
 0x749   : > { %v4805_v32 = vpop.f32.mrf.mxu1  ;;  %v4408_v57 = vadd.f32 %v9921_v19, %v9717_v18 }
 0x74a   : > { %4499 = vmatmul.f32.gmra.mxu0 %v4099_v17  ;;  %v4806_v24 = vadd.f32 %v4805_v32, %v4405_v60  ;;  %v4074_v17 = vmax.f32 %v3769_v45, 0.0 }
 0x74b   : > { %v5297_v27 = vpop.f32.mrf.mxu2  ;;  %v5795_v30 = vpop.f32.mrf.mxu3 }
 0x74c   : > { %v5298_v11 = vadd.f32 %v9759_v10, %v5297_v27  ;;  %v5796_v15 = vadd.f32 %v9616_v52, %v5795_v30  ;;  %4852 = vmatmul.f32.gmra.mxu1 %v4068_v33  ;;  %v5069_v3 = vmax.f32 %v4806_v24, 0.0  ;;  %v3419_v27 = vadd.f32 %v11021_v29, %v8793_v56 }
 0x74e   : > { %v5599_v39 = vmax.f32 %v5298_v11, 0.0  ;;  %6131 = vst [vmem:[%s9626_s23 + $0xc0] sm:$0xff] %v5796_v15  ;;  %v11022_v11 = vld [vmem:[#allocation165_spill] sm:$0xff] }
 0x74f   : > { %v9915_v46 = vpop.f32.mrf.mxu0  ;;  %v3772_v15 = vadd.f32 %v11022_v11, %v9011_v14 }
 0x750   : > { %5347 = vmatmul.f32.gmra.mxu2 %v5067_v20  ;;  %5845 = vmatmul.f32.gmra.mxu3 %v5599_v39  ;;  %v4107_v39 = vmax.f32 %v3419_v27, 0.0 }
 0x751   : > { %v4808_v28 = vpop.f32.mrf.mxu1 }
 0x752   : > { %4502 = vmatmul.f32.gmra.mxu0 %v4101_v25  ;;  %v4809_v38 = vadd.f32 %v4808_v28, %v4408_v57  ;;  %v4411_v25 = vadd.f32 %v9921_v19, %v9728_v5  ;;  %v11024_v5 = vld [vmem:[#allocation166_spill] sm:$0xff] }
 0x753   : > { %v5300_v37 = vpop.f32.mrf.mxu2  ;;  %v5798_v16 = vpop.f32.mrf.mxu3 }
 0x754   : > { %v5301_v62 = vadd.f32 %v9759_v10, %v5300_v37  ;;  %v5799_v1 = vadd.f32 %v9616_v52, %v5798_v16  ;;  %4855 = vmatmul.f32.gmra.mxu1 %v4070_v53  ;;  %v5070_v63 = vmax.f32 %v4809_v38, 0.0  ;;  %v4076_v53 = vmax.f32 %v3772_v15, 0.0 }
 0x756   : > { %v5600_v35 = vmax.f32 %v5301_v62, 0.0  ;;  %6132 = vst [vmem:[%s9626_s23 + $0xc8] sm:$0xff] %v5799_v1  ;;  %v3422_v62 = vadd.f32 %v11023_v34, %v8793_v56 }
 0x757   : > { %v9939_v7 = vpop.f32.mrf.mxu0 }
 0x758   : > { %5350 = vmatmul.f32.gmra.mxu2 %v5068_v58  ;;  %5848 = vmatmul.f32.gmra.mxu3 %v5600_v35  ;;  %v3775_v58 = vadd.f32 %v11024_v5, %v9011_v14  ;;  %v4109_v60 = vmax.f32 %v3422_v62, 0.0 }
 0x759   : > { %v4811_v43 = vpop.f32.mrf.mxu1 }
 0x75a   : > { %4505 = vmatmul.f32.gmra.mxu0 %v4103_v42  ;;  %v4812_v55 = vadd.f32 %v4811_v43, %v4411_v25  ;;  %v4414_v43 = vadd.f32 %v9921_v19, %v9739_v6  ;;  %v4078_v24 = vmax.f32 %v3775_v58, 0.0  ;;  %v11026_v6 = vld [vmem:[#allocation167_spill] sm:$0xff] }
 0x75b   : > { %v5303_v50 = vpop.f32.mrf.mxu2  ;;  %v5801_v36 = vpop.f32.mrf.mxu3 }
 0x75c   : > { %v5304_v59 = vadd.f32 %v9759_v10, %v5303_v50  ;;  %v5802_v23 = vadd.f32 %v9616_v52, %v5801_v36  ;;  %4858 = vmatmul.f32.gmra.mxu1 %v4072_v61  ;;  %v5071_v35 = vmax.f32 %v4812_v55, 0.0 }
 0x75e   : > { %v5601_v8 = vmax.f32 %v5304_v59, 0.0  ;;  %6133 = vst [vmem:[%s9626_s23 + $0xd0] sm:$0xff] %v5802_v23  ;;  %v11025_v23 = vld [vmem:[#allocation45_spill] sm:$0xff] }
 0x75f   : > { %v9950_v50 = vpop.f32.mrf.mxu0  ;;  %v3425_v13 = vadd.f32 %v11025_v23, %v8793_v56 }
 0x760   : > { %5353 = vmatmul.f32.gmra.mxu2 %v5069_v3  ;;  %5851 = vmatmul.f32.gmra.mxu3 %v5601_v8  ;;  %v3778_v8 = vadd.f32 %v11026_v6, %v9011_v14 }
 0x761   : > { %v4814_v52 = vpop.f32.mrf.mxu1 }
 0x762   : > { %4508 = vmatmul.f32.gmra.mxu0 %v4105_v31  ;;  %v4815_v36 = vadd.f32 %v4814_v52, %v4414_v43  ;;  %v4417_v52 = vadd.f32 %v9921_v19, %v9750_v2  ;;  %v11028_v2 = vld [vmem:[#allocation168_spill] sm:$0xff] }
 0x763   : > { %v5306_v32 = vpop.f32.mrf.mxu2  ;;  %v5804_v33 = vpop.f32.mrf.mxu3 }
 0x764   : > { %v5307_v30 = vadd.f32 %v9759_v10, %v5306_v32  ;;  %v5805_v18 = vadd.f32 %v9931_v51, %v5804_v33  ;;  %4861 = vmatmul.f32.gmra.mxu1 %v4074_v17  ;;  %v5072_v31 = vmax.f32 %v4815_v36, 0.0  ;;  %v4111_v17 = vmax.f32 %v3425_v13, 0.0 }
 0x765   : > { %v4080_v32 = vmax.f32 %v3778_v8, 0.0 }
 0x766   : > { %v5602_v20 = vmax.f32 %v5307_v30, 0.0  ;;  %6134 = vst [vmem:[%s9626_s23 + $0xd8] sm:$0xff] %v5805_v18  ;;  %v11027_v30 = vld [vmem:[#allocation162_spill] sm:$0xff] }
 0x767   : > { %v3428_v18 = vadd.f32 %v11027_v30, %v8793_v56  ;;  %v9963_v11 = vpop.f32.mrf.mxu0 }
 0x768   : > { %5356 = vmatmul.f32.gmra.mxu2 %v5070_v63  ;;  %5854 = vmatmul.f32.gmra.mxu3 %v5602_v20  ;;  %v3781_v20 = vadd.f32 %v11028_v2, %v9011_v14 }
 0x769   : > { %v4817_v28 = vpop.f32.mrf.mxu1 }
 0x76a   : > { %4511 = vmatmul.f32.gmra.mxu0 %v4107_v39  ;;  %v4818_v33 = vadd.f32 %v4817_v28, %v4417_v52  ;;  %v4113_v28 = vmax.f32 %v3428_v18, 0.0 }
 0x76b   : > { %v5309_v37 = vpop.f32.mrf.mxu2  ;;  %v5807_v16 = vpop.f32.mrf.mxu3 }
 0x76c   : > { %v5310_v1 = vadd.f32 %v9759_v10, %v5309_v37  ;;  %v5808_v22 = vadd.f32 %v9931_v51, %v5807_v16  ;;  %4864 = vmatmul.f32.gmra.mxu1 %v4076_v53  ;;  %v5073_v39 = vmax.f32 %v4818_v33, 0.0  ;;  %v4420_v53 = vadd.f32 %v9921_v19, %v9766_v54 }
 0x76d   : > { %v4082_v37 = vmax.f32 %v3781_v20, 0.0 }
 0x76e   : > { %v5603_v42 = vmax.f32 %v5310_v1, 0.0  ;;  %6135 = vst [vmem:[%s9626_s23 + $0xe0] sm:$0xff] %v5808_v22  ;;  %v11029_v1 = vld [vmem:[#allocation22_spill] sm:$0xff] }
 0x76f   : > { %v3431_v22 = vadd.f32 %v11029_v1, %v8793_v56 }
 0x770   : > { %5359 = vmatmul.f32.gmra.mxu2 %v5071_v35  ;;  %5857 = vmatmul.f32.gmra.mxu3 %v5603_v42  ;;  %v11030_v35 = vld [vmem:[#allocation29_spill] sm:$0xff]  ;;  %v9978_v42 = vpop.f32.mrf.mxu0 }
 0x771   : > { %v4820_v61 = vpop.f32.mrf.mxu1  ;;  %v3784_v54 = vadd.f32 %v11030_v35, %v9011_v14 }
 0x772   : > { %4514 = vmatmul.f32.gmra.mxu0 %v4109_v60  ;;  %v4821_v16 = vadd.f32 %v4820_v61, %v4420_v53  ;;  %v4115_v61 = vmax.f32 %v3431_v22, 0.0 }
 0x773   : > { %v5312_v9 = vpop.f32.mrf.mxu2  ;;  %v5810_v59 = vpop.f32.mrf.mxu3 }
 0x774   : > { %v5313_v45 = vadd.f32 %v9759_v10, %v5312_v9  ;;  %v5811_v3 = vadd.f32 %v9931_v51, %v5810_v59  ;;  %4867 = vmatmul.f32.gmra.mxu1 %v4078_v24  ;;  %v5074_v60 = vmax.f32 %v4821_v16, 0.0  ;;  %v4423_v24 = vadd.f32 %v9921_v19, %v9777_v41 }
 0x775   : > { %v4084_v9 = vmax.f32 %v3784_v54, 0.0 }
 0x776   : > { %v5604_v57 = vmax.f32 %v5313_v45, 0.0  ;;  %6136 = vst [vmem:[%s9626_s23 + $0xe8] sm:$0xff] %v5811_v3  ;;  %v11031_v45 = vld [vmem:[#allocation23_spill] sm:$0xff] }
 0x777   : > { %v3434_v3 = vadd.f32 %v11031_v45, %v8793_v56 }
 0x778   : > { %5362 = vmatmul.f32.gmra.mxu2 %v5072_v31  ;;  %5860 = vmatmul.f32.gmra.mxu3 %v5604_v57  ;;  %v11032_v31 = vld [vmem:[#allocation31_spill] sm:$0xff] }
 0x779   : > { %v4823_v38 = vpop.f32.mrf.mxu1  ;;  %v3787_v41 = vadd.f32 %v11032_v31, %v9011_v14  ;;  %v4117_v52 = vmax.f32 %v3434_v3, 0.0  ;;  %v11037_v3 = vld [vmem:[#allocation55_spill] sm:$0xff] }
 0x77a   : > { %4517 = vmatmul.f32.gmra.mxu0 %v4111_v17  ;;  %v4824_v59 = vadd.f32 %v4823_v38, %v4423_v24  ;;  %v4426_v38 = vadd.f32 %v9921_v19, %v9788_v48  ;;  %v11034_v48 = vld [vmem:[#allocation33_spill] sm:$0xff] }
 0x77b   : > { %v5315_v29 = vpop.f32.mrf.mxu2  ;;  %v5813_v27 = vpop.f32.mrf.mxu3 }
 0x77c   : > { %v5316_v15 = vadd.f32 %v9759_v10, %v5315_v29  ;;  %v5814_v63 = vadd.f32 %v9931_v51, %v5813_v27  ;;  %4870 = vmatmul.f32.gmra.mxu1 %v4080_v32  ;;  %v5075_v57 = vmax.f32 %v4824_v59, 0.0  ;;  %v9992_v32 = vpop.f32.mrf.mxu0  ;;  %v4086_v29 = vmax.f32 %v3787_v41, 0.0 }
 0x77e   : > { %v5605_v25 = vmax.f32 %v5316_v15, 0.0  ;;  %6137 = vst [vmem:[%s9626_s23 + $0xf0] sm:$0xff] %v5814_v63  ;;  %v11033_v15 = vld [vmem:[#allocation24_spill] sm:$0xff] }
 0x77f   : > { %v3437_v63 = vadd.f32 %v11033_v15, %v8793_v56 }
 0x780   : > { %5365 = vmatmul.f32.gmra.mxu2 %v5073_v39  ;;  %5863 = vmatmul.f32.gmra.mxu3 %v5605_v25  ;;  %v3790_v39 = vadd.f32 %v11034_v48, %v9011_v14 }
 0x781   : > { %v4826_v55 = vpop.f32.mrf.mxu1  ;;  %v4119_v53 = vmax.f32 %v3437_v63, 0.0  ;;  %v11039_v63 = vld [vmem:[#allocation57_spill] sm:$0xff] }
 0x782   : > { %4520 = vmatmul.f32.gmra.mxu0 %v4113_v28  ;;  %v4827_v27 = vadd.f32 %v4826_v55, %v4426_v38  ;;  %v4429_v55 = vadd.f32 %v9921_v19, %v9799_v44  ;;  %v4088_v16 = vmax.f32 %v3790_v39, 0.0  ;;  %v11036_v44 = vld [vmem:[#allocation35_spill] sm:$0xff] }
 0x783   : > { %v5318_v34 = vpop.f32.mrf.mxu2  ;;  %v5816_v62 = vpop.f32.mrf.mxu3  ;;  %v11040_v39 = vld [vmem:[#allocation39_spill] sm:$0xff] }
 0x784   : > { %v5319_v5 = vadd.f32 %v9759_v10, %v5318_v34  ;;  %v5817_v58 = vadd.f32 %v9931_v51, %v5816_v62  ;;  %4873 = vmatmul.f32.gmra.mxu1 %v4082_v37  ;;  %v5076_v25 = vmax.f32 %v4827_v27, 0.0  ;;  %v10003_v34 = vpop.f32.mrf.mxu0 }
 0x786   : > { %v5606_v43 = vmax.f32 %v5319_v5, 0.0  ;;  %6138 = vst [vmem:[%s9626_s23 + $0xf8] sm:$0xff] %v5817_v58  ;;  %v11035_v5 = vld [vmem:[#allocation53_spill] sm:$0xff] }
 0x787   : > { %v3440_v58 = vadd.f32 %v11035_v5, %v8793_v56 }
 0x788   : > { %5368 = vmatmul.f32.gmra.mxu2 %v5074_v60  ;;  %5866 = vmatmul.f32.gmra.mxu3 %v5606_v43  ;;  %v3793_v60 = vadd.f32 %v11036_v44, %v9011_v14 }
 0x789   : > { %v4829_v36 = vpop.f32.mrf.mxu1  ;;  %v4121_v24 = vmax.f32 %v3440_v58, 0.0  ;;  %v11041_v58 = vld [vmem:[#allocation59_spill] sm:$0xff] }
 0x78a   : > { %4523 = vmatmul.f32.gmra.mxu0 %v4115_v61  ;;  %v4830_v62 = vadd.f32 %v4829_v36, %v4429_v55  ;;  %v4432_v36 = vadd.f32 %v9921_v19, %v9810_v47  ;;  %v4090_v59 = vmax.f32 %v3793_v60, 0.0  ;;  %v11038_v47 = vld [vmem:[#allocation37_spill] sm:$0xff] }
 0x78b   : > { %v5321_v23 = vpop.f32.mrf.mxu2  ;;  %v5819_v13 = vpop.f32.mrf.mxu3  ;;  %v11042_v60 = vld [vmem:[#allocation41_spill] sm:$0xff] }
 0x78c   : > { %v5322_v6 = vadd.f32 %v9759_v10, %v5321_v23  ;;  %v5820_v8 = vadd.f32 %v9931_v51, %v5819_v13  ;;  %4876 = vmatmul.f32.gmra.mxu1 %v4084_v9  ;;  %v5077_v43 = vmax.f32 %v4830_v62, 0.0 }
 0x78e   : > { %v5607_v17 = vmax.f32 %v5322_v6, 0.0  ;;  %6139 = vst [vmem:[%s9626_s23 + $0x100] sm:$0xff] %v5820_v8  ;;  %v3443_v6 = vadd.f32 %v11037_v3, %v8793_v56  ;;  %v10016_v8 = vpop.f32.mrf.mxu0 }
 0x790   : > { %5371 = vmatmul.f32.gmra.mxu2 %v5075_v57  ;;  %5869 = vmatmul.f32.gmra.mxu3 %v5607_v17  ;;  %v3796_v57 = vadd.f32 %v11038_v47, %v9011_v14  ;;  %v4123_v38 = vmax.f32 %v3443_v6, 0.0  ;;  %v11043_v6 = vld [vmem:[#allocation61_spill] sm:$0xff] }
 0x791   : > { %v4832_v33 = vpop.f32.mrf.mxu1 }
 0x792   : > { %4526 = vmatmul.f32.gmra.mxu0 %v4117_v52  ;;  %v4833_v23 = vadd.f32 %v4832_v33, %v4432_v36  ;;  %v4435_v33 = vadd.f32 %v9921_v19, %v9823_v12  ;;  %v4092_v27 = vmax.f32 %v3796_v57, 0.0  ;;  %v3799_v12 = vadd.f32 %v11040_v39, %v9011_v14 }
 0x793   : > { %v5324_v30 = vpop.f32.mrf.mxu2  ;;  %v5822_v18 = vpop.f32.mrf.mxu3  ;;  %v4441_v36 = vadd.f32 %v9921_v19, %v9847_v26  ;;  %v11044_v26 = vld [vmem:[#allocation19_spill] sm:$0xff] }
 0x794   : > { %v5325_v2 = vadd.f32 %v9759_v10, %v5324_v30  ;;  %v5823_v20 = vadd.f32 %v9931_v51, %v5822_v18  ;;  %4879 = vmatmul.f32.gmra.mxu1 %v4086_v29  ;;  %v5078_v17 = vmax.f32 %v4833_v23, 0.0  ;;  %v4094_v62 = vmax.f32 %v3799_v12, 0.0 }
 0x795   : > { %v3805_v57 = vadd.f32 %v11044_v26, %v9011_v14  ;;  %v11050_v26 = vld [vmem:[#allocation47_spill] sm:$0xff] }
 0x796   : > { %v5608_v28 = vmax.f32 %v5325_v2, 0.0  ;;  %6140 = vst [vmem:[%s9626_s23 + $0x108] sm:$0xff] %v5823_v20  ;;  %v3446_v2 = vadd.f32 %v11039_v63, %v8793_v56 }
 0x798   : > { %5374 = vmatmul.f32.gmra.mxu2 %v5076_v25  ;;  %5872 = vmatmul.f32.gmra.mxu3 %v5608_v28  ;;  %v10031_v25 = vpop.f32.mrf.mxu0  ;;  %v4125_v55 = vmax.f32 %v3446_v2, 0.0  ;;  %v11045_v2 = vld [vmem:[#allocation30_spill] sm:$0xff] }
 0x799   : > { %v4835_v37 = vpop.f32.mrf.mxu1 }
 0x79a   : > { %4529 = vmatmul.f32.gmra.mxu0 %v4119_v53  ;;  %v4836_v30 = vadd.f32 %v4835_v37, %v4435_v33  ;;  %v4438_v37 = vadd.f32 %v9921_v19, %v9834_v49  ;;  %v3802_v49 = vadd.f32 %v11042_v60, %v9011_v14  ;;  %v4444_v33 = vadd.f32 %v9921_v19, %v9862_v0  ;;  %v11046_v0 = vld [vmem:[#allocation20_spill] sm:$0xff]  ;;  %v11048_v60 = vld [vmem:[#allocation21_spill] sm:$0xff] }
 0x79b   : > { %v5327_v1 = vpop.f32.mrf.mxu2  ;;  %v5825_v22 = vpop.f32.mrf.mxu3  ;;  %v3808_v12 = vadd.f32 %v11046_v0, %v9011_v14  ;;  %v11052_v0 = vld [vmem:[#allocation49_spill] sm:$0xff] }
 0x79c   : > { %v5328_v35 = vadd.f32 %v9759_v10, %v5327_v1  ;;  %v5826_v54 = vadd.f32 %v9931_v51, %v5825_v22  ;;  %4882 = vmatmul.f32.gmra.mxu1 %v4088_v16  ;;  %v5079_v28 = vmax.f32 %v4836_v30, 0.0  ;;  %v4096_v23 = vmax.f32 %v3802_v49, 0.0 }
 0x79d   : > { %v3811_v49 = vadd.f32 %v11048_v60, %v9011_v14 }
 0x79e   : > { %v5609_v61 = vmax.f32 %v5328_v35, 0.0  ;;  %6141 = vst [vmem:[%s9626_s23 + $0x110] sm:$0xff] %v5826_v54  ;;  %v3449_v35 = vadd.f32 %v11041_v58, %v8793_v56 }
 0x7a0   : > { %5377 = vmatmul.f32.gmra.mxu2 %v5077_v43  ;;  %5875 = vmatmul.f32.gmra.mxu3 %v5609_v61 }
 0x7a1   : > { %v4838_v9 = vpop.f32.mrf.mxu1 }
 0x7a2   : > { %4532 = vmatmul.f32.gmra.mxu0 %v4121_v24  ;;  %v4839_v1 = vadd.f32 %v4838_v9, %v4438_v37  ;;  %v4127_v24 = vmax.f32 %v3449_v35, 0.0  ;;  %v10045_v9 = vpop.f32.mrf.mxu0  ;;  %v4447_v37 = vadd.f32 %v9921_v19, %v9876_v40 }
 0x7a3   : > { %v5330_v13 = vpop.f32.mrf.mxu2  ;;  %v5828_v45 = vpop.f32.mrf.mxu3 }
 0x7a4   : > { %v5331_v31 = vadd.f32 %v9759_v10, %v5330_v13  ;;  %v5829_v41 = vadd.f32 %v9931_v51, %v5828_v45  ;;  %4885 = vmatmul.f32.gmra.mxu1 %v4090_v59  ;;  %v5080_v43 = vmax.f32 %v4839_v1, 0.0 }
 0x7a6   : > { %v5610_v52 = vmax.f32 %v5331_v31, 0.0  ;;  %6142 = vst [vmem:[%s9626_s23 + $0x118] sm:$0xff] %v5829_v41  ;;  %v3452_v31 = vadd.f32 %v11043_v6, %v8793_v56  ;;  %v11049_v6 = vld [vmem:[#allocation34_spill] sm:$0xff] }
 0x7a8   : > { %5380 = vmatmul.f32.gmra.mxu2 %v5078_v17  ;;  %5878 = vmatmul.f32.gmra.mxu3 %v5610_v52 }
 0x7a9   : > { %v4841_v29 = vpop.f32.mrf.mxu1 }
 0x7aa   : > { %4535 = vmatmul.f32.gmra.mxu0 %v4123_v38  ;;  %v4842_v13 = vadd.f32 %v4841_v29, %v4441_v36  ;;  %v4129_v38 = vmax.f32 %v3452_v31, 0.0  ;;  %v10056_v30 = vpop.f32.mrf.mxu0  ;;  %v4450_v36 = vadd.f32 %v9921_v19, %v9887_v21  ;;  %v3461_v31 = vadd.f32 %v11049_v6, %v8793_v56  ;;  %v11055_v6 = vld [vmem:[#allocation38_spill] sm:$0xff] }
 0x7ab   : > { %v5333_v18 = vpop.f32.mrf.mxu2  ;;  %v5831_v15 = vpop.f32.mrf.mxu3  ;;  %v3814_v21 = vadd.f32 %v11050_v26, %v9011_v14 }
 0x7ac   : > { %v5334_v20 = vadd.f32 %v9759_v10, %v5333_v18  ;;  %v5832_v48 = vadd.f32 %v9931_v51, %v5831_v15  ;;  %4888 = vmatmul.f32.gmra.mxu1 %v4092_v27  ;;  %v5081_v17 = vmax.f32 %v4842_v13, 0.0  ;;  %v4098_v27 = vmax.f32 %v3805_v57, 0.0 }
 0x7ae   : > { %v5611_v53 = vmax.f32 %v5334_v20, 0.0  ;;  %6143 = vst [vmem:[%s9626_s23 + $0x120] sm:$0xff] %v5832_v48  ;;  %v3455_v20 = vadd.f32 %v11045_v2, %v8793_v56  ;;  %v11051_v2 = vld [vmem:[#allocation36_spill] sm:$0xff] }
 0x7b0   : > { %5383 = vmatmul.f32.gmra.mxu2 %v5079_v28  ;;  %5881 = vmatmul.f32.gmra.mxu3 %v5611_v53 }
 0x7b1   : > { %v4844_v16 = vpop.f32.mrf.mxu1 }
 0x7b2   : > { %4538 = vmatmul.f32.gmra.mxu0 %v4125_v55  ;;  %v4845_v18 = vadd.f32 %v4844_v16, %v4444_v33  ;;  %v4131_v55 = vmax.f32 %v3455_v20, 0.0  ;;  %v10069_v35 = vpop.f32.mrf.mxu0  ;;  %v4453_v33 = vadd.f32 %v9921_v19, %v9900_v4  ;;  %v3464_v20 = vadd.f32 %v11051_v2, %v8793_v56 }
 0x7b3   : > { %v5336_v22 = vpop.f32.mrf.mxu2  ;;  %v5834_v5 = vpop.f32.mrf.mxu3  ;;  %v3817_v4 = vadd.f32 %v11052_v0, %v9011_v14 }
 0x7b4   : > { %v5337_v54 = vadd.f32 %v9759_v10, %v5336_v22  ;;  %v5835_v44 = vadd.f32 %v9931_v51, %v5834_v5  ;;  %4891 = vmatmul.f32.gmra.mxu1 %v4094_v62  ;;  %v5082_v28 = vmax.f32 %v4845_v18, 0.0  ;;  %v4100_v62 = vmax.f32 %v3808_v12, 0.0  ;;  %v11047_v5 = vld [vmem:[#allocation32_spill] sm:$0xff] }
 0x7b5   : > { %v3458_v58 = vadd.f32 %v11047_v5, %v8793_v56  ;;  %v11053_v5 = vld [vmem:[#allocation69_spill] sm:$0xff] }
 0x7b6   : > { %v5612_v61 = vmax.f32 %v5337_v54, 0.0  ;;  %6144 = vst [vmem:[%s9626_s23 + $0x128] sm:$0xff] %v5835_v44  ;;  %v10074_v54 = vld [vmem:[%s10625_s7] ss:$0 sm:$0xff] }
 0x7b8   : > { %5386 = vmatmul.f32.gmra.mxu2 %v5080_v43  ;;  %5884 = vmatmul.f32.gmra.mxu3 %v5612_v61 }
 0x7b9   : > { %v4847_v59 = vpop.f32.mrf.mxu1 }
 0x7ba   : > { %4541 = vmatmul.f32.gmra.mxu0 %v4127_v24  ;;  %v4848_v1 = vadd.f32 %v4847_v59, %v4447_v37  ;;  %v4133_v24 = vmax.f32 %v3458_v58, 0.0  ;;  %v10089_v57 = vpop.f32.mrf.mxu0  ;;  %v3467_v58 = vadd.f32 %v11053_v5, %v8793_v56 }
 0x7bb   : > { %v5339_v45 = vpop.f32.mrf.mxu2  ;;  %v5837_v3 = vpop.f32.mrf.mxu3 }
 0x7bc   : > { %v5340_v41 = vadd.f32 %v9759_v10, %v5339_v45  ;;  %v5838_v47 = vadd.f32 %v9931_v51, %v5837_v3  ;;  %4894 = vmatmul.f32.gmra.mxu1 %v4096_v23  ;;  %v5083_v43 = vmax.f32 %v4848_v1, 0.0  ;;  %v4102_v23 = vmax.f32 %v3811_v49, 0.0 }
 0x7be   : > { %v5613_v52 = vmax.f32 %v5340_v41, 0.0  ;;  %6145 = vst [vmem:[%s9626_s23 + $0x130] sm:$0xff] %v5838_v47 }
 0x7c0   : > { %5389 = vmatmul.f32.gmra.mxu2 %v5081_v17  ;;  %5887 = vmatmul.f32.gmra.mxu3 %v5613_v52 }
 0x7c1   : > { %v4850_v29 = vpop.f32.mrf.mxu1 }
 0x7c2   : > { %4544 = vmatmul.f32.gmra.mxu0 %v4129_v38  ;;  %v4851_v13 = vadd.f32 %v4850_v29, %v4450_v36  ;;  %v4135_v38 = vmax.f32 %v3461_v31, 0.0  ;;  %v10103_v37 = vpop.f32.mrf.mxu0  ;;  %v3470_v31 = vadd.f32 %v11055_v6, %v8793_v56 }
 0x7c3   : > { %v5342_v15 = vpop.f32.mrf.mxu2  ;;  %v5840_v63 = vpop.f32.mrf.mxu3 }
 0x7c4   : > { %v5343_v48 = vadd.f32 %v9759_v10, %v5342_v15  ;;  %v5841_v39 = vadd.f32 %v9931_v51, %v5840_v63  ;;  %4897 = vmatmul.f32.gmra.mxu1 %v4098_v27  ;;  %v5084_v17 = vmax.f32 %v4851_v13, 0.0  ;;  %v4104_v27 = vmax.f32 %v3814_v21, 0.0 }
 0x7c6   : > { %v5614_v53 = vmax.f32 %v5343_v48, 0.0  ;;  %6146 = vst [vmem:[%s9626_s23 + $0x138] sm:$0xff] %v5841_v39 }
 0x7c8   : > { %5392 = vmatmul.f32.gmra.mxu2 %v5082_v28  ;;  %5890 = vmatmul.f32.gmra.mxu3 %v5614_v53  ;;  %v4137_v53 = vmax.f32 %v3464_v20, 0.0 }
 0x7c9   : > { %v4853_v16 = vpop.f32.mrf.mxu1 }
 0x7ca   : > { %4547 = vmatmul.f32.gmra.mxu0 %v4131_v55  ;;  %v4854_v18 = vadd.f32 %v4853_v16, %v4453_v33  ;;  %v4456_v55 = vadd.f32 %v9921_v19, %v9915_v46  ;;  %v11054_v46 = vld [vmem:[#allocation51_spill] sm:$0xff] }
 0x7cb   : > { %v5345_v10 = vpop.f32.mrf.mxu2  ;;  %v5843_v22 = vpop.f32.mrf.mxu3  ;;  %v3820_v60 = vadd.f32 %v11054_v46, %v9011_v14 }
 0x7cc   : > { %v5346_v40 = vadd.f32 %v10074_v54, %v5345_v10  ;;  %v5844_v44 = vadd.f32 %v9931_v51, %v5843_v22  ;;  %4900 = vmatmul.f32.gmra.mxu1 %v4100_v62  ;;  %v5085_v12 = vmax.f32 %v4854_v18, 0.0  ;;  %v4106_v62 = vmax.f32 %v3817_v4, 0.0 }
 0x7ce   : > { %v5615_v61 = vmax.f32 %v5346_v40, 0.0  ;;  %6147 = vst [vmem:[%s9626_s23 + $0x140] sm:$0xff] %v5844_v44 }
 0x7d0   : > { %5395 = vmatmul.f32.gmra.mxu2 %v5083_v43  ;;  %5893 = vmatmul.f32.gmra.mxu3 %v5615_v61  ;;  %v4139_v61 = vmax.f32 %v3467_v58, 0.0 }
 0x7d1   : > { %v4856_v59 = vpop.f32.mrf.mxu1 }
 0x7d2   : > { %4550 = vmatmul.f32.gmra.mxu0 %v4133_v24  ;;  %v4857_v1 = vadd.f32 %v4856_v59, %v4456_v55  ;;  %v4459_v24 = vadd.f32 %v9921_v19, %v9939_v7  ;;  %v4108_v59 = vmax.f32 %v3820_v60, 0.0  ;;  %v11056_v7 = vld [vmem:[#allocation25_spill] sm:$0xff] }
 0x7d3   : > { %v5348_v45 = vpop.f32.mrf.mxu2  ;;  %v5846_v3 = vpop.f32.mrf.mxu3  ;;  %v3823_v26 = vadd.f32 %v11056_v7, %v9011_v14 }
 0x7d4   : > { %v5349_v41 = vadd.f32 %v10074_v54, %v5348_v45  ;;  %v5847_v47 = vadd.f32 %v9931_v51, %v5846_v3  ;;  %4903 = vmatmul.f32.gmra.mxu1 %v4102_v23  ;;  %v5086_v49 = vmax.f32 %v4857_v1, 0.0  ;;  %v10114_v23 = vpop.f32.mrf.mxu0 }
 0x7d6   : > { %v5616_v52 = vmax.f32 %v5349_v41, 0.0  ;;  %6148 = vst [vmem:[%s9626_s23 + $0x148] sm:$0xff] %v5847_v47 }
 0x7d8   : > { %5398 = vmatmul.f32.gmra.mxu2 %v5084_v17  ;;  %5896 = vmatmul.f32.gmra.mxu3 %v5616_v52  ;;  %v4141_v52 = vmax.f32 %v3470_v31, 0.0 }
 0x7d9   : > { %v4859_v29 = vpop.f32.mrf.mxu1 }
 0x7da   : > { %4553 = vmatmul.f32.gmra.mxu0 %v4135_v38  ;;  %v4860_v13 = vadd.f32 %v4859_v29, %v4459_v24  ;;  %v4462_v38 = vadd.f32 %v9921_v19, %v9950_v50  ;;  %v4110_v29 = vmax.f32 %v3823_v26, 0.0  ;;  %v11058_v50 = vld [vmem:[#allocation26_spill] sm:$0xff] }
 0x7db   : > { %v5351_v15 = vpop.f32.mrf.mxu2  ;;  %v5849_v63 = vpop.f32.mrf.mxu3  ;;  %v3826_v0 = vadd.f32 %v11058_v50, %v9011_v14 }
 0x7dc   : > { %v5352_v48 = vadd.f32 %v10074_v54, %v5351_v15  ;;  %v5850_v39 = vadd.f32 %v9931_v51, %v5849_v63  ;;  %4906 = vmatmul.f32.gmra.mxu1 %v4104_v27  ;;  %v5087_v21 = vmax.f32 %v4860_v13, 0.0  ;;  %v11057_v63 = vld [vmem:[#allocation71_spill] sm:$0xff]  ;;  %v10127_v20 = vpop.f32.mrf.mxu0 }
 0x7dd   : > { %v3473_v2 = vadd.f32 %v11057_v63, %v8793_v56 }
 0x7de   : > { %v5617_v28 = vmax.f32 %v5352_v48, 0.0  ;;  %6149 = vst [vmem:[%s9626_s23 + $0x150] sm:$0xff] %v5850_v39 }
 0x7e0   : > { %5401 = vmatmul.f32.gmra.mxu2 %v5085_v12  ;;  %5899 = vmatmul.f32.gmra.mxu3 %v5617_v28  ;;  %v4143_v28 = vmax.f32 %v3473_v2, 0.0 }
 0x7e1   : > { %v4862_v16 = vpop.f32.mrf.mxu1 }
 0x7e2   : > { %4556 = vmatmul.f32.gmra.mxu0 %v4137_v53  ;;  %v4863_v27 = vadd.f32 %v4862_v16, %v4462_v38  ;;  %v4465_v53 = vadd.f32 %v9921_v19, %v9963_v11  ;;  %v4112_v16 = vmax.f32 %v3826_v0, 0.0 }
 0x7e3   : > { %v5354_v10 = vpop.f32.mrf.mxu2  ;;  %v5852_v22 = vpop.f32.mrf.mxu3 }
 0x7e4   : > { %v5355_v40 = vadd.f32 %v10074_v54, %v5354_v10  ;;  %v5853_v44 = vadd.f32 %v9931_v51, %v5852_v22  ;;  %4909 = vmatmul.f32.gmra.mxu1 %v4106_v62  ;;  %v5088_v4 = vmax.f32 %v4863_v27, 0.0  ;;  %v11059_v22 = vld [vmem:[#allocation40_spill] sm:$0xff]  ;;  %v10142_v46 = vpop.f32.mrf.mxu0 }
 0x7e5   : > { %v3476_v5 = vadd.f32 %v11059_v22, %v8793_v56 }
 0x7e6   : > { %v5618_v43 = vmax.f32 %v5355_v40, 0.0  ;;  %6150 = vst [vmem:[%s9626_s23 + $0x158] sm:$0xff] %v5853_v44  ;;  %v11060_v44 = vld [vmem:[#allocation27_spill] sm:$0xff] }
 0x7e7   : > { %v3829_v11 = vadd.f32 %v11060_v44, %v9011_v14 }
 0x7e8   : > { %5404 = vmatmul.f32.gmra.mxu2 %v5086_v49  ;;  %5902 = vmatmul.f32.gmra.mxu3 %v5618_v43  ;;  %v4145_v43 = vmax.f32 %v3476_v5, 0.0 }
 0x7e9   : > { %v4865_v36 = vpop.f32.mrf.mxu1 }
 0x7ea   : > { %4559 = vmatmul.f32.gmra.mxu0 %v4139_v61  ;;  %v4866_v62 = vadd.f32 %v4865_v36, %v4465_v53  ;;  %v4468_v61 = vadd.f32 %v9921_v19, %v9978_v42  ;;  %v4114_v36 = vmax.f32 %v3829_v11, 0.0 }
 0x7eb   : > { %v5357_v45 = vpop.f32.mrf.mxu2  ;;  %v5855_v3 = vpop.f32.mrf.mxu3 }
 0x7ec   : > { %v5358_v41 = vadd.f32 %v10074_v54, %v5357_v45  ;;  %v5856_v47 = vadd.f32 %v9931_v51, %v5855_v3  ;;  %4912 = vmatmul.f32.gmra.mxu1 %v4108_v59  ;;  %v5089_v60 = vmax.f32 %v4866_v62, 0.0  ;;  %v11061_v3 = vld [vmem:[#allocation42_spill] sm:$0xff] }
 0x7ed   : > { %v3479_v6 = vadd.f32 %v11061_v3, %v8793_v56 }
 0x7ee   : > { %v5619_v17 = vmax.f32 %v5358_v41, 0.0  ;;  %6151 = vst [vmem:[%s9626_s23 + $0x160] sm:$0xff] %v5856_v47  ;;  %v11062_v47 = vld [vmem:[#allocation28_spill] sm:$0xff] }
 0x7ef   : > { %v3832_v42 = vadd.f32 %v11062_v47, %v9011_v14 }
 0x7f0   : > { %5407 = vmatmul.f32.gmra.mxu2 %v5087_v21  ;;  %5905 = vmatmul.f32.gmra.mxu3 %v5619_v17  ;;  %v4147_v21 = vmax.f32 %v3479_v6, 0.0  ;;  %v4471_v17 = vadd.f32 %v9921_v19, %v9992_v32  ;;  %v11064_v32 = vld [vmem:[#allocation63_spill] sm:$0xff] }
 0x7f1   : > { %v4868_v33 = vpop.f32.mrf.mxu1 }
 0x7f2   : > { %4562 = vmatmul.f32.gmra.mxu0 %v4141_v52  ;;  %v4869_v59 = vadd.f32 %v4868_v33, %v4468_v61  ;;  %v10156_v52 = vpop.f32.mrf.mxu0  ;;  %v4116_v33 = vmax.f32 %v3832_v42, 0.0 }
 0x7f3   : > { %v5360_v18 = vpop.f32.mrf.mxu2  ;;  %v5858_v15 = vpop.f32.mrf.mxu3 }
 0x7f4   : > { %v5361_v48 = vadd.f32 %v10074_v54, %v5360_v18  ;;  %v5859_v39 = vadd.f32 %v9931_v51, %v5858_v15  ;;  %4915 = vmatmul.f32.gmra.mxu1 %v4110_v29  ;;  %v5090_v7 = vmax.f32 %v4869_v59, 0.0  ;;  %v11063_v15 = vld [vmem:[#allocation44_spill] sm:$0xff] }
 0x7f5   : > { %v3482_v63 = vadd.f32 %v11063_v15, %v8793_v56 }
 0x7f6   : > { %v5620_v12 = vmax.f32 %v5361_v48, 0.0  ;;  %6152 = vst [vmem:[%s9626_s23 + $0x168] sm:$0xff] %v5859_v39  ;;  %v3835_v39 = vadd.f32 %v11064_v32, %v9011_v14 }
 0x7f8   : > { %5410 = vmatmul.f32.gmra.mxu2 %v5088_v4  ;;  %5908 = vmatmul.f32.gmra.mxu3 %v5620_v12  ;;  %v4149_v4 = vmax.f32 %v3482_v63, 0.0  ;;  %v4474_v12 = vadd.f32 %v9921_v19, %v10003_v34  ;;  %v4118_v53 = vmax.f32 %v3835_v39, 0.0  ;;  %v11066_v34 = vld [vmem:[#allocation65_spill] sm:$0xff] }
 0x7f9   : > { %v4871_v55 = vpop.f32.mrf.mxu1 }
 0x7fa   : > { %4565 = vmatmul.f32.gmra.mxu0 %v4143_v28  ;;  %v4872_v29 = vadd.f32 %v4871_v55, %v4471_v17  ;;  %v10167_v55 = vpop.f32.mrf.mxu0 }
 0x7fb   : > { %v5363_v1 = vpop.f32.mrf.mxu2  ;;  %v5861_v10 = vpop.f32.mrf.mxu3 }
 0x7fc   : > { %v5364_v58 = vadd.f32 %v10074_v54, %v5363_v1  ;;  %v5862_v40 = vadd.f32 %v9931_v51, %v5861_v10  ;;  %4918 = vmatmul.f32.gmra.mxu1 %v4112_v16  ;;  %v5091_v50 = vmax.f32 %v4872_v29, 0.0  ;;  %v11065_v10 = vld [vmem:[#allocation46_spill] sm:$0xff] }
 0x7fd   : > { %v3485_v22 = vadd.f32 %v11065_v10, %v8793_v56 }
 0x7fe   : > { %v5621_v49 = vmax.f32 %v5364_v58, 0.0  ;;  %6153 = vst [vmem:[%s9626_s23 + $0x170] sm:$0xff] %v5862_v40  ;;  %v3838_v40 = vadd.f32 %v11066_v34, %v9011_v14 }
 0x800   : > { %5413 = vmatmul.f32.gmra.mxu2 %v5089_v60  ;;  %5911 = vmatmul.f32.gmra.mxu3 %v5621_v49  ;;  %v4151_v60 = vmax.f32 %v3485_v22, 0.0  ;;  %v4477_v49 = vadd.f32 %v9921_v19, %v10016_v8  ;;  %v4120_v61 = vmax.f32 %v3838_v40, 0.0  ;;  %v11068_v8 = vld [vmem:[#allocation67_spill] sm:$0xff] }
 0x801   : > { %v4874_v24 = vpop.f32.mrf.mxu1 }
 0x802   : > { %4568 = vmatmul.f32.gmra.mxu0 %v4145_v43  ;;  %v4875_v16 = vadd.f32 %v4874_v24, %v4474_v12  ;;  %v10180_v3 = vpop.f32.mrf.mxu0 }
 0x803   : > { %v5366_v13 = vpop.f32.mrf.mxu2  ;;  %v5864_v45 = vpop.f32.mrf.mxu3 }
 0x804   : > { %v5367_v31 = vadd.f32 %v10074_v54, %v5366_v13  ;;  %v5865_v41 = vadd.f32 %v9931_v51, %v5864_v45  ;;  %4921 = vmatmul.f32.gmra.mxu1 %v4114_v36  ;;  %v5092_v44 = vmax.f32 %v4875_v16, 0.0  ;;  %v11067_v13 = vld [vmem:[#allocation48_spill] sm:$0xff] }
 0x805   : > { %v3488_v45 = vadd.f32 %v11067_v13, %v8793_v56 }
 0x806   : > { %v5622_v26 = vmax.f32 %v5367_v31, 0.0  ;;  %6154 = vst [vmem:[%s9626_s23 + $0x178] sm:$0xff] %v5865_v41  ;;  %v3841_v41 = vadd.f32 %v11068_v8, %v9011_v14 }
 0x808   : > { %5416 = vmatmul.f32.gmra.mxu2 %v5090_v7  ;;  %5914 = vmatmul.f32.gmra.mxu3 %v5622_v26  ;;  %v4153_v7 = vmax.f32 %v3488_v45, 0.0  ;;  %v4480_v26 = vadd.f32 %v9921_v19, %v10031_v25  ;;  %v4122_v17 = vmax.f32 %v3841_v41, 0.0 }
 0x809   : > { %v4877_v38 = vpop.f32.mrf.mxu1 }
 0x80a   : > { %4571 = vmatmul.f32.gmra.mxu0 %v4147_v21  ;;  %v4878_v24 = vadd.f32 %v4877_v38, %v4477_v49 }
 0x80b   : > { %v5369_v27 = vpop.f32.mrf.mxu2  ;;  %v5867_v18 = vpop.f32.mrf.mxu3 }
 0x80c   : > { %v5370_v2 = vadd.f32 %v10074_v54, %v5369_v27  ;;  %v5868_v48 = vadd.f32 %v9931_v51, %v5867_v18  ;;  %4924 = vmatmul.f32.gmra.mxu1 %v4116_v33  ;;  %v5093_v47 = vmax.f32 %v4878_v24, 0.0  ;;  %v11069_v27 = vld [vmem:[#allocation81_spill] sm:$0xff] }
 0x80d   : > { %v3491_v18 = vadd.f32 %v11069_v27, %v8793_v56 }
 0x80e   : > { %v5623_v0 = vmax.f32 %v5370_v2, 0.0  ;;  %6155 = vst [vmem:[%s9626_s23 + $0x180] sm:$0xff] %v5868_v48  ;;  %v11070_v2 = vld [vmem:[#allocation73_spill] sm:$0xff]  ;;  %v10195_v48 = vpop.f32.mrf.mxu0 }
 0x80f   : > { %v3844_v25 = vadd.f32 %v11070_v2, %v9011_v14 }
 0x810   : > { %5419 = vmatmul.f32.gmra.mxu2 %v5091_v50  ;;  %5917 = vmatmul.f32.gmra.mxu3 %v5623_v0  ;;  %v4155_v50 = vmax.f32 %v3491_v18, 0.0  ;;  %v4483_v0 = vadd.f32 %v9921_v19, %v10045_v9 }
 0x811   : > { %v4880_v28 = vpop.f32.mrf.mxu1  ;;  %v4124_v12 = vmax.f32 %v3844_v25, 0.0  ;;  %v10232_v25 = vld [vmem:[%s10623_s5] ss:$0 sm:$0xff] }
 0x812   : > { %4574 = vmatmul.f32.gmra.mxu0 %v4149_v4  ;;  %v4881_v38 = vadd.f32 %v4880_v28, %v4480_v26 }
 0x813   : > { %v5372_v62 = vpop.f32.mrf.mxu2  ;;  %v5870_v1 = vpop.f32.mrf.mxu3 }
 0x814   : > { %v5373_v5 = vadd.f32 %v10074_v54, %v5372_v62  ;;  %v5871_v58 = vadd.f32 %v9931_v51, %v5870_v1  ;;  %4927 = vmatmul.f32.gmra.mxu1 %v4118_v53  ;;  %v5094_v32 = vmax.f32 %v4881_v38, 0.0  ;;  %v11071_v62 = vld [vmem:[#allocation83_spill] sm:$0xff] }
 0x815   : > { %v3494_v1 = vadd.f32 %v11071_v62, %v8793_v56 }
 0x816   : > { %v5624_v11 = vmax.f32 %v5373_v5, 0.0  ;;  %6156 = vst [vmem:[%s9626_s23 + $0x188] sm:$0xff] %v5871_v58  ;;  %v11072_v5 = vld [vmem:[#allocation75_spill] sm:$0xff] }
 0x817   : > { %v3847_v9 = vadd.f32 %v11072_v5, %v9011_v14  ;;  %v4157_v40 = vmax.f32 %v3494_v1, 0.0  ;;  %v11078_v1 = vld [vmem:[#allocation50_spill] sm:$0xff] }
 0x818   : > { %5422 = vmatmul.f32.gmra.mxu2 %v5092_v44  ;;  %5920 = vmatmul.f32.gmra.mxu3 %v5624_v11  ;;  %v4486_v44 = vadd.f32 %v9921_v19, %v10056_v30  ;;  %v10209_v11 = vpop.f32.mrf.mxu0  ;;  %v11074_v30 = vld [vmem:[#allocation77_spill] sm:$0xff] }
 0x819   : > { %v4883_v43 = vpop.f32.mrf.mxu1  ;;  %v4126_v49 = vmax.f32 %v3847_v9, 0.0 }
 0x81a   : > { %4577 = vmatmul.f32.gmra.mxu0 %v4151_v60  ;;  %v4884_v28 = vadd.f32 %v4883_v43, %v4483_v0 }
 0x81b   : > { %v5375_v36 = vpop.f32.mrf.mxu2  ;;  %v5873_v59 = vpop.f32.mrf.mxu3 }
 0x81c   : > { %v5376_v6 = vadd.f32 %v10074_v54, %v5375_v36  ;;  %v5874_v31 = vadd.f32 %v9931_v51, %v5873_v59  ;;  %4930 = vmatmul.f32.gmra.mxu1 %v4120_v61  ;;  %v5095_v58 = vmax.f32 %v4884_v28, 0.0  ;;  %v11073_v36 = vld [vmem:[#allocation85_spill] sm:$0xff] }
 0x81d   : > { %v3497_v59 = vadd.f32 %v11073_v36, %v8793_v56 }
 0x81e   : > { %v5625_v42 = vmax.f32 %v5376_v6, 0.0  ;;  %6157 = vst [vmem:[%s9626_s23 + $0x190] sm:$0xff] %v5874_v31  ;;  %v3850_v6 = vadd.f32 %v11074_v30, %v9011_v14 }
 0x81f   : > { %v4159_v41 = vmax.f32 %v3497_v59, 0.0  ;;  %v11080_v59 = vld [vmem:[#allocation52_spill] sm:$0xff] }
 0x820   : > { %5425 = vmatmul.f32.gmra.mxu2 %v5093_v47  ;;  %5923 = vmatmul.f32.gmra.mxu3 %v5625_v42  ;;  %v4489_v47 = vadd.f32 %v9921_v19, %v10069_v35  ;;  %v10220_v26 = vpop.f32.mrf.mxu0  ;;  %v11076_v19 = vld [vmem:[#allocation79_spill] sm:$0xff] }
 0x821   : > { %v4886_v21 = vpop.f32.mrf.mxu1  ;;  %v3853_v35 = vadd.f32 %v11076_v19, %v9011_v14 }
 0x822   : > { %4580 = vmatmul.f32.gmra.mxu0 %v4153_v7  ;;  %v4887_v43 = vadd.f32 %v4886_v21, %v4486_v44  ;;  %v4128_v7 = vmax.f32 %v3850_v6, 0.0 }
 0x823   : > { %v5378_v33 = vpop.f32.mrf.mxu2  ;;  %v5876_v29 = vpop.f32.mrf.mxu3 }
 0x824   : > { %v5379_v15 = vadd.f32 %v10074_v54, %v5378_v33  ;;  %v5877_v63 = vadd.f32 %v9931_v51, %v5876_v29  ;;  %4933 = vmatmul.f32.gmra.mxu1 %v4122_v17  ;;  %v5096_v31 = vmax.f32 %v4887_v43, 0.0  ;;  %v11075_v33 = vld [vmem:[#allocation87_spill] sm:$0xff]  ;;  %v11079_v43 = vld [vmem:[#allocation58_spill] sm:$0xff] }
 0x825   : > { %v3500_v29 = vadd.f32 %v11075_v33, %v8793_v56 }
 0x826   : > { %v5626_v39 = vmax.f32 %v5379_v15, 0.0  ;;  %6158 = vst [vmem:[%s9626_s23 + $0x198] sm:$0xff] %v5877_v63 }
 0x827   : > { %v4161_v2 = vmax.f32 %v3500_v29, 0.0  ;;  %v11082_v29 = vld [vmem:[#allocation54_spill] sm:$0xff] }
 0x828   : > { %5428 = vmatmul.f32.gmra.mxu2 %v5094_v32  ;;  %5926 = vmatmul.f32.gmra.mxu3 %v5626_v39  ;;  %v4492_v32 = vadd.f32 %v10232_v25, %v10089_v57  ;;  %v4130_v39 = vmax.f32 %v3853_v35, 0.0  ;;  %v10244_v57 = vld [vmem:[%s10627_s9] ss:$0 sm:$0xff]  ;;  %v4501_v35 = vadd.f32 %v10232_v25, %v10127_v20  ;;  %v11084_v20 = vld [vmem:[#allocation56_spill] sm:$0xff] }
 0x829   : > { %v4889_v4 = vpop.f32.mrf.mxu1 }
 0x82a   : > { %4583 = vmatmul.f32.gmra.mxu0 %v4155_v50  ;;  %v4890_v21 = vadd.f32 %v4889_v4, %v4489_v47 }
 0x82b   : > { %v5381_v53 = vpop.f32.mrf.mxu2  ;;  %v5879_v16 = vpop.f32.mrf.mxu3 }
 0x82c   : > { %v5382_v10 = vadd.f32 %v10074_v54, %v5381_v53  ;;  %v5880_v22 = vadd.f32 %v9931_v51, %v5879_v16  ;;  %4936 = vmatmul.f32.gmra.mxu1 %v4124_v12  ;;  %v5097_v15 = vmax.f32 %v4890_v21, 0.0  ;;  %v11077_v12 = vld [vmem:[#allocation89_spill] sm:$0xff]  ;;  %v10238_v53 = vpop.f32.mrf.mxu0  ;;  %v11081_v21 = vld [vmem:[#allocation60_spill] sm:$0xff] }
 0x82d   : > { %v3503_v28 = vadd.f32 %v11077_v12, %v8793_v56 }
 0x82e   : > { %v5627_v34 = vmax.f32 %v5382_v10, 0.0  ;;  %6159 = vst [vmem:[%s9626_s23 + $0x1a0] sm:$0xff] %v5880_v22  ;;  %v3856_v10 = vadd.f32 %v11078_v1, %v9011_v14 }
 0x82f   : > { %v4163_v9 = vmax.f32 %v3503_v28, 0.0  ;;  %v3865_v28 = vadd.f32 %v11084_v20, %v9011_v14 }
 0x830   : > { %5431 = vmatmul.f32.gmra.mxu2 %v5095_v58  ;;  %5929 = vmatmul.f32.gmra.mxu3 %v5627_v34  ;;  %v4495_v58 = vadd.f32 %v10232_v25, %v10103_v37  ;;  %v3859_v37 = vadd.f32 %v11080_v59, %v9011_v14 }
 0x831   : > { %v4892_v60 = vpop.f32.mrf.mxu1 }
 0x832   : > { %4586 = vmatmul.f32.gmra.mxu0 %v4157_v40  ;;  %v4893_v50 = vadd.f32 %v4892_v60, %v4492_v32  ;;  %v4132_v40 = vmax.f32 %v3856_v10, 0.0  ;;  %v4504_v10 = vadd.f32 %v10232_v25, %v10142_v46 }
 0x833   : > { %v5384_v61 = vpop.f32.mrf.mxu2  ;;  %v5882_v24 = vpop.f32.mrf.mxu3 }
 0x834   : > { %v5385_v13 = vadd.f32 %v10074_v54, %v5384_v61  ;;  %v5883_v45 = vadd.f32 %v9931_v51, %v5882_v24  ;;  %4939 = vmatmul.f32.gmra.mxu1 %v4126_v49  ;;  %v5098_v22 = vmax.f32 %v4893_v50, 0.0  ;;  %v3506_v61 = vadd.f32 %v11079_v43, %v8793_v56  ;;  %v11083_v50 = vld [vmem:[#allocation62_spill] sm:$0xff] }
 0x836   : > { %v5628_v8 = vmax.f32 %v5385_v13, 0.0  ;;  %6160 = vst [vmem:[%s9626_s23 + $0x1a8] sm:$0xff] %v5883_v45  ;;  %v10258_v13 = vpop.f32.mrf.mxu0  ;;  %v4165_v6 = vmax.f32 %v3506_v61, 0.0  ;;  %v4507_v61 = vadd.f32 %v10232_v25, %v10156_v52  ;;  %v4510_v52 = vadd.f32 %v10232_v25, %v10167_v55 }
 0x837   : > { %v4513_v55 = vadd.f32 %v10232_v25, %v10180_v3  ;;  %v4516_v3 = vadd.f32 %v10232_v25, %v10195_v48  ;;  %v4519_v48 = vadd.f32 %v10232_v25, %v10209_v11  ;;  %v4522_v11 = vadd.f32 %v10232_v25, %v10220_v26 }
 0x838   : > { %5434 = vmatmul.f32.gmra.mxu2 %v5096_v31  ;;  %5932 = vmatmul.f32.gmra.mxu3 %v5628_v8  ;;  %v4498_v31 = vadd.f32 %v10232_v25, %v10114_v23  ;;  %v3862_v23 = vadd.f32 %v11082_v29, %v9011_v14  ;;  %v4525_v26 = vadd.f32 %v10232_v25, %v10238_v53 }
 0x839   : > { %v4895_v42 = vpop.f32.mrf.mxu1  ;;  %v4528_v53 = vadd.f32 %v10232_v25, %v10258_v13 }
 0x83a   : > { %4589 = vmatmul.f32.gmra.mxu0 %v4159_v41  ;;  %v4896_v44 = vadd.f32 %v4895_v42, %v4495_v58  ;;  %v4134_v41 = vmax.f32 %v3859_v37, 0.0 }
 0x83b   : > { %v5387_v17 = vpop.f32.mrf.mxu2  ;;  %v5885_v38 = vpop.f32.mrf.mxu3 }
 0x83c   : > { %v5388_v27 = vadd.f32 %v10074_v54, %v5387_v17  ;;  %v5886_v18 = vadd.f32 %v9931_v51, %v5885_v38  ;;  %4942 = vmatmul.f32.gmra.mxu1 %v4128_v7  ;;  %v5099_v45 = vmax.f32 %v4896_v44, 0.0  ;;  %v3509_v17 = vadd.f32 %v11081_v21, %v8793_v56 }
 0x83e   : > { %v5629_v63 = vmax.f32 %v5388_v27, 0.0  ;;  %6161 = vst [vmem:[%s9626_s23 + $0x1b0] sm:$0xff] %v5886_v18  ;;  %v4167_v19 = vmax.f32 %v3509_v17, 0.0 }
 0x840   : > { %5437 = vmatmul.f32.gmra.mxu2 %v5097_v15  ;;  %5935 = vmatmul.f32.gmra.mxu3 %v5629_v63  ;;  %v10272_v15 = vpop.f32.mrf.mxu0 }
 0x841   : > { %v4898_v51 = vpop.f32.mrf.mxu1  ;;  %v4531_v13 = vadd.f32 %v10232_v25, %v10272_v15 }
 0x842   : > { %4592 = vmatmul.f32.gmra.mxu0 %v4161_v2  ;;  %v4899_v47 = vadd.f32 %v4898_v51, %v4498_v31  ;;  %v4136_v2 = vmax.f32 %v3862_v23, 0.0  ;;  %v11086_v31 = vld [vmem:[#allocation93_spill] sm:$0xff]  ;;  %v11087_v23 = vld [vmem:[#allocation95_spill] sm:$0xff] }
 0x843   : > { %v5390_v0 = vpop.f32.mrf.mxu2  ;;  %v5888_v4 = vpop.f32.mrf.mxu3 }
 0x844   : > { %v5391_v16 = vadd.f32 %v10074_v54, %v5390_v0  ;;  %v5889_v62 = vadd.f32 %v10244_v57, %v5888_v4  ;;  %4945 = vmatmul.f32.gmra.mxu1 %v4130_v39  ;;  %v5100_v27 = vmax.f32 %v4899_v47, 0.0  ;;  %v3512_v0 = vadd.f32 %v11083_v50, %v8793_v56 }
 0x845   : > { %v4138_v56 = vmax.f32 %v3865_v28, 0.0 }
 0x846   : > { %v5630_v5 = vmax.f32 %v5391_v16, 0.0  ;;  %6162 = vst [vmem:[%s9626_s23 + $0x1b8] sm:$0xff] %v5889_v62  ;;  %v4169_v1 = vmax.f32 %v3512_v0, 0.0  ;;  %v11088_v0 = vld [vmem:[#allocation64_spill] sm:$0xff] }
 0x848   : > { %5440 = vmatmul.f32.gmra.mxu2 %v5098_v22  ;;  %5938 = vmatmul.f32.gmra.mxu3 %v5630_v5  ;;  %v10283_v5 = vpop.f32.mrf.mxu0 }
 0x849   : > { %v4901_v34 = vpop.f32.mrf.mxu1  ;;  %v4534_v15 = vadd.f32 %v10232_v25, %v10283_v5 }
 0x84a   : > { %4595 = vmatmul.f32.gmra.mxu0 %v4163_v9  ;;  %v4902_v32 = vadd.f32 %v4901_v34, %v4501_v35 }
 0x84b   : > { %v5393_v60 = vpop.f32.mrf.mxu2  ;;  %v5891_v49 = vpop.f32.mrf.mxu3 }
 0x84c   : > { %v5394_v24 = vadd.f32 %v10074_v54, %v5393_v60  ;;  %v5892_v36 = vadd.f32 %v10244_v57, %v5891_v49  ;;  %4948 = vmatmul.f32.gmra.mxu1 %v4132_v40  ;;  %v5101_v16 = vmax.f32 %v4902_v32, 0.0  ;;  %v11085_v60 = vld [vmem:[#allocation91_spill] sm:$0xff] }
 0x84d   : > { %v3868_v49 = vadd.f32 %v11085_v60, %v9011_v14 }
 0x84e   : > { %v5631_v30 = vmax.f32 %v5394_v24, 0.0  ;;  %6163 = vst [vmem:[%s9626_s23 + $0x1c0] sm:$0xff] %v5892_v36 }
 0x84f   : > { %v4140_v36 = vmax.f32 %v3868_v49, 0.0 }
 0x850   : > { %5443 = vmatmul.f32.gmra.mxu2 %v5099_v45  ;;  %5941 = vmatmul.f32.gmra.mxu3 %v5631_v30 }
 0x851   : > { %v4904_v8 = vpop.f32.mrf.mxu1 }
 0x852   : > { %4598 = vmatmul.f32.gmra.mxu0 %v4165_v6  ;;  %v4905_v9 = vadd.f32 %v4904_v8, %v4504_v10  ;;  %v3871_v8 = vadd.f32 %v11086_v31, %v9011_v14 }
 0x853   : > { %v5396_v42 = vpop.f32.mrf.mxu2  ;;  %v5894_v7 = vpop.f32.mrf.mxu3 }
 0x854   : > { %v5397_v38 = vadd.f32 %v10074_v54, %v5396_v42  ;;  %v5895_v33 = vadd.f32 %v10244_v57, %v5894_v7  ;;  %4951 = vmatmul.f32.gmra.mxu1 %v4134_v41  ;;  %v5102_v46 = vmax.f32 %v4905_v9, 0.0  ;;  %v4142_v7 = vmax.f32 %v3871_v8, 0.0  ;;  %v11089_v9 = vld [vmem:[#allocation97_spill] sm:$0xff] }
 0x856   : > { %v5632_v18 = vmax.f32 %v5397_v38, 0.0  ;;  %6164 = vst [vmem:[%s9626_s23 + $0x1c8] sm:$0xff] %v5895_v33 }
 0x858   : > { %5446 = vmatmul.f32.gmra.mxu2 %v5100_v27  ;;  %5944 = vmatmul.f32.gmra.mxu3 %v5632_v18  ;;  %v3874_v27 = vadd.f32 %v11087_v23, %v9011_v14 }
 0x859   : > { %v4907_v63 = vpop.f32.mrf.mxu1 }
 0x85a   : > { %4601 = vmatmul.f32.gmra.mxu0 %v4167_v19  ;;  %v4908_v59 = vadd.f32 %v4907_v63, %v4507_v61  ;;  %v4144_v63 = vmax.f32 %v3874_v27, 0.0 }
 0x85b   : > { %v5399_v51 = vpop.f32.mrf.mxu2  ;;  %v5897_v39 = vpop.f32.mrf.mxu3 }
 0x85c   : > { %v5400_v4 = vadd.f32 %v10074_v54, %v5399_v51  ;;  %v5898_v12 = vadd.f32 %v10244_v57, %v5897_v39  ;;  %4954 = vmatmul.f32.gmra.mxu1 %v4136_v2  ;;  %v5103_v41 = vmax.f32 %v4908_v59, 0.0  ;;  %v11090_v59 = vld [vmem:[#allocation66_spill] sm:$0xff] }
 0x85e   : > { %v5633_v62 = vmax.f32 %v5400_v4, 0.0  ;;  %6165 = vst [vmem:[%s9626_s23 + $0x1d0] sm:$0xff] %v5898_v12  ;;  %v3877_v4 = vadd.f32 %v11088_v0, %v9011_v14 }
 0x860   : > { %5449 = vmatmul.f32.gmra.mxu2 %v5101_v16  ;;  %5947 = vmatmul.f32.gmra.mxu3 %v5633_v62  ;;  %v4146_v16 = vmax.f32 %v3877_v4, 0.0 }
 0x861   : > { %v4910_v22 = vpop.f32.mrf.mxu1 }
 0x862   : > { %4604 = vmatmul.f32.gmra.mxu0 %v4169_v1  ;;  %v4911_v21 = vadd.f32 %v4910_v22, %v4510_v52 }
 0x863   : > { %v5402_v58 = vpop.f32.mrf.mxu2  ;;  %v5900_v34 = vpop.f32.mrf.mxu3 }
 0x864   : > { %v5403_v40 = vadd.f32 %v10074_v54, %v5402_v58  ;;  %v5901_v44 = vadd.f32 %v10244_v57, %v5900_v34  ;;  %4957 = vmatmul.f32.gmra.mxu1 %v4138_v56  ;;  %v5104_v18 = vmax.f32 %v4911_v21, 0.0  ;;  %v3880_v58 = vadd.f32 %v11089_v9, %v9011_v14  ;;  %v10317_v34 = vpop.f32.mrf.mxu0  ;;  %v11091_v21 = vld [vmem:[#allocation99_spill] sm:$0xff] }
 0x865   : > { %v4537_v5 = vadd.f32 %v10232_v25, %v10317_v34  ;;  %v11096_v34 = vld [vmem:[#allocation72_spill] sm:$0xff] }
 0x866   : > { %v5634_v43 = vmax.f32 %v5403_v40, 0.0  ;;  %6166 = vst [vmem:[%s9626_s23 + $0x1d8] sm:$0xff] %v5901_v44  ;;  %v4148_v49 = vmax.f32 %v3880_v58, 0.0 }
 0x868   : > { %5452 = vmatmul.f32.gmra.mxu2 %v5102_v46  ;;  %5950 = vmatmul.f32.gmra.mxu3 %v5634_v43 }
 0x869   : > { %v4913_v24 = vpop.f32.mrf.mxu1 }
 0x86a   : > { %v4914_v2 = vadd.f32 %v4913_v24, %v4513_v55 }
 0x86b   : > { %v5405_v37 = vpop.f32.mrf.mxu2  ;;  %v5903_v45 = vpop.f32.mrf.mxu3 }
 0x86c   : > { %v5406_v30 = vadd.f32 %v10074_v54, %v5405_v37  ;;  %v5904_v6 = vadd.f32 %v10244_v57, %v5903_v45  ;;  %4960 = vmatmul.f32.gmra.mxu1 %v4140_v36  ;;  %v5105_v12 = vmax.f32 %v4914_v2, 0.0  ;;  %v3883_v37 = vadd.f32 %v11090_v59, %v9011_v14  ;;  %v11092_v2 = vld [vmem:[#allocation68_spill] sm:$0xff] }
 0x86e   : > { %v5635_v47 = vmax.f32 %v5406_v30, 0.0  ;;  %6167 = vst [vmem:[%s9626_s23 + $0x1e0] sm:$0xff] %v5904_v6  ;;  %v10329_v6 = vpop.f32.mrf.mxu0  ;;  %v4150_v8 = vmax.f32 %v3883_v37, 0.0 }
 0x870   : > { %5455 = vmatmul.f32.gmra.mxu2 %v5103_v41  ;;  %5953 = vmatmul.f32.gmra.mxu3 %v5635_v47 }
 0x871   : > { %v4916_v42 = vpop.f32.mrf.mxu1 }
 0x872   : > { %v4917_v62 = vadd.f32 %v4916_v42, %v4516_v3 }
 0x873   : > { %v5408_v17 = vpop.f32.mrf.mxu2  ;;  %v5906_v38 = vpop.f32.mrf.mxu3 }
 0x874   : > { %v5409_v33 = vadd.f32 %v10074_v54, %v5408_v17  ;;  %v5907_v29 = vadd.f32 %v10244_v57, %v5906_v38  ;;  %4963 = vmatmul.f32.gmra.mxu1 %v4142_v7  ;;  %v5106_v40 = vmax.f32 %v4917_v62, 0.0  ;;  %v3886_v17 = vadd.f32 %v11091_v21, %v9011_v14  ;;  %v11093_v62 = vld [vmem:[#allocation101_spill] sm:$0xff] }
 0x876   : > { %v5636_v19 = vmax.f32 %v5409_v33, 0.0  ;;  %6168 = vst [vmem:[%s9626_s23 + $0x1e8] sm:$0xff] %v5907_v29  ;;  %v4152_v23 = vmax.f32 %v3886_v17, 0.0  ;;  %v10338_v27 = vpop.f32.mrf.mxu0 }
 0x878   : > { %5458 = vmatmul.f32.gmra.mxu2 %v5104_v18  ;;  %5956 = vmatmul.f32.gmra.mxu3 %v5636_v19 }
 0x879   : > { %v4919_v35 = vpop.f32.mrf.mxu1 }
 0x87a   : > { %v4920_v46 = vadd.f32 %v4919_v35, %v4519_v48 }
 0x87b   : > { %v5411_v32 = vpop.f32.mrf.mxu2  ;;  %v5909_v51 = vpop.f32.mrf.mxu3 }
 0x87c   : > { %v5412_v39 = vadd.f32 %v10074_v54, %v5411_v32  ;;  %v5910_v50 = vadd.f32 %v10244_v57, %v5909_v51  ;;  %4966 = vmatmul.f32.gmra.mxu1 %v4144_v63  ;;  %v5107_v45 = vmax.f32 %v4920_v46, 0.0  ;;  %v3889_v32 = vadd.f32 %v11092_v2, %v9011_v14 }
 0x87e   : > { %v5637_v20 = vmax.f32 %v5412_v39, 0.0  ;;  %6169 = vst [vmem:[%s9626_s23 + $0x1f0] sm:$0xff] %v5910_v50  ;;  %v4154_v0 = vmax.f32 %v3889_v32, 0.0  ;;  %v10347_v3 = vpop.f32.mrf.mxu0 }
 0x880   : > { %5461 = vmatmul.f32.gmra.mxu2 %v5105_v12  ;;  %5959 = vmatmul.f32.gmra.mxu3 %v5637_v20 }
 0x881   : > { %v4922_v28 = vpop.f32.mrf.mxu1 }
 0x882   : > { %v4923_v41 = vadd.f32 %v4922_v28, %v4522_v11 }
 0x883   : > { %v5414_v1 = vpop.f32.mrf.mxu2  ;;  %v5912_v10 = vpop.f32.mrf.mxu3 }
 0x884   : > { %v5415_v22 = vadd.f32 %v10074_v54, %v5414_v1  ;;  %v5913_v56 = vadd.f32 %v10244_v57, %v5912_v10  ;;  %4969 = vmatmul.f32.gmra.mxu1 %v4146_v16  ;;  %v5108_v38 = vmax.f32 %v4923_v41, 0.0  ;;  %v3892_v1 = vadd.f32 %v11093_v62, %v9011_v14 }
 0x886   : > { %v5638_v44 = vmax.f32 %v5415_v22, 0.0  ;;  %6170 = vst [vmem:[%s9626_s23 + $0x1f8] sm:$0xff] %v5913_v56  ;;  %v4156_v9 = vmax.f32 %v3892_v1, 0.0 }
 0x888   : > { %5464 = vmatmul.f32.gmra.mxu2 %v5106_v40  ;;  %5962 = vmatmul.f32.gmra.mxu3 %v5638_v44 }
 0x889   : > { %v4925_v60 = vpop.f32.mrf.mxu1 }
 0x88a   : > { %v4926_v18 = vadd.f32 %v4925_v60, %v4525_v26 }
 0x88b   : > { %v5417_v43 = vpop.f32.mrf.mxu2  ;;  %v5915_v61 = vpop.f32.mrf.mxu3 }
 0x88c   : > { %v5418_v24 = vadd.f32 %v10074_v54, %v5417_v43  ;;  %v5916_v36 = vadd.f32 %v10244_v57, %v5915_v61  ;;  %4972 = vmatmul.f32.gmra.mxu1 %v4148_v49  ;;  %v5109_v51 = vmax.f32 %v4926_v18, 0.0  ;;  %v11094_v49 = vld [vmem:[#allocation70_spill] sm:$0xff]  ;;  %v10360_v43 = vpop.f32.mrf.mxu0 }
 0x88d   : > { %v3895_v46 = vadd.f32 %v11094_v49, %v9011_v14 }
 0x88e   : > { %v5639_v30 = vmax.f32 %v5418_v24, 0.0  ;;  %6171 = vst [vmem:[%s9626_s23 + $0x200] sm:$0xff] %v5916_v36 }
 0x88f   : > { %v4158_v59 = vmax.f32 %v3895_v46, 0.0 }
 0x890   : > { %5467 = vmatmul.f32.gmra.mxu2 %v5107_v45  ;;  %5965 = vmatmul.f32.gmra.mxu3 %v5639_v30 }
 0x891   : > { %v4928_v31 = vpop.f32.mrf.mxu1 }
 0x892   : > { %v4929_v4 = vadd.f32 %v4928_v31, %v4528_v53 }
 0x893   : > { %v5420_v47 = vpop.f32.mrf.mxu2  ;;  %v5918_v52 = vpop.f32.mrf.mxu3 }
 0x894   : > { %v5421_v42 = vadd.f32 %v10074_v54, %v5420_v47  ;;  %v5919_v7 = vadd.f32 %v10244_v57, %v5918_v52  ;;  %4975 = vmatmul.f32.gmra.mxu1 %v4150_v8  ;;  %v5110_v10 = vmax.f32 %v4929_v4, 0.0  ;;  %v11095_v8 = vld [vmem:[#allocation103_spill] sm:$0xff] }
 0x895   : > { %v3898_v41 = vadd.f32 %v11095_v8, %v9011_v14 }
 0x896   : > { %v5640_v33 = vmax.f32 %v5421_v42, 0.0  ;;  %6172 = vst [vmem:[%s9626_s23 + $0x208] sm:$0xff] %v5919_v7  ;;  %v10372_v42 = vpop.f32.mrf.mxu0 }
 0x897   : > { %v4160_v21 = vmax.f32 %v3898_v41, 0.0 }
 0x898   : > { %5470 = vmatmul.f32.gmra.mxu2 %v5108_v38  ;;  %5968 = vmatmul.f32.gmra.mxu3 %v5640_v33  ;;  %v10377_v33 = vld [vmem:[%s10625_s7] ss:$0 sm:$0xff] }
 0x899   : > { %v4931_v29 = vpop.f32.mrf.mxu1 }
 0x89a   : > { %v4932_v58 = vadd.f32 %v4931_v29, %v4531_v13 }
 0x89b   : > { %v5423_v19 = vpop.f32.mrf.mxu2  ;;  %v5921_v55 = vpop.f32.mrf.mxu3 }
 0x89c   : > { %v5424_v35 = vadd.f32 %v10074_v54, %v5423_v19  ;;  %v5922_v63 = vadd.f32 %v10244_v57, %v5921_v55  ;;  %4978 = vmatmul.f32.gmra.mxu1 %v4152_v23  ;;  %v5111_v61 = vmax.f32 %v4932_v58, 0.0  ;;  %v3901_v23 = vadd.f32 %v11096_v34, %v9011_v14 }
 0x89d   : > { %v4540_v55 = vadd.f32 %v10232_v25, %v10329_v6  ;;  %v4543_v6 = vadd.f32 %v10232_v25, %v10338_v27  ;;  %v4546_v27 = vadd.f32 %v10232_v25, %v10347_v3  ;;  %v4549_v3 = vadd.f32 %v10232_v25, %v10360_v43 }
 0x89e   : > { %v5641_v39 = vmax.f32 %v5424_v35, 0.0  ;;  %6173 = vst [vmem:[%s9626_s23 + $0x210] sm:$0xff] %v5922_v63  ;;  %v4162_v63 = vmax.f32 %v3901_v23, 0.0  ;;  %v10386_v2 = vpop.f32.mrf.mxu0  ;;  %v4552_v43 = vadd.f32 %v10232_v25, %v10372_v42 }
 0x89f   : > { %v4555_v42 = vadd.f32 %v10232_v25, %v10386_v2 }
 0x8a0   : > { %5473 = vmatmul.f32.gmra.mxu2 %v5109_v51  ;;  %5971 = vmatmul.f32.gmra.mxu3 %v5641_v39 }
 0x8a1   : > { %v4934_v50 = vpop.f32.mrf.mxu1 }
 0x8a2   : > { %v4935_v37 = vadd.f32 %v4934_v50, %v4534_v15 }
 0x8a3   : > { %v5426_v12 = vpop.f32.mrf.mxu2  ;;  %v5924_v20 = vpop.f32.mrf.mxu3 }
 0x8a4   : > { %v5427_v28 = vadd.f32 %v10074_v54, %v5426_v12  ;;  %v5925_v16 = vadd.f32 %v10244_v57, %v5924_v20  ;;  %4981 = vmatmul.f32.gmra.mxu1 %v4154_v0  ;;  %v5112_v47 = vmax.f32 %v4935_v37, 0.0  ;;  %v11097_v0 = vld [vmem:[#allocation105_spill] sm:$0xff] }
 0x8a5   : > { %v3904_v4 = vadd.f32 %v11097_v0, %v9011_v14 }
 0x8a6   : > { %v5642_v22 = vmax.f32 %v5427_v28, 0.0  ;;  %6174 = vst [vmem:[%s9626_s23 + $0x218] sm:$0xff] %v5925_v16 }
 0x8a7   : > { %v4164_v16 = vmax.f32 %v3904_v4, 0.0 }
 0x8a8   : > { %5476 = vmatmul.f32.gmra.mxu2 %v5110_v10  ;;  %5974 = vmatmul.f32.gmra.mxu3 %v5642_v22  ;;  %v10395_v22 = vpop.f32.mrf.mxu0 }
 0x8a9   : > { %v4937_v56 = vpop.f32.mrf.mxu1 }
 0x8ab   : > { %v5429_v40 = vpop.f32.mrf.mxu2  ;;  %v5927_v44 = vpop.f32.mrf.mxu3 }
 0x8ac   : > { %v5430_v48 = vadd.f32 %v10074_v54, %v5429_v40  ;;  %v5928_v60 = vadd.f32 %v10244_v57, %v5927_v44  ;;  %4984 = vmatmul.f32.gmra.mxu1 %v4156_v9  ;;  %v11098_v9 = vld [vmem:[#allocation74_spill] sm:$0xff] }
 0x8ad   : > { %v3907_v58 = vadd.f32 %v11098_v9, %v9011_v14 }
 0x8ae   : > { %v5643_v24 = vmax.f32 %v5430_v48, 0.0  ;;  %6175 = vst [vmem:[%s9626_s23 + $0x220] sm:$0xff] %v5928_v60 }
 0x8af   : > { %v4166_v60 = vmax.f32 %v3907_v58, 0.0 }
 0x8b0   : > { %5479 = vmatmul.f32.gmra.mxu2 %v5111_v61  ;;  %5977 = vmatmul.f32.gmra.mxu3 %v5643_v24  ;;  %v4560_v37 = vpop.f32.mrf.mxu0 }
 0x8b1   : > { %v4940_v36 = vpop.f32.mrf.mxu1  ;;  %v4561_v9 = vadd.f32 %v10232_v25, %v4560_v37 }
 0x8b2   : > { %v4941_v32 = vadd.f32 %v4940_v36, %v4540_v55  ;;  %v11099_v36 = vld [vmem:[#allocation107_spill] sm:$0xff] }
 0x8b3   : > { %v5432_v45 = vpop.f32.mrf.mxu2  ;;  %v5930_v30 = vpop.f32.mrf.mxu3 }
 0x8b4   : > { %v5433_v11 = vadd.f32 %v10074_v54, %v5432_v45  ;;  %v5931_v31 = vadd.f32 %v10244_v57, %v5930_v30  ;;  %4987 = vmatmul.f32.gmra.mxu1 %v4158_v59  ;;  %v4938_v54 = vadd.f32 %v4937_v56, %v4537_v5  ;;  %v5114_v12 = vmax.f32 %v4941_v32, 0.0 }
 0x8b5   : > { %v3910_v59 = vadd.f32 %v11099_v36, %v9011_v14 }
 0x8b6   : > { %v5644_v52 = vmax.f32 %v5433_v11, 0.0  ;;  %6176 = vst [vmem:[%s9626_s23 + $0x228] sm:$0xff] %v5931_v31  ;;  %v5113_v18 = vmax.f32 %v4938_v54, 0.0 }
 0x8b7   : > { %v4168_v31 = vmax.f32 %v3910_v59, 0.0 }
 0x8b8   : > { %5482 = vmatmul.f32.gmra.mxu2 %v5112_v47  ;;  %5980 = vmatmul.f32.gmra.mxu3 %v5644_v52 }
 0x8b9   : > { %v4943_v7 = vpop.f32.mrf.mxu1 }
 0x8ba   : > { %v4944_v62 = vadd.f32 %v4943_v7, %v4543_v6  ;;  %v11100_v7 = vld [vmem:[#allocation76_spill] sm:$0xff] }
 0x8bb   : > { %v5435_v17 = vpop.f32.mrf.mxu2  ;;  %v5933_v38 = vpop.f32.mrf.mxu3 }
 0x8bc   : > { %v5436_v26 = vadd.f32 %v10377_v33, %v5435_v17  ;;  %v5934_v29 = vadd.f32 %v10244_v57, %v5933_v38  ;;  %4990 = vmatmul.f32.gmra.mxu1 %v4160_v21  ;;  %v5115_v40 = vmax.f32 %v4944_v62, 0.0  ;;  %v3913_v21 = vadd.f32 %v11100_v7, %v9011_v14  ;;  %v4563_v38 = vpop.f32.mrf.mxu0 }
 0x8be   : > { %v5645_v19 = vmax.f32 %v5436_v26, 0.0  ;;  %6177 = vst [vmem:[%s9626_s23 + $0x230] sm:$0xff] %v5934_v29  ;;  %v4170_v29 = vmax.f32 %v3913_v21, 0.0 }
 0x8c0   : > { %5485 = vmatmul.f32.gmra.mxu2 %v5113_v18  ;;  %5983 = vmatmul.f32.gmra.mxu3 %v5645_v19 }
 0x8c1   : > { %v4946_v35 = vpop.f32.mrf.mxu1 }
 0x8c2   : > { %v4947_v49 = vadd.f32 %v4946_v35, %v4546_v27 }
 0x8c3   : > { %v5438_v51 = vpop.f32.mrf.mxu2  ;;  %v5936_v39 = vpop.f32.mrf.mxu3 }
 0x8c4   : > { %v5439_v53 = vadd.f32 %v10377_v33, %v5438_v51  ;;  %v5937_v50 = vadd.f32 %v10244_v57, %v5936_v39  ;;  %4993 = vmatmul.f32.gmra.mxu1 %v4162_v63  ;;  %v5116_v45 = vmax.f32 %v4947_v49, 0.0  ;;  %v4566_v32 = vpop.f32.mrf.mxu0 }
 0x8c6   : > { %v5646_v20 = vmax.f32 %v5439_v53, 0.0  ;;  %6178 = vst [vmem:[%s9626_s23 + $0x238] sm:$0xff] %v5937_v50 }
 0x8c8   : > { %5488 = vmatmul.f32.gmra.mxu2 %v5114_v12  ;;  %5986 = vmatmul.f32.gmra.mxu3 %v5646_v20  ;;  %v4558_v20 = vadd.f32 %v10232_v25, %v10395_v22 }
 0x8c9   : > { %v4949_v28 = vpop.f32.mrf.mxu1 }
 0x8ca   : > { %v4950_v8 = vadd.f32 %v4949_v28, %v4549_v3 }
 0x8cb   : > { %v5441_v1 = vpop.f32.mrf.mxu2  ;;  %v5939_v10 = vpop.f32.mrf.mxu3 }
 0x8cc   : > { %v5442_v13 = vadd.f32 %v10377_v33, %v5441_v1  ;;  %v5940_v56 = vadd.f32 %v10244_v57, %v5939_v10  ;;  %4996 = vmatmul.f32.gmra.mxu1 %v4164_v16  ;;  %v5117_v54 = vmax.f32 %v4950_v8, 0.0  ;;  %v4569_v62 = vpop.f32.mrf.mxu0 }
 0x8ce   : > { %v5647_v44 = vmax.f32 %v5442_v13, 0.0  ;;  %6179 = vst [vmem:[%s9626_s23 + $0x240] sm:$0xff] %v5940_v56 }
 0x8d0   : > { %5491 = vmatmul.f32.gmra.mxu2 %v5115_v40  ;;  %5989 = vmatmul.f32.gmra.mxu3 %v5647_v44 }
 0x8d1   : > { %v4952_v48 = vpop.f32.mrf.mxu1 }
 0x8d2   : > { %v4953_v34 = vadd.f32 %v4952_v48, %v4552_v43 }
 0x8d3   : > { %v5444_v46 = vpop.f32.mrf.mxu2  ;;  %v5942_v61 = vpop.f32.mrf.mxu3 }
 0x8d4   : > { %v5445_v24 = vadd.f32 %v10377_v33, %v5444_v46  ;;  %v5943_v15 = vadd.f32 %v10244_v57, %v5942_v61  ;;  %4999 = vmatmul.f32.gmra.mxu1 %v4166_v60  ;;  %v5118_v14 = vmax.f32 %v4953_v34, 0.0  ;;  %v4572_v60 = vpop.f32.mrf.mxu0  ;;  %v4564_v61 = vadd.f32 %v10232_v25, %v4563_v38 }
 0x8d6   : > { %v5648_v30 = vmax.f32 %v5445_v24, 0.0  ;;  %6180 = vst [vmem:[%s9626_s23 + $0x248] sm:$0xff] %v5943_v15 }
 0x8d8   : > { %5494 = vmatmul.f32.gmra.mxu2 %v5116_v45  ;;  %5992 = vmatmul.f32.gmra.mxu3 %v5648_v30 }
 0x8d9   : > { %v4955_v11 = vpop.f32.mrf.mxu1 }
 0x8da   : > { %v4956_v51 = vadd.f32 %v4955_v11, %v4555_v42  ;;  %v4567_v11 = vadd.f32 %v10232_v25, %v4566_v32 }
 0x8db   : > { %v5447_v41 = vpop.f32.mrf.mxu2  ;;  %v5945_v47 = vpop.f32.mrf.mxu3 }
 0x8dc   : > { %v5448_v52 = vadd.f32 %v10377_v33, %v5447_v41  ;;  %v5946_v5 = vadd.f32 %v10244_v57, %v5945_v47  ;;  %5002 = vmatmul.f32.gmra.mxu1 %v4168_v31  ;;  %v5119_v4 = vmax.f32 %v4956_v51, 0.0  ;;  %v4575_v31 = vpop.f32.mrf.mxu0 }
 0x8de   : > { %v5649_v17 = vmax.f32 %v5448_v52, 0.0  ;;  %6181 = vst [vmem:[%s9626_s23 + $0x250] sm:$0xff] %v5946_v5 }
 0x8e0   : > { %5497 = vmatmul.f32.gmra.mxu2 %v5117_v54  ;;  %5995 = vmatmul.f32.gmra.mxu3 %v5649_v17  ;;  %v4570_v17 = vadd.f32 %v10232_v25, %v4569_v62 }
 0x8e1   : > { %v4958_v26 = vpop.f32.mrf.mxu1 }
 0x8e2   : > { %v4959_v6 = vadd.f32 %v4958_v26, %v4558_v20 }
 0x8e3   : > { %v5450_v23 = vpop.f32.mrf.mxu2  ;;  %v5948_v18 = vpop.f32.mrf.mxu3 }
 0x8e4   : > { %v5451_v19 = vadd.f32 %v10377_v33, %v5450_v23  ;;  %v5949_v55 = vadd.f32 %v10244_v57, %v5948_v18  ;;  %5005 = vmatmul.f32.gmra.mxu1 %v4170_v29  ;;  %v5120_v13 = vmax.f32 %v4959_v6, 0.0  ;;  %v4578_v38 = vpop.f32.mrf.mxu0 }
 0x8e6   : > { %v5650_v35 = vmax.f32 %v5451_v19, 0.0  ;;  %6182 = vst [vmem:[%s9626_s23 + $0x258] sm:$0xff] %v5949_v55 }
 0x8e8   : > { %5500 = vmatmul.f32.gmra.mxu2 %v5118_v14  ;;  %5998 = vmatmul.f32.gmra.mxu3 %v5650_v35  ;;  %v4573_v14 = vadd.f32 %v10232_v25, %v4572_v60 }
 0x8e9   : > { %v4961_v63 = vpop.f32.mrf.mxu1 }
 0x8ea   : > { %v4962_v58 = vadd.f32 %v4961_v63, %v4561_v9 }
 0x8eb   : > { %v5453_v39 = vpop.f32.mrf.mxu2  ;;  %v5951_v53 = vpop.f32.mrf.mxu3 }
 0x8ec   : > { %v5454_v50 = vadd.f32 %v10377_v33, %v5453_v39  ;;  %v5952_v0 = vadd.f32 %v10244_v57, %v5951_v53  ;;  %v5121_v49 = vmax.f32 %v4962_v58, 0.0  ;;  %v4581_v51 = vpop.f32.mrf.mxu0 }
 0x8ed   : > { %v4582_v60 = vadd.f32 %v10232_v25, %v4581_v51 }
 0x8ee   : > { %v5651_v12 = vmax.f32 %v5454_v50, 0.0  ;;  %6183 = vst [vmem:[%s9626_s23 + $0x260] sm:$0xff] %v5952_v0 }
 0x8f0   : > { %5503 = vmatmul.f32.gmra.mxu2 %v5119_v4  ;;  %6001 = vmatmul.f32.gmra.mxu3 %v5651_v12  ;;  %v4576_v4 = vadd.f32 %v10232_v25, %v4575_v31 }
 0x8f1   : > { %v4964_v2 = vpop.f32.mrf.mxu1 }
 0x8f2   : > { %v4965_v15 = vadd.f32 %v4964_v2, %v4564_v61 }
 0x8f3   : > { %v5456_v28 = vpop.f32.mrf.mxu2  ;;  %v5954_v16 = vpop.f32.mrf.mxu3 }
 0x8f4   : > { %v5457_v1 = vadd.f32 %v10377_v33, %v5456_v28  ;;  %v5955_v10 = vadd.f32 %v10244_v57, %v5954_v16  ;;  %v5122_v30 = vmax.f32 %v4965_v15, 0.0  ;;  %v4584_v62 = vpop.f32.mrf.mxu0 }
 0x8f6   : > { %v5652_v56 = vmax.f32 %v5457_v1, 0.0  ;;  %6184 = vst [vmem:[%s9626_s23 + $0x268] sm:$0xff] %v5955_v10 }
 0x8f8   : > { %5506 = vmatmul.f32.gmra.mxu2 %v5120_v13  ;;  %6004 = vmatmul.f32.gmra.mxu3 %v5652_v56  ;;  %v4579_v13 = vadd.f32 %v10232_v25, %v4578_v38 }
 0x8f9   : > { %v4967_v22 = vpop.f32.mrf.mxu1 }
 0x8fa   : > { %v4968_v41 = vadd.f32 %v4967_v22, %v4567_v11 }
 0x8fb   : > { %v5459_v40 = vpop.f32.mrf.mxu2  ;;  %v5957_v44 = vpop.f32.mrf.mxu3 }
 0x8fc   : > { %v5460_v27 = vadd.f32 %v10377_v33, %v5459_v40  ;;  %v5958_v48 = vadd.f32 %v10244_v57, %v5957_v44  ;;  %v5123_v21 = vmax.f32 %v4968_v41, 0.0 }
 0x8fe   : > { %v5653_v46 = vmax.f32 %v5460_v27, 0.0  ;;  %6185 = vst [vmem:[%s9626_s23 + $0x270] sm:$0xff] %v5958_v48 }
 0x900   : > { %5509 = vmatmul.f32.gmra.mxu2 %v5121_v49  ;;  %6007 = vmatmul.f32.gmra.mxu3 %v5653_v46  ;;  %v4587_v49 = vpop.f32.mrf.mxu0 }
 0x901   : > { %v4970_v24 = vpop.f32.mrf.mxu1 }
 0x902   : > { %v4971_v26 = vadd.f32 %v4970_v24, %v4570_v17 }
 0x903   : > { %v5462_v36 = vpop.f32.mrf.mxu2  ;;  %v5960_v59 = vpop.f32.mrf.mxu3 }
 0x904   : > { %v5463_v37 = vadd.f32 %v10377_v33, %v5462_v36  ;;  %v5961_v45 = vadd.f32 %v10244_v57, %v5960_v59  ;;  %v5124_v19 = vmax.f32 %v4971_v26, 0.0 }
 0x906   : > { %v5654_v3 = vmax.f32 %v5463_v37, 0.0  ;;  %6186 = vst [vmem:[%s9626_s23 + $0x278] sm:$0xff] %v5961_v45 }
 0x908   : > { %5512 = vmatmul.f32.gmra.mxu2 %v5122_v30  ;;  %6010 = vmatmul.f32.gmra.mxu3 %v5654_v3  ;;  %v4585_v30 = vadd.f32 %v10232_v25, %v4584_v62  ;;  %v4590_v3 = vpop.f32.mrf.mxu0 }
 0x909   : > { %v4973_v8 = vpop.f32.mrf.mxu1 }
 0x90a   : > { %v4974_v42 = vadd.f32 %v4973_v8, %v4573_v14 }
 0x90b   : > { %v5465_v47 = vpop.f32.mrf.mxu2  ;;  %v5963_v52 = vpop.f32.mrf.mxu3 }
 0x90c   : > { %v5466_v5 = vadd.f32 %v10377_v33, %v5465_v47  ;;  %v5964_v7 = vadd.f32 %v10244_v57, %v5963_v52  ;;  %v5125_v50 = vmax.f32 %v4974_v42, 0.0 }
 0x90e   : > { %v5655_v54 = vmax.f32 %v5466_v5, 0.0  ;;  %6187 = vst [vmem:[%s9626_s23 + $0x280] sm:$0xff] %v5964_v7 }
 0x910   : > { %5515 = vmatmul.f32.gmra.mxu2 %v5123_v21  ;;  %6013 = vmatmul.f32.gmra.mxu3 %v5655_v54  ;;  %v4588_v21 = vadd.f32 %v10232_v25, %v4587_v49  ;;  %v4593_v38 = vpop.f32.mrf.mxu0 }
 0x911   : > { %v4976_v43 = vpop.f32.mrf.mxu1 }
 0x912   : > { %v4977_v20 = vadd.f32 %v4976_v43, %v4576_v4 }
 0x913   : > { %v5468_v29 = vpop.f32.mrf.mxu2  ;;  %v5966_v34 = vpop.f32.mrf.mxu3 }
 0x914   : > { %v5469_v23 = vadd.f32 %v10377_v33, %v5468_v29  ;;  %v5967_v18 = vadd.f32 %v10244_v57, %v5966_v34  ;;  %v5126_v1 = vmax.f32 %v4977_v20, 0.0 }
 0x916   : > { %v5656_v55 = vmax.f32 %v5469_v23, 0.0  ;;  %6188 = vst [vmem:[%s9626_s23 + $0x288] sm:$0xff] %v5967_v18 }
 0x918   : > { %5518 = vmatmul.f32.gmra.mxu2 %v5124_v19  ;;  %6016 = vmatmul.f32.gmra.mxu3 %v5656_v55  ;;  %v4591_v19 = vadd.f32 %v10232_v25, %v4590_v3 }
 0x919   : > { %v4979_v35 = vpop.f32.mrf.mxu1 }
 0x91a   : > { %v4980_v9 = vadd.f32 %v4979_v35, %v4579_v13 }
 0x91b   : > { %v5471_v63 = vpop.f32.mrf.mxu2  ;;  %v5969_v32 = vpop.f32.mrf.mxu3 }
 0x91c   : > { %v5472_v39 = vadd.f32 %v10377_v33, %v5471_v63  ;;  %v5970_v53 = vadd.f32 %v10244_v57, %v5969_v32  ;;  %v5127_v27 = vmax.f32 %v4980_v9, 0.0  ;;  %v4596_v32 = vpop.f32.mrf.mxu0 }
 0x91e   : > { %v5657_v0 = vmax.f32 %v5472_v39, 0.0  ;;  %6189 = vst [vmem:[%s9626_s23 + $0x290] sm:$0xff] %v5970_v53  ;;  %v4594_v53 = vadd.f32 %v10232_v25, %v4593_v38 }
 0x920   : > { %5521 = vmatmul.f32.gmra.mxu2 %v5125_v50  ;;  %6019 = vmatmul.f32.gmra.mxu3 %v5657_v0 }
 0x921   : > { %v4982_v12 = vpop.f32.mrf.mxu1 }
 0x922   : > { %v4983_v46 = vadd.f32 %v4982_v12, %v4582_v60 }
 0x923   : > { %v5474_v2 = vpop.f32.mrf.mxu2  ;;  %v5972_v6 = vpop.f32.mrf.mxu3 }
 0x924   : > { %v5475_v28 = vadd.f32 %v10377_v33, %v5474_v2  ;;  %v5973_v16 = vadd.f32 %v10244_v57, %v5972_v6  ;;  %v5128_v37 = vmax.f32 %v4983_v46, 0.0  ;;  %v4599_v25 = vpop.f32.mrf.mxu0 }
 0x926   : > { %v5658_v10 = vmax.f32 %v5475_v28, 0.0  ;;  %6190 = vst [vmem:[%s9626_s23 + $0x298] sm:$0xff] %v5973_v16  ;;  %v6768_v16 = vld [vmem:[%s10623_s5] ss:$0 sm:$0xff] }
 0x927   : > { %v4597_v62 = vadd.f32 %v6768_v16, %v4596_v32 }
 0x928   : > { %5524 = vmatmul.f32.gmra.mxu2 %v5126_v1  ;;  %6022 = vmatmul.f32.gmra.mxu3 %v5658_v10 }
 0x929   : > { %v4985_v56 = vpop.f32.mrf.mxu1 }
 0x92a   : > { %v4986_v11 = vadd.f32 %v4985_v56, %v4585_v30 }
 0x92b   : > { %v5477_v22 = vpop.f32.mrf.mxu2  ;;  %v5975_v58 = vpop.f32.mrf.mxu3 }
 0x92c   : > { %v5478_v40 = vadd.f32 %v10377_v33, %v5477_v22  ;;  %v5976_v44 = vadd.f32 %v10244_v57, %v5975_v58  ;;  %v5129_v5 = vmax.f32 %v4986_v11, 0.0 }
 0x92e   : > { %v5659_v48 = vmax.f32 %v5478_v40, 0.0  ;;  %6191 = vst [vmem:[%s9626_s23 + $0x2a0] sm:$0xff] %v5976_v44  ;;  %v4600_v44 = vadd.f32 %v6768_v16, %v4599_v25 }
 0x930   : > { %5527 = vmatmul.f32.gmra.mxu2 %v5127_v27  ;;  %6025 = vmatmul.f32.gmra.mxu3 %v5659_v48  ;;  %v4602_v27 = vpop.f32.mrf.mxu0 }
 0x931   : > { %v4988_v61 = vpop.f32.mrf.mxu1 }
 0x932   : > { %v4989_v54 = vadd.f32 %v4988_v61, %v4588_v21 }
 0x933   : > { %v5480_v24 = vpop.f32.mrf.mxu2  ;;  %v5978_v15 = vpop.f32.mrf.mxu3 }
 0x934   : > { %v5481_v36 = vadd.f32 %v10377_v33, %v5480_v24  ;;  %v5979_v59 = vadd.f32 %v10244_v57, %v5978_v15  ;;  %v5130_v34 = vmax.f32 %v4989_v54, 0.0 }
 0x936   : > { %v5660_v45 = vmax.f32 %v5481_v36, 0.0  ;;  %6192 = vst [vmem:[%s9626_s23 + $0x2a8] sm:$0xff] %v5979_v59  ;;  %v4603_v59 = vadd.f32 %v6768_v16, %v4602_v27 }
 0x938   : > { %5530 = vmatmul.f32.gmra.mxu2 %v5128_v37  ;;  %6028 = vmatmul.f32.gmra.mxu3 %v5660_v45 }
 0x939   : > { %v4991_v41 = vpop.f32.mrf.mxu1 }
 0x93a   : > { %v4992_v55 = vadd.f32 %v4991_v41, %v4591_v19 }
 0x93b   : > { %v5483_v31 = vpop.f32.mrf.mxu2  ;;  %v5981_v8 = vpop.f32.mrf.mxu3 }
 0x93c   : > { %v5484_v47 = vadd.f32 %v10377_v33, %v5483_v31  ;;  %v5982_v52 = vadd.f32 %v10244_v57, %v5981_v8  ;;  %v5131_v51 = vmax.f32 %v4992_v55, 0.0  ;;  %v4605_v31 = vpop.f32.mrf.mxu0 }
 0x93e   : > { %v5661_v7 = vmax.f32 %v5484_v47, 0.0  ;;  %6193 = vst [vmem:[%s9626_s23 + $0x2b0] sm:$0xff] %v5982_v52  ;;  %v4606_v52 = vadd.f32 %v6768_v16, %v4605_v31 }
 0x940   : > { %5533 = vmatmul.f32.gmra.mxu2 %v5129_v5  ;;  %6031 = vmatmul.f32.gmra.mxu3 %v5661_v7 }
 0x941   : > { %v4994_v23 = vpop.f32.mrf.mxu1 }
 0x942   : > { %v4995_v0 = vadd.f32 %v4994_v23, %v4594_v53 }
 0x943   : > { %v5486_v17 = vpop.f32.mrf.mxu2  ;;  %v5984_v43 = vpop.f32.mrf.mxu3 }
 0x944   : > { %v5487_v26 = vadd.f32 %v10377_v33, %v5486_v17  ;;  %v5985_v29 = vadd.f32 %v10244_v57, %v5984_v43  ;;  %v5132_v6 = vmax.f32 %v4995_v0, 0.0 }
 0x946   : > { %v5662_v18 = vmax.f32 %v5487_v26, 0.0  ;;  %6194 = vst [vmem:[%s9626_s23 + $0x2b8] sm:$0xff] %v5985_v29 }
 0x948   : > { %5536 = vmatmul.f32.gmra.mxu2 %v5130_v34  ;;  %6034 = vmatmul.f32.gmra.mxu3 %v5662_v18 }
 0x949   : > { %v4997_v50 = vpop.f32.mrf.mxu1 }
 0x94a   : > { %v4998_v1 = vadd.f32 %v4997_v50, %v4597_v62 }
 0x94b   : > { %v5489_v14 = vpop.f32.mrf.mxu2  ;;  %v5987_v35 = vpop.f32.mrf.mxu3 }
 0x94c   : > { %v5490_v42 = vadd.f32 %v10377_v33, %v5489_v14  ;;  %v5988_v63 = vadd.f32 %v10244_v57, %v5987_v35  ;;  %v5133_v58 = vmax.f32 %v4998_v1, 0.0 }
 0x94e   : > { %v5663_v39 = vmax.f32 %v5490_v42, 0.0  ;;  %6195 = vst [vmem:[%s9626_s23 + $0x2c0] sm:$0xff] %v5988_v63 }
 0x950   : > { %5539 = vmatmul.f32.gmra.mxu2 %v5131_v51  ;;  %6037 = vmatmul.f32.gmra.mxu3 %v5663_v39 }
 0x951   : > { %v5000_v10 = vpop.f32.mrf.mxu1 }
 0x952   : > { %v5001_v48 = vadd.f32 %v5000_v10, %v4600_v44 }
 0x953   : > { %v5492_v4 = vpop.f32.mrf.mxu2  ;;  %v5990_v12 = vpop.f32.mrf.mxu3 }
 0x954   : > { %v5493_v20 = vadd.f32 %v10377_v33, %v5492_v4  ;;  %v5991_v2 = vadd.f32 %v10244_v57, %v5990_v12  ;;  %v10486_v57 = vld [vmem:[%s10627_s9] ss:$0 sm:$0xff]  ;;  %v5134_v15 = vmax.f32 %v5001_v48, 0.0 }
 0x956   : > { %v5664_v28 = vmax.f32 %v5493_v20, 0.0  ;;  %6196 = vst [vmem:[%s9626_s23 + $0x2c8] sm:$0xff] %v5991_v2 }
 0x958   : > { %5542 = vmatmul.f32.gmra.mxu2 %v5132_v6  ;;  %6040 = vmatmul.f32.gmra.mxu3 %v5664_v28 }
 0x959   : > { %v5003_v24 = vpop.f32.mrf.mxu1 }
 0x95a   : > { %v5004_v37 = vadd.f32 %v5003_v24, %v4603_v59 }
 0x95b   : > { %v5495_v13 = vpop.f32.mrf.mxu2  ;;  %v5993_v56 = vpop.f32.mrf.mxu3 }
 0x95c   : > { %v5496_v9 = vadd.f32 %v10377_v33, %v5495_v13  ;;  %v5994_v22 = vadd.f32 %v10486_v57, %v5993_v56  ;;  %v5135_v8 = vmax.f32 %v5004_v37, 0.0 }
 0x95e   : > { %v5665_v40 = vmax.f32 %v5496_v9, 0.0  ;;  %6197 = vst [vmem:[%s9626_s23 + $0x2d0] sm:$0xff] %v5994_v22 }
 0x960   : > { %5545 = vmatmul.f32.gmra.mxu2 %v5133_v58  ;;  %6043 = vmatmul.f32.gmra.mxu3 %v5665_v40 }
 0x961   : > { %v5006_v47 = vpop.f32.mrf.mxu1 }
 0x962   : > { %v5007_v5 = vadd.f32 %v5006_v47, %v4606_v52 }
 0x963   : > { %v5498_v60 = vpop.f32.mrf.mxu2  ;;  %v5996_v49 = vpop.f32.mrf.mxu3 }
 0x964   : > { %v5499_v46 = vadd.f32 %v10377_v33, %v5498_v60  ;;  %v5997_v61 = vadd.f32 %v10486_v57, %v5996_v49  ;;  %v5136_v43 = vmax.f32 %v5007_v5, 0.0 }
 0x966   : > { %v5666_v36 = vmax.f32 %v5499_v46, 0.0  ;;  %6198 = vst [vmem:[%s9626_s23 + $0x2d8] sm:$0xff] %v5997_v61 }
 0x968   : > { %5548 = vmatmul.f32.gmra.mxu2 %v5134_v15  ;;  %6046 = vmatmul.f32.gmra.mxu3 %v5666_v36 }
 0x96b   : > { %v5501_v45 = vpop.f32.mrf.mxu2  ;;  %v5999_v30 = vpop.f32.mrf.mxu3 }
 0x96c   : > { %v5502_v3 = vadd.f32 %v10377_v33, %v5501_v45  ;;  %v6000_v11 = vadd.f32 %v10486_v57, %v5999_v30 }
 0x96e   : > { %v5667_v41 = vmax.f32 %v5502_v3, 0.0  ;;  %6199 = vst [vmem:[%s9626_s23 + $0x2e0] sm:$0xff] %v6000_v11 }
 0x970   : > { %5551 = vmatmul.f32.gmra.mxu2 %v5135_v8  ;;  %6049 = vmatmul.f32.gmra.mxu3 %v5667_v41 }
 0x973   : > { %v5504_v7 = vpop.f32.mrf.mxu2  ;;  %v6002_v21 = vpop.f32.mrf.mxu3 }
 0x974   : > { %v5505_v54 = vadd.f32 %v10377_v33, %v5504_v7  ;;  %v6003_v17 = vadd.f32 %v10486_v57, %v6002_v21 }
 0x976   : > { %v5668_v38 = vmax.f32 %v5505_v54, 0.0  ;;  %6200 = vst [vmem:[%s9626_s23 + $0x2e8] sm:$0xff] %v6003_v17 }
 0x978   : > { %5554 = vmatmul.f32.gmra.mxu2 %v5136_v43  ;;  %6052 = vmatmul.f32.gmra.mxu3 %v5668_v38 }
 0x97b   : > { %v5507_v26 = vpop.f32.mrf.mxu2  ;;  %v6005_v29 = vpop.f32.mrf.mxu3 }
 0x97c   : > { %v5508_v34 = vadd.f32 %v10377_v33, %v5507_v26  ;;  %v6006_v23 = vadd.f32 %v10486_v57, %v6005_v29 }
 0x97e   : > { %v5669_v18 = vmax.f32 %v5508_v34, 0.0  ;;  %6201 = vst [vmem:[%s9626_s23 + $0x2f0] sm:$0xff] %v6006_v23 }
 0x980   : > { %6055 = vmatmul.f32.gmra.mxu3 %v5669_v18 }
 0x983   : > { %v5510_v19 = vpop.f32.mrf.mxu2  ;;  %v6008_v55 = vpop.f32.mrf.mxu3 }
 0x984   : > { %v5511_v14 = vadd.f32 %v10377_v33, %v5510_v19  ;;  %v6009_v35 = vadd.f32 %v10486_v57, %v6008_v55 }
 0x986   : > { %v5670_v42 = vmax.f32 %v5511_v14, 0.0  ;;  %6202 = vst [vmem:[%s9626_s23 + $0x2f8] sm:$0xff] %v6009_v35 }
 0x988   : > { %6058 = vmatmul.f32.gmra.mxu3 %v5670_v42 }
 0x98b   : > { %v5513_v63 = vpop.f32.mrf.mxu2  ;;  %v6011_v32 = vpop.f32.mrf.mxu3 }
 0x98c   : > { %v5514_v51 = vadd.f32 %v10377_v33, %v5513_v63  ;;  %v6012_v39 = vadd.f32 %v10486_v57, %v6011_v32 }
 0x98e   : > { %v5671_v53 = vmax.f32 %v5514_v51, 0.0  ;;  %6203 = vst [vmem:[%s9626_s23 + $0x300] sm:$0xff] %v6012_v39 }
 0x990   : > { %6061 = vmatmul.f32.gmra.mxu3 %v5671_v53 }
 0x993   : > { %v5516_v50 = vpop.f32.mrf.mxu2  ;;  %v6014_v0 = vpop.f32.mrf.mxu3 }
 0x994   : > { %v5517_v4 = vadd.f32 %v10377_v33, %v5516_v50  ;;  %v6015_v12 = vadd.f32 %v10486_v57, %v6014_v0 }
 0x996   : > { %v5672_v20 = vmax.f32 %v5517_v4, 0.0  ;;  %6204 = vst [vmem:[%s9626_s23 + $0x308] sm:$0xff] %v6015_v12 }
 0x998   : > { %6064 = vmatmul.f32.gmra.mxu3 %v5672_v20 }
 0x99b   : > { %v5519_v2 = vpop.f32.mrf.mxu2  ;;  %v6017_v6 = vpop.f32.mrf.mxu3 }
 0x99c   : > { %v5520_v28 = vadd.f32 %v10377_v33, %v5519_v2  ;;  %v6018_v16 = vadd.f32 %v10486_v57, %v6017_v6 }
 0x99e   : > { %v5673_v62 = vmax.f32 %v5520_v28, 0.0  ;;  %6205 = vst [vmem:[%s9626_s23 + $0x310] sm:$0xff] %v6018_v16 }
 0x9a0   : > { %6067 = vmatmul.f32.gmra.mxu3 %v5673_v62 }
 0x9a3   : > { %v5522_v25 = vpop.f32.mrf.mxu2  ;;  %v6020_v1 = vpop.f32.mrf.mxu3 }
 0x9a4   : > { %v5523_v10 = vadd.f32 %v10377_v33, %v5522_v25  ;;  %v6021_v13 = vadd.f32 %v10486_v57, %v6020_v1 }
 0x9a6   : > { %v5674_v56 = vmax.f32 %v5523_v10, 0.0  ;;  %6206 = vst [vmem:[%s9626_s23 + $0x318] sm:$0xff] %v6021_v13 }
 0x9a8   : > { %6070 = vmatmul.f32.gmra.mxu3 %v5674_v56 }
 0x9ab   : > { %v5525_v9 = vpop.f32.mrf.mxu2  ;;  %v6023_v22 = vpop.f32.mrf.mxu3 }
 0x9ac   : > { %v5526_v58 = vadd.f32 %v10377_v33, %v5525_v9  ;;  %v6024_v40 = vadd.f32 %v10486_v57, %v6023_v22 }
 0x9ae   : > { %v5675_v44 = vmax.f32 %v5526_v58, 0.0  ;;  %6207 = vst [vmem:[%s9626_s23 + $0x320] sm:$0xff] %v6024_v40 }
 0x9b0   : > { %6073 = vmatmul.f32.gmra.mxu3 %v5675_v44 }
 0x9b3   : > { %v5528_v27 = vpop.f32.mrf.mxu2  ;;  %v6026_v48 = vpop.f32.mrf.mxu3 }
 0x9b4   : > { %v5529_v60 = vadd.f32 %v10377_v33, %v5528_v27  ;;  %v6027_v49 = vadd.f32 %v10486_v57, %v6026_v48 }
 0x9b6   : > { %v5676_v46 = vmax.f32 %v5529_v60, 0.0  ;;  %6208 = vst [vmem:[%s9626_s23 + $0x328] sm:$0xff] %v6027_v49 }
 0x9b8   : > { %6076 = vmatmul.f32.gmra.mxu3 %v5676_v46 }
 0x9bb   : > { %v5531_v61 = vpop.f32.mrf.mxu2  ;;  %v6029_v24 = vpop.f32.mrf.mxu3 }
 0x9bc   : > { %v5532_v15 = vadd.f32 %v10377_v33, %v5531_v61  ;;  %v6030_v36 = vadd.f32 %v10486_v57, %v6029_v24 }
 0x9be   : > { %v5677_v59 = vmax.f32 %v5532_v15, 0.0  ;;  %6209 = vst [vmem:[%s9626_s23 + $0x330] sm:$0xff] %v6030_v36 }
 0x9c0   : > { %6079 = vmatmul.f32.gmra.mxu3 %v5677_v59 }
 0x9c3   : > { %v5534_v37 = vpop.f32.mrf.mxu2  ;;  %v6032_v45 = vpop.f32.mrf.mxu3 }
 0x9c4   : > { %v5535_v30 = vadd.f32 %v10377_v33, %v5534_v37  ;;  %v6033_v3 = vadd.f32 %v10486_v57, %v6032_v45 }
 0x9c6   : > { %v5678_v11 = vmax.f32 %v5535_v30, 0.0  ;;  %6210 = vst [vmem:[%s9626_s23 + $0x338] sm:$0xff] %v6033_v3 }
 0x9c8   : > { %6082 = vmatmul.f32.gmra.mxu3 %v5678_v11 }
 0x9cb   : > { %v5537_v31 = vpop.f32.mrf.mxu2  ;;  %v6035_v8 = vpop.f32.mrf.mxu3 }
 0x9cc   : > { %v5538_v41 = vadd.f32 %v10377_v33, %v5537_v31  ;;  %v6036_v47 = vadd.f32 %v10486_v57, %v6035_v8 }
 0x9ce   : > { %v5679_v52 = vmax.f32 %v5538_v41, 0.0  ;;  %6211 = vst [vmem:[%s9626_s23 + $0x340] sm:$0xff] %v6036_v47 }
 0x9d0   : > { %6085 = vmatmul.f32.gmra.mxu3 %v5679_v52 }
 0x9d3   : > { %v5540_v5 = vpop.f32.mrf.mxu2  ;;  %v6038_v7 = vpop.f32.mrf.mxu3 }
 0x9d4   : > { %v5541_v21 = vadd.f32 %v10377_v33, %v5540_v5  ;;  %v6039_v54 = vadd.f32 %v10486_v57, %v6038_v7 }
 0x9d6   : > { %v5680_v17 = vmax.f32 %v5541_v21, 0.0  ;;  %6212 = vst [vmem:[%s9626_s23 + $0x348] sm:$0xff] %v6039_v54 }
 0x9d8   : > { %6088 = vmatmul.f32.gmra.mxu3 %v5680_v17 }
 0x9db   : > { %v5543_v43 = vpop.f32.mrf.mxu2  ;;  %v6041_v38 = vpop.f32.mrf.mxu3 }
 0x9dc   : > { %v5544_v26 = vadd.f32 %v10377_v33, %v5543_v43  ;;  %v6042_v29 = vadd.f32 %v10486_v57, %v6041_v38 }
 0x9de   : > { %v5681_v34 = vmax.f32 %v5544_v26, 0.0  ;;  %6213 = vst [vmem:[%s9626_s23 + $0x350] sm:$0xff] %v6042_v29 }
 0x9e0   : > { %6091 = vmatmul.f32.gmra.mxu3 %v5681_v34 }
 0x9e3   : > { %v5546_v23 = vpop.f32.mrf.mxu2  ;;  %v6044_v18 = vpop.f32.mrf.mxu3 }
 0x9e4   : > { %v5547_v19 = vadd.f32 %v10377_v33, %v5546_v23  ;;  %v6045_v55 = vadd.f32 %v10486_v57, %v6044_v18 }
 0x9e6   : > { %v5682_v14 = vmax.f32 %v5547_v19, 0.0  ;;  %6214 = vst [vmem:[%s9626_s23 + $0x358] sm:$0xff] %v6045_v55 }
 0x9e8   : > { %6094 = vmatmul.f32.gmra.mxu3 %v5682_v14 }
 0x9eb   : > { %v5549_v35 = vpop.f32.mrf.mxu2  ;;  %v6047_v42 = vpop.f32.mrf.mxu3 }
 0x9ec   : > { %v5550_v63 = vadd.f32 %v10377_v33, %v5549_v35  ;;  %v6048_v32 = vadd.f32 %v10486_v57, %v6047_v42 }
 0x9ee   : > { %v5683_v51 = vmax.f32 %v5550_v63, 0.0  ;;  %6215 = vst [vmem:[%s9626_s23 + $0x360] sm:$0xff] %v6048_v32 }
 0x9f0   : > { %6097 = vmatmul.f32.gmra.mxu3 %v5683_v51 }
 0x9f3   : > { %v5552_v39 = vpop.f32.mrf.mxu2  ;;  %v6050_v53 = vpop.f32.mrf.mxu3 }
 0x9f4   : > { %v5553_v50 = vadd.f32 %v10377_v33, %v5552_v39  ;;  %v6051_v0 = vadd.f32 %v10486_v57, %v6050_v53 }
 0x9f6   : > { %v5684_v4 = vmax.f32 %v5553_v50, 0.0  ;;  %6216 = vst [vmem:[%s9626_s23 + $0x368] sm:$0xff] %v6051_v0 }
 0x9f8   : > { %6100 = vmatmul.f32.gmra.mxu3 %v5684_v4 }
 0x9fb   : > { %v5555_v12 = vpop.f32.mrf.mxu2  ;;  %v6053_v20 = vpop.f32.mrf.mxu3 }
 0x9fc   : > { %v5556_v2 = vadd.f32 %v10377_v33, %v5555_v12  ;;  %v6054_v6 = vadd.f32 %v10486_v57, %v6053_v20 }
 0x9fe   : > { %v5685_v28 = vmax.f32 %v5556_v2, 0.0  ;;  %6217 = vst [vmem:[%s9626_s23 + $0x370] sm:$0xff] %v6054_v6 }
 0xa00   : > { %6103 = vmatmul.f32.gmra.mxu3 %v5685_v28 }
 0xa03   : > { %v6056_v16 = vpop.f32.mrf.mxu3 }
 0xa04   : > { %v6057_v62 = vadd.f32 %v10486_v57, %v6056_v16 }
 0xa06   : > { %6218 = vst [vmem:[%s9626_s23 + $0x378] sm:$0xff] %v6057_v62 }
 0xa0b   : > { %v6059_v25 = vpop.f32.mrf.mxu3 }
 0xa0c   : > { %v6060_v1 = vadd.f32 %v10486_v57, %v6059_v25 }
 0xa0e   : > { %6219 = vst [vmem:[%s9626_s23 + $0x380] sm:$0xff] %v6060_v1 }
 0xa13   : > { %v6062_v10 = vpop.f32.mrf.mxu3 }
 0xa14   : > { %v6063_v33 = vadd.f32 %v10486_v57, %v6062_v10 }
 0xa16   : > { %6220 = vst [vmem:[%s9626_s23 + $0x388] sm:$0xff] %v6063_v33 }
 0xa1b   : > { %v6065_v13 = vpop.f32.mrf.mxu3 }
 0xa1c   : > { %v6066_v56 = vadd.f32 %v10486_v57, %v6065_v13 }
 0xa1e   : > { %6221 = vst [vmem:[%s9626_s23 + $0x390] sm:$0xff] %v6066_v56 }
 0xa23   : > { %v6068_v9 = vpop.f32.mrf.mxu3 }
 0xa24   : > { %v6069_v22 = vadd.f32 %v10486_v57, %v6068_v9 }
 0xa26   : > { %6222 = vst [vmem:[%s9626_s23 + $0x398] sm:$0xff] %v6069_v22 }
 0xa2b   : > { %v6071_v58 = vpop.f32.mrf.mxu3 }
 0xa2c   : > { %v6072_v40 = vadd.f32 %v10486_v57, %v6071_v58 }
 0xa2e   : > { %6223 = vst [vmem:[%s9626_s23 + $0x3a0] sm:$0xff] %v6072_v40 }
 0xa33   : > { %v6074_v44 = vpop.f32.mrf.mxu3 }
 0xa34   : > { %v6075_v27 = vadd.f32 %v10486_v57, %v6074_v44 }
 0xa36   : > { %6224 = vst [vmem:[%s9626_s23 + $0x3a8] sm:$0xff] %v6075_v27 }
 0xa3b   : > { %v6077_v48 = vpop.f32.mrf.mxu3 }
 0xa3c   : > { %v6078_v60 = vadd.f32 %v10486_v57, %v6077_v48 }
 0xa3e   : > { %6225 = vst [vmem:[%s9626_s23 + $0x3b0] sm:$0xff] %v6078_v60 }
 0xa43   : > { %v6080_v49 = vpop.f32.mrf.mxu3 }
 0xa44   : > { %v6081_v46 = vadd.f32 %v10486_v57, %v6080_v49 }
 0xa46   : > { %6226 = vst [vmem:[%s9626_s23 + $0x3b8] sm:$0xff] %v6081_v46 }
 0xa4b   : > { %v6083_v61 = vpop.f32.mrf.mxu3 }
 0xa4c   : > { %v6084_v24 = vadd.f32 %v10486_v57, %v6083_v61 }
 0xa4e   : > { %6227 = vst [vmem:[%s9626_s23 + $0x3c0] sm:$0xff] %v6084_v24 }
 0xa53   : > { %v6086_v15 = vpop.f32.mrf.mxu3 }
 0xa54   : > { %v6087_v36 = vadd.f32 %v10486_v57, %v6086_v15 }
 0xa56   : > { %6228 = vst [vmem:[%s9626_s23 + $0x3c8] sm:$0xff] %v6087_v36 }
 0xa5b   : > { %v6089_v59 = vpop.f32.mrf.mxu3 }
 0xa5c   : > { %v6090_v37 = vadd.f32 %v10486_v57, %v6089_v59 }
 0xa5e   : > { %6229 = vst [vmem:[%s9626_s23 + $0x3d0] sm:$0xff] %v6090_v37 }
 0xa63   : > { %v6092_v45 = vpop.f32.mrf.mxu3 }
 0xa64   : > { %v6093_v30 = vadd.f32 %v10486_v57, %v6092_v45 }
 0xa66   : > { %6230 = vst [vmem:[%s9626_s23 + $0x3d8] sm:$0xff] %v6093_v30 }
 0xa6b   : > { %v6095_v3 = vpop.f32.mrf.mxu3 }
 0xa6c   : > { %v6096_v11 = vadd.f32 %v10486_v57, %v6095_v3 }
 0xa6e   : > { %6231 = vst [vmem:[%s9626_s23 + $0x3e0] sm:$0xff] %v6096_v11 }
 0xa73   : > { %v6098_v31 = vpop.f32.mrf.mxu3 }
 0xa74   : > { %v6099_v8 = vadd.f32 %v10486_v57, %v6098_v31 }
 0xa76   : > { %6232 = vst [vmem:[%s9626_s23 + $0x3e8] sm:$0xff] %v6099_v8 }
 0xa7b   : > { %v6101_v41 = vpop.f32.mrf.mxu3 }
 0xa7c   : > { %v6102_v47 = vadd.f32 %v10486_v57, %v6101_v41 }
 0xa7e   : > { %6233 = vst [vmem:[%s9626_s23 + $0x3f0] sm:$0xff] %v6102_v47 }
 0xa83   : > { %v6104_v52 = vpop.f32.mrf.mxu3 }
 0xa84   : > { %v6105_v5 = vadd.f32 %v10486_v57, %v6104_v52 }
 0xa86   : > { %6234 = vst [vmem:[%s9626_s23 + $0x3f8] sm:$0xff] %v6105_v5 }
 0xa87   : > { %6977 = shalt.err (!%p6974_p9)
}
 0xa88   : > { %s7039_s30 = smov 128   ;;  %s7040_s23 = smov 8  }
 0xa89   : > { %6420 = dma.vmem_to_hbm [thread:$0]  (%p7194_p13), %s6249_s18, 16384, %s6251_s25, %s6236_s19, %s7039_s30, %s7039_s30, %s7040_s23  }
 0xa8a PF: > { %s6265_s21 = sand.u32 1, %s7016_s13   ;;  %p11101_p10 = scmp.ge.s32.totalorder %s7028_s16, 2 }
 0xa8b   : > { %s6266_s17 = scalar_lea.sflag [#allocation4], %s6265_s21 }
 0xa8c   : > { %p6443_p11 = pnand %p11101_p10, %p7199_p4 }
 0xa8e   : > { %p6444_p0 = pneg %p6443_p11 }
 0xa90   : > { %7011 = dma.done.wait (%p6444_p0), %s6266_s17, 16384  }
 0xa91   : > { %7013 = vsyncadd (%p6444_p0), %s6266_s17, 4294950912  ;;  %p26_p2 = scmp.ge.s32.totalorder %s7174_s11, 4   ;;  %s11102_s13 = smov %s7020_s14 }
 0xa92   : > { %s11103_s14 = smov %s7024_s15  ;;  %s11104_s15 = smov %s7186_s29 }
 0xa93   : > { %s11105_s16 = smov %s7174_s11  ;;  %28 = sbr.rel (!%p26_p2) target bundleno = 13 (0xd), region = 125 }
 0xa98   :  { %6272 = vsyncpa [#allocation3], 1 }
 0xa99   :  { %6274 = vsyncpa [#allocation3 + $0x1], 1 }
 0xa9a   :  { %6275 = vsyncpa [#allocation6], 1 }
 0xa9b   :  { %6276 = vsyncpa [#allocation9], 1 }
 0xa9c   :  { %6277 = vsyncpa [#allocation12], 1 }
 0xa9d   :  { %6278 = vsyncpa [#allocation4], 1 }
 0xa9e   :  { %6280 = vsyncpa [#allocation4 + $0x1], 1 }

</bundles_post_ra>
